<compile_context>
chip_gen: v7x
topology: tpu7x:2x2x1
jax: 0.10.0
libtpu: 0.0.40
codegen_flags: <defaults>
</compile_context>

<pallas_src>
import functools

import jax
import jax.numpy as jnp
from jax.experimental import pallas as pl
from jax.experimental.pallas import tpu as pltpu


LANE = 128                       # channel (lane) padding -> unmasked stores
_TM_MAX = 512                    # max rows per output tile (flattened spatial)
_BN_EPS = 1e-5
_VMEM_LIMIT = 64 * 1024 * 1024   # headroom over the 32 MiB scoped default


def _round_up(x, m):
    return ((x + m - 1) // m) * m


def _cdiv(a, b):
    return -(-a // b)


# ----------------------------------------------------------------------------
# Pallas kernels
# ----------------------------------------------------------------------------
def _conv_mm_kernel(x_ref, w_ref, b_ref, o_ref, *stats_refs,
                    offsets, tm, ws, ow_valid, rows_valid, act,
                    num_row_tiles):
    """Fused conv-as-matmul row tile.

    x_ref     : (1, R_in, Cin)  bf16  whole flattened padded image (resident)
    w_ref     : (P, Cin, Cout)  bf16  packed weights, one (Cin,Cout) per tap
    b_ref     : (1, Cout)       f32   bias (zeros for BatchNorm layers)
    o_ref     : (1, tm, Cout)         this row tile of the "wide" output
    stats_refs: optional (1, 2, Cout) f32 revisited accumulator [sum, sum_sq]
    """
    t = pl.program_id(1)
    if num_row_tiles == 1:
        row0 = 0                                   # fully static slices
    else:
        row0 = pl.multiple_of(t * tm, 8)

    cout = o_ref.shape[-1]
    # Seed the accumulator with the broadcast bias (saves a tail add).
    acc = jnp.broadcast_to(b_ref[...], (tm, cout)).astype(jnp.float32)
    for p, off in enumerate(offsets):              # static, unrolled tap loop
        xk = x_ref[0, pl.ds(row0 + off, tm), :]    # (tm, Cin) VMEM slice
        acc = acc + jnp.dot(xk, w_ref[p], preferred_element_type=jnp.float32)

    if stats_refs:                                 # fused BatchNorm statistics
        stats_ref = stats_refs[0]
        gidx = row0 + jax.lax.broadcasted_iota(jnp.int32, (tm, 1), 0)
        valid = (gidx < rows_valid) & ((gidx % ws) < ow_valid)
        am = jnp.where(valid, acc, 0.0)
        part = jnp.concatenate(
            [jnp.sum(am, axis=0, keepdims=True),
             jnp.sum(am * am, axis=0, keepdims=True)], axis=0)   # (2, Cout)

        @pl.when(t == 0)
        def _init():
            stats_ref[...] = jnp.zeros_like(stats_ref)

        stats_ref[...] += part[None]

    if act == "lrelu":
        acc = jnp.where(acc >= 0.0, acc, 0.2 * acc)
    elif act == "sigmoid":
        acc = jax.nn.sigmoid(acc)
    o_ref[...] = acc[None].astype(o_ref.dtype)


def _affine_lrelu_kernel(y_ref, scale_ref, shift_ref, o_ref):
    """Fused per-channel affine (precomputed BN scale/shift) + LeakyReLU."""
    z = (y_ref[...].astype(jnp.float32) * scale_ref[...][None]
         + shift_ref[...][None])
    o_ref[...] = jnp.where(z >= 0.0, z, 0.2 * z).astype(o_ref.dtype)


# ----------------------------------------------------------------------------
# pallas_call wrappers
# ----------------------------------------------------------------------------
def _conv_core(xpad, w_pk, bias, *, kh_eff, kw_eff, act, want_stats,
               out_dtype):
    """Shifted-window conv over a padded NHWC map with flattened spatial dims.

    xpad : (N, Hc, Wc, Cin) padded (and possibly space-to-depth'ed) input.
    w_pk : (kh_eff*kw_eff, Cin, Cout) packed weights (Cout padded to 128).
    Returns (y_wide, stats):
      y_wide : (N, rows_out, Cout) wide output; row r = oh*Wc + ow,
               valid columns are ow < OW.
      stats  : (N, 2, Cout) per-image [sum, sum_sq] over valid pixels or None.
    """
    N, Hc, Wc, Cin = xpad.shape
    P, Cin2, Cout = w_pk.shape
    assert Cin2 == Cin and P == kh_eff * kw_eff
    OH = Hc - kh_eff + 1
    OW = Wc - kw_eff + 1
    rows_valid = OH * Wc
    offsets = tuple(dh * Wc + dw
                    for dh in range(kh_eff) for dw in range(kw_eff))
    max_off = offsets[-1]

    tm = min(_TM_MAX, _round_up(rows_valid, 8))
    T = _cdiv(rows_valid, tm)
    rows_out = T * tm
    rin_needed = rows_out + max_off

    # TODO(synk): for very large spatial inputs, stream row bands of the
    # padded image instead of keeping the whole flattened image VMEM-resident.
    x_flat = xpad.reshape(N, Hc * Wc, Cin).astype(jnp.bfloat16)
    if rin_needed > Hc * Wc:
        x_flat = jnp.pad(x_flat, ((0, 0), (0, rin_needed - Hc * Wc), (0, 0)))
    r_in = x_flat.shape[1]

    kernel = functools.partial(
        _conv_mm_kernel, offsets=offsets, tm=tm, ws=Wc, ow_valid=OW,
        rows_valid=rows_valid, act=act, num_row_tiles=T)

    in_specs = [
        pl.BlockSpec((1, r_in, Cin), lambda n, t: (n, 0, 0)),
        pl.BlockSpec((P, Cin, Cout), lambda n, t: (0, 0, 0)),
        pl.BlockSpec((1, Cout), lambda n, t: (0, 0)),
    ]
    out_spec_y = pl.BlockSpec((1, tm, Cout), lambda n, t: (n, t, 0))
    shape_y = jax.ShapeDtypeStruct((N, rows_out, Cout), out_dtype)

    if want_stats:
        out_shape = (shape_y, jax.ShapeDtypeStruct((N, 2, Cout), jnp.float32))
        out_specs = [out_spec_y,
                     pl.BlockSpec((1, 2, Cout), lambda n, t: (n, 0, 0))]
        dims = ("parallel", "arbitrary")       # stats revisited across tiles
    else:
        out_shape = shape_y
        out_specs = out_spec_y
        dims = ("parallel", "parallel")        # fully independent tiles

    res = pl.pallas_call(
        kernel,
        out_shape=out_shape,
        grid_spec=pltpu.PrefetchScalarGridSpec(
            num_scalar_prefetch=0,
            grid=(N, T),
            in_specs=in_specs,
            out_specs=out_specs,
        ),
        compiler_params=pltpu.CompilerParams(
            dimension_semantics=dims,
            vmem_limit_bytes=_VMEM_LIMIT),
    )(x_flat, w_pk, bias.reshape(1, Cout).astype(jnp.float32))

    if want_stats:
        return res[0], res[1]
    return res, None


def _bn_scale_shift(stats, gamma, beta, count):
    """Training-mode BatchNorm batch stats -> per-channel scale/shift (1, C).

    O(C) host-side XLA work; keeps the apply kernel a pure affine + LReLU.
    """
    s = jnp.sum(stats, axis=0)                         # reduce over batch
    inv = 1.0 / float(count)
    mean = s[0] * inv
    var = s[1] * inv - mean * mean                     # biased variance
    scale = gamma.astype(jnp.float32) * jax.lax.rsqrt(var + _BN_EPS)
    shift = beta.astype(jnp.float32) - mean * scale
    return scale.reshape(1, -1), shift.reshape(1, -1)


def _affine_lrelu_apply(y_wide, scale, shift):
    N, R, C = y_wide.shape
    tm = min(_TM_MAX, R)
    assert R % tm == 0
    T = R // tm
    return pl.pallas_call(
        _affine_lrelu_kernel,
        out_shape=jax.ShapeDtypeStruct((N, R, C), y_wide.dtype),
        grid_spec=pltpu.PrefetchScalarGridSpec(
            num_scalar_prefetch=0,
            grid=(N, T),
            in_specs=[
                pl.BlockSpec((1, tm, C), lambda n, t: (n, t, 0)),
                pl.BlockSpec((1, C), lambda n, t: (0, 0)),
                pl.BlockSpec((1, C), lambda n, t: (0, 0)),
            ],
            out_specs=pl.BlockSpec((1, tm, C), lambda n, t: (n, t, 0)),
        ),
        compiler_params=pltpu.CompilerParams(
            dimension_semantics=("parallel", "parallel"),
            vmem_limit_bytes=_VMEM_LIMIT),
    )(y_wide, scale, shift)


# ----------------------------------------------------------------------------
# layer glue (padding / space-to-depth / un-flattening) — plain XLA, 1x data
# ----------------------------------------------------------------------------
def _prep_stride2(x):
    """pad=2 then space-to-depth by 2: the stride-2 4x4 conv becomes a
    stride-1 2x2 conv with 4x channels (no im2col, no zero multiplies)."""
    N, H, W, C = x.shape
    OH, OW = H // 2 + 1, W // 2 + 1
    Hp, Wp = 2 * OH + 2, 2 * OW + 2      # exactly the rows/cols the conv reads
    xp = jnp.pad(x, ((0, 0), (2, Hp - H - 2), (2, Wp - W - 2), (0, 0)))
    s2d = xp.reshape(N, Hp // 2, 2, Wp // 2, 2, C)
    s2d = s2d.transpose(0, 1, 3, 2, 4, 5).reshape(N, Hp // 2, Wp // 2, 4 * C)
    return s2d, OH, OW


def _prep_stride1(x):
    N, H, W, C = x.shape
    xp = jnp.pad(x, ((0, 0), (2, 2), (2, 2), (0, 0)))
    return xp, H + 1, W + 1


def _unflatten(y_wide, OH, OW, Wc):
    N, _, C = y_wide.shape
    return y_wide[:, :OH * Wc, :].reshape(N, OH, Wc, C)[:, :, :OW, :]


def conv_lrelu_s2(x, w_pk, bias):
    s2d, OH, OW = _prep_stride2(x)
    y_wide, _ = _conv_core(s2d, w_pk, bias, kh_eff=2, kw_eff=2,
                           act="lrelu", want_stats=False,
                           out_dtype=jnp.bfloat16)
    return _unflatten(y_wide, OH, OW, s2d.shape[2])


def conv_bn_lrelu(x, w_pk, gamma, beta, *, stride):
    if stride == 2:
        xp, OH, OW = _prep_stride2(x)
        ke = 2
    else:
        xp, OH, OW = _prep_stride1(x)
        ke = 4
    cout = w_pk.shape[-1]
    zero_bias = jnp.zeros((cout,), jnp.float32)     # bias=False (BatchNorm)
    y_wide, stats = _conv_core(xp, w_pk, zero_bias, kh_eff=ke, kw_eff=ke,
                               act="none", want_stats=True,
                               out_dtype=jnp.bfloat16)
    count = x.shape[0] * OH * OW
    scale, shift = _bn_scale_shift(stats, gamma, beta, count)
    y_wide = _affine_lrelu_apply(y_wide, scale, shift)
    return _unflatten(y_wide, OH, OW, xp.shape[2])


def conv_final_s1(x, w_pk, bias, use_sigmoid=False):
    xp, OH, OW = _prep_stride1(x)
    y_wide, _ = _conv_core(xp, w_pk, bias, kh_eff=4, kw_eff=4,
                           act="sigmoid" if use_sigmoid else "none",
                           want_stats=False, out_dtype=jnp.float32)
    return _unflatten(y_wide, OH, OW, xp.shape[2])


# ----------------------------------------------------------------------------
# parameter construction (random init mirroring the PyTorch module structure)
# ----------------------------------------------------------------------------
def _pack_weight_s2(w, cout_pad):
    """PyTorch (Cout,Cin,4,4) stride-2 weight -> (4, 4*Cin, cout_pad)
    tap matrices matching the space-to-depth input channel layout."""
    cout = w.shape[0]
    mats = []
    for a in range(2):
        for b in range(2):
            rows = [w[:, :, 2 * a + p, 2 * b + q].T
                    for p in range(2) for q in range(2)]
            mats.append(jnp.concatenate(rows, axis=0))
    wp = jnp.stack(mats, axis=0)
    wp = jnp.pad(wp, ((0, 0), (0, 0), (0, cout_pad - cout)))
    return wp.astype(jnp.bfloat16)


def _pack_weight_s1(w, cout_pad):
    """PyTorch (Cout,Cin,4,4) stride-1 weight -> (16, Cin, cout_pad)."""
    cout = w.shape[0]
    mats = [w[:, :, kh, kw].T for kh in range(4) for kw in range(4)]
    wp = jnp.stack(mats, axis=0)
    wp = jnp.pad(wp, ((0, 0), (0, 0), (0, cout_pad - cout)))
    return wp.astype(jnp.bfloat16)


def _rand_conv(key, cin, cout, scale=0.05):
    kw_, kb = jax.random.split(key)
    w = scale * jax.random.normal(kw_, (cout, cin, 4, 4), jnp.float32)
    b = scale * jax.random.normal(kb, (cout,), jnp.float32)
    return w, b


def build_nlayer_discriminator(key, input_nc, ndf=64, n_layers=3):
    """Params mirroring NLayerDiscriminator(input_nc, ndf, n_layers,
    norm_layer=nn.BatchNorm2d, use_sigmoid=False)."""
    layers = []
    keys = jax.random.split(key, n_layers + 2)

    # Conv2d(input_nc, ndf, 4, stride=2, padding=2, bias=True) + LeakyReLU(0.2)
    w, b = _rand_conv(keys[0], input_nc, ndf)
    cpad = _round_up(ndf, LANE)
    layers.append(dict(kind="conv_lrelu", stride=2,
                       w=_pack_weight_s2(w, cpad),
                       b=jnp.pad(b, (0, cpad - ndf))))
    prev_pad, nf_mult = cpad, 1

    # stride-2 Conv (bias=False) + BatchNorm + LeakyReLU blocks
    for n in range(1, n_layers):
        nf_mult_prev, nf_mult = nf_mult, min(2 ** n, 8)
        cin, cout = ndf * nf_mult_prev, ndf * nf_mult
        w, _ = _rand_conv(keys[n], cin, cout)
        w = jnp.pad(w, ((0, 0), (0, prev_pad - cin), (0, 0), (0, 0)))
        cpad = _round_up(cout, LANE)
        layers.append(dict(kind="conv_bn_lrelu", stride=2,
                           w=_pack_weight_s2(w, cpad),
                           gamma=jnp.ones((cpad,), jnp.float32),
                           beta=jnp.zeros((cpad,), jnp.float32)))
        prev_pad = cpad

    # stride-1 Conv (bias=False) + BatchNorm + LeakyReLU
    nf_mult_prev, nf_mult = nf_mult, min(2 ** n_layers, 8)
    cin, cout = ndf * nf_mult_prev, ndf * nf_mult
    w, _ = _rand_conv(keys[n_layers], cin, cout)
    w = jnp.pad(w, ((0, 0), (0, prev_pad - cin), (0, 0), (0, 0)))
    cpad = _round_up(cout, LANE)
    layers.append(dict(kind="conv_bn_lrelu", stride=1,
                       w=_pack_weight_s1(w, cpad),
                       gamma=jnp.ones((cpad,), jnp.float32),
                       beta=jnp.zeros((cpad,), jnp.float32)))
    prev_pad = cpad

    # Conv2d(ndf*nf_mult, 1, 4, stride=1, padding=2, bias=True)
    w, b = _rand_conv(keys[n_layers + 1], cout, 1)
    w = jnp.pad(w, ((0, 0), (0, prev_pad - cout), (0, 0), (0, 0)))
    layers.append(dict(kind="conv_final", stride=1,
                       w=_pack_weight_s1(w, LANE),
                       b=jnp.pad(b, (0, LANE - 1))))
    return layers


def nlayer_discriminator_forward(layers, x_nchw, use_sigmoid=False):
    # single host-boundary transpose: NCHW f32 -> NHWC bf16 (channels in lanes)
    x = jnp.transpose(x_nchw, (0, 2, 3, 1)).astype(jnp.bfloat16)
    for layer in layers:
        if layer["kind"] == "conv_lrelu":
            x = conv_lrelu_s2(x, layer["w"], layer["b"])
        elif layer["kind"] == "conv_bn_lrelu":
            x = conv_bn_lrelu(x, layer["w"], layer["gamma"], layer["beta"],
                              stride=layer["stride"])
        else:
            x = conv_final_s1(x, layer["w"], layer["b"],
                              use_sigmoid=use_sigmoid)
    y = x[..., :1]                     # drop lane padding (real Cout = 1)
    return jnp.transpose(y, (0, 3, 1, 2)).astype(jnp.float32)


# ----------------------------------------------------------------------------
if __name__ == "__main__":
    key = jax.random.PRNGKey(0)
    kp, kx = jax.random.split(key)

    batch, channels, spatial = 2, 4, 16
    ndf, n_layers = 8, 3

    layers = build_nlayer_discriminator(kp, channels, ndf=ndf,
                                        n_layers=n_layers)
    x = jax.random.normal(kx, (batch, channels, spatial, spatial), jnp.float32)

    fwd = jax.jit(lambda inp: nlayer_discriminator_forward(layers, inp))
    y = jax.block_until_ready(fwd(x))

    # kernel=4, padding=2: 16 -> 9 -> 5 -> 3 -> 4 -> 5 spatial, 1 out channel
    assert y.shape == (batch, 1, 5, 5), y.shape
    assert bool(jnp.all(jnp.isfinite(y)))
    print("KERNEL_OK")
</pallas_src>

<mosaic_0001>
module attributes {stable_mosaic.version = 11 : i64} {
  func.func @_conv_mm_kernel(%arg0: i32, %arg1: i32, %arg2: memref<1x107x16xbf16, #tpu.memory_space<vmem>>, %arg3: memref<4x16x128xbf16, #tpu.memory_space<vmem>>, %arg4: memref<1x128xf32, #tpu.memory_space<vmem>>, %arg5: memref<1x96x128xbf16, #tpu.memory_space<vmem>>) attributes {dimension_semantics = [#tpu.dimension_semantics<parallel>, #tpu.dimension_semantics<parallel>], iteration_bounds = array<i64: 2, 1>, scalar_prefetch = 0 : i64, scratch_operands = 0 : i64, tpu.core_type = #tpu.core_type<tc>, window_params = [{transform_indices = @transform_0, window_bounds = array<i64: 1, 107, 16>}, {pipeline_mode = #tpu.pipeline_mode<synchronous>, transform_indices = @transform_1, window_bounds = array<i64: 4, 16, 128>}, {pipeline_mode = #tpu.pipeline_mode<synchronous>, transform_indices = @transform_2, window_bounds = array<i64: 1, 128>}, {transform_indices = @transform_3, window_bounds = array<i64: 1, 96, 128>}]} {
    %c0 = arith.constant 0 : index
    %c0_0 = arith.constant 0 : index
    %0 = vector.load %arg4[%c0, %c0_0] : memref<1x128xf32, #tpu.memory_space<vmem>>, vector<1x128xf32>
    %1 = vector.shape_cast %0 : vector<1x128xf32> to vector<1x128xf32>
    %2 = vector.broadcast %1 : vector<1x128xf32> to vector<96x128xf32>
    %c0_1 = arith.constant 0 : index
    %c0_2 = arith.constant 0 : index
    %c0_3 = arith.constant 0 : index
    %3 = vector.load %arg2[%c0_1, %c0_2, %c0_3] : memref<1x107x16xbf16, #tpu.memory_space<vmem>>, vector<1x96x16xbf16>
    %4 = vector.shape_cast %3 : vector<1x96x16xbf16> to vector<96x16xbf16>
    %c0_4 = arith.constant 0 : index
    %c0_5 = arith.constant 0 : index
    %c0_6 = arith.constant 0 : index
    %5 = vector.load %arg3[%c0_4, %c0_5, %c0_6] : memref<4x16x128xbf16, #tpu.memory_space<vmem>>, vector<1x16x128xbf16>
    %6 = vector.shape_cast %5 : vector<1x16x128xbf16> to vector<16x128xbf16>
    %cst = arith.constant dense<0.000000e+00> : vector<96x128xf32>
    %7 = tpu.matmul %4, %6, %cst {dimension_numbers = #tpu.dot_dimension_numbers<[1], [0], [0], [1], [0, 0, 1, 1], [], []>} : vector<96x16xbf16>, vector<16x128xbf16>, vector<96x128xf32> -> vector<96x128xf32>
    %8 = arith.addf %2, %7 : vector<96x128xf32>
    %c0_7 = arith.constant 0 : index
    %c1 = arith.constant 1 : index
    %c0_8 = arith.constant 0 : index
    %9 = vector.load %arg2[%c0_7, %c1, %c0_8] : memref<1x107x16xbf16, #tpu.memory_space<vmem>>, vector<1x96x16xbf16>
    %10 = vector.shape_cast %9 : vector<1x96x16xbf16> to vector<96x16xbf16>
    %c1_9 = arith.constant 1 : index
    %c0_10 = arith.constant 0 : index
    %c0_11 = arith.constant 0 : index
    %11 = vector.load %arg3[%c1_9, %c0_10, %c0_11] : memref<4x16x128xbf16, #tpu.memory_space<vmem>>, vector<1x16x128xbf16>
    %12 = vector.shape_cast %11 : vector<1x16x128xbf16> to vector<16x128xbf16>
    %cst_12 = arith.constant dense<0.000000e+00> : vector<96x128xf32>
    %13 = tpu.matmul %10, %12, %cst_12 {dimension_numbers = #tpu.dot_dimension_numbers<[1], [0], [0], [1], [0, 0, 1, 1], [], []>} : vector<96x16xbf16>, vector<16x128xbf16>, vector<96x128xf32> -> vector<96x128xf32>
    %14 = arith.addf %8, %13 : vector<96x128xf32>
    %c0_13 = arith.constant 0 : index
    %c10 = arith.constant 10 : index
    %c0_14 = arith.constant 0 : index
    %15 = vector.load %arg2[%c0_13, %c10, %c0_14] : memref<1x107x16xbf16, #tpu.memory_space<vmem>>, vector<1x96x16xbf16>
    %16 = vector.shape_cast %15 : vector<1x96x16xbf16> to vector<96x16xbf16>
    %c2 = arith.constant 2 : index
    %c0_15 = arith.constant 0 : index
    %c0_16 = arith.constant 0 : index
    %17 = vector.load %arg3[%c2, %c0_15, %c0_16] : memref<4x16x128xbf16, #tpu.memory_space<vmem>>, vector<1x16x128xbf16>
    %18 = vector.shape_cast %17 : vector<1x16x128xbf16> to vector<16x128xbf16>
    %cst_17 = arith.constant dense<0.000000e+00> : vector<96x128xf32>
    %19 = tpu.matmul %16, %18, %cst_17 {dimension_numbers = #tpu.dot_dimension_numbers<[1], [0], [0], [1], [0, 0, 1, 1], [], []>} : vector<96x16xbf16>, vector<16x128xbf16>, vector<96x128xf32> -> vector<96x128xf32>
    %20 = arith.addf %14, %19 : vector<96x128xf32>
    %c0_18 = arith.constant 0 : index
    %c11 = arith.constant 11 : index
    %c0_19 = arith.constant 0 : index
    %21 = vector.load %arg2[%c0_18, %c11, %c0_19] : memref<1x107x16xbf16, #tpu.memory_space<vmem>>, vector<1x96x16xbf16>
    %22 = vector.shape_cast %21 : vector<1x96x16xbf16> to vector<96x16xbf16>
    %c3 = arith.constant 3 : index
    %c0_20 = arith.constant 0 : index
    %c0_21 = arith.constant 0 : index
    %23 = vector.load %arg3[%c3, %c0_20, %c0_21] : memref<4x16x128xbf16, #tpu.memory_space<vmem>>, vector<1x16x128xbf16>
    %24 = vector.shape_cast %23 : vector<1x16x128xbf16> to vector<16x128xbf16>
    %cst_22 = arith.constant dense<0.000000e+00> : vector<96x128xf32>
    %25 = tpu.matmul %22, %24, %cst_22 {dimension_numbers = #tpu.dot_dimension_numbers<[1], [0], [0], [1], [0, 0, 1, 1], [], []>} : vector<96x16xbf16>, vector<16x128xbf16>, vector<96x128xf32> -> vector<96x128xf32>
    %26 = arith.addf %20, %25 : vector<96x128xf32>
    %cst_23 = arith.constant 0.000000e+00 : f32
    %27 = vector.broadcast %cst_23 : f32 to vector<96x128xf32>
    %28 = arith.cmpf oge, %26, %27 : vector<96x128xf32>
    %cst_24 = arith.constant 2.000000e-01 : f32
    %29 = vector.broadcast %cst_24 : f32 to vector<96x128xf32>
    %30 = arith.mulf %29, %26 : vector<96x128xf32>
    %31 = arith.select %28, %26, %30 : vector<96x128xi1>, vector<96x128xf32>
    %32 = vector.shape_cast %31 : vector<96x128xf32> to vector<1x96x128xf32>
    %33 = arith.truncf %32 : vector<1x96x128xf32> to vector<1x96x128xbf16>
    %c0_25 = arith.constant 0 : index
    %c0_26 = arith.constant 0 : index
    %c0_27 = arith.constant 0 : index
    %34 = vector.load %arg5[%c0_25, %c0_26, %c0_27] : memref<1x96x128xbf16, #tpu.memory_space<vmem>>, vector<1x96x128xbf16>
    tpu.vector_store %arg5[%c0_25, %c0_26, %c0_27], %33 {strides = array<i32>} : memref<1x96x128xbf16, #tpu.memory_space<vmem>>, vector<1x96x128xbf16>,
    return
  }
  func.func @transform_0(%arg0: i32, %arg1: i32) -> (i32, i32, i32) {
    %c0_i32 = arith.constant 0 : i32
    %c0_i32_0 = arith.constant 0 : i32
    %c0_i32_1 = arith.constant 0 : i32
    return %arg0, %c0_i32, %c0_i32_0 : i32, i32, i32
  }
  func.func @transform_1(%arg0: i32, %arg1: i32) -> (i32, i32, i32) {
    %c0_i32 = arith.constant 0 : i32
    %c0_i32_0 = arith.constant 0 : i32
    %c0_i32_1 = arith.constant 0 : i32
    %c0_i32_2 = arith.constant 0 : i32
    return %c0_i32, %c0_i32_0, %c0_i32_1 : i32, i32, i32
  }
  func.func @transform_2(%arg0: i32, %arg1: i32) -> (i32, i32) {
    %c0_i32 = arith.constant 0 : i32
    %c0_i32_0 = arith.constant 0 : i32
    %c0_i32_1 = arith.constant 0 : i32
    return %c0_i32, %c0_i32_0 : i32, i32
  }
  func.func @transform_3(%arg0: i32, %arg1: i32) -> (i32, i32, i32) {
    %c0_i32 = arith.constant 0 : i32
    %c0_i32_0 = arith.constant 0 : i32
    return %arg0, %arg1, %c0_i32 : i32, i32, i32
  }
}

module attributes {stable_mosaic.version = 11 : i64} {
  func.func @_conv_mm_kernel(%arg0: i32, %arg1: i32, %arg2: memref<1x39x512xbf16, #tpu.memory_space<vmem>>, %arg3: memref<4x512x128xbf16, #tpu.memory_space<vmem>>, %arg4: memref<1x128xf32, #tpu.memory_space<vmem>>, %arg5: memref<1x32x128xbf16, #tpu.memory_space<vmem>>, %arg6: memref<1x2x128xf32, #tpu.memory_space<vmem>>) attributes {dimension_semantics = [#tpu.dimension_semantics<parallel>, #tpu.dimension_semantics<arbitrary>], iteration_bounds = array<i64: 2, 1>, scalar_prefetch = 0 : i64, scratch_operands = 0 : i64, tpu.core_type = #tpu.core_type<tc>, window_params = [{transform_indices = @transform_0, window_bounds = array<i64: 1, 39, 512>}, {pipeline_mode = #tpu.pipeline_mode<synchronous>, transform_indices = @transform_1, window_bounds = array<i64: 4, 512, 128>}, {pipeline_mode = #tpu.pipeline_mode<synchronous>, transform_indices = @transform_2, window_bounds = array<i64: 1, 128>}, {transform_indices = @transform_3, window_bounds = array<i64: 1, 32, 128>}, {transform_indices = @transform_4, window_bounds = array<i64: 1, 2, 128>}]} {
    %c0 = arith.constant 0 : index
    %c0_0 = arith.constant 0 : index
    %0 = vector.load %arg4[%c0, %c0_0] : memref<1x128xf32, #tpu.memory_space<vmem>>, vector<1x128xf32>
    %1 = vector.shape_cast %0 : vector<1x128xf32> to vector<1x128xf32>
    %2 = vector.broadcast %1 : vector<1x128xf32> to vector<32x128xf32>
    %c0_1 = arith.constant 0 : index
    %c0_2 = arith.constant 0 : index
    %c0_3 = arith.constant 0 : index
    %3 = vector.load %arg2[%c0_1, %c0_2, %c0_3] : memref<1x39x512xbf16, #tpu.memory_space<vmem>>, vector<1x32x512xbf16>
    %4 = vector.shape_cast %3 : vector<1x32x512xbf16> to vector<32x512xbf16>
    %c0_4 = arith.constant 0 : index
    %c0_5 = arith.constant 0 : index
    %c0_6 = arith.constant 0 : index
    %5 = vector.load %arg3[%c0_4, %c0_5, %c0_6] : memref<4x512x128xbf16, #tpu.memory_space<vmem>>, vector<1x512x128xbf16>
    %6 = vector.shape_cast %5 : vector<1x512x128xbf16> to vector<512x128xbf16>
    %cst = arith.constant dense<0.000000e+00> : vector<32x128xf32>
    %7 = tpu.matmul %4, %6, %cst {dimension_numbers = #tpu.dot_dimension_numbers<[1], [0], [0], [1], [0, 0, 1, 1], [], []>} : vector<32x512xbf16>, vector<512x128xbf16>, vector<32x128xf32> -> vector<32x128xf32>
    %8 = arith.addf %2, %7 : vector<32x128xf32>
    %c0_7 = arith.constant 0 : index
    %c1 = arith.constant 1 : index
    %c0_8 = arith.constant 0 : index
    %9 = vector.load %arg2[%c0_7, %c1, %c0_8] : memref<1x39x512xbf16, #tpu.memory_space<vmem>>, vector<1x32x512xbf16>
    %10 = vector.shape_cast %9 : vector<1x32x512xbf16> to vector<32x512xbf16>
    %c1_9 = arith.constant 1 : index
    %c0_10 = arith.constant 0 : index
    %c0_11 = arith.constant 0 : index
    %11 = vector.load %arg3[%c1_9, %c0_10, %c0_11] : memref<4x512x128xbf16, #tpu.memory_space<vmem>>, vector<1x512x128xbf16>
    %12 = vector.shape_cast %11 : vector<1x512x128xbf16> to vector<512x128xbf16>
    %cst_12 = arith.constant dense<0.000000e+00> : vector<32x128xf32>
    %13 = tpu.matmul %10, %12, %cst_12 {dimension_numbers = #tpu.dot_dimension_numbers<[1], [0], [0], [1], [0, 0, 1, 1], [], []>} : vector<32x512xbf16>, vector<512x128xbf16>, vector<32x128xf32> -> vector<32x128xf32>
    %14 = arith.addf %8, %13 : vector<32x128xf32>
    %c0_13 = arith.constant 0 : index
    %c6 = arith.constant 6 : index
    %c0_14 = arith.constant 0 : index
    %15 = vector.load %arg2[%c0_13, %c6, %c0_14] : memref<1x39x512xbf16, #tpu.memory_space<vmem>>, vector<1x32x512xbf16>
    %16 = vector.shape_cast %15 : vector<1x32x512xbf16> to vector<32x512xbf16>
    %c2 = arith.constant 2 : index
    %c0_15 = arith.constant 0 : index
    %c0_16 = arith.constant 0 : index
    %17 = vector.load %arg3[%c2, %c0_15, %c0_16] : memref<4x512x128xbf16, #tpu.memory_space<vmem>>, vector<1x512x128xbf16>
    %18 = vector.shape_cast %17 : vector<1x512x128xbf16> to vector<512x128xbf16>
    %cst_17 = arith.constant dense<0.000000e+00> : vector<32x128xf32>
    %19 = tpu.matmul %16, %18, %cst_17 {dimension_numbers = #tpu.dot_dimension_numbers<[1], [0], [0], [1], [0, 0, 1, 1], [], []>} : vector<32x512xbf16>, vector<512x128xbf16>, vector<32x128xf32> -> vector<32x128xf32>
    %20 = arith.addf %14, %19 : vector<32x128xf32>
    %c0_18 = arith.constant 0 : index
    %c7 = arith.constant 7 : index
    %c0_19 = arith.constant 0 : index
    %21 = vector.load %arg2[%c0_18, %c7, %c0_19] : memref<1x39x512xbf16, #tpu.memory_space<vmem>>, vector<1x32x512xbf16>
    %22 = vector.shape_cast %21 : vector<1x32x512xbf16> to vector<32x512xbf16>
    %c3 = arith.constant 3 : index
    %c0_20 = arith.constant 0 : index
    %c0_21 = arith.constant 0 : index
    %23 = vector.load %arg3[%c3, %c0_20, %c0_21] : memref<4x512x128xbf16, #tpu.memory_space<vmem>>, vector<1x512x128xbf16>
    %24 = vector.shape_cast %23 : vector<1x512x128xbf16> to vector<512x128xbf16>
    %cst_22 = arith.constant dense<0.000000e+00> : vector<32x128xf32>
    %25 = tpu.matmul %22, %24, %cst_22 {dimension_numbers = #tpu.dot_dimension_numbers<[1], [0], [0], [1], [0, 0, 1, 1], [], []>} : vector<32x512xbf16>, vector<512x128xbf16>, vector<32x128xf32> -> vector<32x128xf32>
    %26 = arith.addf %20, %25 : vector<32x128xf32>
    %27 = tpu.iota {dimensions = array<i32: 0>} : vector<32x1xi32>
    %c0_i32 = arith.constant 0 : i32
    %28 = vector.broadcast %c0_i32 : i32 to vector<32x1xi32>
    %29 = arith.addi %28, %27 : vector<32x1xi32>
    %c30_i32 = arith.constant 30 : i32
    %30 = vector.broadcast %c30_i32 : i32 to vector<32x1xi32>
    %31 = arith.cmpi slt, %29, %30 : vector<32x1xi32>
    %c6_i32 = arith.constant 6 : i32
    %c0_i32_23 = arith.constant 0 : i32
    %32 = arith.cmpi eq, %c6_i32, %c0_i32_23 : i32
    %c1_i32 = arith.constant 1 : i32
    %33 = arith.select %32, %c1_i32, %c6_i32 : i32
    %34 = vector.broadcast %33 : i32 to vector<32x1xi32>
    %35 = arith.remsi %29, %34 : vector<32x1xi32>
    %c0_i32_24 = arith.constant 0 : i32
    %36 = vector.broadcast %c0_i32_24 : i32 to vector<32x1xi32>
    %37 = arith.cmpi ne, %35, %36 : vector<32x1xi32>
    %c0_i32_25 = arith.constant 0 : i32
    %38 = vector.broadcast %c0_i32_25 : i32 to vector<32x1xi32>
    %39 = arith.cmpi slt, %35, %38 : vector<32x1xi32>
    %c0_i32_26 = arith.constant 0 : i32
    %40 = arith.cmpi slt, %33, %c0_i32_26 : i32
    %41 = vector.broadcast %40 : i1 to vector<32x1xi1>
    %42 = vector.broadcast %41 : vector<32x1xi1> to vector<32x1xi1>
    %43 = arith.xori %39, %42 : vector<32x1xi1>
    %44 = arith.andi %43, %37 : vector<32x1xi1>
    %45 = vector.broadcast %33 : i32 to vector<32x1xi32>
    %46 = arith.addi %35, %45 : vector<32x1xi32>
    %47 = arith.select %44, %46, %35 : vector<32x1xi1>, vector<32x1xi32>
    %c5_i32 = arith.constant 5 : i32
    %48 = vector.broadcast %c5_i32 : i32 to vector<32x1xi32>
    %49 = arith.cmpi slt, %47, %48 : vector<32x1xi32>
    %50 = arith.andi %31, %49 : vector<32x1xi1>
    %cst_27 = arith.constant 0.000000e+00 : f32
    %51 = vector.shape_cast %50 : vector<32x1xi1> to vector<32x1xi1>
    %52 = vector.broadcast %51 : vector<32x1xi1> to vector<32x128xi1>
    %53 = vector.broadcast %cst_27 : f32 to vector<32x128xf32>
    %54 = arith.select %52, %26, %53 : vector<32x128xi1>, vector<32x128xf32>
    %cst_28 = arith.constant dense<0.000000e+00> : vector<128xf32>
    %55 = vector.multi_reduction <add>, %54, %cst_28 [0] : vector<32x128xf32> to vector<128xf32>
    %56 = vector.shape_cast %55 : vector<128xf32> to vector<1x128xf32>
    %57 = arith.mulf %54, %54 : vector<32x128xf32>
    %cst_29 = arith.constant dense<0.000000e+00> : vector<128xf32>
    %58 = vector.multi_reduction <add>, %57, %cst_29 [0] : vector<32x128xf32> to vector<128xf32>
    %59 = vector.shape_cast %58 : vector<128xf32> to vector<1x128xf32>
    %60 = tpu.concatenate %56, %59 in 0 : vector<1x128xf32>, vector<1x128xf32> -> vector<2x128xf32>
    %c0_i32_30 = arith.constant 0 : i32
    %61 = arith.cmpi eq, %arg1, %c0_i32_30 : i32
    %62 = arith.extui %61 : i1 to i32
    %c0_i32_31 = arith.constant 0 : i32
    %63 = arith.cmpi ne, %62, %c0_i32_31 : i32
    scf.if %63 {
      %cst_41 = arith.constant 0.000000e+00 : f32
      %71 = vector.broadcast %cst_41 : f32 to vector<1x2x128xf32>
      %c0_42 = arith.constant 0 : index
      %c0_43 = arith.constant 0 : index
      %c0_44 = arith.constant 0 : index
      %72 = vector.load %arg6[%c0_42, %c0_43, %c0_44] : memref<1x2x128xf32, #tpu.memory_space<vmem>>, vector<1x2x128xf32>
      tpu.vector_store %arg6[%c0_42, %c0_43, %c0_44], %71 {strides = array<i32>} : memref<1x2x128xf32, #tpu.memory_space<vmem>>, vector<1x2x128xf32>,
    } else {
    }
    %c0_32 = arith.constant 0 : index
    %c0_33 = arith.constant 0 : index
    %c0_34 = arith.constant 0 : index
    %64 = vector.load %arg6[%c0_32, %c0_33, %c0_34] : memref<1x2x128xf32, #tpu.memory_space<vmem>>, vector<1x2x128xf32>
    %65 = vector.shape_cast %60 : vector<2x128xf32> to vector<1x2x128xf32>
    %66 = arith.addf %64, %65 : vector<1x2x128xf32>
    %c0_35 = arith.constant 0 : index
    %c0_36 = arith.constant 0 : index
    %c0_37 = arith.constant 0 : index
    %67 = vector.load %arg6[%c0_35, %c0_36, %c0_37] : memref<1x2x128xf32, #tpu.memory_space<vmem>>, vector<1x2x128xf32>
    tpu.vector_store %arg6[%c0_35, %c0_36, %c0_37], %66 {strides = array<i32>} : memref<1x2x128xf32, #tpu.memory_space<vmem>>, vector<1x2x128xf32>,
    %68 = vector.shape_cast %26 : vector<32x128xf32> to vector<1x32x128xf32>
    %69 = arith.truncf %68 : vector<1x32x128xf32> to vector<1x32x128xbf16>
    %c0_38 = arith.constant 0 : index
    %c0_39 = arith.constant 0 : index
    %c0_40 = arith.constant 0 : index
    %70 = vector.load %arg5[%c0_38, %c0_39, %c0_40] : memref<1x32x128xbf16, #tpu.memory_space<vmem>>, vector<1x32x128xbf16>
    tpu.vector_store %arg5[%c0_38, %c0_39, %c0_40], %69 {strides = array<i32>} : memref<1x32x128xbf16, #tpu.memory_space<vmem>>, vector<1x32x128xbf16>,
    return
  }
  func.func @transform_0(%arg0: i32, %arg1: i32) -> (i32, i32, i32) {
    %c0_i32 = arith.constant 0 : i32
    %c0_i32_0 = arith.constant 0 : i32
    %c0_i32_1 = arith.constant 0 : i32
    return %arg0, %c0_i32, %c0_i32_0 : i32, i32, i32
  }
  func.func @transform_1(%arg0: i32, %arg1: i32) -> (i32, i32, i32) {
    %c0_i32 = arith.constant 0 : i32
    %c0_i32_0 = arith.constant 0 : i32
    %c0_i32_1 = arith.constant 0 : i32
    %c0_i32_2 = arith.constant 0 : i32
    return %c0_i32, %c0_i32_0, %c0_i32_1 : i32, i32, i32
  }
  func.func @transform_2(%arg0: i32, %arg1: i32) -> (i32, i32) {
    %c0_i32 = arith.constant 0 : i32
    %c0_i32_0 = arith.constant 0 : i32
    %c0_i32_1 = arith.constant 0 : i32
    return %c0_i32, %c0_i32_0 : i32, i32
  }
  func.func @transform_3(%arg0: i32, %arg1: i32) -> (i32, i32, i32) {
    %c0_i32 = arith.constant 0 : i32
    %c0_i32_0 = arith.constant 0 : i32
    return %arg0, %arg1, %c0_i32 : i32, i32, i32
  }
  func.func @transform_4(%arg0: i32, %arg1: i32) -> (i32, i32, i32) {
    %c0_i32 = arith.constant 0 : i32
    %c0_i32_0 = arith.constant 0 : i32
    %c0_i32_1 = arith.constant 0 : i32
    return %arg0, %c0_i32, %c0_i32_0 : i32, i32, i32
  }
}

module attributes {stable_mosaic.version = 11 : i64} {
  func.func @_affine_lrelu_kernel(%arg0: i32, %arg1: i32, %arg2: memref<1x32x128xbf16, #tpu.memory_space<vmem>>, %arg3: memref<1x128xf32, #tpu.memory_space<vmem>>, %arg4: memref<1x128xf32, #tpu.memory_space<vmem>>, %arg5: memref<1x32x128xbf16, #tpu.memory_space<vmem>>) attributes {dimension_semantics = [#tpu.dimension_semantics<parallel>, #tpu.dimension_semantics<parallel>], iteration_bounds = array<i64: 2, 1>, scalar_prefetch = 0 : i64, scratch_operands = 0 : i64, tpu.core_type = #tpu.core_type<tc>, window_params = [{transform_indices = @transform_0, window_bounds = array<i64: 1, 32, 128>}, {pipeline_mode = #tpu.pipeline_mode<synchronous>, transform_indices = @transform_1, window_bounds = array<i64: 1, 128>}, {pipeline_mode = #tpu.pipeline_mode<synchronous>, transform_indices = @transform_2, window_bounds = array<i64: 1, 128>}, {transform_indices = @transform_3, window_bounds = array<i64: 1, 32, 128>}]} {
    %c0 = arith.constant 0 : index
    %c0_0 = arith.constant 0 : index
    %c0_1 = arith.constant 0 : index
    %0 = vector.load %arg2[%c0, %c0_0, %c0_1] : memref<1x32x128xbf16, #tpu.memory_space<vmem>>, vector<1x32x128xbf16>
    %1 = arith.extf %0 : vector<1x32x128xbf16> to vector<1x32x128xf32>
    %c0_2 = arith.constant 0 : index
    %c0_3 = arith.constant 0 : index
    %2 = vector.load %arg3[%c0_2, %c0_3] : memref<1x128xf32, #tpu.memory_space<vmem>>, vector<1x128xf32>
    %3 = vector.shape_cast %2 : vector<1x128xf32> to vector<1x1x128xf32>
    %4 = vector.broadcast %3 : vector<1x1x128xf32> to vector<1x32x128xf32>
    %5 = arith.mulf %1, %4 : vector<1x32x128xf32>
    %c0_4 = arith.constant 0 : index
    %c0_5 = arith.constant 0 : index
    %6 = vector.load %arg4[%c0_4, %c0_5] : memref<1x128xf32, #tpu.memory_space<vmem>>, vector<1x128xf32>
    %7 = vector.shape_cast %6 : vector<1x128xf32> to vector<1x1x128xf32>
    %8 = vector.broadcast %7 : vector<1x1x128xf32> to vector<1x32x128xf32>
    %9 = arith.addf %5, %8 : vector<1x32x128xf32>
    %cst = arith.constant 0.000000e+00 : f32
    %10 = vector.broadcast %cst : f32 to vector<1x32x128xf32>
    %11 = arith.cmpf oge, %9, %10 : vector<1x32x128xf32>
    %cst_6 = arith.constant 2.000000e-01 : f32
    %12 = vector.broadcast %cst_6 : f32 to vector<1x32x128xf32>
    %13 = arith.mulf %12, %9 : vector<1x32x128xf32>
    %14 = arith.select %11, %9, %13 : vector<1x32x128xi1>, vector<1x32x128xf32>
    %15 = arith.truncf %14 : vector<1x32x128xf32> to vector<1x32x128xbf16>
    %c0_7 = arith.constant 0 : index
    %c0_8 = arith.constant 0 : index
    %c0_9 = arith.constant 0 : index
    %16 = vector.load %arg5[%c0_7, %c0_8, %c0_9] : memref<1x32x128xbf16, #tpu.memory_space<vmem>>, vector<1x32x128xbf16>
    tpu.vector_store %arg5[%c0_7, %c0_8, %c0_9], %15 {strides = array<i32>} : memref<1x32x128xbf16, #tpu.memory_space<vmem>>, vector<1x32x128xbf16>,
    return
  }
  func.func @transform_0(%arg0: i32, %arg1: i32) -> (i32, i32, i32) {
    %c0_i32 = arith.constant 0 : i32
    %c0_i32_0 = arith.constant 0 : i32
    return %arg0, %arg1, %c0_i32 : i32, i32, i32
  }
  func.func @transform_1(%arg0: i32, %arg1: i32) -> (i32, i32) {
    %c0_i32 = arith.constant 0 : i32
    %c0_i32_0 = arith.constant 0 : i32
    %c0_i32_1 = arith.constant 0 : i32
    return %c0_i32, %c0_i32_0 : i32, i32
  }
  func.func @transform_2(%arg0: i32, %arg1: i32) -> (i32, i32) {
    %c0_i32 = arith.constant 0 : i32
    %c0_i32_0 = arith.constant 0 : i32
    %c0_i32_1 = arith.constant 0 : i32
    return %c0_i32, %c0_i32_0 : i32, i32
  }
  func.func @transform_3(%arg0: i32, %arg1: i32) -> (i32, i32, i32) {
    %c0_i32 = arith.constant 0 : i32
    %c0_i32_0 = arith.constant 0 : i32
    return %arg0, %arg1, %c0_i32 : i32, i32, i32
  }
}

module attributes {stable_mosaic.version = 11 : i64} {
  func.func @_conv_mm_kernel(%arg0: i32, %arg1: i32, %arg2: memref<1x21x512xbf16, #tpu.memory_space<vmem>>, %arg3: memref<4x512x128xbf16, #tpu.memory_space<vmem>>, %arg4: memref<1x128xf32, #tpu.memory_space<vmem>>, %arg5: memref<1x16x128xbf16, #tpu.memory_space<vmem>>, %arg6: memref<1x2x128xf32, #tpu.memory_space<vmem>>) attributes {dimension_semantics = [#tpu.dimension_semantics<parallel>, #tpu.dimension_semantics<arbitrary>], iteration_bounds = array<i64: 2, 1>, scalar_prefetch = 0 : i64, scratch_operands = 0 : i64, tpu.core_type = #tpu.core_type<tc>, window_params = [{transform_indices = @transform_0, window_bounds = array<i64: 1, 21, 512>}, {pipeline_mode = #tpu.pipeline_mode<synchronous>, transform_indices = @transform_1, window_bounds = array<i64: 4, 512, 128>}, {pipeline_mode = #tpu.pipeline_mode<synchronous>, transform_indices = @transform_2, window_bounds = array<i64: 1, 128>}, {transform_indices = @transform_3, window_bounds = array<i64: 1, 16, 128>}, {transform_indices = @transform_4, window_bounds = array<i64: 1, 2, 128>}]} {
    %c0 = arith.constant 0 : index
    %c0_0 = arith.constant 0 : index
    %0 = vector.load %arg4[%c0, %c0_0] : memref<1x128xf32, #tpu.memory_space<vmem>>, vector<1x128xf32>
    %1 = vector.shape_cast %0 : vector<1x128xf32> to vector<1x128xf32>
    %2 = vector.broadcast %1 : vector<1x128xf32> to vector<16x128xf32>
    %c0_1 = arith.constant 0 : index
    %c0_2 = arith.constant 0 : index
    %c0_3 = arith.constant 0 : index
    %3 = vector.load %arg2[%c0_1, %c0_2, %c0_3] : memref<1x21x512xbf16, #tpu.memory_space<vmem>>, vector<1x16x512xbf16>
    %4 = vector.shape_cast %3 : vector<1x16x512xbf16> to vector<16x512xbf16>
    %c0_4 = arith.constant 0 : index
    %c0_5 = arith.constant 0 : index
    %c0_6 = arith.constant 0 : index
    %5 = vector.load %arg3[%c0_4, %c0_5, %c0_6] : memref<4x512x128xbf16, #tpu.memory_space<vmem>>, vector<1x512x128xbf16>
    %6 = vector.shape_cast %5 : vector<1x512x128xbf16> to vector<512x128xbf16>
    %cst = arith.constant dense<0.000000e+00> : vector<16x128xf32>
    %7 = tpu.matmul %4, %6, %cst {dimension_numbers = #tpu.dot_dimension_numbers<[1], [0], [0], [1], [0, 0, 1, 1], [], []>} : vector<16x512xbf16>, vector<512x128xbf16>, vector<16x128xf32> -> vector<16x128xf32>
    %8 = arith.addf %2, %7 : vector<16x128xf32>
    %c0_7 = arith.constant 0 : index
    %c1 = arith.constant 1 : index
    %c0_8 = arith.constant 0 : index
    %9 = vector.load %arg2[%c0_7, %c1, %c0_8] : memref<1x21x512xbf16, #tpu.memory_space<vmem>>, vector<1x16x512xbf16>
    %10 = vector.shape_cast %9 : vector<1x16x512xbf16> to vector<16x512xbf16>
    %c1_9 = arith.constant 1 : index
    %c0_10 = arith.constant 0 : index
    %c0_11 = arith.constant 0 : index
    %11 = vector.load %arg3[%c1_9, %c0_10, %c0_11] : memref<4x512x128xbf16, #tpu.memory_space<vmem>>, vector<1x512x128xbf16>
    %12 = vector.shape_cast %11 : vector<1x512x128xbf16> to vector<512x128xbf16>
    %cst_12 = arith.constant dense<0.000000e+00> : vector<16x128xf32>
    %13 = tpu.matmul %10, %12, %cst_12 {dimension_numbers = #tpu.dot_dimension_numbers<[1], [0], [0], [1], [0, 0, 1, 1], [], []>} : vector<16x512xbf16>, vector<512x128xbf16>, vector<16x128xf32> -> vector<16x128xf32>
    %14 = arith.addf %8, %13 : vector<16x128xf32>
    %c0_13 = arith.constant 0 : index
    %c4 = arith.constant 4 : index
    %c0_14 = arith.constant 0 : index
    %15 = vector.load %arg2[%c0_13, %c4, %c0_14] : memref<1x21x512xbf16, #tpu.memory_space<vmem>>, vector<1x16x512xbf16>
    %16 = vector.shape_cast %15 : vector<1x16x512xbf16> to vector<16x512xbf16>
    %c2 = arith.constant 2 : index
    %c0_15 = arith.constant 0 : index
    %c0_16 = arith.constant 0 : index
    %17 = vector.load %arg3[%c2, %c0_15, %c0_16] : memref<4x512x128xbf16, #tpu.memory_space<vmem>>, vector<1x512x128xbf16>
    %18 = vector.shape_cast %17 : vector<1x512x128xbf16> to vector<512x128xbf16>
    %cst_17 = arith.constant dense<0.000000e+00> : vector<16x128xf32>
    %19 = tpu.matmul %16, %18, %cst_17 {dimension_numbers = #tpu.dot_dimension_numbers<[1], [0], [0], [1], [0, 0, 1, 1], [], []>} : vector<16x512xbf16>, vector<512x128xbf16>, vector<16x128xf32> -> vector<16x128xf32>
    %20 = arith.addf %14, %19 : vector<16x128xf32>
    %c0_18 = arith.constant 0 : index
    %c5 = arith.constant 5 : index
    %c0_19 = arith.constant 0 : index
    %21 = vector.load %arg2[%c0_18, %c5, %c0_19] : memref<1x21x512xbf16, #tpu.memory_space<vmem>>, vector<1x16x512xbf16>
    %22 = vector.shape_cast %21 : vector<1x16x512xbf16> to vector<16x512xbf16>
    %c3 = arith.constant 3 : index
    %c0_20 = arith.constant 0 : index
    %c0_21 = arith.constant 0 : index
    %23 = vector.load %arg3[%c3, %c0_20, %c0_21] : memref<4x512x128xbf16, #tpu.memory_space<vmem>>, vector<1x512x128xbf16>
    %24 = vector.shape_cast %23 : vector<1x512x128xbf16> to vector<512x128xbf16>
    %cst_22 = arith.constant dense<0.000000e+00> : vector<16x128xf32>
    %25 = tpu.matmul %22, %24, %cst_22 {dimension_numbers = #tpu.dot_dimension_numbers<[1], [0], [0], [1], [0, 0, 1, 1], [], []>} : vector<16x512xbf16>, vector<512x128xbf16>, vector<16x128xf32> -> vector<16x128xf32>
    %26 = arith.addf %20, %25 : vector<16x128xf32>
    %27 = tpu.iota {dimensions = array<i32: 0>} : vector<16x1xi32>
    %c0_i32 = arith.constant 0 : i32
    %28 = vector.broadcast %c0_i32 : i32 to vector<16x1xi32>
    %29 = arith.addi %28, %27 : vector<16x1xi32>
    %c12_i32 = arith.constant 12 : i32
    %30 = vector.broadcast %c12_i32 : i32 to vector<16x1xi32>
    %31 = arith.cmpi slt, %29, %30 : vector<16x1xi32>
    %c4_i32 = arith.constant 4 : i32
    %c0_i32_23 = arith.constant 0 : i32
    %32 = arith.cmpi eq, %c4_i32, %c0_i32_23 : i32
    %c1_i32 = arith.constant 1 : i32
    %33 = arith.select %32, %c1_i32, %c4_i32 : i32
    %34 = vector.broadcast %33 : i32 to vector<16x1xi32>
    %35 = arith.remsi %29, %34 : vector<16x1xi32>
    %c0_i32_24 = arith.constant 0 : i32
    %36 = vector.broadcast %c0_i32_24 : i32 to vector<16x1xi32>
    %37 = arith.cmpi ne, %35, %36 : vector<16x1xi32>
    %c0_i32_25 = arith.constant 0 : i32
    %38 = vector.broadcast %c0_i32_25 : i32 to vector<16x1xi32>
    %39 = arith.cmpi slt, %35, %38 : vector<16x1xi32>
    %c0_i32_26 = arith.constant 0 : i32
    %40 = arith.cmpi slt, %33, %c0_i32_26 : i32
    %41 = vector.broadcast %40 : i1 to vector<16x1xi1>
    %42 = vector.broadcast %41 : vector<16x1xi1> to vector<16x1xi1>
    %43 = arith.xori %39, %42 : vector<16x1xi1>
    %44 = arith.andi %43, %37 : vector<16x1xi1>
    %45 = vector.broadcast %33 : i32 to vector<16x1xi32>
    %46 = arith.addi %35, %45 : vector<16x1xi32>
    %47 = arith.select %44, %46, %35 : vector<16x1xi1>, vector<16x1xi32>
    %c3_i32 = arith.constant 3 : i32
    %48 = vector.broadcast %c3_i32 : i32 to vector<16x1xi32>
    %49 = arith.cmpi slt, %47, %48 : vector<16x1xi32>
    %50 = arith.andi %31, %49 : vector<16x1xi1>
    %cst_27 = arith.constant 0.000000e+00 : f32
    %51 = vector.shape_cast %50 : vector<16x1xi1> to vector<16x1xi1>
    %52 = vector.broadcast %51 : vector<16x1xi1> to vector<16x128xi1>
    %53 = vector.broadcast %cst_27 : f32 to vector<16x128xf32>
    %54 = arith.select %52, %26, %53 : vector<16x128xi1>, vector<16x128xf32>
    %cst_28 = arith.constant dense<0.000000e+00> : vector<128xf32>
    %55 = vector.multi_reduction <add>, %54, %cst_28 [0] : vector<16x128xf32> to vector<128xf32>
    %56 = vector.shape_cast %55 : vector<128xf32> to vector<1x128xf32>
    %57 = arith.mulf %54, %54 : vector<16x128xf32>
    %cst_29 = arith.constant dense<0.000000e+00> : vector<128xf32>
    %58 = vector.multi_reduction <add>, %57, %cst_29 [0] : vector<16x128xf32> to vector<128xf32>
    %59 = vector.shape_cast %58 : vector<128xf32> to vector<1x128xf32>
    %60 = tpu.concatenate %56, %59 in 0 : vector<1x128xf32>, vector<1x128xf32> -> vector<2x128xf32>
    %c0_i32_30 = arith.constant 0 : i32
    %61 = arith.cmpi eq, %arg1, %c0_i32_30 : i32
    %62 = arith.extui %61 : i1 to i32
    %c0_i32_31 = arith.constant 0 : i32
    %63 = arith.cmpi ne, %62, %c0_i32_31 : i32
    scf.if %63 {
      %cst_41 = arith.constant 0.000000e+00 : f32
      %71 = vector.broadcast %cst_41 : f32 to vector<1x2x128xf32>
      %c0_42 = arith.constant 0 : index
      %c0_43 = arith.constant 0 : index
      %c0_44 = arith.constant 0 : index
      %72 = vector.load %arg6[%c0_42, %c0_43, %c0_44] : memref<1x2x128xf32, #tpu.memory_space<vmem>>, vector<1x2x128xf32>
      tpu.vector_store %arg6[%c0_42, %c0_43, %c0_44], %71 {strides = array<i32>} : memref<1x2x128xf32, #tpu.memory_space<vmem>>, vector<1x2x128xf32>,
    } else {
    }
    %c0_32 = arith.constant 0 : index
    %c0_33 = arith.constant 0 : index
    %c0_34 = arith.constant 0 : index
    %64 = vector.load %arg6[%c0_32, %c0_33, %c0_34] : memref<1x2x128xf32, #tpu.memory_space<vmem>>, vector<1x2x128xf32>
    %65 = vector.shape_cast %60 : vector<2x128xf32> to vector<1x2x128xf32>
    %66 = arith.addf %64, %65 : vector<1x2x128xf32>
    %c0_35 = arith.constant 0 : index
    %c0_36 = arith.constant 0 : index
    %c0_37 = arith.constant 0 : index
    %67 = vector.load %arg6[%c0_35, %c0_36, %c0_37] : memref<1x2x128xf32, #tpu.memory_space<vmem>>, vector<1x2x128xf32>
    tpu.vector_store %arg6[%c0_35, %c0_36, %c0_37], %66 {strides = array<i32>} : memref<1x2x128xf32, #tpu.memory_space<vmem>>, vector<1x2x128xf32>,
    %68 = vector.shape_cast %26 : vector<16x128xf32> to vector<1x16x128xf32>
    %69 = arith.truncf %68 : vector<1x16x128xf32> to vector<1x16x128xbf16>
    %c0_38 = arith.constant 0 : index
    %c0_39 = arith.constant 0 : index
    %c0_40 = arith.constant 0 : index
    %70 = vector.load %arg5[%c0_38, %c0_39, %c0_40] : memref<1x16x128xbf16, #tpu.memory_space<vmem>>, vector<1x16x128xbf16>
    tpu.vector_store %arg5[%c0_38, %c0_39, %c0_40], %69 {strides = array<i32>} : memref<1x16x128xbf16, #tpu.memory_space<vmem>>, vector<1x16x128xbf16>,
    return
  }
  func.func @transform_0(%arg0: i32, %arg1: i32) -> (i32, i32, i32) {
    %c0_i32 = arith.constant 0 : i32
    %c0_i32_0 = arith.constant 0 : i32
    %c0_i32_1 = arith.constant 0 : i32
    return %arg0, %c0_i32, %c0_i32_0 : i32, i32, i32
  }
  func.func @transform_1(%arg0: i32, %arg1: i32) -> (i32, i32, i32) {
    %c0_i32 = arith.constant 0 : i32
    %c0_i32_0 = arith.constant 0 : i32
    %c0_i32_1 = arith.constant 0 : i32
    %c0_i32_2 = arith.constant 0 : i32
    return %c0_i32, %c0_i32_0, %c0_i32_1 : i32, i32, i32
  }
  func.func @transform_2(%arg0: i32, %arg1: i32) -> (i32, i32) {
    %c0_i32 = arith.constant 0 : i32
    %c0_i32_0 = arith.constant 0 : i32
    %c0_i32_1 = arith.constant 0 : i32
    return %c0_i32, %c0_i32_0 : i32, i32
  }
  func.func @transform_3(%arg0: i32, %arg1: i32) -> (i32, i32, i32) {
    %c0_i32 = arith.constant 0 : i32
    %c0_i32_0 = arith.constant 0 : i32
    return %arg0, %arg1, %c0_i32 : i32, i32, i32
  }
  func.func @transform_4(%arg0: i32, %arg1: i32) -> (i32, i32, i32) {
    %c0_i32 = arith.constant 0 : i32
    %c0_i32_0 = arith.constant 0 : i32
    %c0_i32_1 = arith.constant 0 : i32
    return %arg0, %c0_i32, %c0_i32_0 : i32, i32, i32
  }
}

module attributes {stable_mosaic.version = 11 : i64} {
  func.func @_affine_lrelu_kernel(%arg0: i32, %arg1: i32, %arg2: memref<1x16x128xbf16, #tpu.memory_space<vmem>>, %arg3: memref<1x128xf32, #tpu.memory_space<vmem>>, %arg4: memref<1x128xf32, #tpu.memory_space<vmem>>, %arg5: memref<1x16x128xbf16, #tpu.memory_space<vmem>>) attributes {dimension_semantics = [#tpu.dimension_semantics<parallel>, #tpu.dimension_semantics<parallel>], iteration_bounds = array<i64: 2, 1>, scalar_prefetch = 0 : i64, scratch_operands = 0 : i64, tpu.core_type = #tpu.core_type<tc>, window_params = [{transform_indices = @transform_0, window_bounds = array<i64: 1, 16, 128>}, {pipeline_mode = #tpu.pipeline_mode<synchronous>, transform_indices = @transform_1, window_bounds = array<i64: 1, 128>}, {pipeline_mode = #tpu.pipeline_mode<synchronous>, transform_indices = @transform_2, window_bounds = array<i64: 1, 128>}, {transform_indices = @transform_3, window_bounds = array<i64: 1, 16, 128>}]} {
    %c0 = arith.constant 0 : index
    %c0_0 = arith.constant 0 : index
    %c0_1 = arith.constant 0 : index
    %0 = vector.load %arg2[%c0, %c0_0, %c0_1] : memref<1x16x128xbf16, #tpu.memory_space<vmem>>, vector<1x16x128xbf16>
    %1 = arith.extf %0 : vector<1x16x128xbf16> to vector<1x16x128xf32>
    %c0_2 = arith.constant 0 : index
    %c0_3 = arith.constant 0 : index
    %2 = vector.load %arg3[%c0_2, %c0_3] : memref<1x128xf32, #tpu.memory_space<vmem>>, vector<1x128xf32>
    %3 = vector.shape_cast %2 : vector<1x128xf32> to vector<1x1x128xf32>
    %4 = vector.broadcast %3 : vector<1x1x128xf32> to vector<1x16x128xf32>
    %5 = arith.mulf %1, %4 : vector<1x16x128xf32>
    %c0_4 = arith.constant 0 : index
    %c0_5 = arith.constant 0 : index
    %6 = vector.load %arg4[%c0_4, %c0_5] : memref<1x128xf32, #tpu.memory_space<vmem>>, vector<1x128xf32>
    %7 = vector.shape_cast %6 : vector<1x128xf32> to vector<1x1x128xf32>
    %8 = vector.broadcast %7 : vector<1x1x128xf32> to vector<1x16x128xf32>
    %9 = arith.addf %5, %8 : vector<1x16x128xf32>
    %cst = arith.constant 0.000000e+00 : f32
    %10 = vector.broadcast %cst : f32 to vector<1x16x128xf32>
    %11 = arith.cmpf oge, %9, %10 : vector<1x16x128xf32>
    %cst_6 = arith.constant 2.000000e-01 : f32
    %12 = vector.broadcast %cst_6 : f32 to vector<1x16x128xf32>
    %13 = arith.mulf %12, %9 : vector<1x16x128xf32>
    %14 = arith.select %11, %9, %13 : vector<1x16x128xi1>, vector<1x16x128xf32>
    %15 = arith.truncf %14 : vector<1x16x128xf32> to vector<1x16x128xbf16>
    %c0_7 = arith.constant 0 : index
    %c0_8 = arith.constant 0 : index
    %c0_9 = arith.constant 0 : index
    %16 = vector.load %arg5[%c0_7, %c0_8, %c0_9] : memref<1x16x128xbf16, #tpu.memory_space<vmem>>, vector<1x16x128xbf16>
    tpu.vector_store %arg5[%c0_7, %c0_8, %c0_9], %15 {strides = array<i32>} : memref<1x16x128xbf16, #tpu.memory_space<vmem>>, vector<1x16x128xbf16>,
    return
  }
  func.func @transform_0(%arg0: i32, %arg1: i32) -> (i32, i32, i32) {
    %c0_i32 = arith.constant 0 : i32
    %c0_i32_0 = arith.constant 0 : i32
    return %arg0, %arg1, %c0_i32 : i32, i32, i32
  }
  func.func @transform_1(%arg0: i32, %arg1: i32) -> (i32, i32) {
    %c0_i32 = arith.constant 0 : i32
    %c0_i32_0 = arith.constant 0 : i32
    %c0_i32_1 = arith.constant 0 : i32
    return %c0_i32, %c0_i32_0 : i32, i32
  }
  func.func @transform_2(%arg0: i32, %arg1: i32) -> (i32, i32) {
    %c0_i32 = arith.constant 0 : i32
    %c0_i32_0 = arith.constant 0 : i32
    %c0_i32_1 = arith.constant 0 : i32
    return %c0_i32, %c0_i32_0 : i32, i32
  }
  func.func @transform_3(%arg0: i32, %arg1: i32) -> (i32, i32, i32) {
    %c0_i32 = arith.constant 0 : i32
    %c0_i32_0 = arith.constant 0 : i32
    return %arg0, %arg1, %c0_i32 : i32, i32, i32
  }
}

module attributes {stable_mosaic.version = 11 : i64} {
  func.func @_conv_mm_kernel(%arg0: i32, %arg1: i32, %arg2: memref<1x56x128xbf16, #tpu.memory_space<vmem>>, %arg3: memref<16x128x128xbf16, #tpu.memory_space<vmem>>, %arg4: memref<1x128xf32, #tpu.memory_space<vmem>>, %arg5: memref<1x32x128xbf16, #tpu.memory_space<vmem>>, %arg6: memref<1x2x128xf32, #tpu.memory_space<vmem>>) attributes {dimension_semantics = [#tpu.dimension_semantics<parallel>, #tpu.dimension_semantics<arbitrary>], iteration_bounds = array<i64: 2, 1>, scalar_prefetch = 0 : i64, scratch_operands = 0 : i64, tpu.core_type = #tpu.core_type<tc>, window_params = [{transform_indices = @transform_0, window_bounds = array<i64: 1, 56, 128>}, {pipeline_mode = #tpu.pipeline_mode<synchronous>, transform_indices = @transform_1, window_bounds = array<i64: 16, 128, 128>}, {pipeline_mode = #tpu.pipeline_mode<synchronous>, transform_indices = @transform_2, window_bounds = array<i64: 1, 128>}, {transform_indices = @transform_3, window_bounds = array<i64: 1, 32, 128>}, {transform_indices = @transform_4, window_bounds = array<i64: 1, 2, 128>}]} {
    %c0 = arith.constant 0 : index
    %c0_0 = arith.constant 0 : index
    %0 = vector.load %arg4[%c0, %c0_0] : memref<1x128xf32, #tpu.memory_space<vmem>>, vector<1x128xf32>
    %1 = vector.shape_cast %0 : vector<1x128xf32> to vector<1x128xf32>
    %2 = vector.broadcast %1 : vector<1x128xf32> to vector<32x128xf32>
    %c0_1 = arith.constant 0 : index
    %c0_2 = arith.constant 0 : index
    %c0_3 = arith.constant 0 : index
    %3 = vector.load %arg2[%c0_1, %c0_2, %c0_3] : memref<1x56x128xbf16, #tpu.memory_space<vmem>>, vector<1x32x128xbf16>
    %4 = vector.shape_cast %3 : vector<1x32x128xbf16> to vector<32x128xbf16>
    %c0_4 = arith.constant 0 : index
    %c0_5 = arith.constant 0 : index
    %c0_6 = arith.constant 0 : index
    %5 = vector.load %arg3[%c0_4, %c0_5, %c0_6] : memref<16x128x128xbf16, #tpu.memory_space<vmem>>, vector<1x128x128xbf16>
    %6 = vector.shape_cast %5 : vector<1x128x128xbf16> to vector<128x128xbf16>
    %cst = arith.constant dense<0.000000e+00> : vector<32x128xf32>
    %7 = tpu.matmul %4, %6, %cst {dimension_numbers = #tpu.dot_dimension_numbers<[1], [0], [0], [1], [0, 0, 1, 1], [], []>} : vector<32x128xbf16>, vector<128x128xbf16>, vector<32x128xf32> -> vector<32x128xf32>
    %8 = arith.addf %2, %7 : vector<32x128xf32>
    %c0_7 = arith.constant 0 : index
    %c1 = arith.constant 1 : index
    %c0_8 = arith.constant 0 : index
    %9 = vector.load %arg2[%c0_7, %c1, %c0_8] : memref<1x56x128xbf16, #tpu.memory_space<vmem>>, vector<1x32x128xbf16>
    %10 = vector.shape_cast %9 : vector<1x32x128xbf16> to vector<32x128xbf16>
    %c1_9 = arith.constant 1 : index
    %c0_10 = arith.constant 0 : index
    %c0_11 = arith.constant 0 : index
    %11 = vector.load %arg3[%c1_9, %c0_10, %c0_11] : memref<16x128x128xbf16, #tpu.memory_space<vmem>>, vector<1x128x128xbf16>
    %12 = vector.shape_cast %11 : vector<1x128x128xbf16> to vector<128x128xbf16>
    %cst_12 = arith.constant dense<0.000000e+00> : vector<32x128xf32>
    %13 = tpu.matmul %10, %12, %cst_12 {dimension_numbers = #tpu.dot_dimension_numbers<[1], [0], [0], [1], [0, 0, 1, 1], [], []>} : vector<32x128xbf16>, vector<128x128xbf16>, vector<32x128xf32> -> vector<32x128xf32>
    %14 = arith.addf %8, %13 : vector<32x128xf32>
    %c0_13 = arith.constant 0 : index
    %c2 = arith.constant 2 : index
    %c0_14 = arith.constant 0 : index
    %15 = vector.load %arg2[%c0_13, %c2, %c0_14] : memref<1x56x128xbf16, #tpu.memory_space<vmem>>, vector<1x32x128xbf16>
    %16 = vector.shape_cast %15 : vector<1x32x128xbf16> to vector<32x128xbf16>
    %c2_15 = arith.constant 2 : index
    %c0_16 = arith.constant 0 : index
    %c0_17 = arith.constant 0 : index
    %17 = vector.load %arg3[%c2_15, %c0_16, %c0_17] : memref<16x128x128xbf16, #tpu.memory_space<vmem>>, vector<1x128x128xbf16>
    %18 = vector.shape_cast %17 : vector<1x128x128xbf16> to vector<128x128xbf16>
    %cst_18 = arith.constant dense<0.000000e+00> : vector<32x128xf32>
    %19 = tpu.matmul %16, %18, %cst_18 {dimension_numbers = #tpu.dot_dimension_numbers<[1], [0], [0], [1], [0, 0, 1, 1], [], []>} : vector<32x128xbf16>, vector<128x128xbf16>, vector<32x128xf32> -> vector<32x128xf32>
    %20 = arith.addf %14, %19 : vector<32x128xf32>
    %c0_19 = arith.constant 0 : index
    %c3 = arith.constant 3 : index
    %c0_20 = arith.constant 0 : index
    %21 = vector.load %arg2[%c0_19, %c3, %c0_20] : memref<1x56x128xbf16, #tpu.memory_space<vmem>>, vector<1x32x128xbf16>
    %22 = vector.shape_cast %21 : vector<1x32x128xbf16> to vector<32x128xbf16>
    %c3_21 = arith.constant 3 : index
    %c0_22 = arith.constant 0 : index
    %c0_23 = arith.constant 0 : index
    %23 = vector.load %arg3[%c3_21, %c0_22, %c0_23] : memref<16x128x128xbf16, #tpu.memory_space<vmem>>, vector<1x128x128xbf16>
    %24 = vector.shape_cast %23 : vector<1x128x128xbf16> to vector<128x128xbf16>
    %cst_24 = arith.constant dense<0.000000e+00> : vector<32x128xf32>
    %25 = tpu.matmul %22, %24, %cst_24 {dimension_numbers = #tpu.dot_dimension_numbers<[1], [0], [0], [1], [0, 0, 1, 1], [], []>} : vector<32x128xbf16>, vector<128x128xbf16>, vector<32x128xf32> -> vector<32x128xf32>
    %26 = arith.addf %20, %25 : vector<32x128xf32>
    %c0_25 = arith.constant 0 : index
    %c7 = arith.constant 7 : index
    %c0_26 = arith.constant 0 : index
    %27 = vector.load %arg2[%c0_25, %c7, %c0_26] : memref<1x56x128xbf16, #tpu.memory_space<vmem>>, vector<1x32x128xbf16>
    %28 = vector.shape_cast %27 : vector<1x32x128xbf16> to vector<32x128xbf16>
    %c4 = arith.constant 4 : index
    %c0_27 = arith.constant 0 : index
    %c0_28 = arith.constant 0 : index
    %29 = vector.load %arg3[%c4, %c0_27, %c0_28] : memref<16x128x128xbf16, #tpu.memory_space<vmem>>, vector<1x128x128xbf16>
    %30 = vector.shape_cast %29 : vector<1x128x128xbf16> to vector<128x128xbf16>
    %cst_29 = arith.constant dense<0.000000e+00> : vector<32x128xf32>
    %31 = tpu.matmul %28, %30, %cst_29 {dimension_numbers = #tpu.dot_dimension_numbers<[1], [0], [0], [1], [0, 0, 1, 1], [], []>} : vector<32x128xbf16>, vector<128x128xbf16>, vector<32x128xf32> -> vector<32x128xf32>
    %32 = arith.addf %26, %31 : vector<32x128xf32>
    %c0_30 = arith.constant 0 : index
    %c8 = arith.constant 8 : index
    %c0_31 = arith.constant 0 : index
    %33 = vector.load %arg2[%c0_30, %c8, %c0_31] : memref<1x56x128xbf16, #tpu.memory_space<vmem>>, vector<1x32x128xbf16>
    %34 = vector.shape_cast %33 : vector<1x32x128xbf16> to vector<32x128xbf16>
    %c5 = arith.constant 5 : index
    %c0_32 = arith.constant 0 : index
    %c0_33 = arith.constant 0 : index
    %35 = vector.load %arg3[%c5, %c0_32, %c0_33] : memref<16x128x128xbf16, #tpu.memory_space<vmem>>, vector<1x128x128xbf16>
    %36 = vector.shape_cast %35 : vector<1x128x128xbf16> to vector<128x128xbf16>
    %cst_34 = arith.constant dense<0.000000e+00> : vector<32x128xf32>
    %37 = tpu.matmul %34, %36, %cst_34 {dimension_numbers = #tpu.dot_dimension_numbers<[1], [0], [0], [1], [0, 0, 1, 1], [], []>} : vector<32x128xbf16>, vector<128x128xbf16>, vector<32x128xf32> -> vector<32x128xf32>
    %38 = arith.addf %32, %37 : vector<32x128xf32>
    %c0_35 = arith.constant 0 : index
    %c9 = arith.constant 9 : index
    %c0_36 = arith.constant 0 : index
    %39 = vector.load %arg2[%c0_35, %c9, %c0_36] : memref<1x56x128xbf16, #tpu.memory_space<vmem>>, vector<1x32x128xbf16>
    %40 = vector.shape_cast %39 : vector<1x32x128xbf16> to vector<32x128xbf16>
    %c6 = arith.constant 6 : index
    %c0_37 = arith.constant 0 : index
    %c0_38 = arith.constant 0 : index
    %41 = vector.load %arg3[%c6, %c0_37, %c0_38] : memref<16x128x128xbf16, #tpu.memory_space<vmem>>, vector<1x128x128xbf16>
    %42 = vector.shape_cast %41 : vector<1x128x128xbf16> to vector<128x128xbf16>
    %cst_39 = arith.constant dense<0.000000e+00> : vector<32x128xf32>
    %43 = tpu.matmul %40, %42, %cst_39 {dimension_numbers = #tpu.dot_dimension_numbers<[1], [0], [0], [1], [0, 0, 1, 1], [], []>} : vector<32x128xbf16>, vector<128x128xbf16>, vector<32x128xf32> -> vector<32x128xf32>
    %44 = arith.addf %38, %43 : vector<32x128xf32>
    %c0_40 = arith.constant 0 : index
    %c10 = arith.constant 10 : index
    %c0_41 = arith.constant 0 : index
    %45 = vector.load %arg2[%c0_40, %c10, %c0_41] : memref<1x56x128xbf16, #tpu.memory_space<vmem>>, vector<1x32x128xbf16>
    %46 = vector.shape_cast %45 : vector<1x32x128xbf16> to vector<32x128xbf16>
    %c7_42 = arith.constant 7 : index
    %c0_43 = arith.constant 0 : index
    %c0_44 = arith.constant 0 : index
    %47 = vector.load %arg3[%c7_42, %c0_43, %c0_44] : memref<16x128x128xbf16, #tpu.memory_space<vmem>>, vector<1x128x128xbf16>
    %48 = vector.shape_cast %47 : vector<1x128x128xbf16> to vector<128x128xbf16>
    %cst_45 = arith.constant dense<0.000000e+00> : vector<32x128xf32>
    %49 = tpu.matmul %46, %48, %cst_45 {dimension_numbers = #tpu.dot_dimension_numbers<[1], [0], [0], [1], [0, 0, 1, 1], [], []>} : vector<32x128xbf16>, vector<128x128xbf16>, vector<32x128xf32> -> vector<32x128xf32>
    %50 = arith.addf %44, %49 : vector<32x128xf32>
    %c0_46 = arith.constant 0 : index
    %c14 = arith.constant 14 : index
    %c0_47 = arith.constant 0 : index
    %51 = vector.load %arg2[%c0_46, %c14, %c0_47] : memref<1x56x128xbf16, #tpu.memory_space<vmem>>, vector<1x32x128xbf16>
    %52 = vector.shape_cast %51 : vector<1x32x128xbf16> to vector<32x128xbf16>
    %c8_48 = arith.constant 8 : index
    %c0_49 = arith.constant 0 : index
    %c0_50 = arith.constant 0 : index
    %53 = vector.load %arg3[%c8_48, %c0_49, %c0_50] : memref<16x128x128xbf16, #tpu.memory_space<vmem>>, vector<1x128x128xbf16>
    %54 = vector.shape_cast %53 : vector<1x128x128xbf16> to vector<128x128xbf16>
    %cst_51 = arith.constant dense<0.000000e+00> : vector<32x128xf32>
    %55 = tpu.matmul %52, %54, %cst_51 {dimension_numbers = #tpu.dot_dimension_numbers<[1], [0], [0], [1], [0, 0, 1, 1], [], []>} : vector<32x128xbf16>, vector<128x128xbf16>, vector<32x128xf32> -> vector<32x128xf32>
    %56 = arith.addf %50, %55 : vector<32x128xf32>
    %c0_52 = arith.constant 0 : index
    %c15 = arith.constant 15 : index
    %c0_53 = arith.constant 0 : index
    %57 = vector.load %arg2[%c0_52, %c15, %c0_53] : memref<1x56x128xbf16, #tpu.memory_space<vmem>>, vector<1x32x128xbf16>
    %58 = vector.shape_cast %57 : vector<1x32x128xbf16> to vector<32x128xbf16>
    %c9_54 = arith.constant 9 : index
    %c0_55 = arith.constant 0 : index
    %c0_56 = arith.constant 0 : index
    %59 = vector.load %arg3[%c9_54, %c0_55, %c0_56] : memref<16x128x128xbf16, #tpu.memory_space<vmem>>, vector<1x128x128xbf16>
    %60 = vector.shape_cast %59 : vector<1x128x128xbf16> to vector<128x128xbf16>
    %cst_57 = arith.constant dense<0.000000e+00> : vector<32x128xf32>
    %61 = tpu.matmul %58, %60, %cst_57 {dimension_numbers = #tpu.dot_dimension_numbers<[1], [0], [0], [1], [0, 0, 1, 1], [], []>} : vector<32x128xbf16>, vector<128x128xbf16>, vector<32x128xf32> -> vector<32x128xf32>
    %62 = arith.addf %56, %61 : vector<32x128xf32>
    %c0_58 = arith.constant 0 : index
    %c16 = arith.constant 16 : index
    %c0_59 = arith.constant 0 : index
    %63 = vector.load %arg2[%c0_58, %c16, %c0_59] : memref<1x56x128xbf16, #tpu.memory_space<vmem>>, vector<1x32x128xbf16>
    %64 = vector.shape_cast %63 : vector<1x32x128xbf16> to vector<32x128xbf16>
    %c10_60 = arith.constant 10 : index
    %c0_61 = arith.constant 0 : index
    %c0_62 = arith.constant 0 : index
    %65 = vector.load %arg3[%c10_60, %c0_61, %c0_62] : memref<16x128x128xbf16, #tpu.memory_space<vmem>>, vector<1x128x128xbf16>
    %66 = vector.shape_cast %65 : vector<1x128x128xbf16> to vector<128x128xbf16>
    %cst_63 = arith.constant dense<0.000000e+00> : vector<32x128xf32>
    %67 = tpu.matmul %64, %66, %cst_63 {dimension_numbers = #tpu.dot_dimension_numbers<[1], [0], [0], [1], [0, 0, 1, 1], [], []>} : vector<32x128xbf16>, vector<128x128xbf16>, vector<32x128xf32> -> vector<32x128xf32>
    %68 = arith.addf %62, %67 : vector<32x128xf32>
    %c0_64 = arith.constant 0 : index
    %c17 = arith.constant 17 : index
    %c0_65 = arith.constant 0 : index
    %69 = vector.load %arg2[%c0_64, %c17, %c0_65] : memref<1x56x128xbf16, #tpu.memory_space<vmem>>, vector<1x32x128xbf16>
    %70 = vector.shape_cast %69 : vector<1x32x128xbf16> to vector<32x128xbf16>
    %c11 = arith.constant 11 : index
    %c0_66 = arith.constant 0 : index
    %c0_67 = arith.constant 0 : index
    %71 = vector.load %arg3[%c11, %c0_66, %c0_67] : memref<16x128x128xbf16, #tpu.memory_space<vmem>>, vector<1x128x128xbf16>
    %72 = vector.shape_cast %71 : vector<1x128x128xbf16> to vector<128x128xbf16>
    %cst_68 = arith.constant dense<0.000000e+00> : vector<32x128xf32>
    %73 = tpu.matmul %70, %72, %cst_68 {dimension_numbers = #tpu.dot_dimension_numbers<[1], [0], [0], [1], [0, 0, 1, 1], [], []>} : vector<32x128xbf16>, vector<128x128xbf16>, vector<32x128xf32> -> vector<32x128xf32>
    %74 = arith.addf %68, %73 : vector<32x128xf32>
    %c0_69 = arith.constant 0 : index
    %c21 = arith.constant 21 : index
    %c0_70 = arith.constant 0 : index
    %75 = vector.load %arg2[%c0_69, %c21, %c0_70] : memref<1x56x128xbf16, #tpu.memory_space<vmem>>, vector<1x32x128xbf16>
    %76 = vector.shape_cast %75 : vector<1x32x128xbf16> to vector<32x128xbf16>
    %c12 = arith.constant 12 : index
    %c0_71 = arith.constant 0 : index
    %c0_72 = arith.constant 0 : index
    %77 = vector.load %arg3[%c12, %c0_71, %c0_72] : memref<16x128x128xbf16, #tpu.memory_space<vmem>>, vector<1x128x128xbf16>
    %78 = vector.shape_cast %77 : vector<1x128x128xbf16> to vector<128x128xbf16>
    %cst_73 = arith.constant dense<0.000000e+00> : vector<32x128xf32>
    %79 = tpu.matmul %76, %78, %cst_73 {dimension_numbers = #tpu.dot_dimension_numbers<[1], [0], [0], [1], [0, 0, 1, 1], [], []>} : vector<32x128xbf16>, vector<128x128xbf16>, vector<32x128xf32> -> vector<32x128xf32>
    %80 = arith.addf %74, %79 : vector<32x128xf32>
    %c0_74 = arith.constant 0 : index
    %c22 = arith.constant 22 : index
    %c0_75 = arith.constant 0 : index
    %81 = vector.load %arg2[%c0_74, %c22, %c0_75] : memref<1x56x128xbf16, #tpu.memory_space<vmem>>, vector<1x32x128xbf16>
    %82 = vector.shape_cast %81 : vector<1x32x128xbf16> to vector<32x128xbf16>
    %c13 = arith.constant 13 : index
    %c0_76 = arith.constant 0 : index
    %c0_77 = arith.constant 0 : index
    %83 = vector.load %arg3[%c13, %c0_76, %c0_77] : memref<16x128x128xbf16, #tpu.memory_space<vmem>>, vector<1x128x128xbf16>
    %84 = vector.shape_cast %83 : vector<1x128x128xbf16> to vector<128x128xbf16>
    %cst_78 = arith.constant dense<0.000000e+00> : vector<32x128xf32>
    %85 = tpu.matmul %82, %84, %cst_78 {dimension_numbers = #tpu.dot_dimension_numbers<[1], [0], [0], [1], [0, 0, 1, 1], [], []>} : vector<32x128xbf16>, vector<128x128xbf16>, vector<32x128xf32> -> vector<32x128xf32>
    %86 = arith.addf %80, %85 : vector<32x128xf32>
    %c0_79 = arith.constant 0 : index
    %c23 = arith.constant 23 : index
    %c0_80 = arith.constant 0 : index
    %87 = vector.load %arg2[%c0_79, %c23, %c0_80] : memref<1x56x128xbf16, #tpu.memory_space<vmem>>, vector<1x32x128xbf16>
    %88 = vector.shape_cast %87 : vector<1x32x128xbf16> to vector<32x128xbf16>
    %c14_81 = arith.constant 14 : index
    %c0_82 = arith.constant 0 : index
    %c0_83 = arith.constant 0 : index
    %89 = vector.load %arg3[%c14_81, %c0_82, %c0_83] : memref<16x128x128xbf16, #tpu.memory_space<vmem>>, vector<1x128x128xbf16>
    %90 = vector.shape_cast %89 : vector<1x128x128xbf16> to vector<128x128xbf16>
    %cst_84 = arith.constant dense<0.000000e+00> : vector<32x128xf32>
    %91 = tpu.matmul %88, %90, %cst_84 {dimension_numbers = #tpu.dot_dimension_numbers<[1], [0], [0], [1], [0, 0, 1, 1], [], []>} : vector<32x128xbf16>, vector<128x128xbf16>, vector<32x128xf32> -> vector<32x128xf32>
    %92 = arith.addf %86, %91 : vector<32x128xf32>
    %c0_85 = arith.constant 0 : index
    %c24 = arith.constant 24 : index
    %c0_86 = arith.constant 0 : index
    %93 = vector.load %arg2[%c0_85, %c24, %c0_86] : memref<1x56x128xbf16, #tpu.memory_space<vmem>>, vector<1x32x128xbf16>
    %94 = vector.shape_cast %93 : vector<1x32x128xbf16> to vector<32x128xbf16>
    %c15_87 = arith.constant 15 : index
    %c0_88 = arith.constant 0 : index
    %c0_89 = arith.constant 0 : index
    %95 = vector.load %arg3[%c15_87, %c0_88, %c0_89] : memref<16x128x128xbf16, #tpu.memory_space<vmem>>, vector<1x128x128xbf16>
    %96 = vector.shape_cast %95 : vector<1x128x128xbf16> to vector<128x128xbf16>
    %cst_90 = arith.constant dense<0.000000e+00> : vector<32x128xf32>
    %97 = tpu.matmul %94, %96, %cst_90 {dimension_numbers = #tpu.dot_dimension_numbers<[1], [0], [0], [1], [0, 0, 1, 1], [], []>} : vector<32x128xbf16>, vector<128x128xbf16>, vector<32x128xf32> -> vector<32x128xf32>
    %98 = arith.addf %92, %97 : vector<32x128xf32>
    %99 = tpu.iota {dimensions = array<i32: 0>} : vector<32x1xi32>
    %c0_i32 = arith.constant 0 : i32
    %100 = vector.broadcast %c0_i32 : i32 to vector<32x1xi32>
    %101 = arith.addi %100, %99 : vector<32x1xi32>
    %c28_i32 = arith.constant 28 : i32
    %102 = vector.broadcast %c28_i32 : i32 to vector<32x1xi32>
    %103 = arith.cmpi slt, %101, %102 : vector<32x1xi32>
    %c7_i32 = arith.constant 7 : i32
    %c0_i32_91 = arith.constant 0 : i32
    %104 = arith.cmpi eq, %c7_i32, %c0_i32_91 : i32
    %c1_i32 = arith.constant 1 : i32
    %105 = arith.select %104, %c1_i32, %c7_i32 : i32
    %106 = vector.broadcast %105 : i32 to vector<32x1xi32>
    %107 = arith.remsi %101, %106 : vector<32x1xi32>
    %c0_i32_92 = arith.constant 0 : i32
    %108 = vector.broadcast %c0_i32_92 : i32 to vector<32x1xi32>
    %109 = arith.cmpi ne, %107, %108 : vector<32x1xi32>
    %c0_i32_93 = arith.constant 0 : i32
    %110 = vector.broadcast %c0_i32_93 : i32 to vector<32x1xi32>
    %111 = arith.cmpi slt, %107, %110 : vector<32x1xi32>
    %c0_i32_94 = arith.constant 0 : i32
    %112 = arith.cmpi slt, %105, %c0_i32_94 : i32
    %113 = vector.broadcast %112 : i1 to vector<32x1xi1>
    %114 = vector.broadcast %113 : vector<32x1xi1> to vector<32x1xi1>
    %115 = arith.xori %111, %114 : vector<32x1xi1>
    %116 = arith.andi %115, %109 : vector<32x1xi1>
    %117 = vector.broadcast %105 : i32 to vector<32x1xi32>
    %118 = arith.addi %107, %117 : vector<32x1xi32>
    %119 = arith.select %116, %118, %107 : vector<32x1xi1>, vector<32x1xi32>
    %c4_i32 = arith.constant 4 : i32
    %120 = vector.broadcast %c4_i32 : i32 to vector<32x1xi32>
    %121 = arith.cmpi slt, %119, %120 : vector<32x1xi32>
    %122 = arith.andi %103, %121 : vector<32x1xi1>
    %cst_95 = arith.constant 0.000000e+00 : f32
    %123 = vector.shape_cast %122 : vector<32x1xi1> to vector<32x1xi1>
    %124 = vector.broadcast %123 : vector<32x1xi1> to vector<32x128xi1>
    %125 = vector.broadcast %cst_95 : f32 to vector<32x128xf32>
    %126 = arith.select %124, %98, %125 : vector<32x128xi1>, vector<32x128xf32>
    %cst_96 = arith.constant dense<0.000000e+00> : vector<128xf32>
    %127 = vector.multi_reduction <add>, %126, %cst_96 [0] : vector<32x128xf32> to vector<128xf32>
    %128 = vector.shape_cast %127 : vector<128xf32> to vector<1x128xf32>
    %129 = arith.mulf %126, %126 : vector<32x128xf32>
    %cst_97 = arith.constant dense<0.000000e+00> : vector<128xf32>
    %130 = vector.multi_reduction <add>, %129, %cst_97 [0] : vector<32x128xf32> to vector<128xf32>
    %131 = vector.shape_cast %130 : vector<128xf32> to vector<1x128xf32>
    %132 = tpu.concatenate %128, %131 in 0 : vector<1x128xf32>, vector<1x128xf32> -> vector<2x128xf32>
    %c0_i32_98 = arith.constant 0 : i32
    %133 = arith.cmpi eq, %arg1, %c0_i32_98 : i32
    %134 = arith.extui %133 : i1 to i32
    %c0_i32_99 = arith.constant 0 : i32
    %135 = arith.cmpi ne, %134, %c0_i32_99 : i32
    scf.if %135 {
      %cst_109 = arith.constant 0.000000e+00 : f32
      %143 = vector.broadcast %cst_109 : f32 to vector<1x2x128xf32>
      %c0_110 = arith.constant 0 : index
      %c0_111 = arith.constant 0 : index
      %c0_112 = arith.constant 0 : index
      %144 = vector.load %arg6[%c0_110, %c0_111, %c0_112] : memref<1x2x128xf32, #tpu.memory_space<vmem>>, vector<1x2x128xf32>
      tpu.vector_store %arg6[%c0_110, %c0_111, %c0_112], %143 {strides = array<i32>} : memref<1x2x128xf32, #tpu.memory_space<vmem>>, vector<1x2x128xf32>,
    } else {
    }
    %c0_100 = arith.constant 0 : index
    %c0_101 = arith.constant 0 : index
    %c0_102 = arith.constant 0 : index
    %136 = vector.load %arg6[%c0_100, %c0_101, %c0_102] : memref<1x2x128xf32, #tpu.memory_space<vmem>>, vector<1x2x128xf32>
    %137 = vector.shape_cast %132 : vector<2x128xf32> to vector<1x2x128xf32>
    %138 = arith.addf %136, %137 : vector<1x2x128xf32>
    %c0_103 = arith.constant 0 : index
    %c0_104 = arith.constant 0 : index
    %c0_105 = arith.constant 0 : index
    %139 = vector.load %arg6[%c0_103, %c0_104, %c0_105] : memref<1x2x128xf32, #tpu.memory_space<vmem>>, vector<1x2x128xf32>
    tpu.vector_store %arg6[%c0_103, %c0_104, %c0_105], %138 {strides = array<i32>} : memref<1x2x128xf32, #tpu.memory_space<vmem>>, vector<1x2x128xf32>,
    %140 = vector.shape_cast %98 : vector<32x128xf32> to vector<1x32x128xf32>
    %141 = arith.truncf %140 : vector<1x32x128xf32> to vector<1x32x128xbf16>
    %c0_106 = arith.constant 0 : index
    %c0_107 = arith.constant 0 : index
    %c0_108 = arith.constant 0 : index
    %142 = vector.load %arg5[%c0_106, %c0_107, %c0_108] : memref<1x32x128xbf16, #tpu.memory_space<vmem>>, vector<1x32x128xbf16>
    tpu.vector_store %arg5[%c0_106, %c0_107, %c0_108], %141 {strides = array<i32>} : memref<1x32x128xbf16, #tpu.memory_space<vmem>>, vector<1x32x128xbf16>,
    return
  }
  func.func @transform_0(%arg0: i32, %arg1: i32) -> (i32, i32, i32) {
    %c0_i32 = arith.constant 0 : i32
    %c0_i32_0 = arith.constant 0 : i32
    %c0_i32_1 = arith.constant 0 : i32
    return %arg0, %c0_i32, %c0_i32_0 : i32, i32, i32
  }
  func.func @transform_1(%arg0: i32, %arg1: i32) -> (i32, i32, i32) {
    %c0_i32 = arith.constant 0 : i32
    %c0_i32_0 = arith.constant 0 : i32
    %c0_i32_1 = arith.constant 0 : i32
    %c0_i32_2 = arith.constant 0 : i32
    return %c0_i32, %c0_i32_0, %c0_i32_1 : i32, i32, i32
  }
  func.func @transform_2(%arg0: i32, %arg1: i32) -> (i32, i32) {
    %c0_i32 = arith.constant 0 : i32
    %c0_i32_0 = arith.constant 0 : i32
    %c0_i32_1 = arith.constant 0 : i32
    return %c0_i32, %c0_i32_0 : i32, i32
  }
  func.func @transform_3(%arg0: i32, %arg1: i32) -> (i32, i32, i32) {
    %c0_i32 = arith.constant 0 : i32
    %c0_i32_0 = arith.constant 0 : i32
    return %arg0, %arg1, %c0_i32 : i32, i32, i32
  }
  func.func @transform_4(%arg0: i32, %arg1: i32) -> (i32, i32, i32) {
    %c0_i32 = arith.constant 0 : i32
    %c0_i32_0 = arith.constant 0 : i32
    %c0_i32_1 = arith.constant 0 : i32
    return %arg0, %c0_i32, %c0_i32_0 : i32, i32, i32
  }
}

module attributes {stable_mosaic.version = 11 : i64} {
  func.func @_conv_mm_kernel(%arg0: i32, %arg1: i32, %arg2: memref<1x67x128xbf16, #tpu.memory_space<vmem>>, %arg3: memref<16x128x128xbf16, #tpu.memory_space<vmem>>, %arg4: memref<1x128xf32, #tpu.memory_space<vmem>>, %arg5: memref<1x40x128xf32, #tpu.memory_space<vmem>>) attributes {dimension_semantics = [#tpu.dimension_semantics<parallel>, #tpu.dimension_semantics<parallel>], iteration_bounds = array<i64: 2, 1>, scalar_prefetch = 0 : i64, scratch_operands = 0 : i64, tpu.core_type = #tpu.core_type<tc>, window_params = [{transform_indices = @transform_0, window_bounds = array<i64: 1, 67, 128>}, {pipeline_mode = #tpu.pipeline_mode<synchronous>, transform_indices = @transform_1, window_bounds = array<i64: 16, 128, 128>}, {pipeline_mode = #tpu.pipeline_mode<synchronous>, transform_indices = @transform_2, window_bounds = array<i64: 1, 128>}, {transform_indices = @transform_3, window_bounds = array<i64: 1, 40, 128>}]} {
    %c0 = arith.constant 0 : index
    %c0_0 = arith.constant 0 : index
    %0 = vector.load %arg4[%c0, %c0_0] : memref<1x128xf32, #tpu.memory_space<vmem>>, vector<1x128xf32>
    %1 = vector.shape_cast %0 : vector<1x128xf32> to vector<1x128xf32>
    %2 = vector.broadcast %1 : vector<1x128xf32> to vector<40x128xf32>
    %c0_1 = arith.constant 0 : index
    %c0_2 = arith.constant 0 : index
    %c0_3 = arith.constant 0 : index
    %3 = vector.load %arg2[%c0_1, %c0_2, %c0_3] : memref<1x67x128xbf16, #tpu.memory_space<vmem>>, vector<1x40x128xbf16>
    %4 = vector.shape_cast %3 : vector<1x40x128xbf16> to vector<40x128xbf16>
    %c0_4 = arith.constant 0 : index
    %c0_5 = arith.constant 0 : index
    %c0_6 = arith.constant 0 : index
    %5 = vector.load %arg3[%c0_4, %c0_5, %c0_6] : memref<16x128x128xbf16, #tpu.memory_space<vmem>>, vector<1x128x128xbf16>
    %6 = vector.shape_cast %5 : vector<1x128x128xbf16> to vector<128x128xbf16>
    %cst = arith.constant dense<0.000000e+00> : vector<40x128xf32>
    %7 = tpu.matmul %4, %6, %cst {dimension_numbers = #tpu.dot_dimension_numbers<[1], [0], [0], [1], [0, 0, 1, 1], [], []>} : vector<40x128xbf16>, vector<128x128xbf16>, vector<40x128xf32> -> vector<40x128xf32>
    %8 = arith.addf %2, %7 : vector<40x128xf32>
    %c0_7 = arith.constant 0 : index
    %c1 = arith.constant 1 : index
    %c0_8 = arith.constant 0 : index
    %9 = vector.load %arg2[%c0_7, %c1, %c0_8] : memref<1x67x128xbf16, #tpu.memory_space<vmem>>, vector<1x40x128xbf16>
    %10 = vector.shape_cast %9 : vector<1x40x128xbf16> to vector<40x128xbf16>
    %c1_9 = arith.constant 1 : index
    %c0_10 = arith.constant 0 : index
    %c0_11 = arith.constant 0 : index
    %11 = vector.load %arg3[%c1_9, %c0_10, %c0_11] : memref<16x128x128xbf16, #tpu.memory_space<vmem>>, vector<1x128x128xbf16>
    %12 = vector.shape_cast %11 : vector<1x128x128xbf16> to vector<128x128xbf16>
    %cst_12 = arith.constant dense<0.000000e+00> : vector<40x128xf32>
    %13 = tpu.matmul %10, %12, %cst_12 {dimension_numbers = #tpu.dot_dimension_numbers<[1], [0], [0], [1], [0, 0, 1, 1], [], []>} : vector<40x128xbf16>, vector<128x128xbf16>, vector<40x128xf32> -> vector<40x128xf32>
    %14 = arith.addf %8, %13 : vector<40x128xf32>
    %c0_13 = arith.constant 0 : index
    %c2 = arith.constant 2 : index
    %c0_14 = arith.constant 0 : index
    %15 = vector.load %arg2[%c0_13, %c2, %c0_14] : memref<1x67x128xbf16, #tpu.memory_space<vmem>>, vector<1x40x128xbf16>
    %16 = vector.shape_cast %15 : vector<1x40x128xbf16> to vector<40x128xbf16>
    %c2_15 = arith.constant 2 : index
    %c0_16 = arith.constant 0 : index
    %c0_17 = arith.constant 0 : index
    %17 = vector.load %arg3[%c2_15, %c0_16, %c0_17] : memref<16x128x128xbf16, #tpu.memory_space<vmem>>, vector<1x128x128xbf16>
    %18 = vector.shape_cast %17 : vector<1x128x128xbf16> to vector<128x128xbf16>
    %cst_18 = arith.constant dense<0.000000e+00> : vector<40x128xf32>
    %19 = tpu.matmul %16, %18, %cst_18 {dimension_numbers = #tpu.dot_dimension_numbers<[1], [0], [0], [1], [0, 0, 1, 1], [], []>} : vector<40x128xbf16>, vector<128x128xbf16>, vector<40x128xf32> -> vector<40x128xf32>
    %20 = arith.addf %14, %19 : vector<40x128xf32>
    %c0_19 = arith.constant 0 : index
    %c3 = arith.constant 3 : index
    %c0_20 = arith.constant 0 : index
    %21 = vector.load %arg2[%c0_19, %c3, %c0_20] : memref<1x67x128xbf16, #tpu.memory_space<vmem>>, vector<1x40x128xbf16>
    %22 = vector.shape_cast %21 : vector<1x40x128xbf16> to vector<40x128xbf16>
    %c3_21 = arith.constant 3 : index
    %c0_22 = arith.constant 0 : index
    %c0_23 = arith.constant 0 : index
    %23 = vector.load %arg3[%c3_21, %c0_22, %c0_23] : memref<16x128x128xbf16, #tpu.memory_space<vmem>>, vector<1x128x128xbf16>
    %24 = vector.shape_cast %23 : vector<1x128x128xbf16> to vector<128x128xbf16>
    %cst_24 = arith.constant dense<0.000000e+00> : vector<40x128xf32>
    %25 = tpu.matmul %22, %24, %cst_24 {dimension_numbers = #tpu.dot_dimension_numbers<[1], [0], [0], [1], [0, 0, 1, 1], [], []>} : vector<40x128xbf16>, vector<128x128xbf16>, vector<40x128xf32> -> vector<40x128xf32>
    %26 = arith.addf %20, %25 : vector<40x128xf32>
    %c0_25 = arith.constant 0 : index
    %c8 = arith.constant 8 : index
    %c0_26 = arith.constant 0 : index
    %27 = vector.load %arg2[%c0_25, %c8, %c0_26] : memref<1x67x128xbf16, #tpu.memory_space<vmem>>, vector<1x40x128xbf16>
    %28 = vector.shape_cast %27 : vector<1x40x128xbf16> to vector<40x128xbf16>
    %c4 = arith.constant 4 : index
    %c0_27 = arith.constant 0 : index
    %c0_28 = arith.constant 0 : index
    %29 = vector.load %arg3[%c4, %c0_27, %c0_28] : memref<16x128x128xbf16, #tpu.memory_space<vmem>>, vector<1x128x128xbf16>
    %30 = vector.shape_cast %29 : vector<1x128x128xbf16> to vector<128x128xbf16>
    %cst_29 = arith.constant dense<0.000000e+00> : vector<40x128xf32>
    %31 = tpu.matmul %28, %30, %cst_29 {dimension_numbers = #tpu.dot_dimension_numbers<[1], [0], [0], [1], [0, 0, 1, 1], [], []>} : vector<40x128xbf16>, vector<128x128xbf16>, vector<40x128xf32> -> vector<40x128xf32>
    %32 = arith.addf %26, %31 : vector<40x128xf32>
    %c0_30 = arith.constant 0 : index
    %c9 = arith.constant 9 : index
    %c0_31 = arith.constant 0 : index
    %33 = vector.load %arg2[%c0_30, %c9, %c0_31] : memref<1x67x128xbf16, #tpu.memory_space<vmem>>, vector<1x40x128xbf16>
    %34 = vector.shape_cast %33 : vector<1x40x128xbf16> to vector<40x128xbf16>
    %c5 = arith.constant 5 : index
    %c0_32 = arith.constant 0 : index
    %c0_33 = arith.constant 0 : index
    %35 = vector.load %arg3[%c5, %c0_32, %c0_33] : memref<16x128x128xbf16, #tpu.memory_space<vmem>>, vector<1x128x128xbf16>
    %36 = vector.shape_cast %35 : vector<1x128x128xbf16> to vector<128x128xbf16>
    %cst_34 = arith.constant dense<0.000000e+00> : vector<40x128xf32>
    %37 = tpu.matmul %34, %36, %cst_34 {dimension_numbers = #tpu.dot_dimension_numbers<[1], [0], [0], [1], [0, 0, 1, 1], [], []>} : vector<40x128xbf16>, vector<128x128xbf16>, vector<40x128xf32> -> vector<40x128xf32>
    %38 = arith.addf %32, %37 : vector<40x128xf32>
    %c0_35 = arith.constant 0 : index
    %c10 = arith.constant 10 : index
    %c0_36 = arith.constant 0 : index
    %39 = vector.load %arg2[%c0_35, %c10, %c0_36] : memref<1x67x128xbf16, #tpu.memory_space<vmem>>, vector<1x40x128xbf16>
    %40 = vector.shape_cast %39 : vector<1x40x128xbf16> to vector<40x128xbf16>
    %c6 = arith.constant 6 : index
    %c0_37 = arith.constant 0 : index
    %c0_38 = arith.constant 0 : index
    %41 = vector.load %arg3[%c6, %c0_37, %c0_38] : memref<16x128x128xbf16, #tpu.memory_space<vmem>>, vector<1x128x128xbf16>
    %42 = vector.shape_cast %41 : vector<1x128x128xbf16> to vector<128x128xbf16>
    %cst_39 = arith.constant dense<0.000000e+00> : vector<40x128xf32>
    %43 = tpu.matmul %40, %42, %cst_39 {dimension_numbers = #tpu.dot_dimension_numbers<[1], [0], [0], [1], [0, 0, 1, 1], [], []>} : vector<40x128xbf16>, vector<128x128xbf16>, vector<40x128xf32> -> vector<40x128xf32>
    %44 = arith.addf %38, %43 : vector<40x128xf32>
    %c0_40 = arith.constant 0 : index
    %c11 = arith.constant 11 : index
    %c0_41 = arith.constant 0 : index
    %45 = vector.load %arg2[%c0_40, %c11, %c0_41] : memref<1x67x128xbf16, #tpu.memory_space<vmem>>, vector<1x40x128xbf16>
    %46 = vector.shape_cast %45 : vector<1x40x128xbf16> to vector<40x128xbf16>
    %c7 = arith.constant 7 : index
    %c0_42 = arith.constant 0 : index
    %c0_43 = arith.constant 0 : index
    %47 = vector.load %arg3[%c7, %c0_42, %c0_43] : memref<16x128x128xbf16, #tpu.memory_space<vmem>>, vector<1x128x128xbf16>
    %48 = vector.shape_cast %47 : vector<1x128x128xbf16> to vector<128x128xbf16>
    %cst_44 = arith.constant dense<0.000000e+00> : vector<40x128xf32>
    %49 = tpu.matmul %46, %48, %cst_44 {dimension_numbers = #tpu.dot_dimension_numbers<[1], [0], [0], [1], [0, 0, 1, 1], [], []>} : vector<40x128xbf16>, vector<128x128xbf16>, vector<40x128xf32> -> vector<40x128xf32>
    %50 = arith.addf %44, %49 : vector<40x128xf32>
    %c0_45 = arith.constant 0 : index
    %c16 = arith.constant 16 : index
    %c0_46 = arith.constant 0 : index
    %51 = vector.load %arg2[%c0_45, %c16, %c0_46] : memref<1x67x128xbf16, #tpu.memory_space<vmem>>, vector<1x40x128xbf16>
    %52 = vector.shape_cast %51 : vector<1x40x128xbf16> to vector<40x128xbf16>
    %c8_47 = arith.constant 8 : index
    %c0_48 = arith.constant 0 : index
    %c0_49 = arith.constant 0 : index
    %53 = vector.load %arg3[%c8_47, %c0_48, %c0_49] : memref<16x128x128xbf16, #tpu.memory_space<vmem>>, vector<1x128x128xbf16>
    %54 = vector.shape_cast %53 : vector<1x128x128xbf16> to vector<128x128xbf16>
    %cst_50 = arith.constant dense<0.000000e+00> : vector<40x128xf32>
    %55 = tpu.matmul %52, %54, %cst_50 {dimension_numbers = #tpu.dot_dimension_numbers<[1], [0], [0], [1], [0, 0, 1, 1], [], []>} : vector<40x128xbf16>, vector<128x128xbf16>, vector<40x128xf32> -> vector<40x128xf32>
    %56 = arith.addf %50, %55 : vector<40x128xf32>
    %c0_51 = arith.constant 0 : index
    %c17 = arith.constant 17 : index
    %c0_52 = arith.constant 0 : index
    %57 = vector.load %arg2[%c0_51, %c17, %c0_52] : memref<1x67x128xbf16, #tpu.memory_space<vmem>>, vector<1x40x128xbf16>
    %58 = vector.shape_cast %57 : vector<1x40x128xbf16> to vector<40x128xbf16>
    %c9_53 = arith.constant 9 : index
    %c0_54 = arith.constant 0 : index
    %c0_55 = arith.constant 0 : index
    %59 = vector.load %arg3[%c9_53, %c0_54, %c0_55] : memref<16x128x128xbf16, #tpu.memory_space<vmem>>, vector<1x128x128xbf16>
    %60 = vector.shape_cast %59 : vector<1x128x128xbf16> to vector<128x128xbf16>
    %cst_56 = arith.constant dense<0.000000e+00> : vector<40x128xf32>
    %61 = tpu.matmul %58, %60, %cst_56 {dimension_numbers = #tpu.dot_dimension_numbers<[1], [0], [0], [1], [0, 0, 1, 1], [], []>} : vector<40x128xbf16>, vector<128x128xbf16>, vector<40x128xf32> -> vector<40x128xf32>
    %62 = arith.addf %56, %61 : vector<40x128xf32>
    %c0_57 = arith.constant 0 : index
    %c18 = arith.constant 18 : index
    %c0_58 = arith.constant 0 : index
    %63 = vector.load %arg2[%c0_57, %c18, %c0_58] : memref<1x67x128xbf16, #tpu.memory_space<vmem>>, vector<1x40x128xbf16>
    %64 = vector.shape_cast %63 : vector<1x40x128xbf16> to vector<40x128xbf16>
    %c10_59 = arith.constant 10 : index
    %c0_60 = arith.constant 0 : index
    %c0_61 = arith.constant 0 : index
    %65 = vector.load %arg3[%c10_59, %c0_60, %c0_61] : memref<16x128x128xbf16, #tpu.memory_space<vmem>>, vector<1x128x128xbf16>
    %66 = vector.shape_cast %65 : vector<1x128x128xbf16> to vector<128x128xbf16>
    %cst_62 = arith.constant dense<0.000000e+00> : vector<40x128xf32>
    %67 = tpu.matmul %64, %66, %cst_62 {dimension_numbers = #tpu.dot_dimension_numbers<[1], [0], [0], [1], [0, 0, 1, 1], [], []>} : vector<40x128xbf16>, vector<128x128xbf16>, vector<40x128xf32> -> vector<40x128xf32>
    %68 = arith.addf %62, %67 : vector<40x128xf32>
    %c0_63 = arith.constant 0 : index
    %c19 = arith.constant 19 : index
    %c0_64 = arith.constant 0 : index
    %69 = vector.load %arg2[%c0_63, %c19, %c0_64] : memref<1x67x128xbf16, #tpu.memory_space<vmem>>, vector<1x40x128xbf16>
    %70 = vector.shape_cast %69 : vector<1x40x128xbf16> to vector<40x128xbf16>
    %c11_65 = arith.constant 11 : index
    %c0_66 = arith.constant 0 : index
    %c0_67 = arith.constant 0 : index
    %71 = vector.load %arg3[%c11_65, %c0_66, %c0_67] : memref<16x128x128xbf16, #tpu.memory_space<vmem>>, vector<1x128x128xbf16>
    %72 = vector.shape_cast %71 : vector<1x128x128xbf16> to vector<128x128xbf16>
    %cst_68 = arith.constant dense<0.000000e+00> : vector<40x128xf32>
    %73 = tpu.matmul %70, %72, %cst_68 {dimension_numbers = #tpu.dot_dimension_numbers<[1], [0], [0], [1], [0, 0, 1, 1], [], []>} : vector<40x128xbf16>, vector<128x128xbf16>, vector<40x128xf32> -> vector<40x128xf32>
    %74 = arith.addf %68, %73 : vector<40x128xf32>
    %c0_69 = arith.constant 0 : index
    %c24 = arith.constant 24 : index
    %c0_70 = arith.constant 0 : index
    %75 = vector.load %arg2[%c0_69, %c24, %c0_70] : memref<1x67x128xbf16, #tpu.memory_space<vmem>>, vector<1x40x128xbf16>
    %76 = vector.shape_cast %75 : vector<1x40x128xbf16> to vector<40x128xbf16>
    %c12 = arith.constant 12 : index
    %c0_71 = arith.constant 0 : index
    %c0_72 = arith.constant 0 : index
    %77 = vector.load %arg3[%c12, %c0_71, %c0_72] : memref<16x128x128xbf16, #tpu.memory_space<vmem>>, vector<1x128x128xbf16>
    %78 = vector.shape_cast %77 : vector<1x128x128xbf16> to vector<128x128xbf16>
    %cst_73 = arith.constant dense<0.000000e+00> : vector<40x128xf32>
    %79 = tpu.matmul %76, %78, %cst_73 {dimension_numbers = #tpu.dot_dimension_numbers<[1], [0], [0], [1], [0, 0, 1, 1], [], []>} : vector<40x128xbf16>, vector<128x128xbf16>, vector<40x128xf32> -> vector<40x128xf32>
    %80 = arith.addf %74, %79 : vector<40x128xf32>
    %c0_74 = arith.constant 0 : index
    %c25 = arith.constant 25 : index
    %c0_75 = arith.constant 0 : index
    %81 = vector.load %arg2[%c0_74, %c25, %c0_75] : memref<1x67x128xbf16, #tpu.memory_space<vmem>>, vector<1x40x128xbf16>
    %82 = vector.shape_cast %81 : vector<1x40x128xbf16> to vector<40x128xbf16>
    %c13 = arith.constant 13 : index
    %c0_76 = arith.constant 0 : index
    %c0_77 = arith.constant 0 : index
    %83 = vector.load %arg3[%c13, %c0_76, %c0_77] : memref<16x128x128xbf16, #tpu.memory_space<vmem>>, vector<1x128x128xbf16>
    %84 = vector.shape_cast %83 : vector<1x128x128xbf16> to vector<128x128xbf16>
    %cst_78 = arith.constant dense<0.000000e+00> : vector<40x128xf32>
    %85 = tpu.matmul %82, %84, %cst_78 {dimension_numbers = #tpu.dot_dimension_numbers<[1], [0], [0], [1], [0, 0, 1, 1], [], []>} : vector<40x128xbf16>, vector<128x128xbf16>, vector<40x128xf32> -> vector<40x128xf32>
    %86 = arith.addf %80, %85 : vector<40x128xf32>
    %c0_79 = arith.constant 0 : index
    %c26 = arith.constant 26 : index
    %c0_80 = arith.constant 0 : index
    %87 = vector.load %arg2[%c0_79, %c26, %c0_80] : memref<1x67x128xbf16, #tpu.memory_space<vmem>>, vector<1x40x128xbf16>
    %88 = vector.shape_cast %87 : vector<1x40x128xbf16> to vector<40x128xbf16>
    %c14 = arith.constant 14 : index
    %c0_81 = arith.constant 0 : index
    %c0_82 = arith.constant 0 : index
    %89 = vector.load %arg3[%c14, %c0_81, %c0_82] : memref<16x128x128xbf16, #tpu.memory_space<vmem>>, vector<1x128x128xbf16>
    %90 = vector.shape_cast %89 : vector<1x128x128xbf16> to vector<128x128xbf16>
    %cst_83 = arith.constant dense<0.000000e+00> : vector<40x128xf32>
    %91 = tpu.matmul %88, %90, %cst_83 {dimension_numbers = #tpu.dot_dimension_numbers<[1], [0], [0], [1], [0, 0, 1, 1], [], []>} : vector<40x128xbf16>, vector<128x128xbf16>, vector<40x128xf32> -> vector<40x128xf32>
    %92 = arith.addf %86, %91 : vector<40x128xf32>
    %c0_84 = arith.constant 0 : index
    %c27 = arith.constant 27 : index
    %c0_85 = arith.constant 0 : index
    %93 = vector.load %arg2[%c0_84, %c27, %c0_85] : memref<1x67x128xbf16, #tpu.memory_space<vmem>>, vector<1x40x128xbf16>
    %94 = vector.shape_cast %93 : vector<1x40x128xbf16> to vector<40x128xbf16>
    %c15 = arith.constant 15 : index
    %c0_86 = arith.constant 0 : index
    %c0_87 = arith.constant 0 : index
    %95 = vector.load %arg3[%c15, %c0_86, %c0_87] : memref<16x128x128xbf16, #tpu.memory_space<vmem>>, vector<1x128x128xbf16>
    %96 = vector.shape_cast %95 : vector<1x128x128xbf16> to vector<128x128xbf16>
    %cst_88 = arith.constant dense<0.000000e+00> : vector<40x128xf32>
    %97 = tpu.matmul %94, %96, %cst_88 {dimension_numbers = #tpu.dot_dimension_numbers<[1], [0], [0], [1], [0, 0, 1, 1], [], []>} : vector<40x128xbf16>, vector<128x128xbf16>, vector<40x128xf32> -> vector<40x128xf32>
    %98 = arith.addf %92, %97 : vector<40x128xf32>
    %99 = vector.shape_cast %98 : vector<40x128xf32> to vector<1x40x128xf32>
    %c0_89 = arith.constant 0 : index
    %c0_90 = arith.constant 0 : index
    %c0_91 = arith.constant 0 : index
    %100 = vector.load %arg5[%c0_89, %c0_90, %c0_91] : memref<1x40x128xf32, #tpu.memory_space<vmem>>, vector<1x40x128xf32>
    tpu.vector_store %arg5[%c0_89, %c0_90, %c0_91], %99 {strides = array<i32>} : memref<1x40x128xf32, #tpu.memory_space<vmem>>, vector<1x40x128xf32>,
    return
  }
  func.func @transform_0(%arg0: i32, %arg1: i32) -> (i32, i32, i32) {
    %c0_i32 = arith.constant 0 : i32
    %c0_i32_0 = arith.constant 0 : i32
    %c0_i32_1 = arith.constant 0 : i32
    return %arg0, %c0_i32, %c0_i32_0 : i32, i32, i32
  }
  func.func @transform_1(%arg0: i32, %arg1: i32) -> (i32, i32, i32) {
    %c0_i32 = arith.constant 0 : i32
    %c0_i32_0 = arith.constant 0 : i32
    %c0_i32_1 = arith.constant 0 : i32
    %c0_i32_2 = arith.constant 0 : i32
    return %c0_i32, %c0_i32_0, %c0_i32_1 : i32, i32, i32
  }
  func.func @transform_2(%arg0: i32, %arg1: i32) -> (i32, i32) {
    %c0_i32 = arith.constant 0 : i32
    %c0_i32_0 = arith.constant 0 : i32
    %c0_i32_1 = arith.constant 0 : i32
    return %c0_i32, %c0_i32_0 : i32, i32
  }
  func.func @transform_3(%arg0: i32, %arg1: i32) -> (i32, i32, i32) {
    %c0_i32 = arith.constant 0 : i32
    %c0_i32_0 = arith.constant 0 : i32
    return %arg0, %arg1, %c0_i32 : i32, i32, i32
  }
}

</mosaic_0001>

<bundles_post_ra>
// kernel: _lambda_.8
= control target key start
LH: loop header
LB: loop body
LE: loop exit
PB: predicated region body
PF: predicated region fallthrough
CT: control target
= control target key end

     0   :  { %8 = vsyncpa [#allocation3], 0  ;;  %s2144_s0 = inlined_call_operand.hbm [shape: bf16[2,107,16], index: 0, kind: input, shape index: {}]   ;;  %s2145_s1 = inlined_call_operand.hbm [shape: bf16[4,16,128], index: 1, kind: input, shape index: {}]   ;;  %s2146_s2 = inlined_call_operand.hbm [shape: f32[1,128], index: 2, kind: input, shape index: {}]   ;;  %s2147_s3 = inlined_call_operand.hbm [shape: bf16[2,96,128], index: 3, kind: output, shape index: {}]  }
   0x1   :  { %10 = vsyncpa [#allocation3 + $0x1], 0 }
   0x2   :  { %11 = vsyncpa [#allocation6], 0 }
   0x3   :  { %12 = vsyncpa [#allocation4], 0 }
   0x4   :  { %14 = vsyncpa [#allocation4 + $0x1], 0  ;;  %s1775_s12 = smov 0   ;;  %s1777_s13 = smov 0  }
   0x5   :  { %s1779_s14 = smov 0   ;;  %s1781_s15 = smov 0  }
   0x6   :  { %s1783_s16 = smov 0   ;;  %s1785_s17 = smov 0  }
   0x7 LB: > { %s1202_s18 = sadd.s32 4294967295, %s1745_s17   ;;  %s1203_s19 = sadd.s32 4294967294, %s1745_s17   ;;  %s1745_s17 = sphi %s1785_s17, %s20_s17   ;;  %s1741_s16 = sphi %s1783_s16, %s2169_s16   ;;  %s1737_s15 = sphi %s1781_s15, %s2168_s15   ;;  %s1733_s14 = sphi %s1779_s14, %s2167_s14   ;;  %s1729_s13 = sphi %s1777_s13, %s2166_s13   ;;  %s1725_s12 = sphi %s1775_s12, %s2165_s12  }
   0x8   : > { %p52_p0 = scmp.ne.s32.totalorder %s1729_s13, %s1725_s12  ;;  %p1809_p1 = scmp.eq.s32.totalorder %s1202_s18, 0 }
   0x9   : > { %p1813_p2 = scmp.eq.s32.totalorder %s1202_s18, 1  ;;  %p126_p3 = scmp.eq.s32.totalorder %s1203_s19, 1 }
   0xa   : > { %s2152_s20 = scalar_select %p1809_p1, 1, 0 }
   0xb   : > { %p1819_p4 = por %p1809_p1, %p52_p0  ;;  %p1204_p5 = scmp.ge.s32.totalorder %s1745_s17, 1 }
   0xc   : > { %p1824_p6 = por %p126_p3, %p52_p0  ;;  %p133_p7 = scmp.lt.s32.totalorder %s1745_s17, 3 }
   0xd   : > { %s2154_s22 = scalar_select %p1819_p4, 1, 0 }
   0xe   : > { %s2155_s23 = scalar_select %p1824_p6, 1, 0 }
   0xf   : > { %p1829_p8 = pnand %p1204_p5, %p133_p7  ;;  %s1747_s25 = smov [#allocation5]  }
  0x10   : > { %s145_s26 = sshll.u32 %s1747_s25, 4  ;;  %s1748_s28 = smov [#allocation7]   ;;  %s1833_s26 = int_to_ptr.vmem [resolvable:$true] %s145_s26 }
  0x11   : > { %p1473_p9 = pneg %p1829_p8  ;;  %s159_s29 = sshll.u32 %s1748_s28, 4  ;;  %s1844_s29 = int_to_ptr.vmem [resolvable:$true] %s159_s29 }
  0x12   : > { %s1573_s5 = scalar_lea.hbm %s2145_s1, 512 }
  0x13   : > { %p1840_p11 = pnand %p1473_p9, %p1809_p1  ;;  %p1574_p12 = scmp.ne.s32.totalorder %s2145_s1, %s1573_s5 }
  0x14   : > { %p1580_p5 = scmp.lt.u32.totalorder %s1573_s5, %s2145_s1 }
  0x15   : > { %p1575_p13 = pneg %p1840_p11 }
  0x17   : > { %p1576_p0 = pnand %p1575_p13, %p1574_p12 }
  0x19   : > { %p1577_p3 = pneg %p1576_p0 }
  0x1b   : > { %p1582_p7 = pnand %p1580_p5, %p1577_p3 }
  0x1d   : > { %1585 = shalt.err (!%p1582_p7)
}
  0x1e   : > { %s1586_s10 = scalar_lea.vmem %s1833_s26, 512  ;;  %p1594_p1 = scmp.lt.s32.totalorder %s1833_s26, %s1833_s26 }
  0x1f   : > { %p1587_p9 = scmp.ne.s32.totalorder %s1833_s26, %s1586_s10  ;;  %p1595_p12 = scmp.lt.s32.totalorder %s1586_s10, %s1586_s10 }
  0x21   : > { %p1589_p10 = pnand %p1587_p9, %p1575_p13  ;;  %p1596_p0 = por %p1595_p12, %p1594_p1 }
  0x23   : > { %p1590_p6 = pneg %p1589_p10 }
  0x25   : > { %p1597_p4 = pnand %p1596_p0, %p1590_p6 }
  0x27   : > { %1600 = shalt.err (!%p1597_p4)
}
  0x28   : > { %s1749_s11 = smov 64   ;;  %s1750_s18 = smov 4  }
  0x29   : > { %1476 = dma.hbm_to_vmem [thread:$0]  (!%p1840_p11), %s2145_s1, 512, %s1833_s26, [#allocation6], %s1749_s11, %s1749_s11, %s1750_s18  }
  0x2a   : > { %s1601_s4 = scalar_lea.hbm %s2146_s2, 16 }
  0x2b   : > { %p1602_p1 = scmp.ne.s32.totalorder %s2146_s2, %s1601_s4  ;;  %p1608_p10 = scmp.lt.u32.totalorder %s1601_s4, %s2146_s2 }
  0x2d   : > { %p1604_p4 = pnand %p1602_p1, %p1575_p13 }
  0x2f   : > { %p1605_p6 = pneg %p1604_p4 }
  0x31   : > { %p1610_p3 = pnand %p1608_p10, %p1605_p6 }
  0x33   : > { %1613 = shalt.err (!%p1610_p3)
}
  0x34   : > { %s1614_s26 = scalar_lea.vmem %s1844_s29, 16  ;;  %s1621_s9 = scalar_lea.vmem %s1844_s29, 32 }
  0x35   : > { %p1615_p5 = scmp.ne.s32.totalorder %s1844_s29, %s1614_s26  ;;  %p1622_p12 = scmp.lt.s32.totalorder %s1844_s29, %s1844_s29 }
  0x36   : > { %p1623_p0 = scmp.lt.s32.totalorder %s1621_s9, %s1614_s26 }
  0x37   : > { %p1617_p7 = pnand %p1615_p5, %p1575_p13 }
  0x38   : > { %p1624_p1 = por %p1623_p0, %p1622_p12 }
  0x39   : > { %p1618_p9 = pneg %p1617_p7 }
  0x3b   : > { %p1625_p4 = pnand %p1624_p1, %p1618_p9 }
  0x3d   : > { %1628 = shalt.err (!%p1625_p4)
}
  0x3e   : > { %1479 = dma.hbm_to_vmem [thread:$0]  (!%p1840_p11), %s2146_s2, 16, %s1844_s29, [#allocation6]  }
  0x3f   : > { %s32_s25 = sadd.s32 1, %s1741_s16  ;;  %s39_s28 = sadd.s32 1, %s1733_s14 }
  0x40   : > { %p34_p13 = scmp.ge.s32.totalorder %s32_s25, 2  ;;  %p46_p6 = scmp.ne.s32.totalorder %s1733_s14, %s1729_s13 }
  0x41   : > { %p47_p10 = scmp.eq.s32.totalorder %s1745_s17, 0  ;;  %p1490_p3 = scmp.lt.s32.totalorder %s1745_s17, 2 }
  0x42   : > { %s2171_s25 = smov (%p34_p13, %s32_s25), 0  ;;  %p1912_p7 = por %p1813_p2, %p46_p6 }
  0x43   : > { %p48_p5 = por %p47_p10, %p46_p6  ;;  %s36_s30 = ssub.s32 %s1741_s16, %s2171_s25 }
  0x44   : > { %s2158_s27 = scalar_select %p1912_p7, 1, 0 }
  0x45   : > { %s170_s4 = sand.u32 1, %s1733_s14   ;;  %p37_p9 = scmp.eq.s32.totalorder %s36_s30, 0 }
  0x46   : > { %s1456_s29 = smul.u32 56, %s170_s4  ;;  %p1919_p11 = pnand %p1490_p3, %p48_p5 }
  0x47   : > { %s1924_s6 = scalar_select %p37_p9, %s1733_s14, %s39_s28  }
  0x48   : > { %s1457_s7 = smul.u32 896, %s1741_s16  ;;  %s174_s8 = scalar_lea.vmem [#allocation2], %s1456_s29 }
  0x49   : > { %s181_s26 = sshll.u32 %s174_s8, 4  ;;  %s1934_s19 = scalar_lea.sflag [#allocation3], %s170_s4  ;;  %s1932_s26 = int_to_ptr.vmem [resolvable:$true] %s181_s26 }
  0x4a   : > { %s1930_s10 = scalar_lea.hbm %s2144_s0, %s1457_s7  ;;  %p1631_p12 = pneg %p1919_p11 }
  0x4b   : > { %s1629_s30 = scalar_lea.hbm %s1930_s10, 896  ;;  %s1634_s7 = scalar_lea.hbm %s2144_s0, 1792 }
  0x4c   : > { %p1630_p2 = scmp.ne.s32.totalorder %s1930_s10, %s1629_s30  ;;  %p1635_p4 = scmp.lt.u32.totalorder %s1930_s10, %s2144_s0 }
  0x4d   : > { %p1636_p13 = scmp.lt.u32.totalorder %s1634_s7, %s1629_s30  ;;  %p1638_p10 = scmp.lt.u32.totalorder %s1629_s30, %s1930_s10 }
  0x4e   : > { %p1632_p0 = pnand %p1631_p12, %p1630_p2 }
  0x4f   : > { %p1637_p6 = por %p1636_p13, %p1635_p4 }
  0x50   : > { %p1633_p1 = pneg %p1632_p0 }
  0x51   : > { %p1639_p3 = por %p1638_p10, %p1637_p6 }
  0x53   : > { %p1640_p5 = pnand %p1639_p3, %p1633_p1 }
  0x55   : > { %1643 = shalt.err (!%p1640_p5)
}
  0x56   : > { %s1644_s4 = scalar_lea.vmem %s1932_s26, 896  ;;  %s1751_s9 = smov [#allocation2]  }
  0x57   : > { %p1645_p9 = scmp.ne.s32.totalorder %s1932_s26, %s1644_s4  ;;  %s1649_s28 = sshll.u32 %s1751_s9, 4  ;;  %s1650_s28 = int_to_ptr.vmem [resolvable:$false] %s1649_s28 }
  0x58   : > { %s1651_s29 = scalar_lea.vmem %s1650_s28, 1792  ;;  %p1652_p7 = scmp.lt.s32.totalorder %s1932_s26, %s1650_s28 }
  0x59   : > { %p1647_p2 = pnand %p1645_p9, %p1631_p12  ;;  %p1653_p4 = scmp.lt.s32.totalorder %s1651_s29, %s1644_s4 }
  0x5b   : > { %p1648_p0 = pneg %p1647_p2  ;;  %p1654_p13 = por %p1653_p4, %p1652_p7 }
  0x5d   : > { %p1655_p6 = pnand %p1654_p13, %p1648_p0 }
  0x5f   : > { %1658 = shalt.err (!%p1655_p6)
}
  0x60   : > { %1483 = dma.hbm_to_vmem [thread:$0]  (!%p1919_p11), %s1930_s10, 896, %s1932_s26, %s1934_s19, %s1749_s11, %s1749_s11, %s1750_s18  }
  0x61   : > { %193 = sbr.rel (%p1829_p8) target bundleno = 392 (0x188), region = 32  ;;  %s1968_s30 = sand.u32 (!%p1829_p8), 1, %s1729_s13  }
  0x62   : > { %s1458_s7 = smul.u32 (!%p1829_p8), 56, %s1968_s30  ;;  %s196_s8 = scalar_lea.sflag (!%p1829_p8), [#allocation3], %s1968_s30 }
  0x63   : > { %p2160_p7 = scmp.ne.s32.totalorder (!%p1829_p8), %s2154_s22, 0 }
  0x64   : > { %s1972_s21 = scalar_lea.vmem (!%p1829_p8), [#allocation2], %s1458_s7 }
  0x68   : > { %1712 = dma.done.wait (%p2160_p7), %s196_s8, 896  }
  0x69   : > { %1714 = vsyncadd (%p2160_p7), %s196_s8, 4294966400  ;;  %p2161_p11 = scmp.ne.s32.totalorder %s2152_s20, 0 }
  0x6b   : > { %1716 = dma.done.wait (%p2161_p11), [#allocation6], 528  }
  0x6c   : > { %1718 = vsyncadd (%p2161_p11), [#allocation6], 4294966768  ;;  %v1548_v0 = vld [vmem:[#allocation5] sm:$0xff]   ;;  %v1549_v1 = vld [vmem:[#allocation5 + $0x10] sm:$0xff]   ;;  %vm289_vm0 = vcmask 130048   ;;  %vm669_vm1 = vcmask 1046528  }
  0x6d   : > { %1352 = vmatprep.subr.bf16.mxu1 %v1548_v0  ;;  %v1550_v2 = vld [vmem:[%s1972_s21] sm:$0xff]   ;;  %1380 = vmatprep.subr.bf16.mxu0 %v1549_v1  ;;  %v1552_v4 = vld [vmem:[%s1972_s21 + $0xc] sm:$0xff]   ;;  %v1990_v10 = vld [vmem:[%s1972_s21 + $0x14] sm:$0xff]   ;;  %vm450_vm2 = vsmask.f32 7424  ;;  %s1459_s20 = smul.u32 48, %s1968_s30 }
  0x6e   : > { %1353 = vmatpush3.bf16.msra.mxu1 %v1548_v0  ;;  %1381 = vmatpush3.bf16.msra.mxu0 %v1549_v1  ;;  %v1551_v3 = vld [vmem:[%s1972_s21 + $0x4] sm:$0xfe]   ;;  %v671_v7 = vrot.slane %v1552_v4, 1  ;;  %v673_v13 = vrot.slane %v1990_v10, 1  ;;  %v1557_v14 = vld [vmem:[%s1972_s21 + $0x10] sm:$0xff]   ;;  %v1996_v15 = vld [vmem:[%s1972_s21 + $0x1c] sm:$0xff]  }
  0x6f   : > { %1354 = vmatprep.mubr.msk.bf16.mxu1 %vm289_vm0, %v1550_v2  ;;  %v1553_v5 = vld [vmem:[%s1972_s21 + $0x8] sm:$0xff]   ;;  %v670_v6 = vrot.slane %v1551_v3, 1  ;;  %v1554_v8 = vld [vmem:[#allocation5 + $0x8] sm:$0xff]   ;;  %v809_v11 = vshrl.u32 %v1551_v3, 16  ;;  %v812_v16 = vshll.u32 %v1551_v3, 16  ;;  %v675_v20 = vrot.slane %v1996_v15, 1 }
  0x70   : > { %1366 = vmatprep.subr.bf16.mxu1 %v1554_v8  ;;  %v1556_v12 = vld [vmem:[#allocation5 + $0x18] sm:$0xff]   ;;  %v674_v17 = vsel %vm669_vm1, %v671_v7, %v673_v13  ;;  %v1559_v18 = vld [vmem:[%s1972_s21 + $0x18] sm:$0xff]   ;;  %v1561_v22 = vld [vmem:[%s1972_s21 + $0x20] sm:$0xff]   ;;  %v817_v23 = vshrl.u32 %v1552_v4, 16  ;;  %vm807_vm3 = vsmask.f32 6400 }
  0x71   : > { %1355 = vmatmul.mubr.msk.bf16.vlgmr.msra.gmra.mrb[0].mxu1 %vm289_vm0, %v1553_v5  ;;  %v672_v9 = vsel %vm669_vm1, %v670_v6, %v671_v7  ;;  %1394 = vmatprep.subr.bf16.mxu0 %v1556_v12  ;;  %v811_v19 = vrot.slane %v809_v11, 1  ;;  %v2004_v21 = vld [vmem:[%s1972_s21 + $0x24] sm:$0xff]   ;;  %v676_v24 = vsel %vm669_vm1, %v673_v13, %v675_v20  ;;  %v2011_v26 = vld [vmem:[%s1972_s21 + $0x2c] sm:$0xff]   ;;  %v1564_v27 = vld [vmem:[%s1972_s21 + $0x34] ss:$0 sps:$4 sm:$0x11]  }
  0x72   : > { %1382 = vmatprep.mubr.msk.bf16.mxu0 %vm289_vm0, %v672_v9  ;;  %1367 = vmatpush3.bf16.msra.mxu1 %v1554_v8  ;;  %v677_v25 = vrot.slane %v2004_v21, 1  ;;  %v814_v28 = vrot.slane %v812_v16, 2  ;;  %v679_v29 = vrot.slane %v2011_v26, 1  ;;  %v1563_v30 = vld [vmem:[%s1972_s21 + $0x28] sm:$0xff]   ;;  %v1565_v31 = vld [vmem:[%s1972_s21] sm:$0xff]   ;;  %v819_v34 = vrot.slane %v817_v23, 1 }
  0x73   : > { %1358 = vmatprep.mubr.msk.bf16.mxu1 %vm289_vm0, %v1557_v14  ;;  %1383 = vmatmul.mubr.msk.bf16.vlgmr.msra.gmra.mrb[0].mxu0 %vm289_vm0, %v674_v17  ;;  %v1566_v33 = vld [vmem:[%s1972_s21 + $0x8] sm:$0xff]   ;;  %v452_v36 = vshrl.u32 %v1565_v31, 16  ;;  %v454_v37 = vshll.u32 %v1565_v31, 16  ;;  %v820_v38 = vshll.u32 %v1552_v4, 16  ;;  %v1567_v39 = vld [vmem:[%s1972_s21 + $0x10] sm:$0xff]   ;;  %v681_v40 = vrot.slane %v1564_v27, 1 }
  0x74   : > { %1395 = vmatpush3.bf16.msra.mxu0 %v1556_v12  ;;  %1386 = vmatprep.mubr.msk.bf16.mxu0 %vm289_vm0, %v676_v24  ;;  %v678_v32 = vsel %vm669_vm1, %v675_v20, %v677_v25  ;;  %v680_v35 = vsel %vm669_vm1, %v677_v25, %v679_v29  ;;  %v459_v41 = vshll.u32 %v1566_v33, 16  ;;  %v463_v42 = vshrl.u32 %v1566_v33, 16  ;;  %v1568_v43 = vld [vmem:[%s1972_s21 + $0x18] sm:$0xff]   ;;  %v1569_v59 = vld [vmem:[%s1972_s21 + $0x20] sm:$0xff]   ;;  %v1570_v63 = vld [vmem:[%s1972_s21 + $0x28] sm:$0xff]   ;;  %s2076_s22 = scalar_lea.vmem [#allocation8], %s1459_s20 }
  0x75   : > { %v456_v44 = vrot.slane %v454_v37, 1  ;;  %v822_v45 = vrot.slane %v820_v38, 2  ;;  %v467_v46 = vshll.u32 %v1567_v39, 16  ;;  %v826_v47 = vshrl.u32 %v1990_v10, 16  ;;  %s1099_s24 = sshll.u32 %s2076_s22, 4  ;;  %s1460_s11 = smul.u32 768, %s1737_s15  ;;  %s2088_s24 = int_to_ptr.vmem [resolvable:$true] %s1099_s24 }
  0x76   : > { %v461_v48 = vrot.slane %v459_v41, 1  ;;  %v829_v49 = vshll.u32 %v1990_v10, 16  ;;  %v471_v50 = vshrl.u32 %v1567_v39, 16  ;;  %v475_v51 = vshll.u32 %v1568_v43, 16  ;;  %s1084_s15 = scalar_lea.sflag [#allocation4], %s1968_s30  ;;  %s1659_s10 = scalar_lea.vmem %s2088_s24, 768 }
  0x77   : > { %v457_v52 = vor.u32 %v456_v44, %v452_v36  ;;  %v815_v53 = vor.u32 %v814_v28, %v811_v19  ;;  %v823_v54 = vor.u32 %v822_v45, %v819_v34  ;;  %v469_v55 = vrot.slane %v467_v46, 1  ;;  %v1571_v20 = vld [vmem:[%s1972_s21 + $0x30] ss:$0 sps:$4 sm:$0x11]   ;;  %s2093_s26 = scalar_lea.hbm %s2147_s3, %s1460_s11  ;;  %p1660_p8 = scmp.ne.s32.totalorder %s2088_s24, %s1659_s10 }
  0x78   : > { %v465_v56 = vor.u32 %v463_v42, %v461_v48  ;;  %v835_v57 = vshrl.u32 %v1996_v15, 16  ;;  %v838_v58 = vshll.u32 %v1996_v15, 16  ;;  %v477_v62 = vrot.slane %v475_v51, 1  ;;  %v1572_v28 = vld [vmem:[%s1972_s21 + $0x34] ss:$0 sps:$4 sm:$0x33]  }
  0x79   : > { %1359 = vmatmul.mubr.msk.bf16.gmra.mrb[4].mxu1 %vm289_vm0, %v1559_v18  ;;  %v462_v60 = vsel %vm450_vm2, %v457_v52, %v461_v48  ;;  %v473_v61 = vor.u32 %v471_v50, %v469_v55  ;;  %v682_v0 = vsel %vm669_vm1, %v679_v29, %v681_v40  ;;  %v828_v1 = vrot.slane %v826_v47, 1  ;;  %v2065_v47 = vld [vmem:[#allocation7] ss:$0 sm:$0xff]  ;;  %p2162_p12 = scmp.ne.s32.totalorder %s2158_s27, 0  ;;  %s1752_s19 = smov [#allocation8]  }
  0x7a   : > { %1362 = vmatprep.mubr.msk.bf16.mxu1 %vm289_vm0, %v1561_v22  ;;  %v831_v2 = vrot.slane %v829_v49, 2  ;;  %v824_v3 = vsel %vm807_vm3, %v815_v53, %v823_v54  ;;  %v837_v4 = vrot.slane %v835_v57, 1  ;;  %v840_v5 = vrot.slane %v838_v58, 2  ;;  %s1663_s4 = sshll.u32 %s1752_s19, 4  ;;  %s1664_s4 = int_to_ptr.vmem [resolvable:$false] %s1663_s4 }
  0x7b   : > { %1387 = vmatmul.mubr.msk.bf16.gmra.mrb[4].mxu0 %vm289_vm0, %v678_v32  ;;  %v483_v6 = vshll.u32 %v1569_v59, 16  ;;  %v470_v7 = vsel %vm450_vm2, %v465_v56, %v469_v55  ;;  %v479_v8 = vshrl.u32 %v1568_v43, 16  ;;  %v478_v9 = vsel %vm450_vm2, %v473_v61, %v477_v62  ;;  %p1661_p1 = pnand %p1660_p8, %p2162_p12  ;;  %s1665_s9 = scalar_lea.vmem %s1664_s4, 1536 }
  0x7c   : > { %1390 = vmatprep.mubr.msk.bf16.mxu0 %vm289_vm0, %v680_v35  ;;  %v487_v10 = vshrl.u32 %v1569_v59, 16  ;;  %v491_v11 = vshll.u32 %v1570_v63, 16  ;;  %v832_v12 = vor.u32 %v831_v2, %v828_v1  ;;  %v844_v13 = vshrl.u32 %v2004_v21, 16  ;;  %p1666_p3 = scmp.lt.s32.totalorder %s2088_s24, %s1664_s4  ;;  %p1667_p5 = scmp.lt.s32.totalorder %s1665_s9, %s1659_s10 }
  0x7d   : > { %v847_v14 = vshll.u32 %v2004_v21, 16  ;;  %v841_v15 = vor.u32 %v840_v5, %v837_v4  ;;  %v485_v16 = vrot.slane %v483_v6, 1  ;;  %v853_v17 = vshrl.u32 %v2011_v26, 16  ;;  %p1662_p10 = pneg %p1661_p1 }
  0x7e   : > { %v856_v18 = vshll.u32 %v2011_v26, 16  ;;  %v481_v19 = vor.u32 %v479_v8, %v477_v62  ;;  %v493_v23 = vrot.slane %v491_v11, 1  ;;  %v833_v24 = vsel %vm807_vm3, %v823_v54, %v832_v12  ;;  %p1668_p9 = por %p1667_p5, %p1666_p3 }
  0x7f   : > { %v489_v22 = vor.u32 %v487_v10, %v485_v16  ;;  %v846_v25 = vrot.slane %v844_v13, 1  ;;  %v849_v27 = vrot.slane %v847_v14, 2  ;;  %v842_v21 = vsel %vm807_vm3, %v832_v12, %v841_v15 }
  0x80   : > { %v855_v29 = vrot.slane %v853_v17, 1  ;;  %v486_v31 = vsel %vm450_vm2, %v481_v19, %v485_v16  ;;  %v495_v32 = vshrl.u32 %v1570_v63, 16  ;;  %v499_v33 = vshll.u32 %v1571_v20, 16  ;;  %p1669_p2 = pnand %p1668_p9, %p1662_p10 }
  0x81   : > { %1363 = vmatmul.mubr.msk.bf16.gmra.mrb[8].mxu1 %vm289_vm0, %v1563_v30  ;;  %v858_v30 = vrot.slane %v856_v18, 2  ;;  %v494_v26 = vsel %vm450_vm2, %v489_v22, %v493_v23  ;;  %v850_v34 = vor.u32 %v849_v27, %v846_v25  ;;  %v862_v35 = vshrl.u32 %v1572_v28, 16 }
  0x82   : > { %1368 = vmatprep.mubr.msk.bf16.mxu1 %vm289_vm0, %v462_v60  ;;  %v865_v36 = vshll.u32 %v1572_v28, 16  ;;  %v497_v38 = vor.u32 %v495_v32, %v493_v23  ;;  %v501_v39 = vrot.slane %v499_v33, 1 }
  0x83   : > { %1391 = vmatmul.mubr.msk.bf16.gmra.mrb[8].mxu0 %vm289_vm0, %v682_v0  ;;  %v859_v37 = vor.u32 %v858_v30, %v855_v29  ;;  %v851_v40 = vsel %vm807_vm3, %v841_v15, %v850_v34  ;;  %v864_v41 = vrot.slane %v862_v35, 1 }
  0x84   : > { %1396 = vmatprep.mubr.msk.bf16.mxu0 %vm289_vm0, %v824_v3  ;;  %v867_v42 = vrot.slane %v865_v36, 2  ;;  %v502_v44 = vsel %vm450_vm2, %v497_v38, %v501_v39 }
  0x85   : > { %v860_v43 = vsel %vm807_vm3, %v850_v34, %v859_v37 }
  0x86   : > { %v868_v45 = vor.u32 %v867_v42, %v864_v41 }
  0x88   : > { %v869_v46 = vsel %vm807_vm3, %v859_v37, %v868_v45 }
  0x89   : > { %1369 = vmatmul.mubr.msk.bf16.vlgmr.msra.gmra.mrb[0].mxu1 %vm289_vm0, %v470_v7 }
  0x8a   : > { %1372 = vmatprep.mubr.msk.bf16.mxu1 %vm289_vm0, %v478_v9 }
  0x8b   : > { %1397 = vmatmul.mubr.msk.bf16.vlgmr.msra.gmra.mrb[0].mxu0 %vm289_vm0, %v833_v24 }
  0x8c   : > { %1400 = vmatprep.mubr.msk.bf16.mxu0 %vm289_vm0, %v842_v21 }
  0x91   : > { %1373 = vmatmul.mubr.msk.bf16.gmra.mrb[4].mxu1 %vm289_vm0, %v486_v31 }
  0x92   : > { %1376 = vmatprep.mubr.msk.bf16.mxu1 %vm289_vm0, %v494_v26 }
  0x93   : > { %1401 = vmatmul.mubr.msk.bf16.gmra.mrb[4].mxu0 %vm289_vm0, %v851_v40 }
  0x94   : > { %1404 = vmatprep.mubr.msk.bf16.mxu0 %vm289_vm0, %v860_v43 }
  0x99   : > { %1377 = vmatmul.mubr.msk.bf16.gmra.mrb[8].mxu1 %vm289_vm0, %v502_v44 }
  0x9b   : > { %1405 = vmatmul.mubr.msk.bf16.gmra.mrb[8].mxu0 %vm289_vm0, %v869_v46 }
 0x15c   : > { %v1370_v48 = vpop.f32.mrb[0].mxu1 }
 0x15d   : > { %v561_v49 = vpop.f32.mrb[1].mxu1  ;;  %v1408_v51 = vadd.f32 %v1370_v48, %v2065_v47 }
 0x15e   : > { %v1371_v50 = vpop.f32.mrb[2].mxu1  ;;  %v1410_v53 = vadd.f32 %v2065_v47, %v561_v49  ;;  %v1398_v55 = vpop.f32.mrb[0].mxu0 }
 0x15f   : > { %v564_v52 = vpop.f32.mrb[3].mxu1  ;;  %v1412_v54 = vadd.f32 %v1371_v50, %v2065_v47  ;;  %v1409_v57 = vadd.f32 %v1408_v51, %v1398_v55  ;;  %v928_v58 = vpop.f32.mrb[1].mxu0 }
 0x160   : > { %v1414_v56 = vadd.f32 %v2065_v47, %v564_v52  ;;  %v1411_v59 = vadd.f32 %v1410_v53, %v928_v58  ;;  %v1399_v60 = vpop.f32.mrb[2].mxu0 }
 0x161   : > { %v1001_v62 = vmul.f32 0.2, %v1409_v57  ;;  %v1413_v63 = vadd.f32 %v1412_v54, %v1399_v60  ;;  %v931_v0 = vpop.f32.mrb[3].mxu0  ;;  %vm989_vm4 = vcmp.ge.f32.partialorder %v1409_v57, 0.0 }
 0x162   : > { %v999_v2 = vmul.f32 0.2, %v1411_v59  ;;  %v1415_v3 = vadd.f32 %v1414_v56, %v931_v0  ;;  %vm987_vm5 = vcmp.ge.f32.partialorder %v1411_v59, 0.0 }
 0x163   : > { %vm990_vm6 = vcmp.ge.f32.partialorder %v1413_v63, 0.0  ;;  %v1002_v5 = vmul.f32 0.2, %v1413_v63  ;;  %v1013_v10 = vsel %vm989_vm4, %v1409_v57, %v1001_v62 }
 0x164   : > { %v1374_v61 = vpop.f32.mrb[4].mxu1  ;;  %vm988_vm7 = vcmp.ge.f32.partialorder %v1415_v3, 0.0  ;;  %v1000_v8 = vmul.f32 0.2, %v1415_v3  ;;  %v1011_v13 = vsel %vm987_vm5, %v1411_v59, %v999_v2 }
 0x165   : > { %v577_v1 = vpop.f32.mrb[5].mxu1  ;;  %v1416_v6 = vadd.f32 %v1374_v61, %v2065_v47  ;;  %v1014_v11 = vsel %vm990_vm6, %v1413_v63, %v1002_v5 }
 0x166   : > { %v1375_v4 = vpop.f32.mrb[6].mxu1  ;;  %v1418_v9 = vadd.f32 %v2065_v47, %v577_v1  ;;  %v1297_v14 = vpack.c.bf16 %v1014_v11, %v1013_v10  ;;  %v1012_v15 = vsel %vm988_vm7, %v1415_v3, %v1000_v8  ;;  %v1402_v16 = vpop.f32.mrb[4].mxu0 }
 0x167   : > { %v580_v7 = vpop.f32.mrb[7].mxu1  ;;  %v1420_v12 = vadd.f32 %v1375_v4, %v2065_v47  ;;  %v1292_v18 = vpack.c.bf16 %v1012_v15, %v1011_v13  ;;  %v1417_v19 = vadd.f32 %v1416_v6, %v1402_v16  ;;  %v944_v20 = vpop.f32.mrb[5].mxu0 }
 0x168   : > { %v1422_v17 = vadd.f32 %v2065_v47, %v580_v7  ;;  %1319 = vst [vmem:[%s2076_s22 + $0x8] sm:$0xff] %v1297_v14   ;;  %v1419_v22 = vadd.f32 %v1418_v9, %v944_v20  ;;  %v1403_v23 = vpop.f32.mrb[6].mxu0 }
 0x169   : > { %1293 = vst [vmem:[%s2076_s22] sm:$0xff] %v1292_v18   ;;  %v1005_v25 = vmul.f32 0.2, %v1417_v19  ;;  %v1421_v27 = vadd.f32 %v1420_v12, %v1403_v23  ;;  %v947_v28 = vpop.f32.mrb[7].mxu0  ;;  %vm993_vm8 = vcmp.ge.f32.partialorder %v1417_v19, 0.0 }
 0x16a   : > { %v1003_v29 = vmul.f32 0.2, %v1419_v22  ;;  %v1423_v30 = vadd.f32 %v1422_v17, %v947_v28  ;;  %vm991_vm9 = vcmp.ge.f32.partialorder %v1419_v22, 0.0 }
 0x16b   : > { %vm994_vm10 = vcmp.ge.f32.partialorder %v1421_v27, 0.0  ;;  %v1006_v32 = vmul.f32 0.2, %v1421_v27  ;;  %v1017_v36 = vsel %vm993_vm8, %v1417_v19, %v1005_v25 }
 0x16c   : > { %v1378_v24 = vpop.f32.mrb[8].mxu1  ;;  %vm992_vm11 = vcmp.ge.f32.partialorder %v1423_v30, 0.0  ;;  %v1004_v34 = vmul.f32 0.2, %v1423_v30  ;;  %v1015_v39 = vsel %vm991_vm9, %v1419_v22, %v1003_v29 }
 0x16d   : > { %v593_v21 = vpop.f32.mrb[9].mxu1  ;;  %v1424_v33 = vadd.f32 %v1378_v24, %v2065_v47  ;;  %v1018_v37 = vsel %vm994_vm10, %v1421_v27, %v1006_v32 }
 0x16e   : > { %v1379_v31 = vpop.f32.mrb[10].mxu1  ;;  %v1426_v35 = vadd.f32 %v2065_v47, %v593_v21  ;;  %v1307_v40 = vpack.c.bf16 %v1018_v37, %v1017_v36  ;;  %v1016_v41 = vsel %vm992_vm11, %v1423_v30, %v1004_v34  ;;  %v1406_v42 = vpop.f32.mrb[8].mxu0 }
 0x16f   : > { %v596_v26 = vpop.f32.mrb[11].mxu1  ;;  %v1428_v38 = vadd.f32 %v1379_v31, %v2065_v47  ;;  %v1302_v44 = vpack.c.bf16 %v1016_v41, %v1015_v39  ;;  %v1425_v45 = vadd.f32 %v1424_v33, %v1406_v42  ;;  %v960_v46 = vpop.f32.mrb[9].mxu0 }
 0x170   : > { %v1430_v43 = vadd.f32 %v2065_v47, %v596_v26  ;;  %1321 = vst [vmem:[%s2076_s22 + $0x18] sm:$0xff] %v1307_v40   ;;  %v1427_v48 = vadd.f32 %v1426_v35, %v960_v46  ;;  %v1407_v49 = vpop.f32.mrb[10].mxu0 }
 0x171   : > { %1320 = vst [vmem:[%s2076_s22 + $0x10] sm:$0xff] %v1302_v44   ;;  %v1009_v50 = vmul.f32 0.2, %v1425_v45  ;;  %v1429_v51 = vadd.f32 %v1428_v38, %v1407_v49  ;;  %v963_v52 = vpop.f32.mrb[11].mxu0  ;;  %vm997_vm12 = vcmp.ge.f32.partialorder %v1425_v45, 0.0 }
 0x172   : > { %v1007_v53 = vmul.f32 0.2, %v1427_v48  ;;  %v1431_v54 = vadd.f32 %v1430_v43, %v963_v52  ;;  %vm995_vm13 = vcmp.ge.f32.partialorder %v1427_v48, 0.0 }
 0x173   : > { %vm998_vm14 = vcmp.ge.f32.partialorder %v1429_v51, 0.0  ;;  %v1010_v47 = vmul.f32 0.2, %v1429_v51  ;;  %v1021_v56 = vsel %vm997_vm12, %v1425_v45, %v1009_v50 }
 0x174   : > { %vm996_vm15 = vcmp.ge.f32.partialorder %v1431_v54, 0.0  ;;  %v1008_v55 = vmul.f32 0.2, %v1431_v54  ;;  %v1019_v58 = vsel %vm995_vm13, %v1427_v48, %v1007_v53 }
 0x175   : > { %v1022_v57 = vsel %vm998_vm14, %v1429_v51, %v1010_v47 }
 0x176   : > { %v1317_v59 = vpack.c.bf16 %v1022_v57, %v1021_v56  ;;  %v1020_v60 = vsel %vm996_vm15, %v1431_v54, %v1008_v55 }
 0x177   : > { %v1312_v61 = vpack.c.bf16 %v1020_v60, %v1019_v58 }
 0x178   : > { %1323 = vst [vmem:[%s2076_s22 + $0x28] sm:$0xff] %v1317_v59  }
 0x179   : > { %1322 = vst [vmem:[%s2076_s22 + $0x20] sm:$0xff] %v1312_v61  }
 0x17a   : > { %1672 = shalt.err (!%p1669_p2)
}
 0x17b   : > { %s1673_s28 = scalar_lea.hbm %s2093_s26, 768  ;;  %s1677_s8 = scalar_lea.hbm %s2147_s3, 1536 }
 0x17c   : > { %p1674_p0 = scmp.ne.s32.totalorder %s2093_s26, %s1673_s28  ;;  %p1678_p6 = scmp.lt.u32.totalorder %s2093_s26, %s2147_s3 }
 0x17d   : > { %p1679_p7 = scmp.lt.u32.totalorder %s1677_s8, %s1673_s28  ;;  %p1681_p8 = scmp.lt.u32.totalorder %s1673_s28, %s2093_s26 }
 0x17e   : > { %p1675_p4 = pnand %p1674_p0, %p2162_p12 }
 0x17f   : > { %p1680_p11 = por %p1679_p7, %p1678_p6 }
 0x180   : > { %p1676_p13 = pneg %p1675_p4 }
 0x181   : > { %p1682_p1 = por %p1681_p8, %p1680_p11 }
 0x183   : > { %p1683_p10 = pnand %p1682_p1, %p1676_p13 }
 0x185   : > { %1686 = shalt.err (!%p1683_p10)
}
 0x186   : > { %s1753_s22 = smov 64   ;;  %s1754_s11 = smov 4  }
 0x187   : > { %1471 = dma.vmem_to_hbm [thread:$0]  (%p2162_p12), %s2088_s24, 768, %s2093_s26, %s1084_s15, %s1753_s22, %s1753_s22, %s1754_s11  }
 0x188 PF: > { %s1114_s18 = sand.u32 1, %s1725_s12   ;;  %p2163_p3 = scmp.ne.s32.totalorder %s2155_s23, 0 }
 0x189   : > { %p2164_p5 = scmp.ge.s32.totalorder %s1745_s17, 2  ;;  %s1115_s5 = scalar_lea.sflag [#allocation4], %s1114_s18 }
 0x18b   : > { %p1485_p9 = pnand %p2164_p5, %p2163_p3 }
 0x18d   : > { %1720 = dma.done.wait (!%p1485_p9), %s1115_s5, 768  }
 0x18e   : > { %1722 = vsyncadd (!%p1485_p9), %s1115_s5, 4294966528  ;;  %s20_s17 = sadd.s32 1, %s1745_s17   ;;  %s2165_s12 = smov %s1729_s13 }
 0x18f   : > { %p17_p2 = scmp.ge.s32.totalorder %s20_s17, 4   ;;  %s2166_s13 = smov %s1733_s14 }
 0x190   : > { %s2167_s14 = smov %s1924_s6  ;;  %s2168_s15 = smov %s1741_s16 }
 0x191   : > { %s2169_s16 = smov %s2171_s25  ;;  %19 = sbr.rel (!%p17_p2) target bundleno = 7 (0x7), region = 88 }
 0x198   :  { %1120 = vsyncpa [#allocation3], 1 }
 0x199   :  { %1122 = vsyncpa [#allocation3 + $0x1], 1 }
 0x19a   :  { %1123 = vsyncpa [#allocation6], 1 }
 0x19b   :  { %1124 = vsyncpa [#allocation4], 1 }
 0x19c   :  { %1126 = vsyncpa [#allocation4 + $0x1], 1 }

// kernel: _lambda_.10
= control target key start
LH: loop header
LB: loop body
LE: loop exit
PB: predicated region body
PF: predicated region fallthrough
CT: control target
= control target key end

     0   :  { %8 = vsyncpa [#allocation3], 0  ;;  %s1007_s0 = inlined_call_operand.hbm [shape: bf16[2,32,128], index: 0, kind: input, shape index: {}]   ;;  %s1008_s1 = inlined_call_operand.hbm [shape: f32[1,128], index: 1, kind: input, shape index: {}]   ;;  %s1009_s2 = inlined_call_operand.hbm [shape: f32[1,128], index: 2, kind: input, shape index: {}]   ;;  %s1010_s3 = inlined_call_operand.hbm [shape: bf16[2,32,128], index: 3, kind: output, shape index: {}]  }
   0x1   :  { %10 = vsyncpa [#allocation3 + $0x1], 0 }
   0x2   :  { %11 = vsyncpa [#allocation6], 0 }
   0x3   :  { %12 = vsyncpa [#allocation4], 0 }
   0x4   :  { %14 = vsyncpa [#allocation4 + $0x1], 0  ;;  %s758_s12 = smov 0   ;;  %s760_s13 = smov 0  }
   0x5   :  { %s762_s14 = smov 0   ;;  %s764_s15 = smov 0  }
   0x6   :  { %s766_s16 = smov 0   ;;  %s768_s17 = smov 0  }
   0x7 LB: > { %s418_s18 = sadd.s32 4294967295, %s728_s17   ;;  %s419_s19 = sadd.s32 4294967294, %s728_s17   ;;  %s728_s17 = sphi %s768_s17, %s20_s17   ;;  %s724_s16 = sphi %s766_s16, %s1036_s16   ;;  %s720_s15 = sphi %s764_s15, %s1035_s15   ;;  %s716_s14 = sphi %s762_s14, %s1034_s14   ;;  %s712_s13 = sphi %s760_s13, %s1033_s13   ;;  %s708_s12 = sphi %s758_s12, %s1032_s12  }
   0x8   : > { %s41_s20 = sadd.s32 1, %s716_s14  ;;  %p48_p0 = scmp.ne.s32.totalorder %s716_s14, %s712_s13 }
   0x9   : > { %p49_p1 = scmp.eq.s32.totalorder %s728_s17, 0  ;;  %p54_p2 = scmp.ne.s32.totalorder %s712_s13, %s708_s12 }
   0xa   : > { %p796_p3 = scmp.eq.s32.totalorder %s418_s18, 0  ;;  %p122_p4 = scmp.eq.s32.totalorder %s418_s18, 1 }
   0xb   : > { %p800_p5 = por %p49_p1, %p48_p0  ;;  %p128_p6 = scmp.eq.s32.totalorder %s419_s19, 1 }
   0xc   : > { %s1017_s21 = scalar_select %p796_p3, 1, 0 }
   0xd   : > { %p806_p7 = por %p796_p3, %p54_p2  ;;  %p810_p8 = por %p122_p4, %p48_p0 }
   0xe   : > { %p814_p9 = por %p128_p6, %p54_p2  ;;  %p420_p10 = scmp.ge.s32.totalorder %s728_s17, 1 }
   0xf   : > { %s1019_s23 = scalar_select %p806_p7, 1, 0 }
  0x10   : > { %s1020_s24 = scalar_select %p810_p8, 1, 0 }
  0x11   : > { %s1021_s25 = scalar_select %p814_p9, 1, 0 }
  0x12   : > { %p135_p11 = scmp.lt.s32.totalorder %s728_s17, 3  ;;  %s730_s27 = smov [#allocation5]  }
  0x13   : > { %s148_s28 = sshll.u32 %s730_s27, 4  ;;  %p498_p1 = scmp.lt.s32.totalorder %s728_s17, 2  ;;  %s149_s28 = int_to_ptr.vmem [resolvable:$true] %s148_s28 }
  0x14   : > { %p821_p13 = pnand %p420_p10, %p135_p11  ;;  %s731_s30 = smov [#allocation7]  }
  0x15   : > { %p830_p4 = pnand %p498_p1, %p800_p5  ;;  %s159_s4 = sshll.u32 %s731_s30, 4  ;;  %s840_s4 = int_to_ptr.vmem [resolvable:$true] %s159_s4 }
  0x16   : > { %s1022_s26 = scalar_select %p821_p13, 1, 0 }
  0x17   : > { %p481_p0 = pneg %p821_p13  ;;  %s556_s8 = scalar_lea.hbm %s1008_s1, 16 }
  0x18   : > { %s1023_s29 = scalar_select %p830_p4, 1, 0 }
  0x19   : > { %p836_p2 = pnand %p481_p0, %p796_p3  ;;  %p557_p5 = scmp.ne.s32.totalorder %s1008_s1, %s556_s8 }
  0x1a   : > { %p563_p1 = scmp.lt.u32.totalorder %s556_s8, %s1008_s1 }
  0x1b   : > { %p558_p6 = pneg %p836_p2 }
  0x1d   : > { %p559_p10 = pnand %p558_p6, %p557_p5 }
  0x1f   : > { %p560_p11 = pneg %p559_p10 }
  0x21   : > { %p565_p0 = pnand %p563_p1, %p560_p11 }
  0x23   : > { %568 = shalt.err (!%p565_p0)
}
  0x24   : > { %s569_s19 = scalar_lea.vmem %s149_s28, 16  ;;  %s576_s22 = scalar_lea.vmem %s149_s28, 32 }
  0x25   : > { %p570_p12 = scmp.ne.s32.totalorder %s149_s28, %s569_s19  ;;  %p577_p3 = scmp.lt.s32.totalorder %s149_s28, %s149_s28 }
  0x26   : > { %p578_p7 = scmp.lt.s32.totalorder %s576_s22, %s569_s19 }
  0x27   : > { %p572_p9 = pnand %p570_p12, %p558_p6 }
  0x28   : > { %p579_p13 = por %p578_p7, %p577_p3 }
  0x29   : > { %p573_p8 = pneg %p572_p9 }
  0x2b   : > { %p580_p4 = pnand %p579_p13, %p573_p8 }
  0x2d   : > { %583 = shalt.err (!%p580_p4)
}
  0x2e   : > { %484 = dma.hbm_to_vmem [thread:$0]  (!%p836_p2), %s1008_s1, 16, %s149_s28, [#allocation6]  }
  0x2f   : > { %s584_s8 = scalar_lea.hbm %s1009_s2, 16 }
  0x30   : > { %p585_p9 = scmp.ne.s32.totalorder %s1009_s2, %s584_s8  ;;  %p591_p8 = scmp.lt.u32.totalorder %s584_s8, %s1009_s2 }
  0x32   : > { %p587_p3 = pnand %p585_p9, %p558_p6 }
  0x34   : > { %p588_p7 = pneg %p587_p3 }
  0x36   : > { %p593_p12 = pnand %p591_p8, %p588_p7 }
  0x38   : > { %596 = shalt.err (!%p593_p12)
}
  0x39   : > { %s597_s28 = scalar_lea.vmem %s840_s4, 16  ;;  %s604_s19 = scalar_lea.vmem %s840_s4, 32 }
  0x3a   : > { %p598_p13 = scmp.ne.s32.totalorder %s840_s4, %s597_s28  ;;  %p605_p10 = scmp.lt.s32.totalorder %s840_s4, %s840_s4 }
  0x3b   : > { %p606_p11 = scmp.lt.s32.totalorder %s604_s19, %s597_s28 }
  0x3c   : > { %p600_p4 = pnand %p598_p13, %p558_p6 }
  0x3d   : > { %p607_p1 = por %p606_p11, %p605_p10 }
  0x3e   : > { %p601_p5 = pneg %p600_p4 }
  0x40   : > { %p608_p0 = pnand %p607_p1, %p601_p5 }
  0x42   : > { %611 = shalt.err (!%p608_p0)
}
  0x43   : > { %487 = dma.hbm_to_vmem [thread:$0]  (!%p836_p2), %s1009_s2, 16, %s840_s4, [#allocation6]  }
  0x44   : > { %s32_s30 = sadd.s32 1, %s724_s16  ;;  %s170_s6 = sand.u32 1, %s716_s14  }
  0x45   : > { %p34_p6 = scmp.ge.s32.totalorder %s32_s30, 2  ;;  %s424_s7 = sshll.u32 %s170_s6, 4 }
  0x46   : > { %s443_s8 = sshll.u32 %s724_s16, 8  ;;  %s174_s4 = scalar_lea.vmem [#allocation2], %s424_s7 }
  0x47   : > { %s1038_s30 = smov (%p34_p6, %s32_s30), 0  ;;  %s898_s10 = scalar_lea.hbm %s1007_s0, %s443_s8 }
  0x48   : > { %s36_s11 = ssub.s32 %s724_s16, %s1038_s30  ;;  %s183_s18 = sshll.u32 %s174_s4, 4  ;;  %s902_s18 = int_to_ptr.vmem [resolvable:$true] %s183_s18 }
  0x49   : > { %p39_p2 = scmp.eq.s32.totalorder %s36_s11, 0  ;;  %s909_s19 = scalar_lea.sflag [#allocation3], %s170_s6 }
  0x4a   : > { %s612_s22 = scalar_lea.hbm %s898_s10, 256  ;;  %p1025_p3 = scmp.ne.s32.totalorder %s1023_s29, 0 }
  0x4b   : > { %s907_s28 = scalar_select %p39_p2, %s716_s14, %s41_s20  }
  0x4c   : > { %p613_p9 = scmp.ne.s32.totalorder %s898_s10, %s612_s22  ;;  %p614_p7 = pneg %p1025_p3 }
  0x4d   : > { %s617_s7 = scalar_lea.hbm %s1007_s0, 512  ;;  %p618_p13 = scmp.lt.u32.totalorder %s898_s10, %s1007_s0 }
  0x4e   : > { %p615_p8 = pnand %p614_p7, %p613_p9  ;;  %p619_p4 = scmp.lt.u32.totalorder %s617_s7, %s612_s22 }
  0x4f   : > { %p621_p10 = scmp.lt.u32.totalorder %s612_s22, %s898_s10 }
  0x50   : > { %p616_p12 = pneg %p615_p8  ;;  %p620_p5 = por %p619_p4, %p618_p13 }
  0x52   : > { %p622_p11 = por %p621_p10, %p620_p5 }
  0x54   : > { %p623_p1 = pnand %p622_p11, %p616_p12 }
  0x56   : > { %626 = shalt.err (!%p623_p1)
}
  0x57   : > { %s627_s20 = scalar_lea.vmem %s902_s18, 256  ;;  %s732_s6 = smov [#allocation2]  }
  0x58   : > { %p628_p0 = scmp.ne.s32.totalorder %s902_s18, %s627_s20  ;;  %s632_s11 = sshll.u32 %s732_s6, 4  ;;  %s633_s11 = int_to_ptr.vmem [resolvable:$false] %s632_s11 }
  0x59   : > { %s634_s4 = scalar_lea.vmem %s633_s11, 512  ;;  %p635_p9 = scmp.lt.s32.totalorder %s902_s18, %s633_s11 }
  0x5a   : > { %p630_p6 = pnand %p628_p0, %p614_p7  ;;  %p636_p8 = scmp.lt.s32.totalorder %s634_s4, %s627_s20 }
  0x5c   : > { %p631_p2 = pneg %p630_p6  ;;  %p637_p13 = por %p636_p8, %p635_p9 }
  0x5e   : > { %p638_p4 = pnand %p637_p13, %p631_p2 }
  0x60   : > { %641 = shalt.err (!%p638_p4)
}
  0x61   : > { %s733_s22 = smov 64   ;;  %s734_s27 = smov 4  }
  0x62   : > { %491 = dma.hbm_to_vmem [thread:$0]  (!%p1025_p3), %s898_s10, 256, %s902_s18, %s909_s19, %s733_s22, %s733_s22, %s734_s27  }
  0x63   : > { %p1026_p7 = scmp.ne.s32.totalorder %s1022_s26, 0 }
  0x64   : > { %s940_s8 = sand.u32 (!%p1026_p7), 1, %s712_s13   ;;  %p1027_p12 = scmp.ne.s32.totalorder (!%p1026_p7), %s1019_s23, 0 }
  0x65   : > { %195 = sbr.rel (%p1026_p7) target bundleno = 140 (0x8c), region = 32  ;;  %s428_s7 = sshll.u32 (!%p1026_p7), %s940_s8, 4 }
  0x66   : > { %s198_s5 = scalar_lea.sflag (!%p1026_p7), [#allocation3], %s940_s8  ;;  %s201_s9 = scalar_lea.vmem (!%p1026_p7), [#allocation2], %s428_s7 }
  0x6c   : > { %695 = dma.done.wait (%p1027_p12), %s198_s5, 256  }
  0x6d   : > { %697 = vsyncadd (%p1027_p12), %s198_s5, 4294967040  ;;  %p1028_p5 = scmp.ne.s32.totalorder %s1017_s21, 0 }
  0x6f   : > { %699 = dma.done.wait (%p1028_p5), [#allocation6], 32  }
  0x70   : > { %701 = vsyncadd (%p1028_p5), [#allocation6], 4294967264  ;;  %v450_v0 = vld [vmem:[%s201_s9] sm:$0xff]   ;;  %v467_v4 = vld [vmem:[%s201_s9 + $0x8] sm:$0xff]   ;;  %s231_s23 = scalar_lea.vmem [#allocation8], %s428_s7  ;;  %s448_s21 = sshll.u32 %s720_s15, 8 }
  0x71   : > { %v432_v1 = vld [vmem:[#allocation5] ss:$0 sm:$0xff]  ;;  %v451_v2 = vunpack.c.l.bf16 %v450_v0  ;;  %v452_v3 = vunpack.c.h.bf16 %v450_v0  ;;  %v433_v5 = vld [vmem:[#allocation7] ss:$0 sm:$0xff]  ;;  %v455_v6 = vunpack.c.l.bf16 %v467_v4  ;;  %v456_v7 = vunpack.c.h.bf16 %v467_v4  ;;  %s312_s26 = sshll.u32 %s231_s23, 4  ;;  %s958_s10 = scalar_lea.hbm %s1010_s3, %s448_s21  ;;  %s953_s26 = int_to_ptr.vmem [resolvable:$true] %s312_s26 }
  0x72   : > { %s297_s18 = scalar_lea.sflag [#allocation4], %s940_s8  ;;  %s642_s19 = scalar_lea.vmem %s953_s26, 256 }
  0x73   : > { %v249_v8 = vmul.f32 %v451_v2, %v432_v1  ;;  %v250_v9 = vmul.f32 %v452_v3, %v432_v1  ;;  %v251_v10 = vmul.f32 %v455_v6, %v432_v1  ;;  %v252_v11 = vmul.f32 %v456_v7, %v432_v1  ;;  %p643_p3 = scmp.ne.s32.totalorder %s953_s26, %s642_s19  ;;  %p1029_p10 = scmp.ne.s32.totalorder %s1020_s24, 0 }
  0x74   : > { %s735_s20 = smov [#allocation8]  }
  0x75   : > { %v260_v12 = vadd.f32 %v433_v5, %v249_v8  ;;  %v261_v13 = vadd.f32 %v433_v5, %v250_v9  ;;  %v262_v14 = vadd.f32 %v433_v5, %v251_v10  ;;  %v263_v15 = vadd.f32 %v433_v5, %v252_v11  ;;  %p644_p11 = pnand %p643_p3, %p1029_p10  ;;  %s646_s6 = sshll.u32 %s735_s20, 4  ;;  %s647_s6 = int_to_ptr.vmem [resolvable:$false] %s646_s6 }
  0x76   : > { %s648_s11 = scalar_lea.vmem %s647_s6, 512  ;;  %p649_p0 = scmp.lt.s32.totalorder %s953_s26, %s647_s6 }
  0x77   : > { %vm264_vm0 = vcmp.ge.f32.partialorder %v260_v12, 0.0  ;;  %vm265_vm1 = vcmp.ge.f32.partialorder %v261_v13, 0.0  ;;  %v268_v16 = vmul.f32 0.2, %v260_v12  ;;  %v269_v17 = vmul.f32 0.2, %v261_v13  ;;  %p645_p1 = pneg %p644_p11  ;;  %p650_p6 = scmp.lt.s32.totalorder %s648_s11, %s642_s19 }
  0x78   : > { %vm266_vm2 = vcmp.ge.f32.partialorder %v262_v14, 0.0  ;;  %vm267_vm3 = vcmp.ge.f32.partialorder %v263_v15, 0.0  ;;  %v270_v18 = vmul.f32 0.2, %v262_v14  ;;  %v271_v19 = vmul.f32 0.2, %v263_v15 }
  0x79   : > { %v272_v20 = vsel %vm264_vm0, %v260_v12, %v268_v16  ;;  %v273_v21 = vsel %vm265_vm1, %v261_v13, %v269_v17  ;;  %p651_p2 = por %p650_p6, %p649_p0 }
  0x7a   : > { %v460_v22 = vpack.c.bf16 %v273_v21, %v272_v20  ;;  %v274_v23 = vsel %vm266_vm2, %v262_v14, %v270_v18  ;;  %v275_v24 = vsel %vm267_vm3, %v263_v15, %v271_v19 }
  0x7b   : > { %v465_v25 = vpack.c.bf16 %v275_v24, %v274_v23  ;;  %p652_p9 = pnand %p651_p2, %p645_p1 }
  0x7c   : > { %461 = vst [vmem:[%s231_s23] sm:$0xff] %v460_v22  }
  0x7d   : > { %468 = vst [vmem:[%s231_s23 + $0x8] sm:$0xff] %v465_v25  }
  0x7e   : > { %655 = shalt.err (!%p652_p9)
}
  0x7f   : > { %s656_s4 = scalar_lea.hbm %s958_s10, 256  ;;  %s660_s7 = scalar_lea.hbm %s1010_s3, 512 }
  0x80   : > { %p657_p8 = scmp.ne.s32.totalorder %s958_s10, %s656_s4  ;;  %p661_p7 = scmp.lt.u32.totalorder %s958_s10, %s1010_s3 }
  0x81   : > { %p662_p12 = scmp.lt.u32.totalorder %s660_s7, %s656_s4  ;;  %p664_p3 = scmp.lt.u32.totalorder %s656_s4, %s958_s10 }
  0x82   : > { %p658_p13 = pnand %p657_p8, %p1029_p10 }
  0x83   : > { %p663_p5 = por %p662_p12, %p661_p7 }
  0x84   : > { %p659_p4 = pneg %p658_p13 }
  0x85   : > { %p665_p11 = por %p664_p3, %p663_p5 }
  0x87   : > { %p666_p1 = pnand %p665_p11, %p659_p4 }
  0x89   : > { %669 = shalt.err (!%p666_p1)
}
  0x8a   : > { %s736_s23 = smov 64   ;;  %s737_s21 = smov 4  }
  0x8b   : > { %479 = dma.vmem_to_hbm [thread:$0]  (%p1029_p10), %s953_s26, 256, %s958_s10, %s297_s18, %s736_s23, %s736_s23, %s737_s21  }
  0x8c PF: > { %s327_s15 = sand.u32 1, %s708_s12   ;;  %p1030_p0 = scmp.ne.s32.totalorder %s1021_s25, 0 }
  0x8d   : > { %p1031_p6 = scmp.ge.s32.totalorder %s728_s17, 2  ;;  %s328_s29 = scalar_lea.sflag [#allocation4], %s327_s15 }
  0x8f   : > { %p493_p2 = pnand %p1031_p6, %p1030_p0 }
  0x91   : > { %703 = dma.done.wait (!%p493_p2), %s328_s29, 256  }
  0x92   : > { %705 = vsyncadd (!%p493_p2), %s328_s29, 4294967040  ;;  %s20_s17 = sadd.s32 1, %s728_s17   ;;  %s1032_s12 = smov %s712_s13 }
  0x93   : > { %p17_p9 = scmp.ge.s32.totalorder %s20_s17, 4   ;;  %s1033_s13 = smov %s716_s14 }
  0x94   : > { %s1034_s14 = smov %s907_s28  ;;  %s1035_s15 = smov %s724_s16 }
  0x95   : > { %s1036_s16 = smov %s1038_s30  ;;  %19 = sbr.rel (!%p17_p9) target bundleno = 7 (0x7), region = 85 }
  0x9c   :  { %333 = vsyncpa [#allocation3], 1 }
  0x9d   :  { %335 = vsyncpa [#allocation3 + $0x1], 1 }
  0x9e   :  { %336 = vsyncpa [#allocation6], 1 }
  0x9f   :  { %337 = vsyncpa [#allocation4], 1 }
  0xa0   :  { %339 = vsyncpa [#allocation4 + $0x1], 1 }

// kernel: _lambda_.12
= control target key start
LH: loop header
LB: loop body
LE: loop exit
PB: predicated region body
PF: predicated region fallthrough
CT: control target
= control target key end

     0   :  { %8 = vsyncpa [#allocation3], 0  ;;  %s968_s0 = inlined_call_operand.hbm [shape: bf16[2,16,128], index: 0, kind: input, shape index: {}]   ;;  %s969_s1 = inlined_call_operand.hbm [shape: f32[1,128], index: 1, kind: input, shape index: {}]   ;;  %s970_s2 = inlined_call_operand.hbm [shape: f32[1,128], index: 2, kind: input, shape index: {}]   ;;  %s971_s3 = inlined_call_operand.hbm [shape: bf16[2,16,128], index: 3, kind: output, shape index: {}]  }
   0x1   :  { %10 = vsyncpa [#allocation3 + $0x1], 0 }
   0x2   :  { %11 = vsyncpa [#allocation6], 0 }
   0x3   :  { %12 = vsyncpa [#allocation4], 0 }
   0x4   :  { %14 = vsyncpa [#allocation4 + $0x1], 0  ;;  %s719_s12 = smov 0   ;;  %s721_s13 = smov 0  }
   0x5   :  { %s723_s14 = smov 0   ;;  %s725_s15 = smov 0  }
   0x6   :  { %s727_s16 = smov 0   ;;  %s729_s17 = smov 0  }
   0x7 LB: > { %s394_s18 = sadd.s32 4294967295, %s689_s17   ;;  %s395_s19 = sadd.s32 4294967294, %s689_s17   ;;  %s689_s17 = sphi %s729_s17, %s20_s17   ;;  %s685_s16 = sphi %s727_s16, %s997_s16   ;;  %s681_s15 = sphi %s725_s15, %s996_s15   ;;  %s677_s14 = sphi %s723_s14, %s995_s14   ;;  %s673_s13 = sphi %s721_s13, %s994_s13   ;;  %s669_s12 = sphi %s719_s12, %s993_s12  }
   0x8   : > { %s41_s20 = sadd.s32 1, %s677_s14  ;;  %p48_p0 = scmp.ne.s32.totalorder %s677_s14, %s673_s13 }
   0x9   : > { %p49_p1 = scmp.eq.s32.totalorder %s689_s17, 0  ;;  %p54_p2 = scmp.ne.s32.totalorder %s673_s13, %s669_s12 }
   0xa   : > { %p757_p3 = scmp.eq.s32.totalorder %s394_s18, 0  ;;  %p122_p4 = scmp.eq.s32.totalorder %s394_s18, 1 }
   0xb   : > { %p761_p5 = por %p49_p1, %p48_p0  ;;  %p128_p6 = scmp.eq.s32.totalorder %s395_s19, 1 }
   0xc   : > { %s978_s21 = scalar_select %p757_p3, 1, 0 }
   0xd   : > { %p767_p7 = por %p757_p3, %p54_p2  ;;  %p771_p8 = por %p122_p4, %p48_p0 }
   0xe   : > { %p775_p9 = por %p128_p6, %p54_p2  ;;  %p396_p10 = scmp.ge.s32.totalorder %s689_s17, 1 }
   0xf   : > { %s980_s23 = scalar_select %p767_p7, 1, 0 }
  0x10   : > { %s981_s24 = scalar_select %p771_p8, 1, 0 }
  0x11   : > { %s982_s25 = scalar_select %p775_p9, 1, 0 }
  0x12   : > { %p135_p11 = scmp.lt.s32.totalorder %s689_s17, 3  ;;  %s691_s27 = smov [#allocation5]  }
  0x13   : > { %s148_s28 = sshll.u32 %s691_s27, 4  ;;  %p459_p1 = scmp.lt.s32.totalorder %s689_s17, 2  ;;  %s149_s28 = int_to_ptr.vmem [resolvable:$true] %s148_s28 }
  0x14   : > { %p782_p13 = pnand %p396_p10, %p135_p11  ;;  %s692_s30 = smov [#allocation7]  }
  0x15   : > { %p791_p4 = pnand %p459_p1, %p761_p5  ;;  %s159_s4 = sshll.u32 %s692_s30, 4  ;;  %s801_s4 = int_to_ptr.vmem [resolvable:$true] %s159_s4 }
  0x16   : > { %s983_s26 = scalar_select %p782_p13, 1, 0 }
  0x17   : > { %p442_p0 = pneg %p782_p13  ;;  %s517_s8 = scalar_lea.hbm %s969_s1, 16 }
  0x18   : > { %s984_s29 = scalar_select %p791_p4, 1, 0 }
  0x19   : > { %p797_p2 = pnand %p442_p0, %p757_p3  ;;  %p518_p5 = scmp.ne.s32.totalorder %s969_s1, %s517_s8 }
  0x1a   : > { %p524_p1 = scmp.lt.u32.totalorder %s517_s8, %s969_s1 }
  0x1b   : > { %p519_p6 = pneg %p797_p2 }
  0x1d   : > { %p520_p10 = pnand %p519_p6, %p518_p5 }
  0x1f   : > { %p521_p11 = pneg %p520_p10 }
  0x21   : > { %p526_p0 = pnand %p524_p1, %p521_p11 }
  0x23   : > { %529 = shalt.err (!%p526_p0)
}
  0x24   : > { %s530_s19 = scalar_lea.vmem %s149_s28, 16  ;;  %s537_s22 = scalar_lea.vmem %s149_s28, 32 }
  0x25   : > { %p531_p12 = scmp.ne.s32.totalorder %s149_s28, %s530_s19  ;;  %p538_p3 = scmp.lt.s32.totalorder %s149_s28, %s149_s28 }
  0x26   : > { %p539_p7 = scmp.lt.s32.totalorder %s537_s22, %s530_s19 }
  0x27   : > { %p533_p9 = pnand %p531_p12, %p519_p6 }
  0x28   : > { %p540_p13 = por %p539_p7, %p538_p3 }
  0x29   : > { %p534_p8 = pneg %p533_p9 }
  0x2b   : > { %p541_p4 = pnand %p540_p13, %p534_p8 }
  0x2d   : > { %544 = shalt.err (!%p541_p4)
}
  0x2e   : > { %445 = dma.hbm_to_vmem [thread:$0]  (!%p797_p2), %s969_s1, 16, %s149_s28, [#allocation6]  }
  0x2f   : > { %s545_s8 = scalar_lea.hbm %s970_s2, 16 }
  0x30   : > { %p546_p9 = scmp.ne.s32.totalorder %s970_s2, %s545_s8  ;;  %p552_p8 = scmp.lt.u32.totalorder %s545_s8, %s970_s2 }
  0x32   : > { %p548_p3 = pnand %p546_p9, %p519_p6 }
  0x34   : > { %p549_p7 = pneg %p548_p3 }
  0x36   : > { %p554_p12 = pnand %p552_p8, %p549_p7 }
  0x38   : > { %557 = shalt.err (!%p554_p12)
}
  0x39   : > { %s558_s28 = scalar_lea.vmem %s801_s4, 16  ;;  %s565_s19 = scalar_lea.vmem %s801_s4, 32 }
  0x3a   : > { %p559_p13 = scmp.ne.s32.totalorder %s801_s4, %s558_s28  ;;  %p566_p10 = scmp.lt.s32.totalorder %s801_s4, %s801_s4 }
  0x3b   : > { %p567_p11 = scmp.lt.s32.totalorder %s565_s19, %s558_s28 }
  0x3c   : > { %p561_p4 = pnand %p559_p13, %p519_p6 }
  0x3d   : > { %p568_p1 = por %p567_p11, %p566_p10 }
  0x3e   : > { %p562_p5 = pneg %p561_p4 }
  0x40   : > { %p569_p0 = pnand %p568_p1, %p562_p5 }
  0x42   : > { %572 = shalt.err (!%p569_p0)
}
  0x43   : > { %448 = dma.hbm_to_vmem [thread:$0]  (!%p797_p2), %s970_s2, 16, %s801_s4, [#allocation6]  }
  0x44   : > { %s32_s30 = sadd.s32 1, %s685_s16  ;;  %s170_s6 = sand.u32 1, %s677_s14  }
  0x45   : > { %p34_p6 = scmp.ge.s32.totalorder %s32_s30, 2  ;;  %s400_s7 = sshll.u32 %s170_s6, 3 }
  0x46   : > { %s417_s8 = sshll.u32 %s685_s16, 7  ;;  %s174_s4 = scalar_lea.vmem [#allocation2], %s400_s7 }
  0x47   : > { %s999_s30 = smov (%p34_p6, %s32_s30), 0  ;;  %s859_s10 = scalar_lea.hbm %s968_s0, %s417_s8 }
  0x48   : > { %s36_s11 = ssub.s32 %s685_s16, %s999_s30  ;;  %s183_s18 = sshll.u32 %s174_s4, 4  ;;  %s863_s18 = int_to_ptr.vmem [resolvable:$true] %s183_s18 }
  0x49   : > { %p39_p2 = scmp.eq.s32.totalorder %s36_s11, 0  ;;  %s870_s19 = scalar_lea.sflag [#allocation3], %s170_s6 }
  0x4a   : > { %s573_s22 = scalar_lea.hbm %s859_s10, 128  ;;  %p986_p3 = scmp.ne.s32.totalorder %s984_s29, 0 }
  0x4b   : > { %s868_s28 = scalar_select %p39_p2, %s677_s14, %s41_s20  }
  0x4c   : > { %p574_p9 = scmp.ne.s32.totalorder %s859_s10, %s573_s22  ;;  %p575_p7 = pneg %p986_p3 }
  0x4d   : > { %s578_s7 = scalar_lea.hbm %s968_s0, 256  ;;  %p579_p13 = scmp.lt.u32.totalorder %s859_s10, %s968_s0 }
  0x4e   : > { %p576_p8 = pnand %p575_p7, %p574_p9  ;;  %p580_p4 = scmp.lt.u32.totalorder %s578_s7, %s573_s22 }
  0x4f   : > { %p582_p10 = scmp.lt.u32.totalorder %s573_s22, %s859_s10 }
  0x50   : > { %p577_p12 = pneg %p576_p8  ;;  %p581_p5 = por %p580_p4, %p579_p13 }
  0x52   : > { %p583_p11 = por %p582_p10, %p581_p5 }
  0x54   : > { %p584_p1 = pnand %p583_p11, %p577_p12 }
  0x56   : > { %587 = shalt.err (!%p584_p1)
}
  0x57   : > { %s588_s20 = scalar_lea.vmem %s863_s18, 128  ;;  %s693_s6 = smov [#allocation2]  }
  0x58   : > { %p589_p0 = scmp.ne.s32.totalorder %s863_s18, %s588_s20  ;;  %s593_s11 = sshll.u32 %s693_s6, 4  ;;  %s594_s11 = int_to_ptr.vmem [resolvable:$false] %s593_s11 }
  0x59   : > { %s595_s4 = scalar_lea.vmem %s594_s11, 256  ;;  %p596_p9 = scmp.lt.s32.totalorder %s863_s18, %s594_s11 }
  0x5a   : > { %p591_p6 = pnand %p589_p0, %p575_p7  ;;  %p597_p8 = scmp.lt.s32.totalorder %s595_s4, %s588_s20 }
  0x5c   : > { %p592_p2 = pneg %p591_p6  ;;  %p598_p13 = por %p597_p8, %p596_p9 }
  0x5e   : > { %p599_p4 = pnand %p598_p13, %p592_p2 }
  0x60   : > { %602 = shalt.err (!%p599_p4)
}
  0x61   : > { %s694_s22 = smov 64   ;;  %s695_s27 = smov 4  }
  0x62   : > { %452 = dma.hbm_to_vmem [thread:$0]  (!%p986_p3), %s859_s10, 128, %s863_s18, %s870_s19, %s694_s22, %s694_s22, %s695_s27  }
  0x63   : > { %p987_p7 = scmp.ne.s32.totalorder %s983_s26, 0 }
  0x64   : > { %s901_s8 = sand.u32 (!%p987_p7), 1, %s673_s13   ;;  %p988_p12 = scmp.ne.s32.totalorder (!%p987_p7), %s980_s23, 0 }
  0x65   : > { %195 = sbr.rel (%p987_p7) target bundleno = 139 (0x8b), region = 32  ;;  %s404_s7 = sshll.u32 (!%p987_p7), %s901_s8, 3 }
  0x66   : > { %s198_s5 = scalar_lea.sflag (!%p987_p7), [#allocation3], %s901_s8  ;;  %s201_s9 = scalar_lea.vmem (!%p987_p7), [#allocation2], %s404_s7 }
  0x6c   : > { %656 = dma.done.wait (%p988_p12), %s198_s5, 128  }
  0x6d   : > { %658 = vsyncadd (%p988_p12), %s198_s5, 4294967168  ;;  %p989_p5 = scmp.ne.s32.totalorder %s978_s21, 0 }
  0x6f   : > { %660 = dma.done.wait (%p989_p5), [#allocation6], 32  }
  0x70   : > { %662 = vsyncadd (%p989_p5), [#allocation6], 4294967264  ;;  %v422_v0 = vld [vmem:[%s201_s9] sm:$0xff]   ;;  %v408_v1 = vld [vmem:[#allocation5] ss:$0 sm:$0xff]  ;;  %s231_s26 = scalar_lea.vmem [#allocation8], %s404_s7 }
  0x71   : > { %v423_v2 = vunpack.c.l.bf16 %v422_v0  ;;  %v424_v3 = vunpack.c.h.bf16 %v422_v0  ;;  %v409_v4 = vld [vmem:[#allocation7] ss:$0 sm:$0xff]  ;;  %s288_s23 = sshll.u32 %s231_s26, 4  ;;  %s420_s29 = sshll.u32 %s681_s15, 7  ;;  %s914_s23 = int_to_ptr.vmem [resolvable:$true] %s288_s23 }
  0x72   : > { %s919_s18 = scalar_lea.hbm %s971_s3, %s420_s29  ;;  %s273_s19 = scalar_lea.sflag [#allocation4], %s901_s8 }
  0x73   : > { %v245_v5 = vmul.f32 %v423_v2, %v408_v1  ;;  %v246_v6 = vmul.f32 %v424_v3, %v408_v1  ;;  %s603_s15 = scalar_lea.vmem %s914_s23, 128  ;;  %p990_p10 = scmp.ne.s32.totalorder %s981_s24, 0 }
  0x74   : > { %p604_p3 = scmp.ne.s32.totalorder %s914_s23, %s603_s15  ;;  %s696_s20 = smov [#allocation8]  }
  0x75   : > { %v254_v7 = vadd.f32 %v409_v4, %v245_v5  ;;  %v255_v8 = vadd.f32 %v409_v4, %v246_v6  ;;  %s607_s6 = sshll.u32 %s696_s20, 4  ;;  %s608_s6 = int_to_ptr.vmem [resolvable:$false] %s607_s6 }
  0x76   : > { %p605_p11 = pnand %p604_p3, %p990_p10  ;;  %s609_s11 = scalar_lea.vmem %s608_s6, 256 }
  0x77   : > { %vm256_vm0 = vcmp.ge.f32.partialorder %v254_v7, 0.0  ;;  %vm257_vm1 = vcmp.ge.f32.partialorder %v255_v8, 0.0  ;;  %v258_v9 = vmul.f32 0.2, %v254_v7  ;;  %v259_v10 = vmul.f32 0.2, %v255_v8  ;;  %p610_p0 = scmp.lt.s32.totalorder %s914_s23, %s608_s6  ;;  %p611_p6 = scmp.lt.s32.totalorder %s609_s11, %s603_s15 }
  0x78   : > { %p606_p1 = pneg %p605_p11 }
  0x79   : > { %v260_v11 = vsel %vm256_vm0, %v254_v7, %v258_v9  ;;  %v261_v12 = vsel %vm257_vm1, %v255_v8, %v259_v10  ;;  %p612_p2 = por %p611_p6, %p610_p0 }
  0x7a   : > { %v428_v13 = vpack.c.bf16 %v261_v12, %v260_v11 }
  0x7b   : > { %p613_p9 = pnand %p612_p2, %p606_p1 }
  0x7c   : > { %429 = vst [vmem:[%s231_s26] sm:$0xff] %v428_v13  }
  0x7d   : > { %616 = shalt.err (!%p613_p9)
}
  0x7e   : > { %s617_s4 = scalar_lea.hbm %s919_s18, 128  ;;  %s621_s7 = scalar_lea.hbm %s971_s3, 256 }
  0x7f   : > { %p618_p8 = scmp.ne.s32.totalorder %s919_s18, %s617_s4  ;;  %p622_p7 = scmp.lt.u32.totalorder %s919_s18, %s971_s3 }
  0x80   : > { %p623_p12 = scmp.lt.u32.totalorder %s621_s7, %s617_s4  ;;  %p625_p3 = scmp.lt.u32.totalorder %s617_s4, %s919_s18 }
  0x81   : > { %p619_p13 = pnand %p618_p8, %p990_p10 }
  0x82   : > { %p624_p5 = por %p623_p12, %p622_p7 }
  0x83   : > { %p620_p4 = pneg %p619_p13 }
  0x84   : > { %p626_p11 = por %p625_p3, %p624_p5 }
  0x86   : > { %p627_p1 = pnand %p626_p11, %p620_p4 }
  0x88   : > { %630 = shalt.err (!%p627_p1)
}
  0x89   : > { %s697_s26 = smov 64   ;;  %s698_s29 = smov 4  }
  0x8a   : > { %440 = dma.vmem_to_hbm [thread:$0]  (%p990_p10), %s914_s23, 128, %s919_s18, %s273_s19, %s697_s26, %s697_s26, %s698_s29  }
  0x8b PF: > { %s303_s21 = sand.u32 1, %s669_s12   ;;  %p991_p0 = scmp.ne.s32.totalorder %s982_s25, 0 }
  0x8c   : > { %p992_p6 = scmp.ge.s32.totalorder %s689_s17, 2  ;;  %s304_s10 = scalar_lea.sflag [#allocation4], %s303_s21 }
  0x8e   : > { %p454_p2 = pnand %p992_p6, %p991_p0 }
  0x90   : > { %664 = dma.done.wait (!%p454_p2), %s304_s10, 128  }
  0x91   : > { %666 = vsyncadd (!%p454_p2), %s304_s10, 4294967168  ;;  %s20_s17 = sadd.s32 1, %s689_s17   ;;  %s993_s12 = smov %s673_s13 }
  0x92   : > { %p17_p9 = scmp.ge.s32.totalorder %s20_s17, 4   ;;  %s994_s13 = smov %s677_s14 }
  0x93   : > { %s995_s14 = smov %s868_s28  ;;  %s996_s15 = smov %s685_s16 }
  0x94   : > { %s997_s16 = smov %s999_s30  ;;  %19 = sbr.rel (!%p17_p9) target bundleno = 7 (0x7), region = 85 }
  0x9b   :  { %309 = vsyncpa [#allocation3], 1 }
  0x9c   :  { %311 = vsyncpa [#allocation3 + $0x1], 1 }
  0x9d   :  { %312 = vsyncpa [#allocation6], 1 }
  0x9e   :  { %313 = vsyncpa [#allocation4], 1 }
  0x9f   :  { %315 = vsyncpa [#allocation4 + $0x1], 1 }

// kernel: _lambda_.9
= control target key start
LH: loop header
LB: loop body
LE: loop exit
PB: predicated region body
PF: predicated region fallthrough
CT: control target
= control target key end

     0   :  { %10 = vsyncpa [#allocation3], 0  ;;  %s3824_s0 = inlined_call_operand.hbm [shape: bf16[2,39,512], index: 0, kind: input, shape index: {}]   ;;  %s3825_s1 = inlined_call_operand.hbm [shape: bf16[4,512,128], index: 1, kind: input, shape index: {}]   ;;  %s3826_s2 = inlined_call_operand.hbm [shape: f32[1,128], index: 2, kind: input, shape index: {}]   ;;  %s3827_s3 = inlined_call_operand.hbm [shape: bf16[2,32,128], index: 3, kind: output, shape index: {0}]   ;;  %s3828_s4 = inlined_call_operand.hbm [shape: f32[2,2,128], index: 4, kind: output, shape index: {1}]  }
   0x1   :  { %12 = vsyncpa [#allocation3 + $0x1], 0 }
   0x2   :  { %13 = vsyncpa [#allocation6], 0 }
   0x3   :  { %14 = vsyncpa [#allocation4], 0 }
   0x4   :  { %16 = vsyncpa [#allocation4 + $0x1], 0 }
   0x5   :  { %17 = vsyncpa [#allocation10], 0 }
   0x6   :  { %19 = vsyncpa [#allocation10 + $0x1], 0  ;;  %s3300_s15 = smov 0   ;;  %s3302_s16 = smov 0  }
   0x7   :  { %s3304_s17 = smov 0   ;;  %s3306_s18 = smov 0  }
   0x8   :  { %s3308_s19 = smov 0   ;;  %s3310_s20 = smov 0  }
   0x9 LB: > { %s2373_s21 = sadd.s32 4294967295, %s3261_s20   ;;  %s2374_s22 = sadd.s32 4294967294, %s3261_s20   ;;  %s3261_s20 = sphi %s3310_s20, %s25_s20   ;;  %s3257_s19 = sphi %s3308_s19, %s3858_s19   ;;  %s3253_s18 = sphi %s3306_s18, %s3857_s18   ;;  %s3249_s17 = sphi %s3304_s17, %s3856_s17   ;;  %s3245_s16 = sphi %s3302_s16, %s3855_s16   ;;  %s3241_s15 = sphi %s3300_s15, %s3854_s15  }
   0xa   : > { %p57_p0 = scmp.ne.s32.totalorder %s3245_s16, %s3241_s15  ;;  %p3334_p1 = scmp.eq.s32.totalorder %s2373_s21, 0 }
   0xb   : > { %p3338_p2 = scmp.eq.s32.totalorder %s2373_s21, 1  ;;  %p131_p3 = scmp.eq.s32.totalorder %s2374_s22, 1 }
   0xc   : > { %s3833_s23 = scalar_select %p3334_p1, 1, 0 }
   0xd   : > { %p3344_p4 = por %p3334_p1, %p57_p0  ;;  %p2375_p5 = scmp.ge.s32.totalorder %s3261_s20, 1 }
   0xe   : > { %p3349_p6 = por %p131_p3, %p57_p0  ;;  %p164_p7 = scmp.lt.s32.totalorder %s3261_s20, 3 }
   0xf   : > { %s3835_s25 = scalar_select %p3344_p4, 1, 0 }
  0x10   : > { %s3836_s26 = scalar_select %p3349_p6, 1, 0 }
  0x11   : > { %p3354_p8 = pnand %p2375_p5, %p164_p7  ;;  %s3263_s28 = smov [#allocation5]  }
  0x12   : > { %s176_s29 = sshll.u32 %s3263_s28, 4  ;;  %s3264_s5 = smov [#allocation7]   ;;  %s3358_s29 = int_to_ptr.vmem [resolvable:$true] %s176_s29 }
  0x13   : > { %p2822_p9 = pneg %p3354_p8  ;;  %s190_s6 = sshll.u32 %s3264_s5, 4  ;;  %s3369_s6 = int_to_ptr.vmem [resolvable:$true] %s190_s6 }
  0x14   : > { %s3057_s9 = scalar_lea.hbm %s3825_s1, 16384 }
  0x15   : > { %p3365_p11 = pnand %p2822_p9, %p3334_p1  ;;  %p3058_p12 = scmp.ne.s32.totalorder %s3825_s1, %s3057_s9 }
  0x16   : > { %p3064_p5 = scmp.lt.u32.totalorder %s3057_s9, %s3825_s1 }
  0x17   : > { %p3059_p13 = pneg %p3365_p11 }
  0x19   : > { %p3060_p0 = pnand %p3059_p13, %p3058_p12 }
  0x1b   : > { %p3061_p3 = pneg %p3060_p0 }
  0x1d   : > { %p3066_p7 = pnand %p3064_p5, %p3061_p3 }
  0x1f   : > { %3069 = shalt.err (!%p3066_p7)
}
  0x20   : > { %s3070_s14 = scalar_lea.vmem %s3358_s29, 16384  ;;  %p3078_p1 = scmp.lt.s32.totalorder %s3358_s29, %s3358_s29 }
  0x21   : > { %p3071_p9 = scmp.ne.s32.totalorder %s3358_s29, %s3070_s14  ;;  %p3079_p12 = scmp.lt.s32.totalorder %s3070_s14, %s3070_s14 }
  0x23   : > { %p3073_p10 = pnand %p3071_p9, %p3059_p13  ;;  %p3080_p0 = por %p3079_p12, %p3078_p1 }
  0x25   : > { %p3074_p6 = pneg %p3073_p10 }
  0x27   : > { %p3081_p4 = pnand %p3080_p0, %p3074_p6 }
  0x29   : > { %3084 = shalt.err (!%p3081_p4)
}
  0x2a   : > { %s3265_s21 = smov 64   ;;  %s3266_s22 = smov 4  }
  0x2b   : > { %2825 = dma.hbm_to_vmem [thread:$0]  (!%p3365_p11), %s3825_s1, 16384, %s3358_s29, [#allocation6], %s3265_s21, %s3265_s21, %s3266_s22  }
  0x2c   : > { %s3085_s9 = scalar_lea.hbm %s3826_s2, 16 }
  0x2d   : > { %p3086_p1 = scmp.ne.s32.totalorder %s3826_s2, %s3085_s9  ;;  %p3092_p10 = scmp.lt.u32.totalorder %s3085_s9, %s3826_s2 }
  0x2f   : > { %p3088_p4 = pnand %p3086_p1, %p3059_p13 }
  0x31   : > { %p3089_p6 = pneg %p3088_p4 }
  0x33   : > { %p3094_p3 = pnand %p3092_p10, %p3089_p6 }
  0x35   : > { %3097 = shalt.err (!%p3094_p3)
}
  0x36   : > { %s3098_s29 = scalar_lea.vmem %s3369_s6, 16  ;;  %s3105_s14 = scalar_lea.vmem %s3369_s6, 32 }
  0x37   : > { %p3099_p5 = scmp.ne.s32.totalorder %s3369_s6, %s3098_s29  ;;  %p3106_p12 = scmp.lt.s32.totalorder %s3369_s6, %s3369_s6 }
  0x38   : > { %p3107_p0 = scmp.lt.s32.totalorder %s3105_s14, %s3098_s29 }
  0x39   : > { %p3101_p7 = pnand %p3099_p5, %p3059_p13 }
  0x3a   : > { %p3108_p1 = por %p3107_p0, %p3106_p12 }
  0x3b   : > { %p3102_p9 = pneg %p3101_p7 }
  0x3d   : > { %p3109_p4 = pnand %p3108_p1, %p3102_p9 }
  0x3f   : > { %3112 = shalt.err (!%p3109_p4)
}
  0x40   : > { %2828 = dma.hbm_to_vmem [thread:$0]  (!%p3365_p11), %s3826_s2, 16, %s3369_s6, [#allocation6]  }
  0x41   : > { %s37_s28 = sadd.s32 1, %s3257_s19  ;;  %s44_s5 = sadd.s32 1, %s3249_s17 }
  0x42   : > { %p39_p13 = scmp.ge.s32.totalorder %s37_s28, 2  ;;  %p51_p6 = scmp.ne.s32.totalorder %s3249_s17, %s3245_s16 }
  0x43   : > { %p52_p10 = scmp.eq.s32.totalorder %s3261_s20, 0  ;;  %p2842_p3 = scmp.lt.s32.totalorder %s3261_s20, 2 }
  0x44   : > { %s3860_s28 = smov (%p39_p13, %s37_s28), 0  ;;  %p3434_p7 = por %p3338_p2, %p51_p6 }
  0x45   : > { %p53_p5 = por %p52_p10, %p51_p6  ;;  %s41_s7 = ssub.s32 %s3257_s19, %s3860_s28 }
  0x46   : > { %s3839_s30 = scalar_select %p3434_p7, 1, 0 }
  0x47   : > { %s201_s8 = sand.u32 1, %s3249_s17   ;;  %p42_p9 = scmp.eq.s32.totalorder %s41_s7, 0 }
  0x48   : > { %s2797_s6 = smul.u32 80, %s201_s8  ;;  %p3441_p11 = pnand %p2842_p3, %p53_p5 }
  0x49   : > { %s3446_s10 = scalar_select %p42_p9, %s3249_s17, %s44_s5  }
  0x4a   : > { %s2798_s11 = smul.u32 1280, %s3257_s19  ;;  %s205_s12 = scalar_lea.vmem [#allocation2], %s2797_s6 }
  0x4b   : > { %s212_s13 = sshll.u32 %s205_s12, 4  ;;  %s3456_s21 = scalar_lea.sflag [#allocation3], %s201_s8  ;;  %s3454_s13 = int_to_ptr.vmem [resolvable:$true] %s212_s13 }
  0x4c   : > { %s3452_s14 = scalar_lea.hbm %s3824_s0, %s2798_s11  ;;  %p3115_p12 = pneg %p3441_p11 }
  0x4d   : > { %s3113_s22 = scalar_lea.hbm %s3452_s14, 1280  ;;  %s3118_s6 = scalar_lea.hbm %s3824_s0, 2560 }
  0x4e   : > { %p3114_p2 = scmp.ne.s32.totalorder %s3452_s14, %s3113_s22  ;;  %p3119_p4 = scmp.lt.u32.totalorder %s3452_s14, %s3824_s0 }
  0x4f   : > { %p3120_p13 = scmp.lt.u32.totalorder %s3118_s6, %s3113_s22  ;;  %p3122_p10 = scmp.lt.u32.totalorder %s3113_s22, %s3452_s14 }
  0x50   : > { %p3116_p0 = pnand %p3115_p12, %p3114_p2 }
  0x51   : > { %p3121_p6 = por %p3120_p13, %p3119_p4 }
  0x52   : > { %p3117_p1 = pneg %p3116_p0 }
  0x53   : > { %p3123_p3 = por %p3122_p10, %p3121_p6 }
  0x55   : > { %p3124_p5 = pnand %p3123_p3, %p3117_p1 }
  0x57   : > { %3127 = shalt.err (!%p3124_p5)
}
  0x58   : > { %s3128_s8 = scalar_lea.vmem %s3454_s13, 1280  ;;  %s3267_s24 = smov [#allocation2]  }
  0x59   : > { %p3129_p9 = scmp.ne.s32.totalorder %s3454_s13, %s3128_s8  ;;  %s3133_s29 = sshll.u32 %s3267_s24, 4  ;;  %s3134_s29 = int_to_ptr.vmem [resolvable:$false] %s3133_s29 }
  0x5a   : > { %s3135_s5 = scalar_lea.vmem %s3134_s29, 2560  ;;  %p3136_p7 = scmp.lt.s32.totalorder %s3454_s13, %s3134_s29 }
  0x5b   : > { %p3131_p2 = pnand %p3129_p9, %p3115_p12  ;;  %p3137_p4 = scmp.lt.s32.totalorder %s3135_s5, %s3128_s8 }
  0x5d   : > { %p3132_p0 = pneg %p3131_p2  ;;  %p3138_p13 = por %p3137_p4, %p3136_p7 }
  0x5f   : > { %p3139_p6 = pnand %p3138_p13, %p3132_p0 }
  0x61   : > { %3142 = shalt.err (!%p3139_p6)
}
  0x62   : > { %s3268_s22 = smov 256   ;;  %s3269_s7 = smov 16  }
  0x63   : > { %2832 = dma.hbm_to_vmem [thread:$0]  (!%p3441_p11), %s3452_s14, 1280, %s3454_s13, %s3456_s21, %s3268_s22, %s3268_s22, %s3269_s7  }
  0x64   : > { %224 = sbr.rel (%p3354_p8) target bundleno = 516 (0x204), region = 32  ;;  %s3487_s6 = sand.u32 (!%p3354_p8), 1, %s3245_s16  }
  0x65   : > { %s2799_s11 = smul.u32 (!%p3354_p8), 80, %s3487_s6  ;;  %s227_s12 = scalar_lea.sflag (!%p3354_p8), [#allocation3], %s3487_s6 }
  0x66   : > { %p3841_p7 = scmp.ne.s32.totalorder (!%p3354_p8), %s3835_s25, 0 }
  0x67   : > { %s3491_s8 = scalar_lea.vmem (!%p3354_p8), [#allocation2], %s2799_s11 }
  0x6b   : > { %3224 = dma.done.wait (%p3841_p7), %s227_s12, 1280  }
  0x6c   : > { %3226 = vsyncadd (%p3841_p7), %s227_s12, 4294966016  ;;  %p3842_p11 = scmp.ne.s32.totalorder %s3833_s23, 0 }
  0x6e   : > { %3228 = dma.done.wait (%p3842_p11), [#allocation6], 16400  }
  0x6f   : > { %3230 = vsyncadd (%p3842_p11), [#allocation6], 4294950896  ;;  %v2903_v0 = vld [vmem:[#allocation5 + $0x40] sm:$0xff]   ;;  %v2907_v4 = vld [vmem:[#allocation5 + $0x48] sm:$0xff]   ;;  %vm800_vm0 = vsmask.f32 7424 }
  0x70   : > { %v2904_v1 = vld [vmem:[#allocation5 + $0xc0] sm:$0xff]   ;;  %2573 = vmatprep.subr.bf16.mxu0 %v2903_v0  ;;  %v2908_v5 = vld [vmem:[#allocation5 + $0xc8] sm:$0xff]   ;;  %v2911_v8 = vld [vmem:[#allocation5 + $0x50] sm:$0xff]   ;;  %vm1272_vm1 = vcmask 1044480   ;;  %vm1672_vm2 = vsmask.f32 4352 }
  0x71   : > { %v2905_v2 = vld [vmem:[#allocation5] sm:$0xff]   ;;  %2601 = vmatprep.subr.bf16.mxu1 %v2904_v1  ;;  %v2909_v6 = vld [vmem:[#allocation5 + $0x8] sm:$0xff]   ;;  %v2912_v9 = vld [vmem:[#allocation5 + $0xd0] sm:$0xff]   ;;  %s2384_s23 = sshll.u32 %s3487_s6, 1  ;;  %s2383_s27 = sshll.u32 %s3487_s6, 4 }
  0x72   : > { %v2906_v3 = vld [vmem:[#allocation5 + $0x80] sm:$0xff]   ;;  %2574 = vmatpush3.bf16.msra.mxu0 %v2905_v2  ;;  %v2910_v7 = vld [vmem:[#allocation5 + $0x88] sm:$0xff]   ;;  %v2913_v10 = vld [vmem:[#allocation5 + $0x10] sm:$0xff]   ;;  %s3675_s25 = scalar_lea.vmem [#allocation9], %s2384_s23  ;;  %s260_s9 = scalar_lea.vmem [#allocation8], %s2383_s27 }
  0x73   : > { %2602 = vmatpush3.bf16.msra.mxu1 %v2906_v3  ;;  %2575 = vmatprep.subr.bf16.mxu0 %v2907_v4  ;;  %v2914_v11 = vld [vmem:[#allocation5 + $0x90] sm:$0xff]   ;;  %v2915_v12 = vld [vmem:[#allocation5 + $0x58] sm:$0xff]   ;;  %v2919_v16 = vld [vmem:[#allocation5 + $0x60] sm:$0xff]   ;;  %s2225_s13 = sshll.u32 %s260_s9, 4  ;;  %s2561_s14 = sshll.u32 %s3253_s18, 8  ;;  %s3742_s13 = int_to_ptr.vmem [resolvable:$true] %s2225_s13 }
  0x74   : > { %2603 = vmatprep.subr.bf16.mxu1 %v2908_v5  ;;  %v2916_v13 = vld [vmem:[#allocation5 + $0xd8] sm:$0xff]   ;;  %v2920_v17 = vld [vmem:[#allocation5 + $0xe0] sm:$0xff]   ;;  %v2923_v20 = vld [vmem:[#allocation5 + $0x68] sm:$0xff]   ;;  %s3740_s29 = scalar_lea.hbm %s3827_s3, %s2561_s14  ;;  %s2205_s5 = scalar_lea.sflag [#allocation4], %s3487_s6 }
  0x75   : > { %v2917_v14 = vld [vmem:[#allocation5 + $0x18] sm:$0xff]   ;;  %v2921_v18 = vld [vmem:[#allocation5 + $0x20] sm:$0xff]   ;;  %v2924_v21 = vld [vmem:[#allocation5 + $0xe8] sm:$0xff]   ;;  %s3143_s22 = scalar_lea.vmem %s3742_s13, 256  ;;  %p3851_p12 = scmp.ne.s32.totalorder %s3839_s30, 0 }
  0x76   : > { %2576 = vmatpush3.bf16.msra.mxu0 %v2909_v6  ;;  %v2918_v15 = vld [vmem:[#allocation5 + $0x98] sm:$0xff]   ;;  %v2922_v19 = vld [vmem:[#allocation5 + $0xa0] sm:$0xff]   ;;  %v2925_v22 = vld [vmem:[#allocation5 + $0x28] sm:$0xff]   ;;  %p3144_p8 = scmp.ne.s32.totalorder %s3742_s13, %s3143_s22  ;;  %s3271_s7 = smov [#allocation8]  }
  0x77   : > { %2604 = vmatpush3.bf16.msra.mxu1 %v2910_v7  ;;  %2577 = vmatprep.subr.bf16.mxu0 %v2911_v8  ;;  %v2926_v23 = vld [vmem:[#allocation5 + $0xa8] sm:$0xff]   ;;  %v2927_v24 = vld [vmem:[#allocation5 + $0x70] sm:$0xff]   ;;  %v2931_v28 = vld [vmem:[#allocation5 + $0x78] sm:$0xff]   ;;  %s3147_s11 = sshll.u32 %s3271_s7, 4  ;;  %s3148_s11 = int_to_ptr.vmem [resolvable:$false] %s3147_s11 }
  0x78   : > { %2605 = vmatprep.subr.bf16.mxu1 %v2912_v9  ;;  %v2928_v25 = vld [vmem:[#allocation5 + $0xf0] sm:$0xff]   ;;  %v2932_v29 = vld [vmem:[#allocation5 + $0xf8] sm:$0xff]   ;;  %v2939_v40 = vld [vmem:[#allocation5 + $0x140] sm:$0xff]   ;;  %p3145_p1 = pnand %p3144_p8, %p3851_p12  ;;  %s3149_s12 = scalar_lea.vmem %s3148_s11, 512 }
  0x79   : > { %v2929_v26 = vld [vmem:[#allocation5 + $0x30] sm:$0xff]   ;;  %v2933_v30 = vld [vmem:[#allocation5 + $0x38] sm:$0xff]   ;;  %v2940_v41 = vld [vmem:[#allocation5 + $0x1c0] sm:$0xff]   ;;  %p3150_p3 = scmp.lt.s32.totalorder %s3742_s13, %s3148_s11  ;;  %p3151_p5 = scmp.lt.s32.totalorder %s3149_s12, %s3143_s22 }
  0x7a   : > { %2578 = vmatpush3.bf16.msra.mxu0 %v2913_v10  ;;  %v2930_v27 = vld [vmem:[#allocation5 + $0xb0] sm:$0xff]   ;;  %v2934_v31 = vld [vmem:[#allocation5 + $0xb8] sm:$0xff]   ;;  %v2941_v42 = vld [vmem:[#allocation5 + $0x100] sm:$0xff]   ;;  %p3146_p10 = pneg %p3145_p1 }
  0x7b   : > { %2606 = vmatpush3.bf16.msra.mxu1 %v2914_v11  ;;  %2579 = vmatprep.subr.bf16.mxu0 %v2915_v12  ;;  %v277_v32 = vld [vmem:[%s3491_s8] sm:$0xff]  ;;  %v3503_v33 = vld [vmem:[%s3491_s8 + $0x10] sm:$0xff]  ;;  %v278_v34 = vld [vmem:[%s3491_s8 + $0x8] sm:$0xff]  ;;  %p3152_p9 = por %p3151_p5, %p3150_p3 }
  0x7c   : > { %2607 = vmatprep.subr.bf16.mxu1 %v2916_v13  ;;  %v3507_v35 = vcombine.low %v277_v32, %v3503_v33  ;;  %v3510_v36 = vcombine.high %v277_v32, %v3503_v33  ;;  %v3513_v37 = vld [vmem:[%s3491_s8 + $0x18] sm:$0xff]  ;;  %v2942_v43 = vld [vmem:[#allocation5 + $0x180] sm:$0xff]   ;;  %v2947_v48 = vld [vmem:[#allocation5 + $0x150] sm:$0xff]  }
  0x7d   : > { %v3516_v38 = vcombine.low %v278_v34, %v3513_v37  ;;  %v3519_v39 = vcombine.high %v278_v34, %v3513_v37  ;;  %v2943_v44 = vld [vmem:[#allocation5 + $0x148] sm:$0xff]   ;;  %v2948_v49 = vld [vmem:[#allocation5 + $0x1d0] sm:$0xff]   ;;  %v2951_v52 = vld [vmem:[#allocation5 + $0x158] sm:$0xff]   ;;  %p3153_p2 = pnand %p3152_p9, %p3146_p10 }
  0x7e   : > { %2580 = vmatpush3.bf16.msra.mxu0 %v2917_v14  ;;  %613 = vmatprep.mubr.bf16.mxu0 %v3510_v36  ;;  %v2944_v45 = vld [vmem:[#allocation5 + $0x1c8] sm:$0xff]   ;;  %v2949_v50 = vld [vmem:[#allocation5 + $0x110] sm:$0xff]   ;;  %v2952_v53 = vld [vmem:[#allocation5 + $0x1d8] sm:$0xff]   ;;  %v814_v55 = vshrl.u32 %v3510_v36, 16  ;;  %v816_v57 = vshll.u32 %v3510_v36, 16  ;;  %v804_v61 = vshll.u32 %v3507_v35, 16 }
  0x7f   : > { %2608 = vmatpush3.bf16.msra.mxu1 %v2918_v15  ;;  %2581 = vmatprep.subr.bf16.mxu0 %v2919_v16  ;;  %v2945_v46 = vld [vmem:[#allocation5 + $0x108] sm:$0xff]   ;;  %v2950_v51 = vld [vmem:[#allocation5 + $0x190] sm:$0xff]   ;;  %v2953_v54 = vld [vmem:[#allocation5 + $0x118] sm:$0xff]   ;;  %v840_v59 = vshll.u32 %v3519_v39, 16  ;;  %v828_v63 = vshll.u32 %v3516_v38, 16  ;;  %v838_v1 = vshrl.u32 %v3519_v39, 16 }
  0x80   : > { %2609 = vmatprep.subr.bf16.mxu1 %v2920_v17  ;;  %662 = vmatprep.mubr.bf16.mxu1 %v3519_v39  ;;  %v2946_v47 = vld [vmem:[#allocation5 + $0x188] sm:$0xff]   ;;  %v2954_v56 = vld [vmem:[#allocation5 + $0x198] sm:$0xff]   ;;  %v2955_v58 = vld [vmem:[#allocation5 + $0x160] sm:$0xff]   ;;  %v818_v3 = vrot.slane %v816_v57, 1  ;;  %v802_v6 = vshrl.u32 %v3507_v35, 16  ;;  %v826_v7 = vshrl.u32 %v3516_v38, 16 }
  0x81   : > { %v2956_v60 = vld [vmem:[#allocation5 + $0x1e0] sm:$0xff]   ;;  %v2959_v2 = vld [vmem:[#allocation5 + $0x168] sm:$0xff]   ;;  %v842_v5 = vrot.slane %v840_v59, 1  ;;  %v806_v9 = vrot.slane %v804_v61, 1  ;;  %v830_v10 = vrot.slane %v828_v63, 1  ;;  %v2974_v34 = vld [vmem:[#allocation5 + $0x1f8] sm:$0xff]  }
  0x82   : > { %2582 = vmatpush3.bf16.msra.mxu0 %v2921_v18  ;;  %v2957_v62 = vld [vmem:[#allocation5 + $0x120] sm:$0xff]   ;;  %v2960_v4 = vld [vmem:[#allocation5 + $0x1e8] sm:$0xff]   ;;  %v819_v13 = vor.u32 %v818_v3, %v814_v55  ;;  %v2976_v39 = vld [vmem:[#allocation5 + $0x1b8] sm:$0xff]  }
  0x83   : > { %2610 = vmatpush3.bf16.msra.mxu1 %v2922_v19  ;;  %2583 = vmatprep.subr.bf16.mxu0 %v2923_v20  ;;  %v2958_v0 = vld [vmem:[#allocation5 + $0x1a0] sm:$0xff]   ;;  %v3537_v11 = vld [vmem:[%s3491_s8 + $0x2c] ss:$16 sps:$4 sm:$0xff]   ;;  %v3546_v17 = vld [vmem:[%s3491_s8 + $0x28] ss:$16 sps:$4 sm:$0xff]   ;;  %v843_v18 = vor.u32 %v842_v5, %v838_v1 }
  0x84   : > { %2611 = vmatprep.subr.bf16.mxu1 %v2924_v21  ;;  %v3534_v8 = vld [vmem:[%s3491_s8 + $0x24] ss:$16 sps:$4 sm:$0xff]   ;;  %v2965_v12 = vld [vmem:[#allocation5 + $0x128] sm:$0xff]   ;;  %v3543_v16 = vld [vmem:[%s3491_s8 + $0x20] ss:$16 sps:$4 sm:$0xff]   ;;  %v845_v19 = vshll.u32 %v3537_v11, 16 }
  0x85   : > { %v821_v14 = vshll.u32 %v3534_v8, 16  ;;  %v2966_v15 = vld [vmem:[#allocation5 + $0x1a8] sm:$0xff]   ;;  %v2969_v20 = vld [vmem:[#allocation5 + $0x170] sm:$0xff]  }
  0x86   : > { %2584 = vmatpush3.bf16.msra.mxu0 %v2925_v22  ;;  %v2970_v22 = vld [vmem:[#allocation5 + $0x1f0] sm:$0xff]   ;;  %v692_v55 = vld [vmem:[%s3491_s8 + $0x48] sm:$0x11] }
  0x87   : > { %2612 = vmatpush3.bf16.msra.mxu1 %v2926_v23  ;;  %2585 = vmatprep.subr.bf16.mxu0 %v2927_v24  ;;  %v823_v21 = vrot.slane %v821_v14, 1  ;;  %v847_v23 = vrot.slane %v845_v19, 1  ;;  %v2971_v24 = vld [vmem:[#allocation5 + $0x130] sm:$0xff]   ;;  %v2437_v57 = vcombine.high %v692_v55, %v692_v55  ;;  %v2436_v59 = vcombine.low %v692_v55, %v692_v55  ;;  %v3012_v55 = vld [vmem:[#allocation5 + $0x2b8] sm:$0xff]  }
  0x88   : > { %2613 = vmatprep.subr.bf16.mxu1 %v2928_v25  ;;  %v2990_v1 = vld [vmem:[#allocation5 + $0x2d0] sm:$0xff]  }
  0x89   : > { %v824_v25 = vsel %vm800_vm0, %v819_v13, %v823_v21  ;;  %v877_v3 = vshll.u32 %v2437_v57, 16  ;;  %v869_v5 = vshll.u32 %v2436_v59, 16  ;;  %v2992_v13 = vld [vmem:[#allocation5 + $0x290] sm:$0xff]  }
  0x8a   : > { %2586 = vmatpush3.bf16.msra.mxu0 %v2929_v26  ;;  %v809_v26 = vshll.u32 %v3543_v16, 16 }
  0x8b   : > { %2614 = vmatpush3.bf16.msra.mxu1 %v2930_v27  ;;  %2587 = vmatprep.subr.bf16.mxu0 %v2931_v28  ;;  %v2972_v27 = vld [vmem:[#allocation5 + $0x1b0] sm:$0xff]   ;;  %v848_v28 = vsel %vm800_vm0, %v843_v18, %v847_v23 }
  0x8c   : > { %2615 = vmatprep.subr.bf16.mxu1 %v2932_v29  ;;  %v833_v29 = vshll.u32 %v3546_v17, 16  ;;  %v811_v32 = vrot.slane %v809_v26, 1 }
  0x8e   : > { %2588 = vmatpush3.bf16.msra.mxu0 %v2933_v30  ;;  %v2973_v30 = vld [vmem:[#allocation5 + $0x178] sm:$0xff]   ;;  %v835_v36 = vrot.slane %v833_v29, 1 }
  0x8f   : > { %2616 = vmatpush3.bf16.msra.mxu1 %v2934_v31  ;;  %2629 = vmatprep.subr.bf16.mxu0 %v2939_v40  ;;  %v807_v31 = vor.u32 %v806_v9, %v802_v6  ;;  %v2991_v6 = vld [vmem:[#allocation5 + $0x210] sm:$0xff]   ;;  %v879_v9 = vrot.slane %v877_v3, 1 }
  0x90   : > { %2657 = vmatprep.subr.bf16.mxu1 %v2940_v41  ;;  %v2977_v41 = vld [vmem:[#allocation5 + $0x240] sm:$0xff]  }
  0x91   : > { %614 = vmatmul.mubr.bf16.vlgmr.msra.gmra.mrb[0].mxu0 %v3507_v35  ;;  %v831_v35 = vor.u32 %v830_v10, %v826_v7  ;;  %v812_v40 = vsel %vm800_vm0, %v807_v31, %v811_v32  ;;  %v3000_v31 = vld [vmem:[#allocation5 + $0x2a0] sm:$0xff]  }
  0x92   : > { %663 = vmatmul.mubr.bf16.vlgmr.msra.gmra.mrb[0].mxu1 %v3516_v38  ;;  %2630 = vmatpush3.bf16.msra.mxu0 %v2941_v42  ;;  %v2975_v38 = vld [vmem:[#allocation5 + $0x138] sm:$0xff]  }
  0x93   : > { %2658 = vmatpush3.bf16.msra.mxu1 %v2942_v43  ;;  %2631 = vmatprep.subr.bf16.mxu0 %v2943_v44  ;;  %v836_v42 = vsel %vm800_vm0, %v831_v35, %v835_v36  ;;  %v2978_v43 = vld [vmem:[#allocation5 + $0x2c0] sm:$0xff]   ;;  %v3003_v35 = vld [vmem:[#allocation5 + $0x228] sm:$0xff]  }
  0x94   : > { %2659 = vmatprep.subr.bf16.mxu1 %v2944_v45  ;;  %621 = vmatprep.mubr.bf16.mxu0 %v3534_v8  ;;  %v2979_v44 = vld [vmem:[#allocation5 + $0x200] sm:$0xff]  }
  0x95   : > { %670 = vmatprep.mubr.bf16.mxu1 %v3537_v11  ;;  %v2980_v45 = vld [vmem:[#allocation5 + $0x280] sm:$0xff]  }
  0x96   : > { %2632 = vmatpush3.bf16.msra.mxu0 %v2945_v46  ;;  %v857_v46 = vshrl.u32 %v3534_v8, 16 }
  0x97   : > { %2660 = vmatpush3.bf16.msra.mxu1 %v2946_v47  ;;  %2633 = vmatprep.subr.bf16.mxu0 %v2947_v48  ;;  %v2981_v47 = vld [vmem:[#allocation5 + $0x248] sm:$0xff]   ;;  %v873_v48 = vshrl.u32 %v3537_v11, 16 }
  0x98   : > { %2661 = vmatprep.subr.bf16.mxu1 %v2948_v49  ;;  %v2982_v49 = vld [vmem:[#allocation5 + $0x2c8] sm:$0xff]   ;;  %v859_v61 = vor.u32 %v857_v46, %v823_v21 }
  0x99   : > { %622 = vmatmul.mubr.bf16.gmra.mrb[4].mxu0 %v3543_v16  ;;  %v3594_v57 = vrot.slane %v873_v48, 3 }
  0x9a   : > { %2634 = vmatpush3.bf16.msra.mxu0 %v2949_v50  ;;  %671 = vmatmul.mubr.bf16.gmra.mrb[4].mxu1 %v3546_v17  ;;  %v849_v50 = vshrl.u32 %v3543_v16, 16 }
  0x9b   : > { %2662 = vmatpush3.bf16.msra.mxu1 %v2950_v51  ;;  %2635 = vmatprep.subr.bf16.mxu0 %v2951_v52  ;;  %v2983_v51 = vld [vmem:[#allocation5 + $0x208] sm:$0xff]   ;;  %v865_v52 = vshrl.u32 %v3546_v17, 16 }
  0x9c   : > { %2663 = vmatprep.subr.bf16.mxu1 %v2952_v53  ;;  %1113 = vmatprep.mubr.bf16.mxu0 %v824_v25  ;;  %v2984_v53 = vld [vmem:[#allocation5 + $0x288] sm:$0xff]   ;;  %v851_v63 = vor.u32 %v849_v50, %v811_v32  ;;  %v2996_v25 = vld [vmem:[#allocation5 + $0x298] sm:$0xff]  }
  0x9d   : > { %1162 = vmatprep.mubr.bf16.mxu1 %v848_v28  ;;  %v2998_v28 = vld [vmem:[#allocation5 + $0x2e0] sm:$0xff]   ;;  %v3001_v32 = vld [vmem:[#allocation5 + $0x268] sm:$0xff]  }
  0x9e   : > { %2636 = vmatpush3.bf16.msra.mxu0 %v2953_v54  ;;  %v691_v54 = vld [vmem:[%s3491_s8 + $0x40] sm:$0x11] }
  0x9f   : > { %2664 = vmatpush3.bf16.msra.mxu1 %v2954_v56  ;;  %2637 = vmatprep.subr.bf16.mxu0 %v2955_v58  ;;  %v2435_v56 = vcombine.high %v691_v54, %v691_v54  ;;  %v2434_v58 = vcombine.low %v691_v54, %v691_v54  ;;  %v1694_v54 = vrot.slane %v821_v14, 4 }
  0xa0   : > { %2665 = vmatprep.subr.bf16.mxu1 %v2956_v60  ;;  %v2989_v60 = vld [vmem:[#allocation5 + $0x250] sm:$0xff]  }
  0xa2   : > { %2638 = vmatpush3.bf16.msra.mxu0 %v2957_v62  ;;  %v875_v62 = vor.u32 %v873_v48, %v847_v23  ;;  %v2994_v23 = vld [vmem:[#allocation5 + $0x2d8] sm:$0xff]  }
  0xa3   : > { %2666 = vmatpush3.bf16.msra.mxu1 %v2958_v0  ;;  %2639 = vmatprep.subr.bf16.mxu0 %v2959_v2  ;;  %v867_v0 = vor.u32 %v865_v52, %v835_v36  ;;  %v861_v2 = vshll.u32 %v2435_v56, 16  ;;  %v3004_v36 = vld [vmem:[#allocation5 + $0x2a8] sm:$0xff]   ;;  %v1183_v56 = vld [vmem:[%s3491_s8] sm:$0x88] }
  0xa4   : > { %2667 = vmatprep.subr.bf16.mxu1 %v2960_v4  ;;  %v853_v4 = vshll.u32 %v2434_v58, 16  ;;  %v3597_v58 = vcombine.low %v1183_v56, %v3503_v33  ;;  %v2471_v59 = vcombine.high %v1183_v56, %v3503_v33 }
  0xa5   : > { %v863_v7 = vrot.slane %v861_v2, 1 }
  0xa6   : > { %2640 = vmatpush3.bf16.msra.mxu0 %v2965_v12  ;;  %v855_v10 = vrot.slane %v853_v4, 1  ;;  %v871_v12 = vrot.slane %v869_v5, 1  ;;  %v1276_v48 = vrot.slane %v2471_v59, 3  ;;  %v1686_v4 = vshrl.u32 %v2471_v59, 16 }
  0xa7   : > { %2668 = vmatpush3.bf16.msra.mxu1 %v2966_v15  ;;  %2641 = vmatprep.subr.bf16.mxu0 %v2969_v20  ;;  %v2993_v15 = vld [vmem:[#allocation5 + $0x258] sm:$0xff]   ;;  %v864_v18 = vsel %vm800_vm0, %v859_v61, %v863_v7  ;;  %v880_v20 = vsel %vm800_vm0, %v875_v62, %v879_v9  ;;  %v3017_v61 = vld [vmem:[#allocation5 + $0x340] sm:$0xff]   ;;  %v3609_v62 = vrot.slane %v845_v19, 4  ;;  %v3021_v7 = vld [vmem:[#allocation5 + $0x348] sm:$0xff]   ;;  %v1689_v9 = vshll.u32 %v2471_v59, 16 }
  0xa8   : > { %2669 = vmatprep.subr.bf16.mxu1 %v2970_v22  ;;  %v856_v21 = vsel %vm800_vm0, %v851_v63, %v855_v10  ;;  %v872_v22 = vsel %vm800_vm0, %v867_v0, %v871_v12  ;;  %v1273_v63 = vrot.slane %v3597_v58, 3  ;;  %v3018_v0 = vld [vmem:[#allocation5 + $0x3c0] sm:$0xff]   ;;  %v3022_v10 = vld [vmem:[#allocation5 + $0x3c8] sm:$0xff]   ;;  %v1688_v12 = vrot.slane %v1686_v4, 3  ;;  %v3036_v59 = vld [vmem:[#allocation5 + $0x398] sm:$0xff]  }
  0xa9   : > { %v3020_v19 = vld [vmem:[#allocation5 + $0x380] sm:$0xff]   ;;  %v3648_v56 = vor.u32 %v3609_v62, %v3594_v57  ;;  %v1682_v57 = vrot.slane %v809_v26, 4  ;;  %v1706_v62 = vrot.slane %v833_v29, 4  ;;  %v3046_v4 = vld [vmem:[#allocation5 + $0x3f0] sm:$0xff]  }
  0xaa   : > { %2642 = vmatpush3.bf16.msra.mxu0 %v2971_v24  ;;  %v2995_v24 = vld [vmem:[#allocation5 + $0x218] sm:$0xff]  }
  0xab   : > { %2670 = vmatpush3.bf16.msra.mxu1 %v2972_v27  ;;  %2643 = vmatprep.subr.bf16.mxu0 %v2973_v30  ;;  %v2997_v27 = vld [vmem:[#allocation5 + $0x260] sm:$0xff]  }
  0xac   : > { %2671 = vmatprep.subr.bf16.mxu1 %v2974_v34  ;;  %v2999_v30 = vld [vmem:[#allocation5 + $0x220] sm:$0xff]   ;;  %v3002_v34 = vld [vmem:[#allocation5 + $0x2e8] sm:$0xff]  }
  0xae   : > { %2644 = vmatpush3.bf16.msra.mxu0 %v2975_v38  ;;  %v3005_v38 = vld [vmem:[#allocation5 + $0x270] sm:$0xff]  }
  0xaf   : > { %2672 = vmatpush3.bf16.msra.mxu1 %v2976_v39  ;;  %2685 = vmatprep.subr.bf16.mxu0 %v2977_v41  ;;  %v3006_v39 = vld [vmem:[#allocation5 + $0x2f0] sm:$0xff]  }
  0xb0   : > { %2713 = vmatprep.subr.bf16.mxu1 %v2978_v43  ;;  %v3007_v41 = vld [vmem:[#allocation5 + $0x230] sm:$0xff]  }
  0xb1   : > { %1114 = vmatmul.mubr.bf16.vlgmr.msra.gmra.mrb[8].mxu0 %v812_v40  ;;  %v1277_v40 = vrot.slane %v3534_v8, 3  ;;  %v3008_v43 = vld [vmem:[#allocation5 + $0x2b0] sm:$0xff]   ;;  %v3033_v8 = vld [vmem:[#allocation5 + $0x358] sm:$0xff]  }
  0xb2   : > { %1163 = vmatmul.mubr.bf16.vlgmr.msra.gmra.mrb[8].mxu1 %v836_v42  ;;  %2686 = vmatpush3.bf16.msra.mxu0 %v2979_v44  ;;  %v1283_v42 = vrot.slane %v3537_v11, 3  ;;  %v1274_v44 = vrot.slane %v3543_v16, 3  ;;  %v1681_v11 = vrot.slane %v849_v50, 3  ;;  %v3041_v16 = vld [vmem:[#allocation5 + $0x368] sm:$0xff]  }
  0xb3   : > { %2714 = vmatpush3.bf16.msra.mxu1 %v2980_v45  ;;  %2687 = vmatprep.subr.bf16.mxu0 %v2981_v47  ;;  %v3009_v45 = vld [vmem:[#allocation5 + $0x278] sm:$0xff]   ;;  %v1280_v47 = vrot.slane %v3546_v17, 3  ;;  %v3043_v17 = vld [vmem:[#allocation5 + $0x328] sm:$0xff]  }
  0xb4   : > { %2715 = vmatprep.subr.bf16.mxu1 %v2982_v49  ;;  %1121 = vmatprep.mubr.bf16.mxu0 %v864_v18  ;;  %v3010_v49 = vld [vmem:[#allocation5 + $0x2f8] sm:$0xff]   ;;  %v1275_v3 = vsel %vm1272_vm1, %v1273_v63, %v1274_v44  ;;  %v3024_v18 = vld [vmem:[#allocation5 + $0x388] sm:$0xff]   ;;  %v3040_v63 = vld [vmem:[#allocation5 + $0x3a0] sm:$0xff]  }
  0xb5   : > { %1170 = vmatprep.mubr.bf16.mxu1 %v880_v20  ;;  %v1185_v20 = vld [vmem:[%s3491_s8 + $0x40] sm:$0x77] }
  0xb6   : > { %2688 = vmatpush3.bf16.msra.mxu0 %v2983_v51  ;;  %v1693_v51 = vrot.slane %v857_v46, 3 }
  0xb7   : > { %2716 = vmatpush3.bf16.msra.mxu1 %v2984_v53  ;;  %2689 = vmatprep.subr.bf16.mxu0 %v2989_v60  ;;  %v3011_v53 = vld [vmem:[#allocation5 + $0x238] sm:$0xff]  }
  0xb8   : > { %2717 = vmatprep.subr.bf16.mxu1 %v2990_v1  ;;  %v1184_v60 = vld [vmem:[%s3491_s8 + $0x8] sm:$0x88]  ;;  %v3019_v1 = vld [vmem:[#allocation5 + $0x300] sm:$0xff]  }
  0xb9   : > { %1122 = vmatmul.mubr.bf16.gmra.mrb[12].mxu0 %v856_v21  ;;  %v3602_v46 = vcombine.low %v1184_v60, %v3513_v37  ;;  %v3605_v14 = vcombine.high %v1184_v60, %v3513_v37  ;;  %v1278_v37 = vsel %vm1272_vm1, %v1276_v48, %v1277_v40  ;;  %v3039_v48 = vld [vmem:[#allocation5 + $0x320] sm:$0xff]  }
  0xba   : > { %2690 = vmatpush3.bf16.msra.mxu0 %v2991_v6  ;;  %1171 = vmatmul.mubr.bf16.gmra.mrb[12].mxu1 %v872_v22  ;;  %v2475_v22 = vcombine.high %v1185_v20, %v1185_v20 }
  0xbb   : > { %2718 = vmatpush3.bf16.msra.mxu1 %v2992_v13  ;;  %2691 = vmatprep.subr.bf16.mxu0 %v2993_v15  ;;  %v1282_v33 = vrot.slane %v3605_v14, 3  ;;  %v1279_v2 = vrot.slane %v3602_v46, 3  ;;  %v3023_v13 = vld [vmem:[#allocation5 + $0x308] sm:$0xff]   ;;  %v1691_v15 = vrot.slane %v1689_v9, 4  ;;  %v1710_v21 = vshrl.u32 %v3605_v14, 16 }
  0xbc   : > { %2719 = vmatprep.subr.bf16.mxu1 %v2994_v23  ;;  %1525 = vmatprep.mubr.bf16.mxu0 %v1278_v37  ;;  %v1186_v23 = vld [vmem:[%s3491_s8 + $0x48] sm:$0x77]  ;;  %v1698_v26 = vshrl.u32 %v3602_v46, 16 }
  0xbd   : > { %v1284_v5 = vsel %vm1272_vm1, %v1282_v33, %v1283_v42  ;;  %v1281_v6 = vsel %vm1272_vm1, %v1279_v2, %v1280_v47  ;;  %v1701_v33 = vshll.u32 %v3602_v46, 16  ;;  %v3044_v2 = vld [vmem:[#allocation5 + $0x3a8] sm:$0xff]   ;;  %v3049_v46 = vld [vmem:[#allocation5 + $0x378] sm:$0xff]  }
  0xbe   : > { %2692 = vmatpush3.bf16.msra.mxu0 %v2995_v24  ;;  %1574 = vmatprep.mubr.bf16.mxu1 %v1284_v5  ;;  %v2474_v24 = vcombine.low %v1185_v20, %v1185_v20  ;;  %v1595_v20 = vld [vmem:[%s3491_s8 + $0x40] sm:$0xff] }
  0xbf   : > { %2720 = vmatpush3.bf16.msra.mxu1 %v2996_v25  ;;  %2693 = vmatprep.subr.bf16.mxu0 %v2997_v27  ;;  %v2477_v25 = vcombine.high %v1186_v23, %v1186_v23  ;;  %v2476_v27 = vcombine.low %v1186_v23, %v1186_v23  ;;  %v1703_v5 = vrot.slane %v1701_v33, 4  ;;  %v2510_v23 = vcombine.low %v1595_v20, %v1595_v20 }
  0xc0   : > { %2721 = vmatprep.subr.bf16.mxu1 %v2998_v28  ;;  %v3029_v28 = vld [vmem:[#allocation5 + $0x350] sm:$0xff]   ;;  %v3270_v33 = vmov 0.0  }
  0xc1   : > { %2180 = vst [vmem:[%s3675_s25] sm:$0x3] %v3270_v33 }
  0xc2   : > { %2694 = vmatpush3.bf16.msra.mxu0 %v2999_v30  ;;  %v1712_v30 = vrot.slane %v1710_v21, 3  ;;  %v2511_v21 = vcombine.high %v1595_v20, %v1595_v20  ;;  %v2385_v20 = vld [vmem:[#allocation7] ss:$0 sm:$0xff] }
  0xc3   : > { %2722 = vmatpush3.bf16.msra.mxu1 %v3000_v31  ;;  %2695 = vmatprep.subr.bf16.mxu0 %v3001_v32  ;;  %v1287_v31 = vrot.slane %v2475_v22, 3  ;;  %v1285_v32 = vrot.slane %v2474_v24, 3  ;;  %v1596_v22 = vld [vmem:[%s3491_s8 + $0x48] sm:$0xff] }
  0xc4   : > { %2723 = vmatprep.subr.bf16.mxu1 %v3002_v34  ;;  %v3030_v34 = vld [vmem:[#allocation5 + $0x3d0] sm:$0xff]  }
  0xc6   : > { %2696 = vmatpush3.bf16.msra.mxu0 %v3003_v35  ;;  %v3031_v35 = vld [vmem:[#allocation5 + $0x310] sm:$0xff]  }
  0xc7   : > { %2724 = vmatpush3.bf16.msra.mxu1 %v3004_v36  ;;  %2697 = vmatprep.subr.bf16.mxu0 %v3005_v38  ;;  %v1692_v36 = vor.u32 %v1691_v15, %v1688_v12  ;;  %v3629_v38 = vor.u32 %v1694_v54, %v1693_v51  ;;  %v3051_v15 = vld [vmem:[#allocation5 + $0x338] sm:$0xff]  }
  0xc8   : > { %2725 = vmatprep.subr.bf16.mxu1 %v3006_v39  ;;  %v1291_v39 = vrot.slane %v2477_v25, 3 }
  0xca   : > { %2698 = vmatpush3.bf16.msra.mxu0 %v3007_v41  ;;  %v1289_v41 = vrot.slane %v2476_v27, 3  ;;  %v1292_v51 = vsel %vm1272_vm1, %v1283_v42, %v1291_v39  ;;  %v3035_v42 = vld [vmem:[#allocation5 + $0x318] sm:$0xff]   ;;  %v2513_v27 = vcombine.high %v1596_v22, %v1596_v22 }
  0xcb   : > { %2726 = vmatpush3.bf16.msra.mxu1 %v3008_v43  ;;  %2699 = vmatprep.subr.bf16.mxu0 %v3009_v45  ;;  %v1288_v43 = vsel %vm1272_vm1, %v1277_v40, %v1287_v31  ;;  %v1286_v45 = vsel %vm1272_vm1, %v1274_v44, %v1285_v32  ;;  %v3034_v40 = vld [vmem:[#allocation5 + $0x3d8] sm:$0xff]   ;;  %v1696_v44 = vsel %vm1672_vm2, %v1692_v36, %v3629_v38  ;;  %v1734_v31 = vshll.u32 %v2511_v21, 16 }
  0xcc   : > { %2727 = vmatprep.subr.bf16.mxu1 %v3010_v49  ;;  %v3032_v49 = vld [vmem:[#allocation5 + $0x390] sm:$0xff]   ;;  %v1290_v54 = vsel %vm1272_vm1, %v1280_v47, %v1289_v41  ;;  %v1705_v47 = vrot.slane %v865_v52, 3  ;;  %v1674_v52 = vshrl.u32 %v3597_v58, 16  ;;  %v1722_v32 = vshrl.u32 %v2510_v23, 16 }
  0xcd   : > { %v1752_v36 = vshll.u32 %v2513_v27, 16 }
  0xce   : > { %2700 = vmatpush3.bf16.msra.mxu0 %v3011_v53  ;;  %v1713_v53 = vshll.u32 %v3605_v14, 16  ;;  %v3037_v14 = vld [vmem:[#allocation5 + $0x360] sm:$0xff]   ;;  %v1676_v29 = vrot.slane %v1674_v52, 3 }
  0xcf   : > { %2728 = vmatpush3.bf16.msra.mxu1 %v3012_v55  ;;  %2741 = vmatprep.subr.bf16.mxu0 %v3017_v61  ;;  %v3038_v61 = vld [vmem:[#allocation5 + $0x3e0] sm:$0xff]  }
  0xd0   : > { %2769 = vmatprep.subr.bf16.mxu1 %v3018_v0  ;;  %v1715_v55 = vrot.slane %v1713_v53, 4  ;;  %v1677_v0 = vshll.u32 %v3597_v58, 16  ;;  %v3047_v58 = vld [vmem:[#allocation5 + $0x330] sm:$0xff]  }
  0xd1   : > { %1526 = vmatmul.mubr.bf16.vlgmr.msra.gmra.mrb[16].mxu0 %v1275_v3  ;;  %v3045_v3 = vld [vmem:[#allocation5 + $0x370] sm:$0xff]  }
  0xd2   : > { %1575 = vmatmul.mubr.bf16.vlgmr.msra.gmra.mrb[16].mxu1 %v1281_v6  ;;  %2742 = vmatpush3.bf16.msra.mxu0 %v3019_v1  ;;  %v1716_v60 = vor.u32 %v1715_v55, %v1712_v30  ;;  %v3042_v1 = vld [vmem:[#allocation5 + $0x3e8] sm:$0xff]   ;;  %v1679_v37 = vrot.slane %v1677_v0, 4  ;;  %v3048_v6 = vld [vmem:[#allocation5 + $0x3b0] sm:$0xff]   ;;  %v1731_v30 = vshrl.u32 %v2511_v21, 16 }
  0xd3   : > { %2770 = vmatpush3.bf16.msra.mxu1 %v3020_v19  ;;  %2743 = vmatprep.subr.bf16.mxu0 %v3021_v7  ;;  %v1700_v19 = vrot.slane %v1698_v26, 3  ;;  %v3050_v7 = vld [vmem:[#allocation5 + $0x3f8] sm:$0xff]  }
  0xd4   : > { %2771 = vmatprep.subr.bf16.mxu1 %v3022_v10  ;;  %1533 = vmatprep.mubr.bf16.mxu0 %v1288_v43  ;;  %v1720_v50 = vsel %vm1672_vm2, %v1716_v60, %v3648_v56  ;;  %v1680_v9 = vor.u32 %v1679_v37, %v1676_v29  ;;  %v1683_v10 = vor.u32 %v1682_v57, %v1681_v11  ;;  %v1733_v43 = vrot.slane %v1731_v30, 3 }
  0xd5   : > { %1582 = vmatprep.mubr.bf16.mxu1 %v1292_v51  ;;  %v1704_v12 = vor.u32 %v1703_v5, %v1700_v19 }
  0xd6   : > { %2744 = vmatpush3.bf16.msra.mxu0 %v3023_v13  ;;  %v1707_v13 = vor.u32 %v1706_v62, %v1705_v47  ;;  %v1684_v24 = vsel %vm1672_vm2, %v1680_v9, %v1683_v10 }
  0xd7   : > { %2772 = vmatpush3.bf16.msra.mxu1 %v3024_v18  ;;  %2745 = vmatprep.subr.bf16.mxu0 %v3029_v28  ;;  %v3052_v18 = vld [vmem:[#allocation5 + $0x3b8] sm:$0xff]   ;;  %v2512_v28 = vcombine.low %v1596_v22, %v1596_v22 }
  0xd8   : > { %2773 = vmatprep.subr.bf16.mxu1 %v3030_v34  ;;  %v1708_v25 = vsel %vm1672_vm2, %v1704_v12, %v1707_v13  ;;  %v1725_v34 = vshll.u32 %v2510_v23, 16 }
  0xd9   : > { %1534 = vmatmul.mubr.bf16.gmra.mrb[20].mxu0 %v1286_v45  ;;  %v1740_v39 = vshrl.u32 %v2512_v28, 16  ;;  %v1743_v41 = vshll.u32 %v2512_v28, 16  ;;  %v1736_v45 = vrot.slane %v1734_v31, 4 }
  0xda   : > { %1583 = vmatmul.mubr.bf16.gmra.mrb[20].mxu1 %v1290_v54  ;;  %2746 = vmatpush3.bf16.msra.mxu0 %v3031_v35  ;;  %v1749_v35 = vshrl.u32 %v2513_v27, 16  ;;  %v1727_v53 = vrot.slane %v1725_v34, 4  ;;  %v1754_v54 = vrot.slane %v1752_v36, 4 }
  0xdb   : > { %2774 = vmatpush3.bf16.msra.mxu1 %v3032_v49  ;;  %2747 = vmatprep.subr.bf16.mxu0 %v3033_v8  ;;  %v1724_v49 = vrot.slane %v1722_v32, 3  ;;  %v1742_v8 = vrot.slane %v1740_v39, 3 }
  0xdc   : > { %2775 = vmatprep.subr.bf16.mxu1 %v3034_v40  ;;  %1989 = vmatprep.mubr.bf16.mxu0 %v1696_v44  ;;  %v1751_v51 = vrot.slane %v1749_v35, 3  ;;  %v1745_v40 = vrot.slane %v1743_v41, 4  ;;  %v1737_v44 = vor.u32 %v1736_v45, %v1733_v43 }
  0xdd   : > { %2038 = vmatprep.mubr.bf16.mxu1 %v1720_v50  ;;  %v1728_v55 = vor.u32 %v1727_v53, %v1724_v49 }
  0xde   : > { %2748 = vmatpush3.bf16.msra.mxu0 %v3035_v42  ;;  %v1755_v11 = vor.u32 %v1754_v54, %v1751_v51  ;;  %v1746_v42 = vor.u32 %v1745_v40, %v1742_v8  ;;  %v1738_v47 = vsel %vm1672_vm2, %v3629_v38, %v1737_v44 }
  0xdf   : > { %2776 = vmatpush3.bf16.msra.mxu1 %v3036_v59  ;;  %2749 = vmatprep.subr.bf16.mxu0 %v3037_v14  ;;  %v1729_v60 = vsel %vm1672_vm2, %v1683_v10, %v1728_v55 }
  0xe0   : > { %2777 = vmatprep.subr.bf16.mxu1 %v3038_v61  ;;  %v1756_v59 = vsel %vm1672_vm2, %v3648_v56, %v1755_v11  ;;  %v1747_v14 = vsel %vm1672_vm2, %v1707_v13, %v1746_v42 }
  0xe2   : > { %2750 = vmatpush3.bf16.msra.mxu0 %v3039_v48 }
  0xe3   : > { %2778 = vmatpush3.bf16.msra.mxu1 %v3040_v63  ;;  %2751 = vmatprep.subr.bf16.mxu0 %v3041_v16 }
  0xe4   : > { %2779 = vmatprep.subr.bf16.mxu1 %v3042_v1 }
  0xe6   : > { %2752 = vmatpush3.bf16.msra.mxu0 %v3043_v17 }
  0xe7   : > { %2780 = vmatpush3.bf16.msra.mxu1 %v3044_v2  ;;  %2753 = vmatprep.subr.bf16.mxu0 %v3045_v3 }
  0xe8   : > { %2781 = vmatprep.subr.bf16.mxu1 %v3046_v4 }
  0xea   : > { %2754 = vmatpush3.bf16.msra.mxu0 %v3047_v58 }
  0xeb   : > { %2782 = vmatpush3.bf16.msra.mxu1 %v3048_v6  ;;  %2755 = vmatprep.subr.bf16.mxu0 %v3049_v46 }
  0xec   : > { %2783 = vmatprep.subr.bf16.mxu1 %v3050_v7 }
  0xee   : > { %2756 = vmatpush3.bf16.msra.mxu0 %v3051_v15 }
  0xef   : > { %2784 = vmatpush3.bf16.msra.mxu1 %v3052_v18 }
  0xf1   : > { %1990 = vmatmul.mubr.bf16.vlgmr.msra.gmra.mrb[24].mxu0 %v1684_v24 }
  0xf2   : > { %2039 = vmatmul.mubr.bf16.vlgmr.msra.gmra.mrb[24].mxu1 %v1708_v25  ;;  %1997 = vmatprep.mubr.bf16.mxu0 %v1738_v47 }
  0xf3   : > { %2046 = vmatprep.mubr.bf16.mxu1 %v1756_v59 }
  0xf9   : > { %1998 = vmatmul.mubr.bf16.gmra.mrb[28].mxu0 %v1729_v60 }
  0xfa   : > { %2047 = vmatmul.mubr.bf16.gmra.mrb[28].mxu1 %v1747_v14 }
 0x164   : > { %v2589_v57 = vpop.f32.mrb[0].mxu0 }
 0x165   : > { %v2617_v61 = vpop.f32.mrb[0].mxu1  ;;  %v2590_v50 = vpop.f32.mrb[1].mxu0 }
 0x166   : > { %v2591_v62 = vadd.f32 %v2590_v50, %v2589_v57  ;;  %v2618_v48 = vpop.f32.mrb[1].mxu1  ;;  %v2592_v52 = vpop.f32.mrb[2].mxu0  ;;  %v2059_v50 = vlaneseq }
 0x167   : > { %v2619_v63 = vadd.f32 %v2618_v48, %v2617_v61  ;;  %v2620_v38 = vpop.f32.mrb[2].mxu1  ;;  %v2593_v0 = vpop.f32.mrb[3].mxu0 }
 0x168   : > { %v2594_v16 = vadd.f32 %v2593_v0, %v2592_v52  ;;  %v2621_v26 = vpop.f32.mrb[3].mxu1 }
 0x169   : > { %v665_v56 = vadd.f32 %v2619_v63, %v2591_v62  ;;  %v2622_v1 = vadd.f32 %v2621_v26, %v2620_v38 }
 0x16b   : > { %v668_v17 = vadd.f32 %v2622_v1, %v2594_v16  ;;  %v679_v31 = vadd.f32 %v2385_v20, %v665_v56  ;;  %v2060_v1 = vshrl.u32 %v2059_v50, 7 }
 0x16c   : > { %v2595_v29 = vpop.f32.mrb[4].mxu0 }
 0x16d   : > { %v2623_v2 = vpop.f32.mrb[4].mxu1  ;;  %v2596_v37 = vpop.f32.mrb[5].mxu0  ;;  %v680_v35 = vadd.f32 %v2385_v20, %v668_v17 }
 0x16e   : > { %v2597_v3 = vadd.f32 %v2596_v37, %v2595_v29  ;;  %v2624_v19 = vpop.f32.mrb[5].mxu1  ;;  %v2598_v4 = vpop.f32.mrb[6].mxu0 }
 0x16f   : > { %v2625_v5 = vadd.f32 %v2624_v19, %v2623_v2  ;;  %v2626_v58 = vpop.f32.mrb[6].mxu1  ;;  %v2599_v6 = vpop.f32.mrb[7].mxu0  ;;  %v2061_v19 = vadd.s32 8, %v2060_v1 }
 0x170   : > { %v2600_v46 = vadd.f32 %v2599_v6, %v2598_v4  ;;  %v2627_v7 = vpop.f32.mrb[7].mxu1 }
 0x171   : > { %v673_v9 = vadd.f32 %v2625_v5, %v2597_v3  ;;  %v2628_v10 = vadd.f32 %v2627_v7, %v2626_v58 }
 0x173   : > { %v676_v12 = vadd.f32 %v2628_v10, %v2600_v46  ;;  %v681_v11 = vadd.f32 %v2385_v20, %v673_v9  ;;  %v3682_v46 = vmul.u32.u64.low 2863311531, %v2060_v1  ;;  %v3683_v7 = vmul.u32.u64.high 2863311531, %v2060_v1, %v3682_v46 }
 0x175   : > { %v682_v60 = vadd.f32 %v2385_v20, %v676_v12 }
 0x184   : > { %v2645_v13 = vpop.f32.mrb[8].mxu0 }
 0x185   : > { %v2673_v15 = vpop.f32.mrb[8].mxu1  ;;  %v2646_v18 = vpop.f32.mrb[9].mxu0 }
 0x186   : > { %v2647_v21 = vadd.f32 %v2646_v18, %v2645_v13  ;;  %v2674_v22 = vpop.f32.mrb[9].mxu1  ;;  %v2648_v23 = vpop.f32.mrb[10].mxu0 }
 0x187   : > { %v2675_v24 = vadd.f32 %v2674_v22, %v2673_v15  ;;  %v2676_v25 = vpop.f32.mrb[10].mxu1  ;;  %v2649_v27 = vpop.f32.mrb[11].mxu0  ;;  %v3685_v13 = vmul.u32.u64.low 2863311531, %v2061_v19  ;;  %v3686_v15 = vmul.u32.u64.high 2863311531, %v2061_v19, %v3685_v13 }
 0x188   : > { %v2650_v28 = vadd.f32 %v2649_v27, %v2648_v23  ;;  %v2677_v30 = vpop.f32.mrb[11].mxu1 }
 0x189   : > { %v1165_v32 = vadd.f32 %v2675_v24, %v2647_v21  ;;  %v2678_v34 = vadd.f32 %v2677_v30, %v2676_v25  ;;  %v3688_v24 = vadd.s32 24, %v2060_v1 }
 0x18b   : > { %v1179_v36 = vadd.f32 %v1165_v32, %v679_v31  ;;  %v1168_v39 = vadd.f32 %v2678_v34, %v2650_v28  ;;  %v2062_v28 = vadd.s32 16, %v2060_v1  ;;  %vm2067_vm1 = vcmp.lt.s32.totalorder %v3688_v24, 30 }
 0x18c   : > { %v2651_v43 = vpop.f32.mrb[12].mxu0  ;;  %v3693_v32 = vmul.u32.u64.low 2863311531, %v3688_v24  ;;  %v3694_v34 = vmul.u32.u64.high 2863311531, %v3688_v24, %v3693_v32 }
 0x18d   : > { %v1180_v41 = vadd.f32 %v1168_v39, %v680_v35  ;;  %v2679_v45 = vpop.f32.mrb[12].mxu1  ;;  %v2652_v49 = vpop.f32.mrb[13].mxu0 }
 0x18e   : > { %v2680_v53 = vpop.f32.mrb[13].mxu1  ;;  %v2653_v51 = vadd.f32 %v2652_v49, %v2651_v43  ;;  %v2654_v8 = vpop.f32.mrb[14].mxu0  ;;  %v2085_v43 = vshrl.u32 %v3686_v15, 2 }
 0x18f   : > { %v2681_v54 = vadd.f32 %v2680_v53, %v2679_v45  ;;  %v2682_v40 = vpop.f32.mrb[14].mxu1  ;;  %v2655_v44 = vpop.f32.mrb[15].mxu0  ;;  %v2107_v53 = vshrl.u32 %v3694_v34, 2 }
 0x190   : > { %v2683_v55 = vpop.f32.mrb[15].mxu1  ;;  %v2656_v47 = vadd.f32 %v2655_v44, %v2654_v8  ;;  %v2086_v49 = vmul.u32 6, %v2085_v43 }
 0x191   : > { %v1173_v42 = vadd.f32 %v2681_v54, %v2653_v51  ;;  %v2684_v59 = vadd.f32 %v2683_v55, %v2682_v40  ;;  %v2108_v40 = vmul.u32 6, %v2107_v53 }
 0x192   : > { %v2087_v8 = vsub.s32 %v2061_v19, %v2086_v49 }
 0x193   : > { %v1181_v14 = vadd.f32 %v1173_v42, %v681_v11  ;;  %v1176_v57 = vadd.f32 %v2684_v59, %v2656_v47  ;;  %v2109_v59 = vsub.s32 %v3688_v24, %v2108_v40 }
 0x194   : > { %vm2113_vm5 = vcmp.ne.s32.totalorder %v2087_v8, 0  ;;  %vm2117_vm6 = vcmp.lt.s32.totalorder %v2087_v8, 0  ;;  %v2125_v47 = vadd.s32 6, %v2087_v8 }
 0x195   : > { %v1182_v61 = vadd.f32 %v1176_v57, %v682_v60  ;;  %vm3710_vm8 = vmand %vm2117_vm6, %vm2113_vm5  ;;  %vm2115_vm9 = vcmp.ne.s32.totalorder %v2109_v59, 0  ;;  %vm2119_vm10 = vcmp.lt.s32.totalorder %v2109_v59, 0 }
 0x196   : > { %vm3720_vm14 = vmand %vm2119_vm10, %vm2115_vm9 }
 0x1a4   : > { %v2701_v62 = vpop.f32.mrb[16].mxu0 }
 0x1a5   : > { %v2729_v48 = vpop.f32.mrb[16].mxu1  ;;  %v2702_v52 = vpop.f32.mrb[17].mxu0 }
 0x1a6   : > { %v2703_v63 = vadd.f32 %v2702_v52, %v2701_v62  ;;  %v2730_v38 = vpop.f32.mrb[17].mxu1  ;;  %v2704_v0 = vpop.f32.mrb[18].mxu0 }
 0x1a7   : > { %v2731_v16 = vadd.f32 %v2730_v38, %v2729_v48  ;;  %v2732_v26 = vpop.f32.mrb[18].mxu1  ;;  %v2705_v56 = vpop.f32.mrb[19].mxu0 }
 0x1a8   : > { %v2706_v33 = vadd.f32 %v2705_v56, %v2704_v0  ;;  %v2733_v17 = vpop.f32.mrb[19].mxu1  ;;  %v2129_v56 = vsel %vm3710_vm8, %v2125_v47, %v2087_v8 }
 0x1a9   : > { %v1577_v29 = vadd.f32 %v2731_v16, %v2703_v63  ;;  %v2734_v2 = vadd.f32 %v2733_v17, %v2732_v26  ;;  %v2127_v17 = vadd.s32 6, %v2109_v59  ;;  %vm2133_vm15 = vcmp.lt.s32.totalorder %v2129_v56, 5 }
 0x1ab   : > { %v3678_v37 = vadd.f32 %v1577_v29, %v1179_v36  ;;  %v1580_v3 = vadd.f32 %v2734_v2, %v2706_v33  ;;  %v2074_v36 = vshrl.u32 %v3683_v7, 2  ;;  %v2131_v13 = vsel %vm3720_vm14, %v2127_v17, %v2109_v59 }
 0x1ac   : > { %v2707_v5 = vpop.f32.mrb[20].mxu0  ;;  %vm2135_vm2 = vcmp.lt.s32.totalorder %v2131_v13, 5 }
 0x1ad   : > { %v3680_v4 = vadd.f32 %v1580_v3, %v1180_v41  ;;  %v2735_v58 = vpop.f32.mrb[20].mxu1  ;;  %v2708_v6 = vpop.f32.mrb[21].mxu0  ;;  %v3699_v39 = vmul.u32.u64.low 2863311531, %v2062_v28  ;;  %v3700_v41 = vmul.u32.u64.high 2863311531, %v2062_v28, %v3699_v39  ;;  %v2075_v45 = vmul.u32 6, %v2074_v36 }
 0x1ae   : > { %v2709_v9 = vadd.f32 %v2708_v6, %v2707_v5  ;;  %v2736_v10 = vpop.f32.mrb[21].mxu1  ;;  %v2710_v12 = vpop.f32.mrb[22].mxu0 }
 0x1af   : > { %v2737_v18 = vadd.f32 %v2736_v10, %v2735_v58  ;;  %v2738_v20 = vpop.f32.mrb[22].mxu1  ;;  %v2711_v21 = vpop.f32.mrb[23].mxu0  ;;  %v2076_v51 = vsub.s32 %v2060_v1, %v2075_v45  ;;  %v2096_v54 = vshrl.u32 %v3700_v41, 2 }
 0x1b0   : > { %v2712_v22 = vadd.f32 %v2711_v21, %v2710_v12  ;;  %v2739_v23 = vpop.f32.mrb[23].mxu1 }
 0x1b1   : > { %v1585_v25 = vadd.f32 %v2737_v18, %v2709_v9  ;;  %v2740_v27 = vadd.f32 %v2739_v23, %v2738_v20  ;;  %vm2112_vm3 = vcmp.ne.s32.totalorder %v2076_v51, 0  ;;  %vm2116_vm4 = vcmp.lt.s32.totalorder %v2076_v51, 0 }
 0x1b2   : > { %v2097_v44 = vmul.u32 6, %v2096_v54  ;;  %v2124_v55 = vadd.s32 6, %v2076_v51  ;;  %vm3705_vm7 = vmand %vm2116_vm4, %vm2112_vm3 }
 0x1b3   : > { %v3690_v30 = vadd.f32 %v1585_v25, %v1181_v14  ;;  %v1588_v31 = vadd.f32 %v2740_v27, %v2712_v22  ;;  %vm2139_vm4 = vmand %vm2067_vm1, %vm2135_vm2 }
 0x1b4   : > { %v2128_v63 = vsel %vm3705_vm7, %v2124_v55, %v2076_v51 }
 0x1b5   : > { %v3696_v35 = vadd.f32 %v1588_v31, %v1182_v61  ;;  %v2098_v61 = vsub.s32 %v2062_v28, %v2097_v44  ;;  %vm2132_vm13 = vcmp.lt.s32.totalorder %v2128_v63, 5 }
 0x1b7   : > { %vm2114_vm11 = vcmp.ne.s32.totalorder %v2098_v61, 0  ;;  %vm2118_vm12 = vcmp.lt.s32.totalorder %v2098_v61, 0  ;;  %v2126_v3 = vadd.s32 6, %v2098_v61 }
 0x1b8   : > { %vm3724_vm0 = vmand %vm2118_vm12, %vm2114_vm11 }
 0x1b9   : > { %v2130_v21 = vsel %vm3724_vm0, %v2126_v3, %v2098_v61 }
 0x1ba   : > { %vm2134_vm3 = vcmp.lt.s32.totalorder %v2130_v21, 5 }
 0x1c4   : > { %v2757_v11 = vpop.f32.mrb[24].mxu0 }
 0x1c5   : > { %v2785_v60 = vpop.f32.mrb[24].mxu1  ;;  %v2758_v14 = vpop.f32.mrb[25].mxu0 }
 0x1c6   : > { %v2759_v50 = vadd.f32 %v2758_v14, %v2757_v11  ;;  %v2786_v62 = vpop.f32.mrb[25].mxu1  ;;  %v2760_v48 = vpop.f32.mrb[26].mxu0 }
 0x1c7   : > { %v2787_v52 = vadd.f32 %v2786_v62, %v2785_v60  ;;  %v2788_v38 = vpop.f32.mrb[26].mxu1  ;;  %v2761_v0 = vpop.f32.mrb[27].mxu0 }
 0x1c8   : > { %v2762_v16 = vadd.f32 %v2761_v0, %v2760_v48  ;;  %v2789_v26 = vpop.f32.mrb[27].mxu1 }
 0x1c9   : > { %v2041_v1 = vadd.f32 %v2787_v52, %v2759_v50  ;;  %v2790_v33 = vadd.f32 %v2789_v26, %v2788_v38 }
 0x1cb   : > { %v2055_v29 = vadd.f32 %v2041_v1, %v3678_v37  ;;  %v2044_v2 = vadd.f32 %v2790_v33, %v2762_v16 }
 0x1cc   : > { %v2763_v5 = vpop.f32.mrb[28].mxu0 }
 0x1cd   : > { %v2148_v6 = vsel %vm2132_vm13, %v2055_v29, 0.0  ;;  %v2056_v46 = vadd.f32 %v2044_v2, %v3680_v4  ;;  %v2791_v7 = vpop.f32.mrb[28].mxu1  ;;  %v2764_v9 = vpop.f32.mrb[29].mxu0 }
 0x1ce   : > { %v2765_v10 = vadd.f32 %v2764_v9, %v2763_v5  ;;  %v2792_v37 = vpop.f32.mrb[29].mxu1  ;;  %v2766_v12 = vpop.f32.mrb[30].mxu0  ;;  %v2161_v25 = vmul.f32 %v2148_v6, %v2148_v6 }
 0x1cf   : > { %v2149_v15 = vsel %vm2133_vm15, %v2056_v46, 0.0  ;;  %v2565_v18 = vpack.c.bf16 %v2056_v46, %v2055_v29  ;;  %v2793_v20 = vadd.f32 %v2792_v37, %v2791_v7  ;;  %v2794_v22 = vpop.f32.mrb[30].mxu1  ;;  %v2767_v23 = vpop.f32.mrb[31].mxu0 }
 0x1d0   : > { %v2152_v27 = vadd.f32 %v2149_v15, %v2148_v6  ;;  %v2162_v4 = vmul.f32 %v2149_v15, %v2149_v15  ;;  %v2768_v28 = vadd.f32 %v2767_v23, %v2766_v12  ;;  %v2795_v31 = vpop.f32.mrb[31].mxu1 }
 0x1d1   : > { %2566 = vst [vmem:[%s260_s9] sm:$0xff] %v2565_v18   ;;  %v2049_v32 = vadd.f32 %v2793_v20, %v2765_v10  ;;  %v2796_v34 = vadd.f32 %v2795_v31, %v2794_v22 }
 0x1d2   : > { %v2165_v36 = vadd.f32 %v2162_v4, %v2161_v25 }
 0x1d3   : > { %v2057_v39 = vadd.f32 %v2049_v32, %v3690_v30  ;;  %v2052_v41 = vadd.f32 %v2796_v34, %v2768_v28 }
 0x1d5   : > { %v2150_v43 = vsel %vm2134_vm3, %v2057_v39, 0.0  ;;  %v2058_v45 = vadd.f32 %v2052_v41, %v3696_v35 }
 0x1d6   : > { %v2153_v49 = vadd.f32 %v2152_v27, %v2150_v43  ;;  %v2163_v53 = vmul.f32 %v2150_v43, %v2150_v43 }
 0x1d7   : > { %v2151_v24 = vsel %vm2139_vm4, %v2058_v45, 0.0  ;;  %v2570_v30 = vpack.c.bf16 %v2058_v45, %v2057_v39 }
 0x1d8   : > { %v2166_v51 = vadd.f32 %v2165_v36, %v2163_v53  ;;  %v2154_v54 = vadd.f32 %v2153_v49, %v2151_v24  ;;  %v2164_v8 = vmul.f32 %v2151_v24, %v2151_v24 }
 0x1d9   : > { %2572 = vst [vmem:[%s260_s9 + $0x8] sm:$0xff] %v2570_v30  }
 0x1da   : > { %v2155_v35 = vrot.slane %v2154_v54, 4  ;;  %v2167_v40 = vadd.f32 %v2166_v51, %v2164_v8 }
 0x1db   : > { %3156 = shalt.err (!%p3153_p2)
}
 0x1dc   : > { %s3157_s8 = scalar_lea.hbm %s3740_s29, 256  ;;  %s3161_s9 = scalar_lea.hbm %s3827_s3, 512 }
 0x1dd   : > { %p3158_p0 = scmp.ne.s32.totalorder %s3740_s29, %s3157_s8  ;;  %p3162_p6 = scmp.lt.u32.totalorder %s3740_s29, %s3827_s3 }
 0x1de   : > { %p3163_p7 = scmp.lt.u32.totalorder %s3161_s9, %s3157_s8  ;;  %p3165_p8 = scmp.lt.u32.totalorder %s3157_s8, %s3740_s29 }
 0x1df   : > { %p3159_p4 = pnand %p3158_p0, %p3851_p12 }
 0x1e0   : > { %p3164_p11 = por %p3163_p7, %p3162_p6 }
 0x1e1   : > { %p3160_p13 = pneg %p3159_p4 }
 0x1e2   : > { %p3166_p1 = por %p3165_p8, %p3164_p11 }
 0x1e4   : > { %p3167_p10 = pnand %p3166_p1, %p3160_p13 }
 0x1e6   : > { %3170 = shalt.err (!%p3167_p10)
}
 0x1e7   : > { %s3272_s24 = smov 64   ;;  %s3273_s22 = smov 4   ;;  %v2156_v44 = vadd.f32 %v2155_v35, %v2154_v54  ;;  %v2168_v55 = vrot.slane %v2167_v40, 4  ;;  %vm2174_vm5 = vcmask 1040384   ;;  %v2181_v62 = vld [vmem:[%s3675_s25] sm:$0x3] }
 0x1e8   : > { %2818 = dma.vmem_to_hbm [thread:$0]  (%p3851_p12), %s3742_s13, 256, %s3740_s29, %s2205_s5, %s3272_s24, %s3272_s24, %s3273_s22  }
 0x1e9   : > { %v2157_v11 = vrot.slane %v2156_v44, 2  ;;  %v2169_v42 = vadd.f32 %v2168_v55, %v2167_v40  ;;  %s2554_s7 = sshll.u32 %s3253_s18, 5  ;;  %s2241_s11 = sshll.u32 %s3675_s25, 4  ;;  %s3776_s11 = int_to_ptr.vmem [resolvable:$true] %s2241_s11 }
 0x1ea   : > { %s3774_s5 = scalar_lea.hbm %s3828_s4, %s2554_s7  ;;  %s2210_s12 = scalar_lea.sflag [#allocation10], %s3487_s6 }
 0x1eb   : > { %v2158_v47 = vadd.f32 %v2157_v11, %v2156_v44  ;;  %v2170_v59 = vrot.slane %v2169_v42, 2  ;;  %s3171_s8 = scalar_lea.vmem %s3776_s11, 32  ;;  %s3274_s18 = smov [#allocation9]  }
 0x1ec   : > { %p3172_p3 = scmp.ne.s32.totalorder %s3776_s11, %s3171_s8  ;;  %s3175_s23 = sshll.u32 %s3274_s18, 4  ;;  %s3176_s23 = int_to_ptr.vmem [resolvable:$false] %s3175_s23 }
 0x1ed   : > { %v2159_v60 = vrot.slane %v2158_v47, 1  ;;  %v2171_v14 = vadd.f32 %v2170_v59, %v2169_v42  ;;  %s3177_s27 = scalar_lea.vmem %s3176_s23, 64  ;;  %p3178_p2 = scmp.lt.s32.totalorder %s3776_s11, %s3176_s23 }
 0x1ee   : > { %p3173_p5 = pnand %p3172_p3, %p3851_p12  ;;  %p3179_p0 = scmp.lt.s32.totalorder %s3177_s27, %s3171_s8 }
 0x1ef   : > { %v2172_v57 = vrot.slane %v2171_v14, 1  ;;  %v2160_v61 = vadd.f32 %v2159_v60, %v2158_v47 }
 0x1f0   : > { %p3174_p9 = pneg %p3173_p5  ;;  %p3180_p4 = por %p3179_p0, %p3178_p2 }
 0x1f1   : > { %v2173_v50 = vadd.f32 %v2172_v57, %v2171_v14 }
 0x1f2   : > { %p3181_p13 = pnand %p3180_p4, %p3174_p9 }
 0x1f3   : > { %v2175_v48 = vsel %vm2174_vm5, %v2160_v61, %v2173_v50 }
 0x1f4   : > { %v2182_v52 = vadd.f32 %v2181_v62, %v2175_v48 }
 0x1f6   : > { %2183 = vst [vmem:[%s3675_s25] sm:$0x3] %v2182_v52 }
 0x1f7   : > { %3184 = shalt.err (!%p3181_p13)
}
 0x1f8   : > { %s3185_s6 = scalar_lea.hbm %s3774_s5, 32  ;;  %s3189_s14 = scalar_lea.hbm %s3828_s4, 64 }
 0x1f9   : > { %p3186_p6 = scmp.ne.s32.totalorder %s3774_s5, %s3185_s6  ;;  %p3190_p8 = scmp.lt.u32.totalorder %s3774_s5, %s3828_s4 }
 0x1fa   : > { %p3191_p1 = scmp.lt.u32.totalorder %s3189_s14, %s3185_s6  ;;  %p3193_p3 = scmp.lt.u32.totalorder %s3185_s6, %s3774_s5 }
 0x1fb   : > { %p3187_p7 = pnand %p3186_p6, %p3851_p12 }
 0x1fc   : > { %p3192_p10 = por %p3191_p1, %p3190_p8 }
 0x1fd   : > { %p3188_p11 = pneg %p3187_p7 }
 0x1fe   : > { %p3194_p5 = por %p3193_p3, %p3192_p10 }
 0x200   : > { %p3195_p9 = pnand %p3194_p5, %p3188_p11 }
 0x202   : > { %3198 = shalt.err (!%p3195_p9)
}
 0x203   : > { %2819 = dma.vmem_to_hbm [thread:$0]  (%p3851_p12), %s3776_s11, 32, %s3774_s5, %s2210_s12  }
 0x204 PF: > { %s2253_s22 = sand.u32 1, %s3241_s15   ;;  %p3852_p2 = scmp.ne.s32.totalorder %s3836_s26, 0 }
 0x205   : > { %p3853_p0 = scmp.ge.s32.totalorder %s3261_s20, 2  ;;  %s2254_s7 = scalar_lea.sflag [#allocation4], %s2253_s22 }
 0x207   : > { %p2834_p4 = pnand %p3853_p0, %p3852_p2 }
 0x209   : > { %3232 = dma.done.wait (!%p2834_p4), %s2254_s7, 256  }
 0x20a   : > { %3234 = vsyncadd (!%p2834_p4), %s2254_s7, 4294967040  ;;  %s2263_s13 = scalar_lea.sflag [#allocation10], %s2253_s22 }
 0x20b   : > { %3236 = dma.done.wait (!%p2834_p4), %s2263_s13, 32  }
 0x20c   : > { %3238 = vsyncadd (!%p2834_p4), %s2263_s13, 4294967264  ;;  %s25_s20 = sadd.s32 1, %s3261_s20   ;;  %s3854_s15 = smov %s3245_s16 }
 0x20d   : > { %p22_p13 = scmp.ge.s32.totalorder %s25_s20, 4   ;;  %s3855_s16 = smov %s3249_s17 }
 0x20e   : > { %s3856_s17 = smov %s3446_s10  ;;  %s3857_s18 = smov %s3257_s19 }
 0x20f   : > { %s3858_s19 = smov %s3860_s28  ;;  %24 = sbr.rel (!%p22_p13) target bundleno = 9 (0x9), region = 109 }
 0x216   :  { %2268 = vsyncpa [#allocation3], 1 }
 0x217   :  { %2270 = vsyncpa [#allocation3 + $0x1], 1 }
 0x218   :  { %2271 = vsyncpa [#allocation6], 1 }
 0x219   :  { %2272 = vsyncpa [#allocation4], 1 }
 0x21a   :  { %2274 = vsyncpa [#allocation4 + $0x1], 1 }
 0x21b   :  { %2275 = vsyncpa [#allocation10], 1 }
 0x21c   :  { %2277 = vsyncpa [#allocation10 + $0x1], 1 }

// kernel: _lambda_.11
= control target key start
LH: loop header
LB: loop body
LE: loop exit
PB: predicated region body
PF: predicated region fallthrough
CT: control target
= control target key end

     0   :  { %10 = vsyncpa [#allocation3], 0  ;;  %s3348_s0 = inlined_call_operand.hbm [shape: bf16[2,21,512], index: 0, kind: input, shape index: {}]   ;;  %s3349_s1 = inlined_call_operand.hbm [shape: bf16[4,512,128], index: 1, kind: input, shape index: {}]   ;;  %s3350_s2 = inlined_call_operand.hbm [shape: f32[1,128], index: 2, kind: input, shape index: {}]   ;;  %s3351_s3 = inlined_call_operand.hbm [shape: bf16[2,16,128], index: 3, kind: output, shape index: {0}]   ;;  %s3352_s4 = inlined_call_operand.hbm [shape: f32[2,2,128], index: 4, kind: output, shape index: {1}]  }
   0x1   :  { %12 = vsyncpa [#allocation3 + $0x1], 0 }
   0x2   :  { %13 = vsyncpa [#allocation6], 0 }
   0x3   :  { %14 = vsyncpa [#allocation4], 0 }
   0x4   :  { %16 = vsyncpa [#allocation4 + $0x1], 0 }
   0x5   :  { %17 = vsyncpa [#allocation10], 0 }
   0x6   :  { %19 = vsyncpa [#allocation10 + $0x1], 0  ;;  %s2966_s15 = smov 0   ;;  %s2968_s16 = smov 0  }
   0x7   :  { %s2970_s17 = smov 0   ;;  %s2972_s18 = smov 0  }
   0x8   :  { %s2974_s19 = smov 0   ;;  %s2976_s20 = smov 0  }
   0x9 LB: > { %s2119_s21 = sadd.s32 4294967295, %s2927_s20   ;;  %s2120_s22 = sadd.s32 4294967294, %s2927_s20   ;;  %s2927_s20 = sphi %s2976_s20, %s25_s20   ;;  %s2923_s19 = sphi %s2974_s19, %s3374_s19   ;;  %s2919_s18 = sphi %s2972_s18, %s3373_s18   ;;  %s2915_s17 = sphi %s2970_s17, %s3372_s17   ;;  %s2911_s16 = sphi %s2968_s16, %s3371_s16   ;;  %s2907_s15 = sphi %s2966_s15, %s3370_s15  }
   0xa   : > { %p57_p0 = scmp.ne.s32.totalorder %s2911_s16, %s2907_s15  ;;  %p3000_p1 = scmp.eq.s32.totalorder %s2119_s21, 0 }
   0xb   : > { %p3004_p2 = scmp.eq.s32.totalorder %s2119_s21, 1  ;;  %p131_p3 = scmp.eq.s32.totalorder %s2120_s22, 1 }
   0xc   : > { %s3357_s23 = scalar_select %p3000_p1, 1, 0 }
   0xd   : > { %p3010_p4 = por %p3000_p1, %p57_p0  ;;  %p2121_p5 = scmp.ge.s32.totalorder %s2927_s20, 1 }
   0xe   : > { %p3015_p6 = por %p131_p3, %p57_p0  ;;  %p164_p7 = scmp.lt.s32.totalorder %s2927_s20, 3 }
   0xf   : > { %s3359_s25 = scalar_select %p3010_p4, 1, 0 }
  0x10   : > { %s3360_s26 = scalar_select %p3015_p6, 1, 0 }
  0x11   : > { %p3020_p8 = pnand %p2121_p5, %p164_p7  ;;  %s2929_s28 = smov [#allocation5]  }
  0x12   : > { %s176_s29 = sshll.u32 %s2929_s28, 4  ;;  %s2930_s5 = smov [#allocation7]   ;;  %s3024_s29 = int_to_ptr.vmem [resolvable:$true] %s176_s29 }
  0x13   : > { %p2494_p9 = pneg %p3020_p8  ;;  %s190_s6 = sshll.u32 %s2930_s5, 4  ;;  %s3035_s6 = int_to_ptr.vmem [resolvable:$true] %s190_s6 }
  0x14   : > { %s2723_s9 = scalar_lea.hbm %s3349_s1, 16384 }
  0x15   : > { %p3031_p11 = pnand %p2494_p9, %p3000_p1  ;;  %p2724_p12 = scmp.ne.s32.totalorder %s3349_s1, %s2723_s9 }
  0x16   : > { %p2730_p5 = scmp.lt.u32.totalorder %s2723_s9, %s3349_s1 }
  0x17   : > { %p2725_p13 = pneg %p3031_p11 }
  0x19   : > { %p2726_p0 = pnand %p2725_p13, %p2724_p12 }
  0x1b   : > { %p2727_p3 = pneg %p2726_p0 }
  0x1d   : > { %p2732_p7 = pnand %p2730_p5, %p2727_p3 }
  0x1f   : > { %2735 = shalt.err (!%p2732_p7)
}
  0x20   : > { %s2736_s14 = scalar_lea.vmem %s3024_s29, 16384  ;;  %p2744_p1 = scmp.lt.s32.totalorder %s3024_s29, %s3024_s29 }
  0x21   : > { %p2737_p9 = scmp.ne.s32.totalorder %s3024_s29, %s2736_s14  ;;  %p2745_p12 = scmp.lt.s32.totalorder %s2736_s14, %s2736_s14 }
  0x23   : > { %p2739_p10 = pnand %p2737_p9, %p2725_p13  ;;  %p2746_p0 = por %p2745_p12, %p2744_p1 }
  0x25   : > { %p2740_p6 = pneg %p2739_p10 }
  0x27   : > { %p2747_p4 = pnand %p2746_p0, %p2740_p6 }
  0x29   : > { %2750 = shalt.err (!%p2747_p4)
}
  0x2a   : > { %s2931_s21 = smov 64   ;;  %s2932_s22 = smov 4  }
  0x2b   : > { %2497 = dma.hbm_to_vmem [thread:$0]  (!%p3031_p11), %s3349_s1, 16384, %s3024_s29, [#allocation6], %s2931_s21, %s2931_s21, %s2932_s22  }
  0x2c   : > { %s2751_s9 = scalar_lea.hbm %s3350_s2, 16 }
  0x2d   : > { %p2752_p1 = scmp.ne.s32.totalorder %s3350_s2, %s2751_s9  ;;  %p2758_p10 = scmp.lt.u32.totalorder %s2751_s9, %s3350_s2 }
  0x2f   : > { %p2754_p4 = pnand %p2752_p1, %p2725_p13 }
  0x31   : > { %p2755_p6 = pneg %p2754_p4 }
  0x33   : > { %p2760_p3 = pnand %p2758_p10, %p2755_p6 }
  0x35   : > { %2763 = shalt.err (!%p2760_p3)
}
  0x36   : > { %s2764_s29 = scalar_lea.vmem %s3035_s6, 16  ;;  %s2771_s14 = scalar_lea.vmem %s3035_s6, 32 }
  0x37   : > { %p2765_p5 = scmp.ne.s32.totalorder %s3035_s6, %s2764_s29  ;;  %p2772_p12 = scmp.lt.s32.totalorder %s3035_s6, %s3035_s6 }
  0x38   : > { %p2773_p0 = scmp.lt.s32.totalorder %s2771_s14, %s2764_s29 }
  0x39   : > { %p2767_p7 = pnand %p2765_p5, %p2725_p13 }
  0x3a   : > { %p2774_p1 = por %p2773_p0, %p2772_p12 }
  0x3b   : > { %p2768_p9 = pneg %p2767_p7 }
  0x3d   : > { %p2775_p4 = pnand %p2774_p1, %p2768_p9 }
  0x3f   : > { %2778 = shalt.err (!%p2775_p4)
}
  0x40   : > { %2500 = dma.hbm_to_vmem [thread:$0]  (!%p3031_p11), %s3350_s2, 16, %s3035_s6, [#allocation6]  }
  0x41   : > { %s37_s28 = sadd.s32 1, %s2923_s19  ;;  %s44_s5 = sadd.s32 1, %s2915_s17 }
  0x42   : > { %p39_p13 = scmp.ge.s32.totalorder %s37_s28, 2  ;;  %p51_p6 = scmp.ne.s32.totalorder %s2915_s17, %s2911_s16 }
  0x43   : > { %p52_p10 = scmp.eq.s32.totalorder %s2927_s20, 0  ;;  %p2514_p3 = scmp.lt.s32.totalorder %s2927_s20, 2 }
  0x44   : > { %s3376_s28 = smov (%p39_p13, %s37_s28), 0  ;;  %p3100_p7 = por %p3004_p2, %p51_p6 }
  0x45   : > { %p53_p5 = por %p52_p10, %p51_p6  ;;  %s41_s7 = ssub.s32 %s2923_s19, %s3376_s28 }
  0x46   : > { %s3363_s30 = scalar_select %p3100_p7, 1, 0 }
  0x47   : > { %s201_s8 = sand.u32 1, %s2915_s17   ;;  %p42_p9 = scmp.eq.s32.totalorder %s41_s7, 0 }
  0x48   : > { %s2477_s6 = smul.u32 48, %s201_s8  ;;  %p3107_p11 = pnand %p2514_p3, %p53_p5 }
  0x49   : > { %s3112_s10 = scalar_select %p42_p9, %s2915_s17, %s44_s5  }
  0x4a   : > { %s2478_s11 = smul.u32 768, %s2923_s19  ;;  %s205_s12 = scalar_lea.vmem [#allocation2], %s2477_s6 }
  0x4b   : > { %s212_s13 = sshll.u32 %s205_s12, 4  ;;  %s3122_s21 = scalar_lea.sflag [#allocation3], %s201_s8  ;;  %s3120_s13 = int_to_ptr.vmem [resolvable:$true] %s212_s13 }
  0x4c   : > { %s3118_s14 = scalar_lea.hbm %s3348_s0, %s2478_s11  ;;  %p2781_p12 = pneg %p3107_p11 }
  0x4d   : > { %s2779_s22 = scalar_lea.hbm %s3118_s14, 768  ;;  %s2784_s6 = scalar_lea.hbm %s3348_s0, 1536 }
  0x4e   : > { %p2780_p2 = scmp.ne.s32.totalorder %s3118_s14, %s2779_s22  ;;  %p2785_p4 = scmp.lt.u32.totalorder %s3118_s14, %s3348_s0 }
  0x4f   : > { %p2786_p13 = scmp.lt.u32.totalorder %s2784_s6, %s2779_s22  ;;  %p2788_p10 = scmp.lt.u32.totalorder %s2779_s22, %s3118_s14 }
  0x50   : > { %p2782_p0 = pnand %p2781_p12, %p2780_p2 }
  0x51   : > { %p2787_p6 = por %p2786_p13, %p2785_p4 }
  0x52   : > { %p2783_p1 = pneg %p2782_p0 }
  0x53   : > { %p2789_p3 = por %p2788_p10, %p2787_p6 }
  0x55   : > { %p2790_p5 = pnand %p2789_p3, %p2783_p1 }
  0x57   : > { %2793 = shalt.err (!%p2790_p5)
}
  0x58   : > { %s2794_s8 = scalar_lea.vmem %s3120_s13, 768  ;;  %s2933_s24 = smov [#allocation2]  }
  0x59   : > { %p2795_p9 = scmp.ne.s32.totalorder %s3120_s13, %s2794_s8  ;;  %s2799_s29 = sshll.u32 %s2933_s24, 4  ;;  %s2800_s29 = int_to_ptr.vmem [resolvable:$false] %s2799_s29 }
  0x5a   : > { %s2801_s5 = scalar_lea.vmem %s2800_s29, 1536  ;;  %p2802_p7 = scmp.lt.s32.totalorder %s3120_s13, %s2800_s29 }
  0x5b   : > { %p2797_p2 = pnand %p2795_p9, %p2781_p12  ;;  %p2803_p4 = scmp.lt.s32.totalorder %s2801_s5, %s2794_s8 }
  0x5d   : > { %p2798_p0 = pneg %p2797_p2  ;;  %p2804_p13 = por %p2803_p4, %p2802_p7 }
  0x5f   : > { %p2805_p6 = pnand %p2804_p13, %p2798_p0 }
  0x61   : > { %2808 = shalt.err (!%p2805_p6)
}
  0x62   : > { %s2934_s22 = smov 256   ;;  %s2935_s7 = smov 16  }
  0x63   : > { %2504 = dma.hbm_to_vmem [thread:$0]  (!%p3107_p11), %s3118_s14, 768, %s3120_s13, %s3122_s21, %s2934_s22, %s2934_s22, %s2935_s7  }
  0x64   : > { %224 = sbr.rel (%p3020_p8) target bundleno = 508 (0x1fc), region = 32  ;;  %s3153_s6 = sand.u32 (!%p3020_p8), 1, %s2911_s16  }
  0x65   : > { %s2479_s11 = smul.u32 (!%p3020_p8), 48, %s3153_s6  ;;  %s227_s12 = scalar_lea.sflag (!%p3020_p8), [#allocation3], %s3153_s6 }
  0x66   : > { %p3365_p7 = scmp.ne.s32.totalorder (!%p3020_p8), %s3359_s25, 0 }
  0x67   : > { %s3157_s8 = scalar_lea.vmem (!%p3020_p8), [#allocation2], %s2479_s11 }
  0x6b   : > { %2890 = dma.done.wait (%p3365_p7), %s227_s12, 768  }
  0x6c   : > { %2892 = vsyncadd (%p3365_p7), %s227_s12, 4294966528  ;;  %p3366_p11 = scmp.ne.s32.totalorder %s3357_s23, 0 }
  0x6e   : > { %2894 = dma.done.wait (%p3366_p11), [#allocation6], 16400  }
  0x6f   : > { %2896 = vsyncadd (%p3366_p11), [#allocation6], 4294950896  ;;  %v2575_v0 = vld [vmem:[#allocation5 + $0x40] sm:$0xff]   ;;  %v2579_v4 = vld [vmem:[#allocation5 + $0x48] sm:$0xff]   ;;  %vm738_vm0 = vsmask.f32 7424 }
  0x70   : > { %v2576_v1 = vld [vmem:[#allocation5 + $0xc0] sm:$0xff]   ;;  %2301 = vmatprep.subr.bf16.mxu0 %v2575_v0  ;;  %v2580_v5 = vld [vmem:[#allocation5 + $0xc8] sm:$0xff]   ;;  %v2583_v8 = vld [vmem:[#allocation5 + $0x50] sm:$0xff]   ;;  %vm1156_vm1 = vcmask 1045504   ;;  %vm1526_vm2 = vsmask.f32 5376 }
  0x71   : > { %v2577_v2 = vld [vmem:[#allocation5] sm:$0xff]   ;;  %2323 = vmatprep.subr.bf16.mxu1 %v2576_v1  ;;  %v2581_v6 = vld [vmem:[#allocation5 + $0x8] sm:$0xff]   ;;  %v2584_v9 = vld [vmem:[#allocation5 + $0xd0] sm:$0xff]   ;;  %s2130_s23 = sshll.u32 %s3153_s6, 1  ;;  %s2129_s27 = sshll.u32 %s3153_s6, 3 }
  0x72   : > { %v2578_v3 = vld [vmem:[#allocation5 + $0x80] sm:$0xff]   ;;  %2302 = vmatpush3.bf16.msra.mxu0 %v2577_v2  ;;  %v2582_v7 = vld [vmem:[#allocation5 + $0x88] sm:$0xff]   ;;  %v2585_v10 = vld [vmem:[#allocation5 + $0x10] sm:$0xff]   ;;  %s3256_s25 = scalar_lea.vmem [#allocation9], %s2130_s23  ;;  %s2295_s9 = sshll.u32 %s2919_s18, 7 }
  0x73   : > { %2324 = vmatpush3.bf16.msra.mxu1 %v2578_v3  ;;  %2303 = vmatprep.subr.bf16.mxu0 %v2579_v4  ;;  %v2586_v11 = vld [vmem:[#allocation5 + $0x90] sm:$0xff]   ;;  %v2587_v12 = vld [vmem:[#allocation5 + $0x58] sm:$0xff]   ;;  %v2591_v16 = vld [vmem:[#allocation5 + $0x60] sm:$0xff]   ;;  %s260_s13 = scalar_lea.vmem [#allocation8], %s2129_s27  ;;  %s3264_s29 = scalar_lea.hbm %s3351_s3, %s2295_s9 }
  0x74   : > { %2325 = vmatprep.subr.bf16.mxu1 %v2580_v5  ;;  %v2588_v13 = vld [vmem:[#allocation5 + $0xd8] sm:$0xff]   ;;  %v2592_v17 = vld [vmem:[#allocation5 + $0xe0] sm:$0xff]   ;;  %v2595_v20 = vld [vmem:[#allocation5 + $0x68] sm:$0xff]   ;;  %s1971_s14 = sshll.u32 %s260_s13, 4  ;;  %s1951_s5 = scalar_lea.sflag [#allocation4], %s3153_s6  ;;  %s3266_s14 = int_to_ptr.vmem [resolvable:$true] %s1971_s14 }
  0x75   : > { %v2589_v14 = vld [vmem:[#allocation5 + $0x18] sm:$0xff]   ;;  %v2593_v18 = vld [vmem:[#allocation5 + $0x20] sm:$0xff]   ;;  %v2596_v21 = vld [vmem:[#allocation5 + $0xe8] sm:$0xff]   ;;  %s2809_s22 = scalar_lea.vmem %s3266_s14, 128  ;;  %p3367_p12 = scmp.ne.s32.totalorder %s3363_s30, 0 }
  0x76   : > { %2304 = vmatpush3.bf16.msra.mxu0 %v2581_v6  ;;  %v2590_v15 = vld [vmem:[#allocation5 + $0x98] sm:$0xff]   ;;  %v2594_v19 = vld [vmem:[#allocation5 + $0xa0] sm:$0xff]   ;;  %v2597_v22 = vld [vmem:[#allocation5 + $0x28] sm:$0xff]   ;;  %p2810_p8 = scmp.ne.s32.totalorder %s3266_s14, %s2809_s22  ;;  %s2937_s7 = smov [#allocation8]  }
  0x77   : > { %2326 = vmatpush3.bf16.msra.mxu1 %v2582_v7  ;;  %2305 = vmatprep.subr.bf16.mxu0 %v2583_v8  ;;  %v2598_v23 = vld [vmem:[#allocation5 + $0xa8] sm:$0xff]   ;;  %v2599_v24 = vld [vmem:[#allocation5 + $0x70] sm:$0xff]   ;;  %v2603_v28 = vld [vmem:[#allocation5 + $0x78] sm:$0xff]   ;;  %s2813_s11 = sshll.u32 %s2937_s7, 4  ;;  %s2814_s11 = int_to_ptr.vmem [resolvable:$false] %s2813_s11 }
  0x78   : > { %2327 = vmatprep.subr.bf16.mxu1 %v2584_v9  ;;  %v2600_v25 = vld [vmem:[#allocation5 + $0xf0] sm:$0xff]   ;;  %v2604_v29 = vld [vmem:[#allocation5 + $0xf8] sm:$0xff]   ;;  %v2611_v40 = vld [vmem:[#allocation5 + $0x140] sm:$0xff]   ;;  %p2811_p1 = pnand %p2810_p8, %p3367_p12  ;;  %s2815_s12 = scalar_lea.vmem %s2814_s11, 256 }
  0x79   : > { %v2601_v26 = vld [vmem:[#allocation5 + $0x30] sm:$0xff]   ;;  %v2605_v30 = vld [vmem:[#allocation5 + $0x38] sm:$0xff]   ;;  %v2612_v41 = vld [vmem:[#allocation5 + $0x1c0] sm:$0xff]   ;;  %p2816_p3 = scmp.lt.s32.totalorder %s3266_s14, %s2814_s11  ;;  %p2817_p5 = scmp.lt.s32.totalorder %s2815_s12, %s2809_s22 }
  0x7a   : > { %2306 = vmatpush3.bf16.msra.mxu0 %v2585_v10  ;;  %v2602_v27 = vld [vmem:[#allocation5 + $0xb0] sm:$0xff]   ;;  %v2606_v31 = vld [vmem:[#allocation5 + $0xb8] sm:$0xff]   ;;  %v2613_v42 = vld [vmem:[#allocation5 + $0x100] sm:$0xff]   ;;  %p2812_p10 = pneg %p2811_p1 }
  0x7b   : > { %2328 = vmatpush3.bf16.msra.mxu1 %v2586_v11  ;;  %2307 = vmatprep.subr.bf16.mxu0 %v2587_v12  ;;  %v277_v32 = vld [vmem:[%s3157_s8] sm:$0xff]  ;;  %v3169_v33 = vld [vmem:[%s3157_s8 + $0x10] sm:$0xff]  ;;  %v278_v34 = vld [vmem:[%s3157_s8 + $0x8] sm:$0xff]  ;;  %p2818_p9 = por %p2817_p5, %p2816_p3 }
  0x7c   : > { %2329 = vmatprep.subr.bf16.mxu1 %v2588_v13  ;;  %v3173_v35 = vcombine.low %v277_v32, %v3169_v33  ;;  %v3176_v36 = vcombine.high %v277_v32, %v3169_v33  ;;  %v3179_v37 = vld [vmem:[%s3157_s8 + $0x18] sm:$0xff]  ;;  %v2614_v43 = vld [vmem:[#allocation5 + $0x180] sm:$0xff]   ;;  %v2619_v48 = vld [vmem:[#allocation5 + $0x150] sm:$0xff]  }
  0x7d   : > { %v3182_v38 = vcombine.low %v278_v34, %v3179_v37  ;;  %v3185_v39 = vcombine.high %v278_v34, %v3179_v37  ;;  %v2615_v44 = vld [vmem:[#allocation5 + $0x148] sm:$0xff]   ;;  %v2620_v49 = vld [vmem:[#allocation5 + $0x1d0] sm:$0xff]   ;;  %v2623_v52 = vld [vmem:[#allocation5 + $0x158] sm:$0xff]   ;;  %p2819_p2 = pnand %p2818_p9, %p2812_p10 }
  0x7e   : > { %2308 = vmatpush3.bf16.msra.mxu0 %v2589_v14  ;;  %589 = vmatprep.mubr.bf16.mxu0 %v3176_v36  ;;  %v2616_v45 = vld [vmem:[#allocation5 + $0x1c8] sm:$0xff]   ;;  %v2621_v50 = vld [vmem:[#allocation5 + $0x110] sm:$0xff]   ;;  %v2624_v53 = vld [vmem:[#allocation5 + $0x1d8] sm:$0xff]   ;;  %v754_v58 = vshll.u32 %v3176_v36, 16  ;;  %v752_v61 = vshrl.u32 %v3176_v36, 16  ;;  %v740_v5 = vshrl.u32 %v3173_v35, 16 }
  0x7f   : > { %2330 = vmatpush3.bf16.msra.mxu1 %v2590_v15  ;;  %2309 = vmatprep.subr.bf16.mxu0 %v2591_v16  ;;  %v2617_v46 = vld [vmem:[#allocation5 + $0x108] sm:$0xff]   ;;  %v2622_v51 = vld [vmem:[#allocation5 + $0x190] sm:$0xff]   ;;  %v2625_v54 = vld [vmem:[#allocation5 + $0x118] sm:$0xff]   ;;  %v776_v63 = vshrl.u32 %v3185_v39, 16  ;;  %v778_v3 = vshll.u32 %v3185_v39, 16  ;;  %v742_v7 = vshll.u32 %v3173_v35, 16 }
  0x80   : > { %2331 = vmatprep.subr.bf16.mxu1 %v2592_v17  ;;  %630 = vmatprep.mubr.bf16.mxu1 %v3185_v39  ;;  %v2618_v47 = vld [vmem:[#allocation5 + $0x188] sm:$0xff]   ;;  %v2626_v55 = vld [vmem:[#allocation5 + $0x198] sm:$0xff]   ;;  %v2627_v56 = vld [vmem:[#allocation5 + $0x160] sm:$0xff]   ;;  %v756_v1 = vrot.slane %v754_v58, 1  ;;  %v766_v9 = vshll.u32 %v3182_v38, 16  ;;  %v764_v13 = vshrl.u32 %v3182_v38, 16 }
  0x81   : > { %v2628_v57 = vld [vmem:[#allocation5 + $0x1e0] sm:$0xff]   ;;  %v2631_v62 = vld [vmem:[#allocation5 + $0x168] sm:$0xff]   ;;  %v2635_v6 = vld [vmem:[#allocation5 + $0x170] sm:$0xff]   ;;  %v780_v11 = vrot.slane %v778_v3, 1  ;;  %v744_v15 = vrot.slane %v742_v7, 1 }
  0x82   : > { %2310 = vmatpush3.bf16.msra.mxu0 %v2593_v18  ;;  %v2629_v59 = vld [vmem:[#allocation5 + $0x120] sm:$0xff]   ;;  %v2632_v0 = vld [vmem:[#allocation5 + $0x1e8] sm:$0xff]   ;;  %v2636_v8 = vld [vmem:[#allocation5 + $0x1f0] sm:$0xff]   ;;  %v768_v17 = vrot.slane %v766_v9, 1 }
  0x83   : > { %2332 = vmatpush3.bf16.msra.mxu1 %v2594_v19  ;;  %2311 = vmatprep.subr.bf16.mxu0 %v2595_v20  ;;  %v2630_v60 = vld [vmem:[#allocation5 + $0x1a0] sm:$0xff]   ;;  %v2633_v2 = vld [vmem:[#allocation5 + $0x128] sm:$0xff]   ;;  %v2637_v10 = vld [vmem:[#allocation5 + $0x130] sm:$0xff]  }
  0x84   : > { %2333 = vmatprep.subr.bf16.mxu1 %v2596_v21  ;;  %v2634_v4 = vld [vmem:[#allocation5 + $0x1a8] sm:$0xff]   ;;  %v2638_v12 = vld [vmem:[#allocation5 + $0x1b0] sm:$0xff]   ;;  %v2639_v14 = vld [vmem:[#allocation5 + $0x178] sm:$0xff]  }
  0x85   : > { %v2640_v16 = vld [vmem:[#allocation5 + $0x1f8] sm:$0xff]   ;;  %v645_v20 = vld [vmem:[%s3157_s8 + $0x20] sm:$0x11]  ;;  %v2670_v3 = vld [vmem:[#allocation5 + $0x2a8] sm:$0xff]  }
  0x86   : > { %2312 = vmatpush3.bf16.msra.mxu0 %v2597_v22  ;;  %v2641_v18 = vld [vmem:[#allocation5 + $0x138] sm:$0xff]   ;;  %v2173_v22 = vcombine.high %v645_v20, %v645_v20  ;;  %v2674_v7 = vld [vmem:[#allocation5 + $0x2b0] sm:$0xff]  }
  0x87   : > { %2334 = vmatpush3.bf16.msra.mxu1 %v2598_v23  ;;  %2313 = vmatprep.subr.bf16.mxu0 %v2599_v24  ;;  %v2642_v19 = vld [vmem:[#allocation5 + $0x1b8] sm:$0xff]   ;;  %v2172_v24 = vcombine.low %v645_v20, %v645_v20 }
  0x88   : > { %2335 = vmatprep.subr.bf16.mxu1 %v2600_v25  ;;  %v646_v21 = vld [vmem:[%s3157_s8 + $0x28] sm:$0x11]  ;;  %v759_v32 = vshll.u32 %v2173_v22, 16 }
  0x89   : > { %v2175_v23 = vcombine.high %v646_v21, %v646_v21  ;;  %v2174_v25 = vcombine.low %v646_v21, %v646_v21  ;;  %v2661_v58 = vld [vmem:[#allocation5 + $0x218] sm:$0xff]  }
  0x8a   : > { %2314 = vmatpush3.bf16.msra.mxu0 %v2601_v26  ;;  %v2647_v26 = vld [vmem:[#allocation5 + $0x240] sm:$0xff]   ;;  %v761_v39 = vrot.slane %v759_v32, 1  ;;  %v2676_v9 = vld [vmem:[#allocation5 + $0x2f8] sm:$0xff]  }
  0x8b   : > { %2336 = vmatpush3.bf16.msra.mxu1 %v2602_v27  ;;  %2315 = vmatprep.subr.bf16.mxu0 %v2603_v28  ;;  %v757_v27 = vor.u32 %v756_v1, %v752_v61  ;;  %v781_v28 = vor.u32 %v780_v11, %v776_v63  ;;  %v783_v34 = vshll.u32 %v2175_v23, 16  ;;  %v771_v36 = vshll.u32 %v2174_v25, 16  ;;  %v2664_v61 = vld [vmem:[#allocation5 + $0x2e0] sm:$0xff]   ;;  %v2668_v1 = vld [vmem:[#allocation5 + $0x2e8] sm:$0xff]   ;;  %v2678_v11 = vld [vmem:[#allocation5 + $0x2b8] sm:$0xff]  }
  0x8c   : > { %2337 = vmatprep.subr.bf16.mxu1 %v2604_v29  ;;  %v745_v29 = vor.u32 %v744_v15, %v740_v5  ;;  %v2666_v63 = vld [vmem:[#allocation5 + $0x2a0] sm:$0xff]   ;;  %v2672_v5 = vld [vmem:[#allocation5 + $0x2f0] sm:$0xff]  }
  0x8d   : > { %v2687_v23 = vld [vmem:[#allocation5 + $0x340] sm:$0xff]  }
  0x8e   : > { %2316 = vmatpush3.bf16.msra.mxu0 %v2605_v30  ;;  %v769_v30 = vor.u32 %v768_v17, %v764_v13  ;;  %v1069_v13 = vld [vmem:[%s3157_s8 + $0x20] sm:$0x33]  ;;  %v1070_v17 = vld [vmem:[%s3157_s8 + $0x28] sm:$0x33] }
  0x8f   : > { %2338 = vmatpush3.bf16.msra.mxu1 %v2606_v31  ;;  %2345 = vmatprep.subr.bf16.mxu0 %v2611_v40  ;;  %v2648_v31 = vld [vmem:[#allocation5 + $0x2c0] sm:$0xff]   ;;  %v785_v40 = vrot.slane %v783_v34, 1  ;;  %v2213_v15 = vcombine.high %v1069_v13, %v1069_v13  ;;  %v2215_v20 = vcombine.high %v1070_v17, %v1070_v17  ;;  %v2212_v21 = vcombine.low %v1069_v13, %v1069_v13 }
  0x90   : > { %2367 = vmatprep.subr.bf16.mxu1 %v2612_v41  ;;  %v2689_v34 = vld [vmem:[#allocation5 + $0x300] sm:$0xff]  }
  0x91   : > { %590 = vmatmul.mubr.bf16.vlgmr.msra.gmra.mrb[0].mxu0 %v3173_v35  ;;  %v747_v35 = vshll.u32 %v2172_v24, 16  ;;  %v1161_v25 = vrot.slane %v2213_v15, 2 }
  0x92   : > { %631 = vmatmul.mubr.bf16.vlgmr.msra.gmra.mrb[0].mxu1 %v3182_v38  ;;  %2346 = vmatpush3.bf16.msra.mxu0 %v2613_v42  ;;  %v2649_v38 = vld [vmem:[#allocation5 + $0x200] sm:$0xff]   ;;  %v773_v42 = vrot.slane %v771_v36, 1 }
  0x93   : > { %2368 = vmatpush3.bf16.msra.mxu1 %v2614_v43  ;;  %2347 = vmatprep.subr.bf16.mxu0 %v2615_v44  ;;  %v749_v41 = vrot.slane %v747_v35, 1  ;;  %v2650_v43 = vld [vmem:[#allocation5 + $0x280] sm:$0xff]   ;;  %v762_v44 = vsel %vm738_vm0, %v757_v27, %v761_v39  ;;  %v2214_v27 = vcombine.low %v1070_v17, %v1070_v17 }
  0x94   : > { %2369 = vmatprep.subr.bf16.mxu1 %v2616_v45  ;;  %v786_v45 = vsel %vm738_vm0, %v781_v28, %v785_v40  ;;  %1015 = vmatprep.mubr.bf16.mxu0 %v762_v44  ;;  %v2688_v28 = vld [vmem:[#allocation5 + $0x3c0] sm:$0xff]   ;;  %v2691_v40 = vld [vmem:[#allocation5 + $0x348] sm:$0xff]   ;;  %v2695_v44 = vld [vmem:[#allocation5 + $0x350] sm:$0xff]  }
  0x95   : > { %1056 = vmatprep.mubr.bf16.mxu1 %v786_v45  ;;  %v2696_v45 = vld [vmem:[#allocation5 + $0x3d0] sm:$0xff]  }
  0x96   : > { %2348 = vmatpush3.bf16.msra.mxu0 %v2617_v46  ;;  %v750_v46 = vsel %vm738_vm0, %v745_v29, %v749_v41  ;;  %v1167_v29 = vrot.slane %v2215_v20, 2  ;;  %v2692_v41 = vld [vmem:[#allocation5 + $0x3c8] sm:$0xff]   ;;  %v1449_v20 = vld [vmem:[%s3157_s8 + $0x20] sm:$0x77] }
  0x97   : > { %2370 = vmatpush3.bf16.msra.mxu1 %v2618_v47  ;;  %2349 = vmatprep.subr.bf16.mxu0 %v2619_v48  ;;  %v774_v47 = vsel %vm738_vm0, %v769_v30, %v773_v42  ;;  %v2651_v48 = vld [vmem:[#allocation5 + $0x248] sm:$0xff]   ;;  %v1158_v30 = vrot.slane %v2212_v21, 2  ;;  %v2249_v21 = vcombine.high %v1449_v20, %v1449_v20 }
  0x98   : > { %2371 = vmatprep.subr.bf16.mxu1 %v2620_v49  ;;  %v2652_v49 = vld [vmem:[#allocation5 + $0x2c8] sm:$0xff]  }
  0x99   : > { %v2693_v42 = vld [vmem:[#allocation5 + $0x308] sm:$0xff]  }
  0x9a   : > { %2350 = vmatpush3.bf16.msra.mxu0 %v2621_v50  ;;  %v2653_v50 = vld [vmem:[#allocation5 + $0x208] sm:$0xff]  }
  0x9b   : > { %2372 = vmatpush3.bf16.msra.mxu1 %v2622_v51  ;;  %2351 = vmatprep.subr.bf16.mxu0 %v2623_v52  ;;  %v2654_v51 = vld [vmem:[#allocation5 + $0x288] sm:$0xff]   ;;  %v2655_v52 = vld [vmem:[#allocation5 + $0x250] sm:$0xff]  }
  0x9c   : > { %2373 = vmatprep.subr.bf16.mxu1 %v2624_v53  ;;  %v2656_v53 = vld [vmem:[#allocation5 + $0x2d0] sm:$0xff]  }
  0x9e   : > { %2352 = vmatpush3.bf16.msra.mxu0 %v2625_v54  ;;  %v2657_v54 = vld [vmem:[#allocation5 + $0x210] sm:$0xff]  }
  0x9f   : > { %2374 = vmatpush3.bf16.msra.mxu1 %v2626_v55  ;;  %2353 = vmatprep.subr.bf16.mxu0 %v2627_v56  ;;  %v2658_v55 = vld [vmem:[#allocation5 + $0x290] sm:$0xff]   ;;  %v2659_v56 = vld [vmem:[#allocation5 + $0x258] sm:$0xff]  }
  0xa0   : > { %2375 = vmatprep.subr.bf16.mxu1 %v2628_v57  ;;  %v2660_v57 = vld [vmem:[#allocation5 + $0x2d8] sm:$0xff]  }
  0xa2   : > { %2354 = vmatpush3.bf16.msra.mxu0 %v2629_v59  ;;  %v2662_v59 = vld [vmem:[#allocation5 + $0x298] sm:$0xff]  }
  0xa3   : > { %2376 = vmatpush3.bf16.msra.mxu1 %v2630_v60  ;;  %2355 = vmatprep.subr.bf16.mxu0 %v2631_v62  ;;  %v2663_v60 = vld [vmem:[#allocation5 + $0x260] sm:$0xff]  }
  0xa4   : > { %2377 = vmatprep.subr.bf16.mxu1 %v2632_v0  ;;  %v2665_v62 = vld [vmem:[#allocation5 + $0x220] sm:$0xff]   ;;  %v2667_v0 = vld [vmem:[#allocation5 + $0x268] sm:$0xff]  }
  0xa6   : > { %2356 = vmatpush3.bf16.msra.mxu0 %v2633_v2  ;;  %v2669_v2 = vld [vmem:[#allocation5 + $0x228] sm:$0xff]  }
  0xa7   : > { %2378 = vmatpush3.bf16.msra.mxu1 %v2634_v4  ;;  %2357 = vmatprep.subr.bf16.mxu0 %v2635_v6  ;;  %v2671_v4 = vld [vmem:[#allocation5 + $0x270] sm:$0xff]  }
  0xa8   : > { %2379 = vmatprep.subr.bf16.mxu1 %v2636_v8  ;;  %v2673_v6 = vld [vmem:[#allocation5 + $0x230] sm:$0xff]   ;;  %v2675_v8 = vld [vmem:[#allocation5 + $0x278] sm:$0xff]  }
  0xaa   : > { %2358 = vmatpush3.bf16.msra.mxu0 %v2637_v10  ;;  %v2677_v10 = vld [vmem:[#allocation5 + $0x238] sm:$0xff]  }
  0xab   : > { %2380 = vmatpush3.bf16.msra.mxu1 %v2638_v12  ;;  %2359 = vmatprep.subr.bf16.mxu0 %v2639_v14  ;;  %v1067_v12 = vld [vmem:[%s3157_s8] sm:$0xcc] }
  0xac   : > { %2381 = vmatprep.subr.bf16.mxu1 %v2640_v16  ;;  %v3208_v14 = vcombine.high %v1067_v12, %v3169_v33  ;;  %v1068_v16 = vld [vmem:[%s3157_s8 + $0x8] sm:$0xcc] }
  0xad   : > { %v3219_v22 = vcombine.low %v1068_v16, %v3179_v37 }
  0xae   : > { %2360 = vmatpush3.bf16.msra.mxu0 %v2641_v18  ;;  %v3213_v18 = vcombine.low %v1067_v12, %v3169_v33  ;;  %v1160_v24 = vrot.slane %v3208_v14, 2  ;;  %v2714_v12 = vld [vmem:[#allocation5 + $0x3b0] sm:$0xff]  }
  0xaf   : > { %2382 = vmatpush3.bf16.msra.mxu1 %v2642_v19  ;;  %2389 = vmatprep.subr.bf16.mxu0 %v2647_v26  ;;  %v3216_v19 = vcombine.high %v1068_v16, %v3179_v37  ;;  %v1164_v37 = vrot.slane %v2214_v27, 2  ;;  %v2716_v16 = vld [vmem:[#allocation5 + $0x3f8] sm:$0xff]  }
  0xb0   : > { %2411 = vmatprep.subr.bf16.mxu1 %v2648_v31  ;;  %v1157_v26 = vrot.slane %v3213_v18, 2  ;;  %v1163_v31 = vrot.slane %v3219_v22, 2  ;;  %v1162_v32 = vsel %vm1156_vm1, %v1160_v24, %v1161_v25  ;;  %v2248_v25 = vcombine.low %v1449_v20, %v1449_v20 }
  0xb1   : > { %1016 = vmatmul.mubr.bf16.vlgmr.msra.gmra.mrb[4].mxu0 %v750_v46  ;;  %v1166_v33 = vrot.slane %v3216_v19, 2  ;;  %v2697_v46 = vld [vmem:[#allocation5 + $0x310] sm:$0xff]  }
  0xb2   : > { %1057 = vmatmul.mubr.bf16.vlgmr.msra.gmra.mrb[4].mxu1 %v774_v47  ;;  %2390 = vmatpush3.bf16.msra.mxu0 %v2649_v38  ;;  %v1159_v36 = vsel %vm1156_vm1, %v1157_v26, %v1158_v30  ;;  %v2690_v38 = vld [vmem:[#allocation5 + $0x380] sm:$0xff]   ;;  %v1165_v39 = vsel %vm1156_vm1, %v1163_v31, %v1164_v37  ;;  %v2698_v47 = vld [vmem:[#allocation5 + $0x390] sm:$0xff]   ;;  %v1556_v30 = vshll.u32 %v2249_v21, 16  ;;  %v1536_v31 = vshrl.u32 %v2248_v25, 16 }
  0xb3   : > { %2412 = vmatpush3.bf16.msra.mxu1 %v2650_v43  ;;  %2391 = vmatprep.subr.bf16.mxu0 %v2651_v48  ;;  %v1168_v35 = vsel %vm1156_vm1, %v1166_v33, %v1167_v29  ;;  %v2694_v43 = vld [vmem:[#allocation5 + $0x388] sm:$0xff]   ;;  %v2699_v48 = vld [vmem:[#allocation5 + $0x358] sm:$0xff]   ;;  %v1553_v29 = vshrl.u32 %v2249_v21, 16 }
  0xb4   : > { %2413 = vmatprep.subr.bf16.mxu1 %v2652_v49  ;;  %1397 = vmatprep.mubr.bf16.mxu0 %v1162_v32  ;;  %v2700_v49 = vld [vmem:[#allocation5 + $0x3d8] sm:$0xff]   ;;  %v1539_v32 = vshll.u32 %v2248_v25, 16 }
  0xb5   : > { %1438 = vmatprep.mubr.bf16.mxu1 %v1168_v35 }
  0xb6   : > { %2392 = vmatpush3.bf16.msra.mxu0 %v2653_v50  ;;  %v2701_v50 = vld [vmem:[#allocation5 + $0x318] sm:$0xff]  }
  0xb7   : > { %2414 = vmatpush3.bf16.msra.mxu1 %v2654_v51  ;;  %2393 = vmatprep.subr.bf16.mxu0 %v2655_v52  ;;  %v1545_v51 = vshrl.u32 %v3208_v14, 16  ;;  %v2702_v52 = vld [vmem:[#allocation5 + $0x398] sm:$0xff]  }
  0xb8   : > { %2415 = vmatprep.subr.bf16.mxu1 %v2656_v53  ;;  %v1548_v53 = vshll.u32 %v3208_v14, 16  ;;  %v2715_v14 = vld [vmem:[#allocation5 + $0x378] sm:$0xff]  }
  0xba   : > { %2394 = vmatpush3.bf16.msra.mxu0 %v2657_v54  ;;  %v2703_v54 = vld [vmem:[#allocation5 + $0x360] sm:$0xff]  }
  0xbb   : > { %2416 = vmatpush3.bf16.msra.mxu1 %v2658_v55  ;;  %2395 = vmatprep.subr.bf16.mxu0 %v2659_v56  ;;  %v1579_v55 = vshrl.u32 %v3216_v19, 16  ;;  %v2704_v56 = vld [vmem:[#allocation5 + $0x3e0] sm:$0xff]  }
  0xbc   : > { %2417 = vmatprep.subr.bf16.mxu1 %v2660_v57  ;;  %v1582_v57 = vshll.u32 %v3216_v19, 16  ;;  %v2718_v19 = vld [vmem:[#allocation5 + $0x3b8] sm:$0xff]  }
  0xbe   : > { %2396 = vmatpush3.bf16.msra.mxu0 %v2661_v58  ;;  %v2705_v58 = vld [vmem:[#allocation5 + $0x320] sm:$0xff]  }
  0xbf   : > { %2418 = vmatpush3.bf16.msra.mxu1 %v2662_v59  ;;  %2397 = vmatprep.subr.bf16.mxu0 %v2663_v60  ;;  %v3233_v59 = vrot.slane %v1545_v51, 2  ;;  %v2706_v60 = vld [vmem:[#allocation5 + $0x3a0] sm:$0xff]  }
  0xc0   : > { %2419 = vmatprep.subr.bf16.mxu1 %v2664_v61  ;;  %v3235_v61 = vrot.slane %v1548_v53, 3 }
  0xc2   : > { %2398 = vmatpush3.bf16.msra.mxu0 %v2665_v62  ;;  %v2707_v62 = vld [vmem:[#allocation5 + $0x368] sm:$0xff]  }
  0xc3   : > { %2420 = vmatpush3.bf16.msra.mxu1 %v2666_v63  ;;  %2399 = vmatprep.subr.bf16.mxu0 %v2667_v0  ;;  %v3237_v63 = vrot.slane %v1579_v55, 2  ;;  %v2708_v0 = vld [vmem:[#allocation5 + $0x3e8] sm:$0xff]  }
  0xc4   : > { %2421 = vmatprep.subr.bf16.mxu1 %v2668_v1  ;;  %v3239_v1 = vrot.slane %v1582_v57, 3  ;;  %v2936_v57 = vmov 0.0  }
  0xc5   : > { %1936 = vst [vmem:[%s3256_s25] sm:$0x3] %v2936_v57 }
  0xc6   : > { %2400 = vmatpush3.bf16.msra.mxu0 %v2669_v2  ;;  %v2709_v2 = vld [vmem:[#allocation5 + $0x328] sm:$0xff]   ;;  %v1585_v24 = vor.u32 %v3239_v1, %v3237_v63 }
  0xc7   : > { %2422 = vmatpush3.bf16.msra.mxu1 %v2670_v3  ;;  %2401 = vmatprep.subr.bf16.mxu0 %v2671_v4  ;;  %v1528_v3 = vshrl.u32 %v3213_v18, 16  ;;  %v2710_v4 = vld [vmem:[#allocation5 + $0x3a8] sm:$0xff]  }
  0xc8   : > { %2423 = vmatprep.subr.bf16.mxu1 %v2672_v5  ;;  %v1531_v5 = vshll.u32 %v3213_v18, 16  ;;  %v2717_v18 = vld [vmem:[#allocation5 + $0x338] sm:$0xff]  }
  0xca   : > { %2402 = vmatpush3.bf16.msra.mxu0 %v2673_v6  ;;  %v2711_v6 = vld [vmem:[#allocation5 + $0x370] sm:$0xff]   ;;  %v1533_v13 = vrot.slane %v1531_v5, 3 }
  0xcb   : > { %2424 = vmatpush3.bf16.msra.mxu1 %v2674_v7  ;;  %2403 = vmatprep.subr.bf16.mxu0 %v2675_v8  ;;  %v1562_v7 = vshrl.u32 %v3219_v22, 16  ;;  %v2712_v8 = vld [vmem:[#allocation5 + $0x3f0] sm:$0xff]  }
  0xcc   : > { %2425 = vmatprep.subr.bf16.mxu1 %v2676_v9  ;;  %v1565_v9 = vshll.u32 %v3219_v22, 16  ;;  %v1551_v22 = vor.u32 %v3235_v61, %v3233_v59 }
  0xcd   : > { %v1564_v15 = vrot.slane %v1562_v7, 2  ;;  %v2131_v7 = vld [vmem:[#allocation7] ss:$0 sm:$0xff] }
  0xce   : > { %2404 = vmatpush3.bf16.msra.mxu0 %v2677_v10  ;;  %v2713_v10 = vld [vmem:[#allocation5 + $0x330] sm:$0xff]   ;;  %v1567_v17 = vrot.slane %v1565_v9, 3 }
  0xcf   : > { %2426 = vmatpush3.bf16.msra.mxu1 %v2678_v11  ;;  %2433 = vmatprep.subr.bf16.mxu0 %v2687_v23  ;;  %v1530_v11 = vrot.slane %v1528_v3, 2  ;;  %v1450_v23 = vld [vmem:[%s3157_s8 + $0x28] sm:$0x77] }
  0xd0   : > { %2455 = vmatprep.subr.bf16.mxu1 %v2688_v28  ;;  %v2251_v26 = vcombine.high %v1450_v23, %v1450_v23  ;;  %v2250_v28 = vcombine.low %v1450_v23, %v1450_v23  ;;  %v1568_v33 = vor.u32 %v1567_v17, %v1564_v15 }
  0xd1   : > { %1398 = vmatmul.mubr.bf16.vlgmr.msra.gmra.mrb[8].mxu0 %v1159_v36  ;;  %v1534_v27 = vor.u32 %v1533_v13, %v1530_v11 }
  0xd2   : > { %1439 = vmatmul.mubr.bf16.vlgmr.msra.gmra.mrb[8].mxu1 %v1165_v39  ;;  %2434 = vmatpush3.bf16.msra.mxu0 %v2689_v34  ;;  %v1587_v37 = vshrl.u32 %v2251_v26, 16  ;;  %v1590_v34 = vshll.u32 %v2251_v26, 16  ;;  %v1570_v35 = vshrl.u32 %v2250_v28, 16  ;;  %v1573_v36 = vshll.u32 %v2250_v28, 16 }
  0xd3   : > { %2456 = vmatpush3.bf16.msra.mxu1 %v2690_v38  ;;  %2435 = vmatprep.subr.bf16.mxu0 %v2691_v40  ;;  %v1555_v38 = vrot.slane %v1553_v29, 2  ;;  %v1558_v39 = vrot.slane %v1556_v30, 3  ;;  %v1538_v40 = vrot.slane %v1536_v31, 2 }
  0xd4   : > { %2457 = vmatprep.subr.bf16.mxu1 %v2692_v41  ;;  %v1541_v41 = vrot.slane %v1539_v32, 3 }
  0xd6   : > { %2436 = vmatpush3.bf16.msra.mxu0 %v2693_v42  ;;  %v1589_v42 = vrot.slane %v1587_v37, 2 }
  0xd7   : > { %2458 = vmatpush3.bf16.msra.mxu1 %v2694_v43  ;;  %2437 = vmatprep.subr.bf16.mxu0 %v2695_v44  ;;  %v1592_v43 = vrot.slane %v1590_v34, 3  ;;  %v1572_v44 = vrot.slane %v1570_v35, 2 }
  0xd8   : > { %2459 = vmatprep.subr.bf16.mxu1 %v2696_v45  ;;  %v1575_v45 = vrot.slane %v1573_v36, 3 }
  0xda   : > { %2438 = vmatpush3.bf16.msra.mxu0 %v2697_v46  ;;  %v1559_v46 = vor.u32 %v1558_v39, %v1555_v38 }
  0xdb   : > { %2460 = vmatpush3.bf16.msra.mxu1 %v2698_v47  ;;  %2439 = vmatprep.subr.bf16.mxu0 %v2699_v48  ;;  %v1542_v47 = vor.u32 %v1541_v41, %v1538_v40  ;;  %v1593_v48 = vor.u32 %v1592_v43, %v1589_v42  ;;  %v1875_v40 = vlaneseq }
  0xdc   : > { %2461 = vmatprep.subr.bf16.mxu1 %v2700_v49  ;;  %v1576_v49 = vor.u32 %v1575_v45, %v1572_v44 }
  0xdd   : > { %v1543_v51 = vsel %vm1526_vm2, %v1534_v27, %v1542_v47  ;;  %v1876_v41 = vshrl.u32 %v1875_v40, 7 }
  0xde   : > { %2440 = vmatpush3.bf16.msra.mxu0 %v2701_v50  ;;  %v1560_v50 = vsel %vm1526_vm2, %v1551_v22, %v1559_v46  ;;  %v1577_v53 = vsel %vm1526_vm2, %v1568_v33, %v1576_v49 }
  0xdf   : > { %2462 = vmatpush3.bf16.msra.mxu1 %v2702_v52  ;;  %2441 = vmatprep.subr.bf16.mxu0 %v2703_v54  ;;  %v1594_v52 = vsel %vm1526_vm2, %v1585_v24, %v1593_v48  ;;  %v1877_v42 = vadd.s32 8, %v1876_v41  ;;  %v1884_v49 = vand.u32 3, %v1876_v41 }
  0xe0   : > { %2463 = vmatprep.subr.bf16.mxu1 %v2704_v56  ;;  %1823 = vmatprep.mubr.bf16.mxu0 %v1560_v50 }
  0xe1   : > { %1864 = vmatprep.mubr.bf16.mxu1 %v1594_v52  ;;  %v1891_v46 = vand.u32 3, %v1877_v42  ;;  %vm1879_vm3 = vcmp.lt.s32.totalorder %v1877_v42, 12  ;;  %vm1904_vm5 = vcmp.lt.s32.totalorder %v1884_v49, 3 }
  0xe2   : > { %2442 = vmatpush3.bf16.msra.mxu0 %v2705_v58 }
  0xe3   : > { %2464 = vmatpush3.bf16.msra.mxu1 %v2706_v60  ;;  %2443 = vmatprep.subr.bf16.mxu0 %v2707_v62  ;;  %vm1905_vm4 = vcmp.lt.s32.totalorder %v1891_v46, 3 }
  0xe4   : > { %2465 = vmatprep.subr.bf16.mxu1 %v2708_v0  ;;  %vm1907_vm6 = vmand %vm1879_vm3, %vm1905_vm4 }
  0xe6   : > { %2444 = vmatpush3.bf16.msra.mxu0 %v2709_v2 }
  0xe7   : > { %2466 = vmatpush3.bf16.msra.mxu1 %v2710_v4  ;;  %2445 = vmatprep.subr.bf16.mxu0 %v2711_v6 }
  0xe8   : > { %2467 = vmatprep.subr.bf16.mxu1 %v2712_v8 }
  0xea   : > { %2446 = vmatpush3.bf16.msra.mxu0 %v2713_v10 }
  0xeb   : > { %2468 = vmatpush3.bf16.msra.mxu1 %v2714_v12  ;;  %2447 = vmatprep.subr.bf16.mxu0 %v2715_v14 }
  0xec   : > { %2469 = vmatprep.subr.bf16.mxu1 %v2716_v16 }
  0xee   : > { %2448 = vmatpush3.bf16.msra.mxu0 %v2717_v18 }
  0xef   : > { %2470 = vmatpush3.bf16.msra.mxu1 %v2718_v19 }
  0xf1   : > { %1824 = vmatmul.mubr.bf16.vlgmr.msra.gmra.mrb[12].mxu0 %v1543_v51 }
  0xf2   : > { %1865 = vmatmul.mubr.bf16.vlgmr.msra.gmra.mrb[12].mxu1 %v1577_v53 }
 0x164   : > { %v2317_v54 = vpop.f32.mrb[0].mxu0 }
 0x165   : > { %v2339_v55 = vpop.f32.mrb[0].mxu1  ;;  %v2318_v56 = vpop.f32.mrb[1].mxu0 }
 0x166   : > { %v2319_v58 = vadd.f32 %v2318_v56, %v2317_v54  ;;  %v2340_v59 = vpop.f32.mrb[1].mxu1  ;;  %v2320_v60 = vpop.f32.mrb[2].mxu0 }
 0x167   : > { %v2341_v61 = vadd.f32 %v2340_v59, %v2339_v55  ;;  %v2342_v62 = vpop.f32.mrb[2].mxu1  ;;  %v2321_v63 = vpop.f32.mrb[3].mxu0 }
 0x168   : > { %v2322_v0 = vadd.f32 %v2321_v63, %v2320_v60  ;;  %v2343_v1 = vpop.f32.mrb[3].mxu1 }
 0x169   : > { %v633_v2 = vadd.f32 %v2341_v61, %v2319_v58  ;;  %v2344_v3 = vadd.f32 %v2343_v1, %v2342_v62 }
 0x16b   : > { %v636_v4 = vadd.f32 %v2344_v3, %v2322_v0  ;;  %v639_v16 = vadd.f32 %v2131_v7, %v633_v2 }
 0x16d   : > { %v640_v20 = vadd.f32 %v2131_v7, %v636_v4 }
 0x184   : > { %v2361_v5 = vpop.f32.mrb[4].mxu0 }
 0x185   : > { %v2383_v6 = vpop.f32.mrb[4].mxu1  ;;  %v2362_v8 = vpop.f32.mrb[5].mxu0 }
 0x186   : > { %v2384_v9 = vpop.f32.mrb[5].mxu1  ;;  %v2363_v10 = vadd.f32 %v2362_v8, %v2361_v5  ;;  %v2364_v12 = vpop.f32.mrb[6].mxu0 }
 0x187   : > { %v2385_v11 = vadd.f32 %v2384_v9, %v2383_v6  ;;  %v2386_v13 = vpop.f32.mrb[6].mxu1  ;;  %v2365_v14 = vpop.f32.mrb[7].mxu0 }
 0x188   : > { %v2387_v15 = vpop.f32.mrb[7].mxu1  ;;  %v2366_v18 = vadd.f32 %v2365_v14, %v2364_v12 }
 0x189   : > { %v1059_v17 = vadd.f32 %v2385_v11, %v2363_v10  ;;  %v2388_v19 = vadd.f32 %v2387_v15, %v2386_v13 }
 0x18b   : > { %v1065_v21 = vadd.f32 %v1059_v17, %v639_v16  ;;  %v1062_v22 = vadd.f32 %v2388_v19, %v2366_v18 }
 0x18d   : > { %v1066_v23 = vadd.f32 %v1062_v22, %v640_v20 }
 0x1a4   : > { %v2405_v24 = vpop.f32.mrb[8].mxu0 }
 0x1a5   : > { %v2427_v25 = vpop.f32.mrb[8].mxu1  ;;  %v2406_v26 = vpop.f32.mrb[9].mxu0 }
 0x1a6   : > { %v2407_v27 = vadd.f32 %v2406_v26, %v2405_v24  ;;  %v2428_v28 = vpop.f32.mrb[9].mxu1  ;;  %v2408_v33 = vpop.f32.mrb[10].mxu0 }
 0x1a7   : > { %v2429_v29 = vadd.f32 %v2428_v28, %v2427_v25  ;;  %v2430_v30 = vpop.f32.mrb[10].mxu1  ;;  %v2409_v31 = vpop.f32.mrb[11].mxu0 }
 0x1a8   : > { %v2410_v32 = vadd.f32 %v2409_v31, %v2408_v33  ;;  %v2431_v37 = vpop.f32.mrb[11].mxu1 }
 0x1a9   : > { %v1441_v34 = vadd.f32 %v2429_v29, %v2407_v27  ;;  %v2432_v35 = vadd.f32 %v2431_v37, %v2430_v30 }
 0x1ab   : > { %v1447_v36 = vadd.f32 %v1441_v34, %v1065_v21  ;;  %v1444_v38 = vadd.f32 %v2432_v35, %v2410_v32 }
 0x1ad   : > { %v1448_v39 = vadd.f32 %v1444_v38, %v1066_v23 }
 0x1c4   : > { %v2449_v43 = vpop.f32.mrb[12].mxu0 }
 0x1c5   : > { %v2471_v44 = vpop.f32.mrb[12].mxu1  ;;  %v2450_v45 = vpop.f32.mrb[13].mxu0 }
 0x1c6   : > { %v2451_v47 = vadd.f32 %v2450_v45, %v2449_v43  ;;  %v2472_v48 = vpop.f32.mrb[13].mxu1  ;;  %v2452_v50 = vpop.f32.mrb[14].mxu0 }
 0x1c7   : > { %v2473_v51 = vadd.f32 %v2472_v48, %v2471_v44  ;;  %v2474_v52 = vpop.f32.mrb[14].mxu1  ;;  %v2453_v53 = vpop.f32.mrb[15].mxu0 }
 0x1c8   : > { %v2454_v54 = vadd.f32 %v2453_v53, %v2452_v50  ;;  %v2475_v55 = vpop.f32.mrb[15].mxu1 }
 0x1c9   : > { %v1867_v56 = vadd.f32 %v2473_v51, %v2451_v47  ;;  %v2476_v57 = vadd.f32 %v2475_v55, %v2474_v52 }
 0x1cb   : > { %v1873_v58 = vadd.f32 %v1867_v56, %v1447_v36  ;;  %v1870_v59 = vadd.f32 %v2476_v57, %v2454_v54 }
 0x1cd   : > { %v1912_v60 = vsel %vm1904_vm5, %v1873_v58, 0.0  ;;  %v1874_v61 = vadd.f32 %v1870_v59, %v1448_v39 }
 0x1ce   : > { %v1921_v0 = vmul.f32 %v1912_v60, %v1912_v60 }
 0x1cf   : > { %v1913_v62 = vsel %vm1907_vm6, %v1874_v61, 0.0  ;;  %v2299_v63 = vpack.c.bf16 %v1874_v61, %v1873_v58 }
 0x1d0   : > { %v1914_v1 = vadd.f32 %v1913_v62, %v1912_v60  ;;  %v1922_v2 = vmul.f32 %v1913_v62, %v1913_v62 }
 0x1d1   : > { %2300 = vst [vmem:[%s260_s13] sm:$0xff] %v2299_v63  }
 0x1d2   : > { %v1915_v3 = vrot.slane %v1914_v1, 4  ;;  %v1923_v4 = vadd.f32 %v1922_v2, %v1921_v0 }
 0x1d3   : > { %2822 = shalt.err (!%p2819_p2)
}
 0x1d4   : > { %s2823_s8 = scalar_lea.hbm %s3264_s29, 128  ;;  %s2827_s9 = scalar_lea.hbm %s3351_s3, 256 }
 0x1d5   : > { %p2824_p0 = scmp.ne.s32.totalorder %s3264_s29, %s2823_s8  ;;  %p2828_p6 = scmp.lt.u32.totalorder %s3264_s29, %s3351_s3 }
 0x1d6   : > { %p2829_p7 = scmp.lt.u32.totalorder %s2827_s9, %s2823_s8  ;;  %p2831_p8 = scmp.lt.u32.totalorder %s2823_s8, %s3264_s29 }
 0x1d7   : > { %p2825_p4 = pnand %p2824_p0, %p3367_p12 }
 0x1d8   : > { %p2830_p11 = por %p2829_p7, %p2828_p6 }
 0x1d9   : > { %p2826_p13 = pneg %p2825_p4 }
 0x1da   : > { %p2832_p1 = por %p2831_p8, %p2830_p11 }
 0x1dc   : > { %p2833_p10 = pnand %p2832_p1, %p2826_p13 }
 0x1de   : > { %2836 = shalt.err (!%p2833_p10)
}
 0x1df   : > { %s2938_s24 = smov 64   ;;  %s2939_s22 = smov 4   ;;  %v1916_v5 = vadd.f32 %v1915_v3, %v1914_v1  ;;  %v1924_v6 = vrot.slane %v1923_v4, 4  ;;  %vm1930_vm7 = vcmask 1040384   ;;  %v1937_v16 = vld [vmem:[%s3256_s25] sm:$0x3] }
 0x1e0   : > { %2490 = dma.vmem_to_hbm [thread:$0]  (%p3367_p12), %s3266_s14, 128, %s3264_s29, %s1951_s5, %s2938_s24, %s2938_s24, %s2939_s22  }
 0x1e1   : > { %v1917_v7 = vrot.slane %v1916_v5, 2  ;;  %v1925_v8 = vadd.f32 %v1924_v6, %v1923_v4  ;;  %s2290_s7 = sshll.u32 %s2919_s18, 5  ;;  %s1987_s11 = sshll.u32 %s3256_s25, 4  ;;  %s3300_s11 = int_to_ptr.vmem [resolvable:$true] %s1987_s11 }
 0x1e2   : > { %s3298_s5 = scalar_lea.hbm %s3352_s4, %s2290_s7  ;;  %s1956_s12 = scalar_lea.sflag [#allocation10], %s3153_s6 }
 0x1e3   : > { %v1918_v9 = vadd.f32 %v1917_v7, %v1916_v5  ;;  %v1926_v10 = vrot.slane %v1925_v8, 2  ;;  %s2837_s8 = scalar_lea.vmem %s3300_s11, 32  ;;  %s2940_s18 = smov [#allocation9]  }
 0x1e4   : > { %p2838_p3 = scmp.ne.s32.totalorder %s3300_s11, %s2837_s8  ;;  %s2841_s23 = sshll.u32 %s2940_s18, 4  ;;  %s2842_s23 = int_to_ptr.vmem [resolvable:$false] %s2841_s23 }
 0x1e5   : > { %v1919_v11 = vrot.slane %v1918_v9, 1  ;;  %v1927_v12 = vadd.f32 %v1926_v10, %v1925_v8  ;;  %s2843_s27 = scalar_lea.vmem %s2842_s23, 64  ;;  %p2844_p2 = scmp.lt.s32.totalorder %s3300_s11, %s2842_s23 }
 0x1e6   : > { %p2839_p5 = pnand %p2838_p3, %p3367_p12  ;;  %p2845_p0 = scmp.lt.s32.totalorder %s2843_s27, %s2837_s8 }
 0x1e7   : > { %v1928_v13 = vrot.slane %v1927_v12, 1  ;;  %v1920_v14 = vadd.f32 %v1919_v11, %v1918_v9 }
 0x1e8   : > { %p2840_p9 = pneg %p2839_p5  ;;  %p2846_p4 = por %p2845_p0, %p2844_p2 }
 0x1e9   : > { %v1929_v15 = vadd.f32 %v1928_v13, %v1927_v12 }
 0x1ea   : > { %p2847_p13 = pnand %p2846_p4, %p2840_p9 }
 0x1eb   : > { %v1931_v17 = vsel %vm1930_vm7, %v1920_v14, %v1929_v15 }
 0x1ec   : > { %v1938_v18 = vadd.f32 %v1937_v16, %v1931_v17 }
 0x1ee   : > { %1939 = vst [vmem:[%s3256_s25] sm:$0x3] %v1938_v18 }
 0x1ef   : > { %2850 = shalt.err (!%p2847_p13)
}
 0x1f0   : > { %s2851_s6 = scalar_lea.hbm %s3298_s5, 32  ;;  %s2855_s13 = scalar_lea.hbm %s3352_s4, 64 }
 0x1f1   : > { %p2852_p6 = scmp.ne.s32.totalorder %s3298_s5, %s2851_s6  ;;  %p2856_p8 = scmp.lt.u32.totalorder %s3298_s5, %s3352_s4 }
 0x1f2   : > { %p2857_p1 = scmp.lt.u32.totalorder %s2855_s13, %s2851_s6  ;;  %p2859_p3 = scmp.lt.u32.totalorder %s2851_s6, %s3298_s5 }
 0x1f3   : > { %p2853_p7 = pnand %p2852_p6, %p3367_p12 }
 0x1f4   : > { %p2858_p10 = por %p2857_p1, %p2856_p8 }
 0x1f5   : > { %p2854_p11 = pneg %p2853_p7 }
 0x1f6   : > { %p2860_p5 = por %p2859_p3, %p2858_p10 }
 0x1f8   : > { %p2861_p9 = pnand %p2860_p5, %p2854_p11 }
 0x1fa   : > { %2864 = shalt.err (!%p2861_p9)
}
 0x1fb   : > { %2491 = dma.vmem_to_hbm [thread:$0]  (%p3367_p12), %s3300_s11, 32, %s3298_s5, %s1956_s12  }
 0x1fc PF: > { %s1999_s22 = sand.u32 1, %s2907_s15   ;;  %p3368_p2 = scmp.ne.s32.totalorder %s3360_s26, 0 }
 0x1fd   : > { %p3369_p0 = scmp.ge.s32.totalorder %s2927_s20, 2  ;;  %s2000_s7 = scalar_lea.sflag [#allocation4], %s1999_s22 }
 0x1ff   : > { %p2506_p4 = pnand %p3369_p0, %p3368_p2 }
 0x201   : > { %2898 = dma.done.wait (!%p2506_p4), %s2000_s7, 128  }
 0x202   : > { %2900 = vsyncadd (!%p2506_p4), %s2000_s7, 4294967168  ;;  %s2009_s14 = scalar_lea.sflag [#allocation10], %s1999_s22 }
 0x203   : > { %2902 = dma.done.wait (!%p2506_p4), %s2009_s14, 32  }
 0x204   : > { %2904 = vsyncadd (!%p2506_p4), %s2009_s14, 4294967264  ;;  %s25_s20 = sadd.s32 1, %s2927_s20   ;;  %s3370_s15 = smov %s2911_s16 }
 0x205   : > { %p22_p13 = scmp.ge.s32.totalorder %s25_s20, 4   ;;  %s3371_s16 = smov %s2915_s17 }
 0x206   : > { %s3372_s17 = smov %s3112_s10  ;;  %s3373_s18 = smov %s2923_s19 }
 0x207   : > { %s3374_s19 = smov %s3376_s28  ;;  %24 = sbr.rel (!%p22_p13) target bundleno = 9 (0x9), region = 109 }
 0x20e   :  { %2014 = vsyncpa [#allocation3], 1 }
 0x20f   :  { %2016 = vsyncpa [#allocation3 + $0x1], 1 }
 0x210   :  { %2017 = vsyncpa [#allocation6], 1 }
 0x211   :  { %2018 = vsyncpa [#allocation4], 1 }
 0x212   :  { %2020 = vsyncpa [#allocation4 + $0x1], 1 }
 0x213   :  { %2021 = vsyncpa [#allocation10], 1 }
 0x214   :  { %2023 = vsyncpa [#allocation10 + $0x1], 1 }

// kernel: _lambda_.13
= control target key start
LH: loop header
LB: loop body
LE: loop exit
PB: predicated region body
PF: predicated region fallthrough
CT: control target
= control target key end

     0   :  { %10 = vsyncpa [#allocation3], 0  ;;  %s4646_s0 = inlined_call_operand.hbm [shape: bf16[2,56,128], index: 0, kind: input, shape index: {}]   ;;  %s4647_s1 = inlined_call_operand.hbm [shape: bf16[16,128,128], index: 1, kind: input, shape index: {}]   ;;  %s4648_s2 = inlined_call_operand.hbm [shape: f32[1,128], index: 2, kind: input, shape index: {}]   ;;  %s4649_s3 = inlined_call_operand.hbm [shape: bf16[2,32,128], index: 3, kind: output, shape index: {0}]   ;;  %s4650_s4 = inlined_call_operand.hbm [shape: f32[2,2,128], index: 4, kind: output, shape index: {1}]  }
   0x1   :  { %12 = vsyncpa [#allocation3 + $0x1], 0 }
   0x2   :  { %13 = vsyncpa [#allocation6], 0 }
   0x3   :  { %14 = vsyncpa [#allocation4], 0 }
   0x4   :  { %16 = vsyncpa [#allocation4 + $0x1], 0 }
   0x5   :  { %17 = vsyncpa [#allocation10], 0 }
   0x6   :  { %19 = vsyncpa [#allocation10 + $0x1], 0  ;;  %s4082_s15 = smov 0   ;;  %s4084_s16 = smov 0  }
   0x7   :  { %s4086_s17 = smov 0   ;;  %s4088_s18 = smov 0  }
   0x8   :  { %s4090_s19 = smov 0   ;;  %s4092_s20 = smov 0  }
   0x9 LB: > { %s2835_s21 = sadd.s32 4294967295, %s4044_s20   ;;  %s2836_s22 = sadd.s32 4294967294, %s4044_s20   ;;  %s4044_s20 = sphi %s4092_s20, %s25_s20   ;;  %s4040_s19 = sphi %s4090_s19, %s4682_s19   ;;  %s4036_s18 = sphi %s4088_s18, %s4681_s18   ;;  %s4032_s17 = sphi %s4086_s17, %s4680_s17   ;;  %s4028_s16 = sphi %s4084_s16, %s4679_s16   ;;  %s4024_s15 = sphi %s4082_s15, %s4678_s15  }
   0xa   : > { %p57_p0 = scmp.ne.s32.totalorder %s4028_s16, %s4024_s15  ;;  %p4116_p1 = scmp.eq.s32.totalorder %s2835_s21, 0 }
   0xb   : > { %p4120_p2 = scmp.eq.s32.totalorder %s2835_s21, 1  ;;  %p131_p3 = scmp.eq.s32.totalorder %s2836_s22, 1 }
   0xc   : > { %s4656_s23 = scalar_select %p4116_p1, 1, 0 }
   0xd   : > { %p4126_p4 = por %p4116_p1, %p57_p0  ;;  %p2837_p5 = scmp.ge.s32.totalorder %s4044_s20, 1 }
   0xe   : > { %p4131_p6 = por %p131_p3, %p57_p0  ;;  %p164_p7 = scmp.lt.s32.totalorder %s4044_s20, 3 }
   0xf   : > { %s4658_s25 = scalar_select %p4126_p4, 1, 0 }
  0x10   : > { %s4659_s26 = scalar_select %p4131_p6, 1, 0 }
  0x11   : > { %p4136_p8 = pnand %p2837_p5, %p164_p7  ;;  %s4046_s28 = smov [#allocation5]  }
  0x12   : > { %s176_s29 = sshll.u32 %s4046_s28, 4  ;;  %s4047_s5 = smov [#allocation7]   ;;  %s4140_s29 = int_to_ptr.vmem [resolvable:$true] %s176_s29 }
  0x13   : > { %p3601_p9 = pneg %p4136_p8  ;;  %s190_s6 = sshll.u32 %s4047_s5, 4  ;;  %s4151_s6 = int_to_ptr.vmem [resolvable:$true] %s190_s6 }
  0x14   : > { %s3840_s9 = scalar_lea.hbm %s4647_s1, 16384 }
  0x15   : > { %p4147_p11 = pnand %p3601_p9, %p4116_p1  ;;  %p3841_p12 = scmp.ne.s32.totalorder %s4647_s1, %s3840_s9 }
  0x16   : > { %p3847_p5 = scmp.lt.u32.totalorder %s3840_s9, %s4647_s1 }
  0x17   : > { %p3842_p13 = pneg %p4147_p11 }
  0x19   : > { %p3843_p0 = pnand %p3842_p13, %p3841_p12 }
  0x1b   : > { %p3844_p3 = pneg %p3843_p0 }
  0x1d   : > { %p3849_p7 = pnand %p3847_p5, %p3844_p3 }
  0x1f   : > { %3852 = shalt.err (!%p3849_p7)
}
  0x20   : > { %s3853_s14 = scalar_lea.vmem %s4140_s29, 16384  ;;  %p3861_p1 = scmp.lt.s32.totalorder %s4140_s29, %s4140_s29 }
  0x21   : > { %p3854_p9 = scmp.ne.s32.totalorder %s4140_s29, %s3853_s14  ;;  %p3862_p12 = scmp.lt.s32.totalorder %s3853_s14, %s3853_s14 }
  0x23   : > { %p3856_p10 = pnand %p3854_p9, %p3842_p13  ;;  %p3863_p0 = por %p3862_p12, %p3861_p1 }
  0x25   : > { %p3857_p6 = pneg %p3856_p10 }
  0x27   : > { %p3864_p4 = pnand %p3863_p0, %p3857_p6 }
  0x29   : > { %3867 = shalt.err (!%p3864_p4)
}
  0x2a   : > { %s4654_s21 = smov 64   ;;  %s4049_s22 = smov 4  }
  0x2b   : > { %3604 = dma.hbm_to_vmem [thread:$0]  (!%p4147_p11), %s4647_s1, 16384, %s4140_s29, [#allocation6], %s4654_s21, %s4654_s21, %s4049_s22  }
  0x2c   : > { %s3868_s9 = scalar_lea.hbm %s4648_s2, 16 }
  0x2d   : > { %p3869_p1 = scmp.ne.s32.totalorder %s4648_s2, %s3868_s9  ;;  %p3875_p10 = scmp.lt.u32.totalorder %s3868_s9, %s4648_s2 }
  0x2f   : > { %p3871_p4 = pnand %p3869_p1, %p3842_p13 }
  0x31   : > { %p3872_p6 = pneg %p3871_p4 }
  0x33   : > { %p3877_p3 = pnand %p3875_p10, %p3872_p6 }
  0x35   : > { %3880 = shalt.err (!%p3877_p3)
}
  0x36   : > { %s3881_s29 = scalar_lea.vmem %s4151_s6, 16  ;;  %s3888_s14 = scalar_lea.vmem %s4151_s6, 32 }
  0x37   : > { %p3882_p5 = scmp.ne.s32.totalorder %s4151_s6, %s3881_s29  ;;  %p3889_p12 = scmp.lt.s32.totalorder %s4151_s6, %s4151_s6 }
  0x38   : > { %p3890_p0 = scmp.lt.s32.totalorder %s3888_s14, %s3881_s29 }
  0x39   : > { %p3884_p7 = pnand %p3882_p5, %p3842_p13 }
  0x3a   : > { %p3891_p1 = por %p3890_p0, %p3889_p12 }
  0x3b   : > { %p3885_p9 = pneg %p3884_p7 }
  0x3d   : > { %p3892_p4 = pnand %p3891_p1, %p3885_p9 }
  0x3f   : > { %3895 = shalt.err (!%p3892_p4)
}
  0x40   : > { %3607 = dma.hbm_to_vmem [thread:$0]  (!%p4147_p11), %s4648_s2, 16, %s4151_s6, [#allocation6]  }
  0x41   : > { %s37_s7 = sadd.s32 1, %s4040_s19  ;;  %s44_s8 = sadd.s32 1, %s4032_s17 }
  0x42   : > { %p39_p13 = scmp.ge.s32.totalorder %s37_s7, 2  ;;  %p51_p6 = scmp.ne.s32.totalorder %s4032_s17, %s4028_s16 }
  0x43   : > { %p52_p10 = scmp.eq.s32.totalorder %s4044_s20, 0  ;;  %p3621_p3 = scmp.lt.s32.totalorder %s4044_s20, 2 }
  0x44   : > { %s4684_s7 = smov (%p39_p13, %s37_s7), 0  ;;  %p4219_p7 = por %p4120_p2, %p51_p6 }
  0x45   : > { %p53_p5 = por %p52_p10, %p51_p6  ;;  %s41_s9 = ssub.s32 %s4040_s19, %s4684_s7 }
  0x46   : > { %s4662_s30 = scalar_select %p4219_p7, 1, 0 }
  0x47   : > { %s201_s10 = sand.u32 1, %s4032_s17   ;;  %p42_p9 = scmp.eq.s32.totalorder %s41_s9, 0 }
  0x48   : > { %s3576_s6 = smul.u32 28, %s201_s10  ;;  %p4226_p11 = pnand %p3621_p3, %p53_p5 }
  0x49   : > { %s4231_s12 = scalar_select %p42_p9, %s4032_s17, %s44_s8  }
  0x4a   : > { %s3577_s13 = smul.u32 448, %s4040_s19  ;;  %s205_s29 = scalar_lea.vmem [#allocation2], %s3576_s6 }
  0x4b   : > { %s212_s14 = sshll.u32 %s205_s29, 4  ;;  %s4241_s9 = scalar_lea.sflag [#allocation3], %s201_s10  ;;  %s4239_s14 = int_to_ptr.vmem [resolvable:$true] %s212_s14 }
  0x4c   : > { %s4237_s5 = scalar_lea.hbm %s4646_s0, %s3577_s13  ;;  %p3898_p12 = pneg %p4226_p11 }
  0x4d   : > { %s3896_s21 = scalar_lea.hbm %s4237_s5, 448  ;;  %s3901_s13 = scalar_lea.hbm %s4646_s0, 896 }
  0x4e   : > { %p3897_p2 = scmp.ne.s32.totalorder %s4237_s5, %s3896_s21  ;;  %p3902_p4 = scmp.lt.u32.totalorder %s4237_s5, %s4646_s0 }
  0x4f   : > { %p3903_p13 = scmp.lt.u32.totalorder %s3901_s13, %s3896_s21  ;;  %p3905_p10 = scmp.lt.u32.totalorder %s3896_s21, %s4237_s5 }
  0x50   : > { %p3899_p0 = pnand %p3898_p12, %p3897_p2 }
  0x51   : > { %p3904_p6 = por %p3903_p13, %p3902_p4 }
  0x52   : > { %p3900_p1 = pneg %p3899_p0 }
  0x53   : > { %p3906_p3 = por %p3905_p10, %p3904_p6 }
  0x55   : > { %p3907_p5 = pnand %p3906_p3, %p3900_p1 }
  0x57   : > { %3910 = shalt.err (!%p3907_p5)
}
  0x58   : > { %s3911_s10 = scalar_lea.vmem %s4239_s14, 448  ;;  %s4050_s28 = smov [#allocation2]  }
  0x59   : > { %p3912_p9 = scmp.ne.s32.totalorder %s4239_s14, %s3911_s10  ;;  %s3916_s8 = sshll.u32 %s4050_s28, 4  ;;  %s3917_s8 = int_to_ptr.vmem [resolvable:$false] %s3916_s8 }
  0x5a   : > { %s3918_s6 = scalar_lea.vmem %s3917_s8, 896  ;;  %p3919_p7 = scmp.lt.s32.totalorder %s4239_s14, %s3917_s8 }
  0x5b   : > { %p3914_p2 = pnand %p3912_p9, %p3898_p12  ;;  %p3920_p4 = scmp.lt.s32.totalorder %s3918_s6, %s3911_s10 }
  0x5d   : > { %p3915_p0 = pneg %p3914_p2  ;;  %p3921_p13 = por %p3920_p4, %p3919_p7 }
  0x5f   : > { %p3922_p6 = pnand %p3921_p13, %p3915_p0 }
  0x61   : > { %3925 = shalt.err (!%p3922_p6)
}
  0x62   : > { %s4664_s21 = smov 64   ;;  %224 = sbr.rel (%p4136_p8) target bundleno = 634 (0x27a), region = 32 }
  0x63   : > { %3611 = dma.hbm_to_vmem [thread:$0]  (!%p4226_p11), %s4237_s5, 448, %s4239_s14, %s4241_s9, %s4664_s21, %s4664_s21, %s4049_s22  }
  0x64   : > { %s4275_s13 = sand.u32 (!%p4136_p8), 1, %s4028_s16   ;;  %p4665_p7 = scmp.ne.s32.totalorder (!%p4136_p8), %s4658_s25, 0 }
  0x65   : > { %s3578_s29 = smul.u32 (!%p4136_p8), 28, %s4275_s13  ;;  %s227_s24 = scalar_lea.sflag (!%p4136_p8), [#allocation3], %s4275_s13 }
  0x67   : > { %s4279_s10 = scalar_lea.vmem (!%p4136_p8), [#allocation2], %s3578_s29 }
  0x69   : > { %4007 = dma.done.wait (%p4665_p7), %s227_s24, 448  }
  0x6a   : > { %4009 = vsyncadd (%p4665_p7), %s227_s24, 4294966848  ;;  %p4666_p11 = scmp.ne.s32.totalorder %s4656_s23, 0 }
  0x6c   : > { %4011 = dma.done.wait (%p4666_p11), [#allocation6], 16400  }
  0x6d   : > { %4013 = vsyncadd (%p4666_p11), [#allocation6], 4294950896  ;;  %v3681_v0 = vld [vmem:[#allocation5] sm:$0xff]   ;;  %v3683_v2 = vld [vmem:[#allocation5 + $0x8] sm:$0xff]   ;;  %vm1429_vm0 = vcmask 1044480   ;;  %vm590_vm3 = vcmask 1046528  }
  0x6e   : > { %v3682_v1 = vld [vmem:[#allocation5 + $0x200] sm:$0xff]   ;;  %3192 = vmatprep.subr.bf16.mxu1 %v3681_v0  ;;  %v3684_v3 = vld [vmem:[#allocation5 + $0x208] sm:$0xff]   ;;  %v3685_v4 = vld [vmem:[#allocation5 + $0x10] sm:$0xff]   ;;  %vm870_vm1 = vsmask.f32 4352  ;;  %s2846_s23 = sshll.u32 %s4275_s13, 1 }
  0x6f   : > { %3352 = vmatprep.subr.bf16.mxu0 %v3682_v1  ;;  %3193 = vmatpush3.bf16.msra.mxu1 %v3681_v0  ;;  %v3686_v5 = vld [vmem:[#allocation5 + $0x210] sm:$0xff]   ;;  %v3687_v6 = vld [vmem:[#allocation5 + $0x18] sm:$0xff]   ;;  %v3689_v8 = vld [vmem:[#allocation5 + $0x20] sm:$0xff]   ;;  %vm445_vm2 = vsmask.f32 7424  ;;  %s4509_s25 = scalar_lea.vmem [#allocation9], %s2846_s23 }
  0x70   : > { %3353 = vmatpush3.bf16.msra.mxu0 %v3682_v1  ;;  %3194 = vmatprep.subr.bf16.mxu1 %v3683_v2  ;;  %v3688_v7 = vld [vmem:[#allocation5 + $0x218] sm:$0xff]   ;;  %v3690_v9 = vld [vmem:[#allocation5 + $0x220] sm:$0xff]   ;;  %v3691_v10 = vld [vmem:[#allocation5 + $0x28] sm:$0xff]   ;;  %vm720_vm4 = vsmask.f32 6400  ;;  %s2845_s27 = sshll.u32 %s4275_s13, 4 }
  0x71   : > { %3354 = vmatprep.subr.bf16.mxu0 %v3684_v3  ;;  %v3697_v11 = vld [vmem:[%s4279_s10] sm:$0xff]   ;;  %v4291_v13 = vld [vmem:[%s4279_s10 + $0x8] sm:$0xf]  ;;  %v4294_v14 = vld [vmem:[%s4279_s10 + $0xc] sm:$0xf]  ;;  %s260_s22 = scalar_lea.vmem [#allocation8], %s2845_s27 }
  0x72   : > { %v3692_v12 = vld [vmem:[#allocation5 + $0x228] sm:$0xff]   ;;  %3208 = vmatprep.mubr.bf16.mxu1 %v3697_v11  ;;  %v4297_v15 = vld [vmem:[%s4279_s10 + $0x10] sm:$0xf]  ;;  %v3703_v23 = vld [vmem:[%s4279_s10 + $0x14] ss:$0 sps:$4 sm:$0x77]  }
  0x73   : > { %3195 = vmatpush3.bf16.msra.mxu1 %v3683_v2  ;;  %v4301_v16 = vcombine.low %v4294_v14, %v4297_v15  ;;  %v1404_v17 = vld [vmem:[%s4279_s10 + $0x4] sm:$0x8]  ;;  %v3693_v18 = vld [vmem:[#allocation5 + $0x30] sm:$0xff]   ;;  %v3695_v24 = vld [vmem:[#allocation5 + $0x38] sm:$0xff]   ;;  %v1433_v32 = vrot.slane %v3703_v23, 3  ;;  %s2687_s11 = sshll.u32 %s260_s22, 4  ;;  %s4559_s11 = int_to_ptr.vmem [resolvable:$true] %s2687_s11 }
  0x74   : > { %3355 = vmatpush3.bf16.msra.mxu0 %v3684_v3  ;;  %3196 = vmatprep.subr.bf16.mxu1 %v3685_v4  ;;  %v2927_v19 = vcombine.low %v1404_v17, %v4291_v13  ;;  %v3694_v20 = vld [vmem:[#allocation5 + $0x230] sm:$0xff]   ;;  %v3696_v26 = vld [vmem:[#allocation5 + $0x238] sm:$0xff]   ;;  %v3698_v27 = vld [vmem:[#allocation5 + $0x40] sm:$0xff]   ;;  %vm1988_vm5 = vsmask.f32 5376  ;;  %s3020_s14 = sshll.u32 %s4036_s18, 8 }
  0x75   : > { %3356 = vmatprep.subr.bf16.mxu0 %v3686_v5  ;;  %v1431_v21 = vrot.slane %v4301_v16, 3  ;;  %v1164_v28 = vshrl.u32 %v4301_v16, 16  ;;  %v1160_v30 = vshll.u32 %v4301_v16, 16  ;;  %v3701_v34 = vld [vmem:[#allocation5 + $0x240] sm:$0xff]   ;;  %v3702_v36 = vld [vmem:[%s4279_s10 + $0x8] sm:$0xff]   ;;  %v3708_v55 = vld [vmem:[#allocation5 + $0x58] sm:$0xff]   ;;  %s4564_s28 = scalar_lea.hbm %s4649_s3, %s3020_s14 }
  0x76   : > { %v1430_v22 = vrot.slane %v2927_v19, 3  ;;  %v1560_v29 = vshrl.u32 %v2927_v19, 16  ;;  %v1563_v31 = vshll.u32 %v2927_v19, 16  ;;  %v3704_v41 = vld [vmem:[#allocation5 + $0x48] sm:$0xff]   ;;  %v3706_v44 = vld [vmem:[#allocation5 + $0x50] sm:$0xff]   ;;  %v3709_v57 = vld [vmem:[#allocation5 + $0x258] sm:$0xff]  }
  0x77   : > { %3197 = vmatpush3.bf16.msra.mxu1 %v3685_v4  ;;  %v1567_v37 = vrot.slane %v1164_v28, 3  ;;  %v1568_v39 = vrot.slane %v1160_v30, 4  ;;  %v1434_v40 = vsel %vm1429_vm0, %v1431_v21, %v1433_v32  ;;  %v3705_v42 = vld [vmem:[#allocation5 + $0x248] sm:$0xff]   ;;  %v3707_v46 = vld [vmem:[#allocation5 + $0x250] sm:$0xff]   ;;  %v3710_v61 = vld [vmem:[#allocation5 + $0x60] sm:$0xff]   ;;  %s2667_s8 = scalar_lea.sflag [#allocation4], %s4275_s13 }
  0x78   : > { %3357 = vmatpush3.bf16.msra.mxu0 %v3686_v5  ;;  %3198 = vmatprep.subr.bf16.mxu1 %v3687_v6  ;;  %v1432_v25 = vsel %vm1429_vm0, %v1430_v22, %v1431_v21  ;;  %v1562_v33 = vrot.slane %v1560_v29, 3  ;;  %v1565_v35 = vrot.slane %v1563_v31, 4  ;;  %v410_v47 = vld [vmem:[%s4279_s10] sm:$0xf]  ;;  %v4322_v48 = vld [vmem:[%s4279_s10 + $0x4] sm:$0xf] }
  0x79   : > { %3358 = vmatprep.subr.bf16.mxu0 %v3688_v7  ;;  %3368 = vmatprep.mubr.bf16.mxu0 %v1432_v25  ;;  %v4316_v43 = vor.u32 %v1568_v39, %v1567_v37  ;;  %v4325_v49 = vld [vmem:[%s4279_s10 + $0x8] sm:$0xf]  ;;  %v413_v50 = vld [vmem:[%s4279_s10 + $0xc] sm:$0xf]  ;;  %v2858_v51 = vcombine.low %v410_v47, %v4322_v48  ;;  %v3711_v62 = vld [vmem:[#allocation5 + $0x260] sm:$0xff]   ;;  %v2946_v39 = vcombine.low %v4291_v13, %v4294_v14  ;;  %s3926_s6 = scalar_lea.vmem %s4559_s11, 256 }
  0x7a   : > { %v1566_v38 = vor.u32 %v1565_v35, %v1562_v33  ;;  %v4330_v52 = vcombine.low %v4325_v49, %v413_v50  ;;  %v4338_v0 = vld [vmem:[%s4279_s10 + $0x14] sm:$0xf]  ;;  %v3712_v2 = vld [vmem:[#allocation5 + $0x68] sm:$0xff]   ;;  %v4346_v5 = vld [vmem:[%s4279_s10 + $0x10] ss:$0 sps:$4 sm:$0x11]   ;;  %p3927_p8 = scmp.ne.s32.totalorder %s4559_s11, %s3926_s6 }
  0x7b   : > { %3199 = vmatpush3.bf16.msra.mxu1 %v3687_v6  ;;  %v447_v53 = vshrl.u32 %v2858_v51, 16  ;;  %v449_v54 = vshll.u32 %v2858_v51, 16  ;;  %v2937_v3 = vcombine.low %v4338_v0, %v4338_v0  ;;  %v3713_v4 = vld [vmem:[#allocation5 + $0x268] sm:$0xff]   ;;  %v3716_v17 = vld [vmem:[#allocation5 + $0x78] sm:$0xff]   ;;  %v3721_v29 = vld [vmem:[#allocation5 + $0x280] sm:$0xff]   ;;  %p4675_p12 = scmp.ne.s32.totalorder %s4662_s30, 0 }
  0x7c   : > { %3359 = vmatpush3.bf16.msra.mxu0 %v3688_v7  ;;  %3200 = vmatprep.subr.bf16.mxu1 %v3689_v8  ;;  %v1570_v45 = vsel %vm870_vm1, %v1566_v38, %v4316_v43  ;;  %v4333_v56 = vshll.u32 %v4330_v52, 16  ;;  %v4341_v1 = vshrl.u32 %v4330_v52, 16  ;;  %v569_v21 = vld [vmem:[%s4279_s10] sm:$0xe]  ;;  %v3717_v22 = vld [vmem:[#allocation5 + $0x278] sm:$0xff]   ;;  %v592_v32 = vrot.slane %v4330_v52, 1 }
  0x7d   : > { %3360 = vmatprep.subr.bf16.mxu0 %v3690_v9  ;;  %v451_v58 = vrot.slane %v449_v54, 1  ;;  %v4355_v23 = vcombine.low %v569_v21, %v4322_v48  ;;  %v3724_v35 = vld [vmem:[#allocation5 + $0x88] sm:$0xff]   ;;  %v3730_v13 = vld [vmem:[#allocation5 + $0xa0] sm:$0xff]   ;;  %v4372_v47 = vld [vmem:[%s4279_s10 + $0xc] sm:$0xf]  ;;  %p3928_p1 = pnand %p3927_p8, %p4675_p12  ;;  %s4053_s21 = smov [#allocation8]  }
  0x7e   : > { %v456_v59 = vrot.slane %v4333_v56, 1  ;;  %v879_v6 = vrot.slane %v4341_v1, 3  ;;  %v880_v7 = vrot.slane %v4333_v56, 4  ;;  %v3725_v37 = vld [vmem:[#allocation5 + $0x288] sm:$0xff]   ;;  %v3731_v14 = vld [vmem:[#allocation5 + $0x2a0] sm:$0xff]   ;;  %v3734_v50 = vld [vmem:[#allocation5 + $0xb0] sm:$0xff]  }
  0x7f   : > { %3201 = vmatpush3.bf16.msra.mxu1 %v3689_v8  ;;  %v452_v60 = vor.u32 %v451_v58, %v447_v53  ;;  %v3714_v8 = vld [vmem:[#allocation5 + $0x70] sm:$0xff]   ;;  %v591_v31 = vrot.slane %v4355_v23, 1  ;;  %v4379_v54 = vld [vmem:[%s4279_s10 + $0x14] sm:$0xf]  ;;  %v594_v58 = vrot.slane %v4346_v5, 1  ;;  %p3929_p10 = pneg %p3928_p1  ;;  %s3930_s29 = sshll.u32 %s4053_s21, 4  ;;  %s3931_s29 = int_to_ptr.vmem [resolvable:$false] %s3930_s29 }
  0x80   : > { %3361 = vmatpush3.bf16.msra.mxu0 %v3690_v9  ;;  %3202 = vmatprep.subr.bf16.mxu1 %v3691_v10  ;;  %v1572_v9 = vshrl.u32 %v2937_v3, 16  ;;  %v4350_v11 = vor.u32 %v880_v7, %v879_v6  ;;  %v4375_v51 = vld [vmem:[%s4279_s10 + $0x10] sm:$0xf]  ;;  %s3932_s24 = scalar_lea.vmem %s3931_s29, 512  ;;  %p3933_p3 = scmp.lt.s32.totalorder %s4559_s11, %s3931_s29 }
  0x81   : > { %3362 = vmatprep.subr.bf16.mxu0 %v3692_v12  ;;  %v457_v63 = vsel %vm445_vm2, %v452_v60, %v456_v59  ;;  %v593_v38 = vsel %vm590_vm3, %v591_v31, %v592_v32  ;;  %v729_v60 = vrot.slane %v4341_v1, 1  ;;  %v3746_v31 = vld [vmem:[#allocation5 + $0x2d0] sm:$0xff]   ;;  %p3934_p5 = scmp.lt.s32.totalorder %s3932_s24, %s3926_s6 }
  0x82   : > { %v1574_v19 = vrot.slane %v1572_v9, 3  ;;  %v3741_v9 = vld [vmem:[#allocation5 + $0x2c0] sm:$0xff]  }
  0x83   : > { %3203 = vmatpush3.bf16.msra.mxu1 %v3691_v10  ;;  %v1575_v10 = vshll.u32 %v2937_v3, 16  ;;  %v3737_v3 = vld [vmem:[#allocation5 + $0x2b8] sm:$0xff]   ;;  %p3935_p9 = por %p3934_p5, %p3933_p3 }
  0x84   : > { %3363 = vmatpush3.bf16.msra.mxu0 %v3692_v12  ;;  %3204 = vmatprep.subr.bf16.mxu1 %v3693_v18  ;;  %v3715_v12 = vld [vmem:[#allocation5 + $0x270] sm:$0xff]  }
  0x85   : > { %3364 = vmatprep.subr.bf16.mxu0 %v3694_v20  ;;  %p3936_p2 = pnand %p3935_p9, %p3929_p10 }
  0x87   : > { %3205 = vmatpush3.bf16.msra.mxu1 %v3693_v18  ;;  %v462_v18 = vshll.u32 %v4346_v5, 16  ;;  %v3739_v5 = vld [vmem:[#allocation5 + $0xc0] sm:$0xff]  }
  0x88   : > { %3365 = vmatpush3.bf16.msra.mxu0 %v3694_v20  ;;  %3206 = vmatprep.subr.bf16.mxu1 %v3695_v24  ;;  %v1577_v20 = vrot.slane %v1575_v10, 4  ;;  %v845_v10 = vld [vmem:[%s4279_s10] sm:$0x8] }
  0x89   : > { %3366 = vmatprep.subr.bf16.mxu0 %v3696_v26  ;;  %v464_v25 = vrot.slane %v462_v18, 1  ;;  %v595_v18 = vsel %vm590_vm3, %v592_v32, %v594_v58 }
  0x8b   : > { %3207 = vmatpush3.bf16.msra.mxu1 %v3695_v24  ;;  %v460_v24 = vor.u32 %v4341_v1, %v456_v59  ;;  %v725_v59 = vshll.u32 %v4355_v23, 16 }
  0x8c   : > { %3367 = vmatpush3.bf16.msra.mxu0 %v3696_v26  ;;  %3212 = vmatprep.subr.bf16.mxu1 %v3698_v27  ;;  %v3720_v26 = vld [vmem:[#allocation5 + $0x80] sm:$0xff]  }
  0x8d   : > { %3372 = vmatprep.subr.bf16.mxu0 %v3701_v34  ;;  %v465_v33 = vsel %vm445_vm2, %v460_v24, %v464_v25  ;;  %v727_v6 = vrot.slane %v725_v59, 2  ;;  %v3744_v25 = vld [vmem:[#allocation5 + $0x2c8] sm:$0xff]   ;;  %v3754_v59 = vld [vmem:[#allocation5 + $0x2f0] sm:$0xff]  }
  0x8e   : > { %3209 = vmatmul.mubr.bf16.vlgmr.msra.gmra.mrb[0].mxu1 %v3702_v36  ;;  %v2897_v36 = vcombine.low %v4322_v48, %v4325_v49  ;;  %v3792_v49 = vld [vmem:[#allocation5 + $0x368] sm:$0xff]  }
  0x8f   : > { %3213 = vmatpush3.bf16.msra.mxu1 %v3698_v27  ;;  %3369 = vmatmul.mubr.bf16.vlgmr.msra.gmra.mrb[0].mxu0 %v1434_v40  ;;  %v1578_v27 = vor.u32 %v1577_v20, %v1574_v19  ;;  %v3726_v40 = vld [vmem:[#allocation5 + $0x90] sm:$0xff]   ;;  %v2947_v19 = vcombine.low %v4297_v15, %v4338_v0  ;;  %v3743_v20 = vld [vmem:[#allocation5 + $0xc8] sm:$0xff]  }
  0x90   : > { %3373 = vmatpush3.bf16.msra.mxu0 %v3701_v34  ;;  %3214 = vmatprep.subr.bf16.mxu1 %v3704_v41  ;;  %v3745_v0 = vld [vmem:[#allocation5 + $0xd0] sm:$0xff]  }
  0x91   : > { %3374 = vmatprep.subr.bf16.mxu0 %v3705_v42  ;;  %3388 = vmatprep.mubr.bf16.mxu0 %v1570_v45  ;;  %v1579_v34 = vsel %vm870_vm1, %v4316_v43, %v1578_v27  ;;  %v3729_v43 = vld [vmem:[#allocation5 + $0x298] sm:$0xff]   ;;  %v3733_v45 = vld [vmem:[#allocation5 + $0x2a8] sm:$0xff]  }
  0x92   : > { %3228 = vmatprep.mubr.bf16.mxu1 %v457_v63  ;;  %v3736_v63 = vld [vmem:[#allocation5 + $0xb8] sm:$0xff]  }
  0x93   : > { %3215 = vmatpush3.bf16.msra.mxu1 %v3704_v41  ;;  %v3727_v41 = vld [vmem:[#allocation5 + $0x290] sm:$0xff]  }
  0x94   : > { %3375 = vmatpush3.bf16.msra.mxu0 %v3705_v42  ;;  %3216 = vmatprep.subr.bf16.mxu1 %v3706_v44  ;;  %v3728_v42 = vld [vmem:[#allocation5 + $0x98] sm:$0xff]  }
  0x95   : > { %3376 = vmatprep.subr.bf16.mxu0 %v3707_v46 }
  0x97   : > { %3217 = vmatpush3.bf16.msra.mxu1 %v3706_v44  ;;  %v3732_v44 = vld [vmem:[#allocation5 + $0xa8] sm:$0xff]  }
  0x98   : > { %3377 = vmatpush3.bf16.msra.mxu0 %v3707_v46  ;;  %3218 = vmatprep.subr.bf16.mxu1 %v3708_v55  ;;  %v1805_v46 = vld [vmem:[%s4279_s10 + $0x8] sm:$0xf] }
  0x99   : > { %3378 = vmatprep.subr.bf16.mxu0 %v3709_v57  ;;  %v2956_v53 = vcombine.low %v1805_v46, %v4372_v47  ;;  %v3762_v46 = vld [vmem:[%s4279_s10 + $0x18] ss:$0 sps:$4 sm:$0x11]  }
  0x9b   : > { %3219 = vmatpush3.bf16.msra.mxu1 %v3708_v55  ;;  %v3735_v55 = vld [vmem:[#allocation5 + $0x2b0] sm:$0xff]   ;;  %v1841_v7 = vshrl.u32 %v2956_v53, 16 }
  0x9c   : > { %3379 = vmatpush3.bf16.msra.mxu0 %v3709_v57  ;;  %3220 = vmatprep.subr.bf16.mxu1 %v3710_v61  ;;  %v722_v57 = vshrl.u32 %v4355_v23, 16 }
  0x9d   : > { %3380 = vmatprep.subr.bf16.mxu0 %v3711_v62 }
  0x9f   : > { %3221 = vmatpush3.bf16.msra.mxu1 %v3710_v61  ;;  %v4387_v61 = vcombine.low %v4375_v51, %v4379_v54 }
  0xa0   : > { %3381 = vmatpush3.bf16.msra.mxu0 %v3711_v62  ;;  %3222 = vmatprep.subr.bf16.mxu1 %v3712_v2  ;;  %v1843_v62 = vshll.u32 %v2956_v53, 16  ;;  %v2113_v53 = vld [vmem:[%s4279_s10 + $0x8] sm:$0x8] }
  0xa1   : > { %3382 = vmatprep.subr.bf16.mxu0 %v3713_v4  ;;  %v4391_v1 = vshll.u32 %v4387_v61, 16  ;;  %v4409_v32 = vshrl.u32 %v4387_v61, 16  ;;  %v2135_v58 = vrot.slane %v4387_v61, 3  ;;  %v3806_v61 = vld [vmem:[#allocation5 + $0x198] sm:$0xff]  }
  0xa3   : > { %3223 = vmatpush3.bf16.msra.mxu1 %v3712_v2  ;;  %v730_v2 = vrot.slane %v4333_v56, 2  ;;  %v2887_v56 = vcombine.low %v845_v10, %v4322_v48  ;;  %v3756_v10 = vld [vmem:[#allocation5 + $0x2f8] sm:$0xff]   ;;  %v3791_v48 = vld [vmem:[#allocation5 + $0x168] sm:$0xff]  }
  0xa4   : > { %3383 = vmatpush3.bf16.msra.mxu0 %v3713_v4  ;;  %3224 = vmatprep.subr.bf16.mxu1 %v3714_v8  ;;  %v724_v4 = vrot.slane %v722_v57, 1  ;;  %v2977_v57 = vcombine.low %v2113_v53, %v4372_v47 }
  0xa5   : > { %3384 = vmatprep.subr.bf16.mxu0 %v3715_v12  ;;  %v872_v23 = vshrl.u32 %v2887_v56, 16  ;;  %v875_v24 = vshll.u32 %v2887_v56, 16  ;;  %v1997_v56 = vrot.slane %v4409_v32, 2 }
  0xa7   : > { %3225 = vmatpush3.bf16.msra.mxu1 %v3714_v8  ;;  %v1845_v8 = vrot.slane %v1843_v62, 1  ;;  %v874_v52 = vrot.slane %v872_v23, 3  ;;  %v877_v27 = vrot.slane %v875_v24, 4  ;;  %v3757_v24 = vld [vmem:[#allocation5 + $0x100] sm:$0xff]  }
  0xa8   : > { %3385 = vmatpush3.bf16.msra.mxu0 %v3715_v12  ;;  %3226 = vmatprep.subr.bf16.mxu1 %v3716_v17  ;;  %v728_v12 = vor.u32 %v727_v6, %v724_v4  ;;  %v2264_v4 = vshrl.u32 %v2977_v57, 16 }
  0xa9   : > { %3386 = vmatprep.subr.bf16.mxu0 %v3717_v22  ;;  %v1846_v21 = vor.u32 %v1845_v8, %v1841_v7  ;;  %v2267_v7 = vshll.u32 %v2977_v57, 16  ;;  %v1856_v8 = vshll.u32 %v3762_v46, 16  ;;  %v3773_v46 = vld [vmem:[#allocation5 + $0x130] sm:$0xff]  }
  0xab   : > { %3227 = vmatpush3.bf16.msra.mxu1 %v3716_v17  ;;  %v4394_v17 = vor.u32 %v730_v2, %v729_v60  ;;  %v3755_v2 = vld [vmem:[#allocation5 + $0xf8] sm:$0xff]  }
  0xac   : > { %3387 = vmatpush3.bf16.msra.mxu0 %v3717_v22  ;;  %3232 = vmatprep.subr.bf16.mxu1 %v3720_v26  ;;  %v1850_v22 = vrot.slane %v4391_v1, 1 }
  0xad   : > { %3392 = vmatprep.subr.bf16.mxu0 %v3721_v29 }
  0xae   : > { %3229 = vmatmul.mubr.bf16.vlgmr.msra.gmra.mrb[0].mxu1 %v465_v33  ;;  %v1851_v15 = vsel %vm445_vm2, %v1846_v21, %v1850_v22 }
  0xaf   : > { %3233 = vmatpush3.bf16.msra.mxu1 %v3720_v26  ;;  %3389 = vmatmul.mubr.bf16.vlgmr.msra.gmra.mrb[0].mxu0 %v1579_v34  ;;  %v732_v26 = vsel %vm720_vm4, %v728_v12, %v4394_v17  ;;  %v3747_v34 = vld [vmem:[#allocation5 + $0xd8] sm:$0xff]   ;;  %v2269_v12 = vrot.slane %v2267_v7, 4  ;;  %v3780_v7 = vld [vmem:[#allocation5 + $0x340] sm:$0xff]  }
  0xb0   : > { %3393 = vmatpush3.bf16.msra.mxu0 %v3721_v29  ;;  %3234 = vmatprep.subr.bf16.mxu1 %v3724_v35  ;;  %v878_v29 = vor.u32 %v877_v27, %v874_v52  ;;  %v3760_v52 = vld [vmem:[#allocation5 + $0x300] sm:$0xff]  }
  0xb1   : > { %3394 = vmatprep.subr.bf16.mxu0 %v3725_v37  ;;  %3248 = vmatprep.mubr.bf16.mxu1 %v593_v38  ;;  %v2272_v38 = vrot.slane %v4391_v1, 4 }
  0xb2   : > { %3408 = vmatprep.mubr.bf16.mxu0 %v2946_v39  ;;  %v4413_v33 = vsel %vm870_vm1, %v878_v29, %v4350_v11  ;;  %v3761_v39 = vld [vmem:[%s4279_s10 + $0x10] ss:$0 sps:$4 sm:$0x33]  }
  0xb3   : > { %3235 = vmatpush3.bf16.msra.mxu1 %v3724_v35  ;;  %v2271_v35 = vrot.slane %v4409_v32, 3 }
  0xb4   : > { %3395 = vmatpush3.bf16.msra.mxu0 %v3725_v37  ;;  %3236 = vmatprep.subr.bf16.mxu1 %v3726_v40  ;;  %v3748_v37 = vld [vmem:[#allocation5 + $0x2d8] sm:$0xff]  }
  0xb5   : > { %3396 = vmatprep.subr.bf16.mxu0 %v3727_v41 }
  0xb7   : > { %3237 = vmatpush3.bf16.msra.mxu1 %v3726_v40  ;;  %v4418_v40 = vor.u32 %v2272_v38, %v2271_v35  ;;  %v3766_v35 = vld [vmem:[#allocation5 + $0x310] sm:$0xff]   ;;  %v3768_v38 = vld [vmem:[#allocation5 + $0x318] sm:$0xff]  }
  0xb8   : > { %3397 = vmatpush3.bf16.msra.mxu0 %v3727_v41  ;;  %3238 = vmatprep.subr.bf16.mxu1 %v3728_v42  ;;  %v3749_v41 = vld [vmem:[#allocation5 + $0xe0] sm:$0xff]  }
  0xb9   : > { %3398 = vmatprep.subr.bf16.mxu0 %v3729_v43 }
  0xbb   : > { %3239 = vmatpush3.bf16.msra.mxu1 %v3728_v42  ;;  %v3750_v42 = vld [vmem:[#allocation5 + $0x2e0] sm:$0xff]  }
  0xbc   : > { %3399 = vmatpush3.bf16.msra.mxu0 %v3729_v43  ;;  %3240 = vmatprep.subr.bf16.mxu1 %v3730_v13  ;;  %v1963_v43 = vld [vmem:[%s4279_s10 + $0x8] sm:$0xc] }
  0xbd   : > { %3400 = vmatprep.subr.bf16.mxu0 %v3731_v14 }
  0xbf   : > { %3241 = vmatpush3.bf16.msra.mxu1 %v3730_v13  ;;  %v3751_v13 = vld [vmem:[#allocation5 + $0xe8] sm:$0xff]  }
  0xc0   : > { %3401 = vmatpush3.bf16.msra.mxu0 %v3731_v14  ;;  %3242 = vmatprep.subr.bf16.mxu1 %v3732_v44  ;;  %v734_v14 = vshrl.u32 %v3761_v39, 16 }
  0xc1   : > { %3402 = vmatprep.subr.bf16.mxu0 %v3733_v45 }
  0xc2   : > { %v736_v60 = vrot.slane %v734_v14, 1  ;;  %v3772_v14 = vld [vmem:[#allocation5 + $0x328] sm:$0xff]  }
  0xc3   : > { %3243 = vmatpush3.bf16.msra.mxu1 %v3732_v44  ;;  %v3752_v44 = vld [vmem:[#allocation5 + $0x2e8] sm:$0xff]  }
  0xc4   : > { %3403 = vmatpush3.bf16.msra.mxu0 %v3733_v45  ;;  %3244 = vmatprep.subr.bf16.mxu1 %v3734_v50  ;;  %v737_v45 = vshll.u32 %v3761_v39, 16  ;;  %v3769_v39 = vld [vmem:[#allocation5 + $0x120] sm:$0xff]  }
  0xc5   : > { %3404 = vmatprep.subr.bf16.mxu0 %v3735_v55 }
  0xc6   : > { %v739_v62 = vrot.slane %v737_v45, 2 }
  0xc7   : > { %3245 = vmatpush3.bf16.msra.mxu1 %v3734_v50  ;;  %v2967_v50 = vcombine.low %v1963_v43, %v4372_v47  ;;  %v4454_v43 = vld [vmem:[%s4279_s10 + $0x18] ss:$0 sps:$4 sm:$0x77]  }
  0xc8   : > { %3405 = vmatpush3.bf16.msra.mxu0 %v3735_v55  ;;  %3246 = vmatprep.subr.bf16.mxu1 %v3736_v63  ;;  %v3753_v55 = vld [vmem:[#allocation5 + $0xf0] sm:$0xff]   ;;  %v2005_v53 = vshll.u32 %v4454_v43, 16 }
  0xc9   : > { %3406 = vmatprep.subr.bf16.mxu0 %v3737_v3 }
  0xcb   : > { %3247 = vmatpush3.bf16.msra.mxu1 %v3736_v63  ;;  %v2134_v63 = vrot.slane %v2977_v57, 3 }
  0xcc   : > { %3407 = vmatpush3.bf16.msra.mxu0 %v3737_v3  ;;  %3252 = vmatprep.subr.bf16.mxu1 %v3739_v5  ;;  %v1990_v3 = vshrl.u32 %v2967_v50, 16 }
  0xcd   : > { %3412 = vmatprep.subr.bf16.mxu0 %v3741_v9  ;;  %v4429_v6 = vsel %vm1429_vm0, %v2134_v63, %v2135_v58  ;;  %v2007_v63 = vrot.slane %v2005_v53, 3 }
  0xce   : > { %3249 = vmatmul.mubr.bf16.vlgmr.msra.gmra.mrb[0].mxu1 %v595_v18  ;;  %v1998_v18 = vrot.slane %v4391_v1, 3 }
  0xcf   : > { %3253 = vmatpush3.bf16.msra.mxu1 %v3739_v5  ;;  %3409 = vmatmul.mubr.bf16.vlgmr.msra.gmra.mrb[0].mxu0 %v2947_v19  ;;  %v1993_v5 = vshll.u32 %v2967_v50, 16  ;;  %v740_v19 = vor.u32 %v739_v62, %v736_v60  ;;  %v2002_v50 = vshrl.u32 %v4454_v43, 16  ;;  %v3775_v60 = vld [vmem:[#allocation5 + $0x138] sm:$0xff]  }
  0xd0   : > { %3413 = vmatpush3.bf16.msra.mxu0 %v3741_v9  ;;  %3254 = vmatprep.subr.bf16.mxu1 %v3743_v20  ;;  %v2266_v9 = vrot.slane %v2264_v4, 3  ;;  %v3778_v4 = vld [vmem:[#allocation5 + $0x140] sm:$0xff]  }
  0xd1   : > { %3414 = vmatprep.subr.bf16.mxu0 %v3744_v25  ;;  %3268 = vmatprep.mubr.bf16.mxu1 %v732_v26  ;;  %v1995_v21 = vrot.slane %v1993_v5, 3  ;;  %v1858_v26 = vrot.slane %v1856_v8, 1  ;;  %v2004_v62 = vrot.slane %v2002_v50, 2  ;;  %v3812_v50 = vld [vmem:[#allocation5 + $0x1b0] sm:$0xff]  }
  0xd2   : > { %3428 = vmatprep.mubr.bf16.mxu0 %v1851_v15  ;;  %v2270_v23 = vor.u32 %v2269_v12, %v2266_v9  ;;  %v741_v15 = vsel %vm720_vm4, %v4394_v17, %v740_v19  ;;  %v3784_v12 = vld [vmem:[#allocation5 + $0x348] sm:$0xff]   ;;  %v3788_v19 = vld [vmem:[#allocation5 + $0x358] sm:$0xff]  }
  0xd3   : > { %3255 = vmatpush3.bf16.msra.mxu1 %v3743_v20  ;;  %v1992_v20 = vrot.slane %v1990_v3, 2  ;;  %v2008_v5 = vor.u32 %v2007_v63, %v2004_v62  ;;  %v3814_v62 = vld [vmem:[#allocation5 + $0x1b8] sm:$0xff]  }
  0xd4   : > { %3415 = vmatpush3.bf16.msra.mxu0 %v3744_v25  ;;  %3256 = vmatprep.subr.bf16.mxu1 %v3745_v0  ;;  %v1854_v25 = vor.u32 %v4409_v32, %v1850_v22  ;;  %v4438_v27 = vsel %vm870_vm1, %v2270_v23, %v4418_v40  ;;  %v2995_v22 = vcombine.low %v4372_v47, %v4375_v51  ;;  %v3764_v32 = vld [vmem:[#allocation5 + $0x308] sm:$0xff]   ;;  %v3831_v47 = vld [vmem:[#allocation5 + $0x1f0] sm:$0xff]  }
  0xd5   : > { %3416 = vmatprep.subr.bf16.mxu0 %v3746_v31  ;;  %v1996_v29 = vor.u32 %v1995_v21, %v1992_v20  ;;  %v3789_v20 = vld [vmem:[#allocation5 + $0x160] sm:$0xff]   ;;  %v1117_v23 = vld [vmem:[%s4279_s10 + $0x4] sm:$0xf]  ;;  %v3832_v51 = vld [vmem:[#allocation5 + $0x3f0] sm:$0xff]  }
  0xd6   : > { %v1859_v1 = vsel %vm445_vm2, %v1854_v25, %v1858_v26  ;;  %v3790_v21 = vld [vmem:[#allocation5 + $0x360] sm:$0xff]   ;;  %v3794_v25 = vld [vmem:[#allocation5 + $0x370] sm:$0xff]  }
  0xd7   : > { %3257 = vmatpush3.bf16.msra.mxu1 %v3745_v0  ;;  %v3763_v0 = vld [vmem:[#allocation5 + $0x108] sm:$0xff]  }
  0xd8   : > { %3417 = vmatpush3.bf16.msra.mxu0 %v3746_v31  ;;  %3258 = vmatprep.subr.bf16.mxu1 %v3747_v34  ;;  %v4442_v31 = vor.u32 %v1998_v18, %v1997_v56  ;;  %v3785_v56 = vld [vmem:[#allocation5 + $0x150] sm:$0xff]  }
  0xd9   : > { %3418 = vmatprep.subr.bf16.mxu0 %v3748_v37  ;;  %v3786_v18 = vld [vmem:[#allocation5 + $0x350] sm:$0xff]  }
  0xda   : > { %v2000_v17 = vsel %vm1988_vm5, %v1996_v29, %v4442_v31  ;;  %v2009_v9 = vsel %vm1988_vm5, %v4442_v31, %v2008_v5  ;;  %v3798_v31 = vld [vmem:[#allocation5 + $0x180] sm:$0xff]  }
  0xdb   : > { %3259 = vmatpush3.bf16.msra.mxu1 %v3747_v34  ;;  %v3765_v34 = vld [vmem:[#allocation5 + $0x110] sm:$0xff]  }
  0xdc   : > { %3419 = vmatpush3.bf16.msra.mxu0 %v3748_v37  ;;  %3260 = vmatprep.subr.bf16.mxu1 %v3749_v41  ;;  %v3767_v37 = vld [vmem:[#allocation5 + $0x118] sm:$0xff]  }
  0xdd   : > { %3420 = vmatprep.subr.bf16.mxu0 %v3750_v42 }
  0xdf   : > { %3261 = vmatpush3.bf16.msra.mxu1 %v3749_v41  ;;  %v4451_v41 = vld [vmem:[%s4279_s10 + $0x10] sm:$0xf] }
  0xe0   : > { %3421 = vmatpush3.bf16.msra.mxu0 %v3750_v42  ;;  %3262 = vmatprep.subr.bf16.mxu1 %v3751_v13  ;;  %v3770_v42 = vld [vmem:[#allocation5 + $0x320] sm:$0xff]  }
  0xe1   : > { %3422 = vmatprep.subr.bf16.mxu0 %v3752_v44 }
  0xe3   : > { %3263 = vmatpush3.bf16.msra.mxu1 %v3751_v13  ;;  %v3771_v13 = vld [vmem:[#allocation5 + $0x128] sm:$0xff]  }
  0xe4   : > { %3423 = vmatpush3.bf16.msra.mxu0 %v3752_v44  ;;  %3264 = vmatprep.subr.bf16.mxu1 %v3753_v55 }
  0xe5   : > { %3424 = vmatprep.subr.bf16.mxu0 %v3754_v59 }
  0xe7   : > { %3265 = vmatpush3.bf16.msra.mxu1 %v3753_v55  ;;  %v3774_v55 = vld [vmem:[#allocation5 + $0x330] sm:$0xff]  }
  0xe8   : > { %3425 = vmatpush3.bf16.msra.mxu0 %v3754_v59  ;;  %3266 = vmatprep.subr.bf16.mxu1 %v3755_v2 }
  0xe9   : > { %3426 = vmatprep.subr.bf16.mxu0 %v3756_v10 }
  0xeb   : > { %3267 = vmatpush3.bf16.msra.mxu1 %v3755_v2  ;;  %v3776_v2 = vld [vmem:[#allocation5 + $0x338] sm:$0xff]  }
  0xec   : > { %3427 = vmatpush3.bf16.msra.mxu0 %v3756_v10  ;;  %3272 = vmatprep.subr.bf16.mxu1 %v3757_v24  ;;  %v3783_v10 = vld [vmem:[#allocation5 + $0x148] sm:$0xff]  }
  0xed   : > { %3432 = vmatprep.subr.bf16.mxu0 %v3760_v52 }
  0xee   : > { %3269 = vmatmul.mubr.bf16.vlgmr.msra.gmra.mrb[0].mxu1 %v741_v15  ;;  %v3796_v15 = vld [vmem:[#allocation5 + $0x378] sm:$0xff]  }
  0xef   : > { %3273 = vmatpush3.bf16.msra.mxu1 %v3757_v24  ;;  %3429 = vmatmul.mubr.bf16.vlgmr.msra.gmra.mrb[0].mxu0 %v1859_v1  ;;  %v3793_v24 = vld [vmem:[#allocation5 + $0x170] sm:$0xff]   ;;  %v2137_v1 = vrot.slane %v4454_v43, 3 }
  0xf0   : > { %3433 = vmatpush3.bf16.msra.mxu0 %v3760_v52  ;;  %3274 = vmatprep.subr.bf16.mxu1 %v3763_v0  ;;  %v3795_v52 = vld [vmem:[#allocation5 + $0x178] sm:$0xff]  }
  0xf1   : > { %3434 = vmatprep.subr.bf16.mxu0 %v3764_v32  ;;  %3288 = vmatprep.mubr.bf16.mxu1 %v4413_v33  ;;  %v2888_v33 = vcombine.low %v4451_v41, %v4451_v41 }
  0xf2   : > { %3448 = vmatprep.mubr.bf16.mxu0 %v2000_v17  ;;  %v3839_v17 = vld [vmem:[%s4279_s10 + $0xc] sm:$0xf] }
  0xf3   : > { %3275 = vmatpush3.bf16.msra.mxu1 %v3763_v0  ;;  %v884_v44 = vshrl.u32 %v2888_v33, 16  ;;  %v887_v45 = vshll.u32 %v2888_v33, 16  ;;  %v3808_v33 = vld [vmem:[#allocation5 + $0x1a0] sm:$0xff]  }
  0xf4   : > { %3435 = vmatpush3.bf16.msra.mxu0 %v3764_v32  ;;  %3276 = vmatprep.subr.bf16.mxu1 %v3765_v34  ;;  %v3800_v32 = vld [vmem:[#allocation5 + $0x380] sm:$0xff]  }
  0xf5   : > { %3436 = vmatprep.subr.bf16.mxu0 %v3766_v35  ;;  %v886_v57 = vrot.slane %v884_v44, 3  ;;  %v889_v59 = vrot.slane %v887_v45, 4  ;;  %v3811_v45 = vld [vmem:[#allocation5 + $0x3a8] sm:$0xff]  }
  0xf7   : > { %3277 = vmatpush3.bf16.msra.mxu1 %v3765_v34  ;;  %v890_v3 = vor.u32 %v889_v59, %v886_v57  ;;  %v2898_v34 = vcombine.low %v3839_v17, %v4451_v41  ;;  %v3804_v41 = vld [vmem:[#allocation5 + $0x190] sm:$0xff]  }
  0xf8   : > { %3437 = vmatpush3.bf16.msra.mxu0 %v3766_v35  ;;  %3278 = vmatprep.subr.bf16.mxu1 %v3767_v37  ;;  %v3813_v57 = vld [vmem:[#allocation5 + $0x3b0] sm:$0xff]  }
  0xf9   : > { %3438 = vmatprep.subr.bf16.mxu0 %v3768_v38  ;;  %v891_v8 = vsel %vm870_vm1, %v4350_v11, %v890_v3  ;;  %v3787_v11 = vld [vmem:[#allocation5 + $0x158] sm:$0xff]  }
  0xfa   : > { %v3815_v3 = vld [vmem:[#allocation5 + $0x3b8] sm:$0xff]  }
  0xfb   : > { %3279 = vmatpush3.bf16.msra.mxu1 %v3767_v37  ;;  %v1162_v37 = vrot.slane %v1160_v30, 1  ;;  %v3805_v30 = vld [vmem:[#allocation5 + $0x390] sm:$0xff]  }
  0xfc   : > { %3439 = vmatpush3.bf16.msra.mxu0 %v3768_v38  ;;  %3280 = vmatprep.subr.bf16.mxu1 %v3769_v39  ;;  %v2138_v38 = vsel %vm1429_vm0, %v2135_v58, %v2137_v1  ;;  %v3807_v58 = vld [vmem:[#allocation5 + $0x398] sm:$0xff]  }
  0xfd   : > { %3440 = vmatprep.subr.bf16.mxu0 %v3770_v42  ;;  %v1166_v5 = vor.u32 %v1164_v28, %v1162_v37  ;;  %v3822_v28 = vld [vmem:[#allocation5 + $0x3c8] sm:$0xff]  }
  0xff   : > { %3281 = vmatpush3.bf16.msra.mxu1 %v3769_v39  ;;  %v3802_v39 = vld [vmem:[#allocation5 + $0x188] sm:$0xff]  }
 0x100   : > { %3441 = vmatpush3.bf16.msra.mxu0 %v3770_v42  ;;  %3282 = vmatprep.subr.bf16.mxu1 %v3771_v13  ;;  %v3803_v42 = vld [vmem:[#allocation5 + $0x388] sm:$0xff]  }
 0x101   : > { %3442 = vmatprep.subr.bf16.mxu0 %v3772_v14 }
 0x103   : > { %3283 = vmatpush3.bf16.msra.mxu1 %v3771_v13  ;;  %v3809_v13 = vld [vmem:[#allocation5 + $0x3a0] sm:$0xff]  }
 0x104   : > { %3443 = vmatpush3.bf16.msra.mxu0 %v3772_v14  ;;  %3284 = vmatprep.subr.bf16.mxu1 %v3773_v46  ;;  %v4484_v14 = vld [vmem:[%s4279_s10 + $0x18] sm:$0xf] }
 0x105   : > { %3444 = vmatprep.subr.bf16.mxu0 %v3774_v55  ;;  %v2986_v44 = vcombine.low %v4484_v14, %v4484_v14 }
 0x107   : > { %3285 = vmatpush3.bf16.msra.mxu1 %v3773_v46  ;;  %v4489_v46 = vld [vmem:[%s4279_s10 + $0x14] ss:$0 sps:$4 sm:$0x11]   ;;  %v2276_v53 = vshrl.u32 %v2986_v44, 16 }
 0x108   : > { %3445 = vmatpush3.bf16.msra.mxu0 %v3774_v55  ;;  %3286 = vmatprep.subr.bf16.mxu1 %v3775_v60  ;;  %v2279_v55 = vshll.u32 %v2986_v44, 16  ;;  %v1168_v59 = vshll.u32 %v4489_v46, 16 }
 0x109   : > { %3446 = vmatprep.subr.bf16.mxu0 %v3776_v2  ;;  %v2278_v63 = vrot.slane %v2276_v53, 3 }
 0x10b   : > { %3287 = vmatpush3.bf16.msra.mxu1 %v3775_v60  ;;  %v1275_v60 = vld [vmem:[%s4279_s10 + $0x4] sm:$0xe] }
 0x10c   : > { %3447 = vmatpush3.bf16.msra.mxu0 %v3776_v2  ;;  %3292 = vmatprep.subr.bf16.mxu1 %v3778_v4  ;;  %v2281_v2 = vrot.slane %v2279_v55, 4 }
 0x10d   : > { %3452 = vmatprep.subr.bf16.mxu0 %v3780_v7 }
 0x10e   : > { %3289 = vmatmul.mubr.bf16.vlgmr.msra.gmra.mrb[0].mxu1 %v891_v8  ;;  %v3817_v8 = vld [vmem:[#allocation5 + $0x1c0] sm:$0xff]  }
 0x10f   : > { %3293 = vmatpush3.bf16.msra.mxu1 %v3778_v4  ;;  %3449 = vmatmul.mubr.bf16.vlgmr.msra.gmra.mrb[0].mxu0 %v2009_v9  ;;  %v2282_v9 = vor.u32 %v2281_v2, %v2278_v63 }
 0x110   : > { %3453 = vmatpush3.bf16.msra.mxu0 %v3780_v7  ;;  %3294 = vmatprep.subr.bf16.mxu1 %v3783_v10  ;;  %v1170_v7 = vrot.slane %v1168_v59, 1 }
 0x111   : > { %3454 = vmatprep.subr.bf16.mxu0 %v3784_v12  ;;  %3308 = vmatprep.mubr.bf16.mxu1 %v2897_v36  ;;  %v4470_v36 = vld [vmem:[%s4279_s10 + $0x8] sm:$0xf] }
 0x112   : > { %3468 = vmatprep.mubr.bf16.mxu0 %v4429_v6  ;;  %v2907_v6 = vcombine.low %v1117_v23, %v4470_v36  ;;  %v2918_v4 = vcombine.low %v1275_v60, %v4470_v36  ;;  %v3826_v23 = vld [vmem:[#allocation5 + $0x3d8] sm:$0xff]   ;;  %v3829_v36 = vld [vmem:[#allocation5 + $0x1e8] sm:$0xff]  }
 0x113   : > { %3295 = vmatpush3.bf16.msra.mxu1 %v3783_v10  ;;  %v3818_v10 = vld [vmem:[#allocation5 + $0x3c0] sm:$0xff]  }
 0x114   : > { %3455 = vmatpush3.bf16.msra.mxu0 %v3784_v12  ;;  %3296 = vmatprep.subr.bf16.mxu1 %v3785_v56  ;;  %v1155_v26 = vshll.u32 %v2907_v6, 16  ;;  %v1153_v0 = vshrl.u32 %v2907_v6, 16  ;;  %v1296_v12 = vrot.slane %v2918_v4, 1  ;;  %v3830_v6 = vld [vmem:[#allocation5 + $0x3e8] sm:$0xff]  }
 0x115   : > { %3456 = vmatprep.subr.bf16.mxu0 %v3786_v18 }
 0x116   : > { %v1157_v29 = vrot.slane %v1155_v26, 1 }
 0x117   : > { %3297 = vmatpush3.bf16.msra.mxu1 %v3785_v56  ;;  %v1297_v56 = vrot.slane %v4301_v16, 1  ;;  %v3824_v16 = vld [vmem:[#allocation5 + $0x3d0] sm:$0xff]  }
 0x118   : > { %3457 = vmatpush3.bf16.msra.mxu0 %v3786_v18  ;;  %3298 = vmatprep.subr.bf16.mxu1 %v3787_v11  ;;  %v1158_v35 = vor.u32 %v1157_v29, %v1153_v0  ;;  %v1171_v18 = vsel %vm445_vm2, %v1166_v5, %v1170_v7  ;;  %v2509_v0 = vlaneseq }
 0x119   : > { %3458 = vmatprep.subr.bf16.mxu0 %v3788_v19 }
 0x11a   : > { %v1163_v43 = vsel %vm445_vm2, %v1158_v35, %v1162_v37  ;;  %v2510_v29 = vshrl.u32 %v2509_v0, 7 }
 0x11b   : > { %3299 = vmatpush3.bf16.msra.mxu1 %v3787_v11  ;;  %v2283_v11 = vsel %vm870_vm1, %v4418_v40, %v2282_v9  ;;  %v3825_v40 = vld [vmem:[#allocation5 + $0x1d8] sm:$0xff]  }
 0x11c   : > { %3459 = vmatpush3.bf16.msra.mxu0 %v3788_v19  ;;  %3300 = vmatprep.subr.bf16.mxu1 %v3789_v20  ;;  %v3821_v19 = vld [vmem:[#allocation5 + $0x1c8] sm:$0xff]   ;;  %v4512_v1 = vadd.s32 24, %v2510_v29 }
 0x11d   : > { %3460 = vmatprep.subr.bf16.mxu0 %v3790_v21 }
 0x11f   : > { %3301 = vmatpush3.bf16.msra.mxu1 %v3789_v20  ;;  %v1298_v20 = vsel %vm590_vm3, %v1296_v12, %v1297_v56 }
 0x120   : > { %3461 = vmatpush3.bf16.msra.mxu0 %v3790_v21  ;;  %3302 = vmatprep.subr.bf16.mxu1 %v3791_v48  ;;  %v3823_v21 = vld [vmem:[#allocation5 + $0x1d0] sm:$0xff]  }
 0x121   : > { %3462 = vmatprep.subr.bf16.mxu0 %v3792_v49 }
 0x123   : > { %3303 = vmatpush3.bf16.msra.mxu1 %v3791_v48  ;;  %v3827_v48 = vld [vmem:[#allocation5 + $0x1e0] sm:$0xff]  }
 0x124   : > { %3463 = vmatpush3.bf16.msra.mxu0 %v3792_v49  ;;  %3304 = vmatprep.subr.bf16.mxu1 %v3793_v24  ;;  %v3828_v49 = vld [vmem:[#allocation5 + $0x3e0] sm:$0xff]  }
 0x125   : > { %3464 = vmatprep.subr.bf16.mxu0 %v3794_v25 }
 0x127   : > { %3305 = vmatpush3.bf16.msra.mxu1 %v3793_v24  ;;  %v3834_v24 = vld [vmem:[#allocation5 + $0x3f8] sm:$0xff]  }
 0x128   : > { %3465 = vmatpush3.bf16.msra.mxu0 %v3794_v25  ;;  %3306 = vmatprep.subr.bf16.mxu1 %v3795_v52  ;;  %v1299_v25 = vrot.slane %v4489_v46, 1 }
 0x129   : > { %3466 = vmatprep.subr.bf16.mxu0 %v3796_v15 }
 0x12a   : > { %v1300_v26 = vsel %vm590_vm3, %v1297_v56, %v1299_v25 }
 0x12b   : > { %3307 = vmatpush3.bf16.msra.mxu1 %v3795_v52  ;;  %v2996_v52 = vcombine.low %v4379_v54, %v4484_v14  ;;  %v4517_v35 = vmul.u32.u64.low 2454267026, %v2510_v29  ;;  %v4518_v54 = vmul.u32.u64.high 2454267026, %v2510_v29, %v4517_v35 }
 0x12c   : > { %3467 = vmatpush3.bf16.msra.mxu0 %v3796_v15  ;;  %3312 = vmatprep.subr.bf16.mxu1 %v3798_v31  ;;  %v4051_v15 = vmov 0.0  }
 0x12d   : > { %3472 = vmatprep.subr.bf16.mxu0 %v3800_v32  ;;  %2642 = vst [vmem:[%s4509_s25] sm:$0x3] %v4051_v15  ;;  %vm2524_vm7 = vc.u32 %v4517_v35, 2454267026 }
 0x12e   : > { %3309 = vmatmul.mubr.bf16.vlgmr.msra.gmra.mrb[0].mxu1 %v2898_v34 }
 0x12f   : > { %3313 = vmatpush3.bf16.msra.mxu1 %v3798_v31  ;;  %3469 = vmatmul.mubr.bf16.vlgmr.msra.gmra.mrb[0].mxu0 %v2138_v38  ;;  %v2512_v31 = vadd.s32 16, %v2510_v29  ;;  %v4521_v37 = vmul.u32.u64.low 2454267026, %v4512_v1  ;;  %v4522_v38 = vmul.u32.u64.high 2454267026, %v4512_v1, %v4521_v37 }
 0x130   : > { %3473 = vmatpush3.bf16.msra.mxu0 %v3800_v32  ;;  %3314 = vmatprep.subr.bf16.mxu1 %v3802_v39  ;;  %v2511_v32 = vadd.s32 8, %v2510_v29 }
 0x131   : > { %3474 = vmatprep.subr.bf16.mxu0 %v3803_v42  ;;  %3328 = vmatprep.mubr.bf16.mxu1 %v1163_v43  ;;  %v4514_v17 = vmul.u32.u64.low 2454267026, %v2512_v31  ;;  %v4515_v34 = vmul.u32.u64.high 2454267026, %v2512_v31, %v4514_v17  ;;  %vm2566_vm8 = vc.u32 %v4521_v37, 2454267026  ;;  %v4052_v43 = vmov 0  }
 0x132   : > { %3488 = vmatprep.mubr.bf16.mxu0 %v4438_v27  ;;  %v3810_v27 = vld [vmem:[#allocation5 + $0x1a8] sm:$0xff]  }
 0x133   : > { %3315 = vmatpush3.bf16.msra.mxu1 %v3802_v39  ;;  %vm2552_vm6 = vc.u32 %v4514_v17, 2454267026 }
 0x134   : > { %3475 = vmatpush3.bf16.msra.mxu0 %v3803_v42  ;;  %3316 = vmatprep.subr.bf16.mxu1 %v3804_v41  ;;  %v4524_v39 = vmul.u32.u64.low 2454267026, %v2511_v32  ;;  %v4525_v42 = vmul.u32.u64.high 2454267026, %v2511_v32, %v4524_v39 }
 0x135   : > { %3476 = vmatprep.subr.bf16.mxu0 %v3805_v30 }
 0x136   : > { %vm2538_vm9 = vc.u32 %v4524_v39, 2454267026 }
 0x137   : > { %3317 = vmatpush3.bf16.msra.mxu1 %v3804_v41  ;;  %v2553_v41 = vsel %vm2552_vm6, 1, %v4052_v43 }
 0x138   : > { %3477 = vmatpush3.bf16.msra.mxu0 %v3805_v30  ;;  %3318 = vmatprep.subr.bf16.mxu1 %v3806_v61  ;;  %v2525_v30 = vsel %vm2524_vm7, 1, %v4052_v43  ;;  %vm2517_vm7 = vcmp.lt.s32.totalorder %v4512_v1, 28 }
 0x139   : > { %3478 = vmatprep.subr.bf16.mxu0 %v3807_v58 }
 0x13b   : > { %3319 = vmatpush3.bf16.msra.mxu1 %v3806_v61  ;;  %v2567_v61 = vsel %vm2566_vm8, 1, %v4052_v43 }
 0x13c   : > { %3479 = vmatpush3.bf16.msra.mxu0 %v3807_v58  ;;  %3320 = vmatprep.subr.bf16.mxu1 %v3808_v33  ;;  %v2554_v58 = vadd.s32 %v4515_v34, %v2553_v41  ;;  %v2568_v14 = vadd.s32 %v4522_v38, %v2567_v61 }
 0x13d   : > { %3480 = vmatprep.subr.bf16.mxu0 %v3809_v13 }
 0x13e   : > { %v2555_v44 = vshrl.u32 %v2554_v58, 2  ;;  %v2569_v46 = vshrl.u32 %v2568_v14, 2 }
 0x13f   : > { %3321 = vmatpush3.bf16.msra.mxu1 %v3808_v33  ;;  %v2539_v33 = vsel %vm2538_vm9, 1, %v4052_v43 }
 0x140   : > { %3481 = vmatpush3.bf16.msra.mxu0 %v3809_v13  ;;  %3322 = vmatprep.subr.bf16.mxu1 %v3810_v27  ;;  %v2526_v13 = vadd.s32 %v4518_v54, %v2525_v30  ;;  %v2556_v53 = vmul.u32 7, %v2555_v44 }
 0x141   : > { %3482 = vmatprep.subr.bf16.mxu0 %v3811_v45 }
 0x142   : > { %v2557_v60 = vsub.s32 %v2512_v31, %v2556_v53 }
 0x143   : > { %3323 = vmatpush3.bf16.msra.mxu1 %v3810_v27  ;;  %v2540_v27 = vadd.s32 %v4525_v42, %v2539_v33 }
 0x144   : > { %3483 = vmatpush3.bf16.msra.mxu0 %v3811_v45  ;;  %3324 = vmatprep.subr.bf16.mxu1 %v3812_v50  ;;  %v2527_v45 = vshrl.u32 %v2526_v13, 2  ;;  %vm2576_vm10 = vcmp.ne.s32.totalorder %v2557_v60, 0  ;;  %vm2580_vm11 = vcmp.lt.s32.totalorder %v2557_v60, 0  ;;  %v2588_v9 = vadd.s32 7, %v2557_v60 }
 0x145   : > { %3484 = vmatprep.subr.bf16.mxu0 %v3813_v57  ;;  %vm4532_vm0 = vmand %vm2580_vm11, %vm2576_vm10 }
 0x146   : > { %v2528_v55 = vmul.u32 7, %v2527_v45 }
 0x147   : > { %3325 = vmatpush3.bf16.msra.mxu1 %v3812_v50  ;;  %v2541_v50 = vshrl.u32 %v2540_v27, 2 }
 0x148   : > { %3485 = vmatpush3.bf16.msra.mxu0 %v3813_v57  ;;  %3326 = vmatprep.subr.bf16.mxu1 %v3814_v62  ;;  %v2570_v57 = vmul.u32 7, %v2569_v46 }
 0x149   : > { %3486 = vmatprep.subr.bf16.mxu0 %v3815_v3  ;;  %v2542_v59 = vmul.u32 7, %v2541_v50 }
 0x14a   : > { %v2571_v63 = vsub.s32 %v4512_v1, %v2570_v57 }
 0x14b   : > { %3327 = vmatpush3.bf16.msra.mxu1 %v3814_v62  ;;  %v2529_v62 = vsub.s32 %v2510_v29, %v2528_v55  ;;  %v2543_v2 = vsub.s32 %v2511_v32, %v2542_v59 }
 0x14c   : > { %3487 = vmatpush3.bf16.msra.mxu0 %v3815_v3  ;;  %3332 = vmatprep.subr.bf16.mxu1 %v3817_v8  ;;  %vm2577_vm14 = vcmp.ne.s32.totalorder %v2571_v63, 0  ;;  %vm2581_vm15 = vcmp.lt.s32.totalorder %v2571_v63, 0  ;;  %v2589_v7 = vadd.s32 7, %v2571_v63 }
 0x14d   : > { %3492 = vmatprep.subr.bf16.mxu0 %v3818_v10  ;;  %vm2574_vm12 = vcmp.ne.s32.totalorder %v2529_v62, 0  ;;  %vm2578_vm13 = vcmp.lt.s32.totalorder %v2529_v62, 0  ;;  %v2586_v4 = vadd.s32 7, %v2529_v62  ;;  %vm2575_vm1 = vcmp.ne.s32.totalorder %v2543_v2, 0  ;;  %vm4540_vm4 = vmand %vm2581_vm15, %vm2577_vm14 }
 0x14e   : > { %3329 = vmatmul.mubr.bf16.vlgmr.msra.gmra.mrb[0].mxu1 %v1171_v18  ;;  %vm2579_vm2 = vcmp.lt.s32.totalorder %v2543_v2, 0  ;;  %vm4536_vm3 = vmand %vm2578_vm13, %vm2574_vm12  ;;  %v2587_v12 = vadd.s32 7, %v2543_v2 }
 0x14f   : > { %3333 = vmatpush3.bf16.msra.mxu1 %v3817_v8  ;;  %3489 = vmatmul.mubr.bf16.vlgmr.msra.gmra.mrb[0].mxu0 %v2283_v11  ;;  %v2847_v8 = vld [vmem:[#allocation7] ss:$0 sm:$0xff]  ;;  %vm4545_vm5 = vmand %vm2579_vm2, %vm2575_vm1  ;;  %v2590_v11 = vsel %vm4536_vm3, %v2586_v4, %v2529_v62 }
 0x150   : > { %3493 = vmatpush3.bf16.msra.mxu0 %v3818_v10  ;;  %3334 = vmatprep.subr.bf16.mxu1 %v3821_v19  ;;  %vm2594_vm6 = vcmp.lt.s32.totalorder %v2590_v11, 4 }
 0x151   : > { %3494 = vmatprep.subr.bf16.mxu0 %v3822_v28  ;;  %3348 = vmatprep.mubr.bf16.mxu1 %v1298_v20 }
 0x152   : > { %3508 = vmatprep.mubr.bf16.mxu0 %v2995_v22  ;;  %v3833_v22 = vld [vmem:[#allocation5 + $0x1f8] sm:$0xff]  }
 0x153   : > { %3335 = vmatpush3.bf16.msra.mxu1 %v3821_v19 }
 0x154   : > { %3495 = vmatpush3.bf16.msra.mxu0 %v3822_v28  ;;  %3336 = vmatprep.subr.bf16.mxu1 %v3823_v21 }
 0x155   : > { %3496 = vmatprep.subr.bf16.mxu0 %v3824_v16 }
 0x157   : > { %3337 = vmatpush3.bf16.msra.mxu1 %v3823_v21  ;;  %v2593_v21 = vsel %vm4540_vm4, %v2589_v7, %v2571_v63 }
 0x158   : > { %3497 = vmatpush3.bf16.msra.mxu0 %v3824_v16  ;;  %3338 = vmatprep.subr.bf16.mxu1 %v3825_v40  ;;  %v2592_v16 = vsel %vm4532_vm0, %v2588_v9, %v2557_v60  ;;  %vm2597_vm8 = vcmp.lt.s32.totalorder %v2593_v21, 4 }
 0x159   : > { %3498 = vmatprep.subr.bf16.mxu0 %v3826_v23  ;;  %vm2596_vm9 = vcmp.lt.s32.totalorder %v2592_v16, 4  ;;  %vm2601_vm11 = vmand %vm2517_vm7, %vm2597_vm8 }
 0x15b   : > { %3339 = vmatpush3.bf16.msra.mxu1 %v3825_v40 }
 0x15c   : > { %3499 = vmatpush3.bf16.msra.mxu0 %v3826_v23  ;;  %3340 = vmatprep.subr.bf16.mxu1 %v3827_v48 }
 0x15d   : > { %3500 = vmatprep.subr.bf16.mxu0 %v3828_v49 }
 0x15f   : > { %3341 = vmatpush3.bf16.msra.mxu1 %v3827_v48 }
 0x160   : > { %3501 = vmatpush3.bf16.msra.mxu0 %v3828_v49  ;;  %3342 = vmatprep.subr.bf16.mxu1 %v3829_v36  ;;  %v2591_v49 = vsel %vm4545_vm5, %v2587_v12, %v2543_v2 }
 0x161   : > { %3502 = vmatprep.subr.bf16.mxu0 %v3830_v6  ;;  %vm2595_vm10 = vcmp.lt.s32.totalorder %v2591_v49, 4 }
 0x163   : > { %3343 = vmatpush3.bf16.msra.mxu1 %v3829_v36 }
 0x164   : > { %3503 = vmatpush3.bf16.msra.mxu0 %v3830_v6  ;;  %3344 = vmatprep.subr.bf16.mxu1 %v3831_v47 }
 0x165   : > { %3504 = vmatprep.subr.bf16.mxu0 %v3832_v51 }
 0x167   : > { %3345 = vmatpush3.bf16.msra.mxu1 %v3831_v47 }
 0x168   : > { %3505 = vmatpush3.bf16.msra.mxu0 %v3832_v51  ;;  %3346 = vmatprep.subr.bf16.mxu1 %v3833_v22 }
 0x169   : > { %3506 = vmatprep.subr.bf16.mxu0 %v3834_v24 }
 0x16b   : > { %3347 = vmatpush3.bf16.msra.mxu1 %v3833_v22 }
 0x16c   : > { %3507 = vmatpush3.bf16.msra.mxu0 %v3834_v24 }
 0x16e   : > { %3349 = vmatmul.mubr.bf16.vlgmr.msra.gmra.mrb[0].mxu1 %v1300_v26 }
 0x16f   : > { %3509 = vmatmul.mubr.bf16.vlgmr.msra.gmra.mrb[0].mxu0 %v2996_v52 }
 0x241   : > { %v3350_v18 = vpop.f32.mrb[0].mxu1 }
 0x242   : > { %v3512_v19 = vadd.f32 %v3350_v18, %v2847_v8  ;;  %v3510_v28 = vpop.f32.mrb[0].mxu0  ;;  %v1385_v20 = vpop.f32.mrb[1].mxu1 }
 0x243   : > { %v3514_v40 = vadd.f32 %v2847_v8, %v1385_v20  ;;  %v2490_v23 = vpop.f32.mrb[1].mxu0  ;;  %v3351_v48 = vpop.f32.mrb[2].mxu1 }
 0x244   : > { %v3513_v36 = vadd.f32 %v3512_v19, %v3510_v28  ;;  %v3516_v6 = vadd.f32 %v3351_v48, %v2847_v8  ;;  %v3511_v47 = vpop.f32.mrb[2].mxu0  ;;  %v1388_v51 = vpop.f32.mrb[3].mxu1 }
 0x245   : > { %v3515_v22 = vadd.f32 %v3514_v40, %v2490_v23  ;;  %v3518_v24 = vadd.f32 %v2847_v8, %v1388_v51  ;;  %v2493_v25 = vpop.f32.mrb[3].mxu0 }
 0x246   : > { %v3517_v26 = vadd.f32 %v3516_v6, %v3511_v47  ;;  %v2612_v29 = vsel %vm2596_vm9, %v3513_v36, 0.0 }
 0x247   : > { %v2610_v52 = vsel %vm2594_vm6, %v3515_v22, 0.0  ;;  %v3519_v15 = vadd.f32 %v3518_v24, %v2493_v25  ;;  %v2625_v54 = vmul.f32 %v2612_v29, %v2612_v29 }
 0x248   : > { %v3029_v0 = vpack.c.bf16 %v3517_v26, %v3513_v36  ;;  %v2623_v32 = vmul.f32 %v2610_v52, %v2610_v52  ;;  %v2613_v35 = vsel %vm2601_vm11, %v3517_v26, 0.0 }
 0x249   : > { %v2611_v31 = vsel %vm2595_vm10, %v3519_v15, 0.0  ;;  %v3024_v1 = vpack.c.bf16 %v3519_v15, %v3515_v22 }
 0x24a   : > { %3031 = vst [vmem:[%s260_s22 + $0x8] sm:$0xff] %v3029_v0   ;;  %v2614_v17 = vadd.f32 %v2611_v31, %v2610_v52  ;;  %v2624_v34 = vmul.f32 %v2611_v31, %v2611_v31 }
 0x24b   : > { %3025 = vst [vmem:[%s260_s22] sm:$0xff] %v3024_v1  }
 0x24c   : > { %v2615_v37 = vadd.f32 %v2614_v17, %v2612_v29  ;;  %v2627_v38 = vadd.f32 %v2624_v34, %v2623_v32 }
 0x24d   : > { %3939 = shalt.err (!%p3936_p2)
}
 0x24e   : > { %s3940_s10 = scalar_lea.hbm %s4564_s28, 256  ;;  %s3944_s22 = scalar_lea.hbm %s4649_s3, 512 }
 0x24f   : > { %p3941_p0 = scmp.ne.s32.totalorder %s4564_s28, %s3940_s10  ;;  %p3945_p6 = scmp.lt.u32.totalorder %s4564_s28, %s4649_s3 }
 0x250   : > { %p3946_p7 = scmp.lt.u32.totalorder %s3944_s22, %s3940_s10  ;;  %p3948_p8 = scmp.lt.u32.totalorder %s3940_s10, %s4564_s28 }
 0x251   : > { %p3942_p4 = pnand %p3941_p0, %p4675_p12 }
 0x252   : > { %p3947_p11 = por %p3946_p7, %p3945_p6 }
 0x253   : > { %p3943_p13 = pneg %p3942_p4 }
 0x254   : > { %p3949_p1 = por %p3948_p8, %p3947_p11 }
 0x256   : > { %p3950_p10 = pnand %p3949_p1, %p3943_p13 }
 0x258   : > { %3953 = shalt.err (!%p3950_p10)
}
 0x259   : > { %s4054_s9 = smov 64   ;;  %s4055_s6 = smov 4   ;;  %v2626_v39 = vmul.f32 %v2613_v35, %v2613_v35  ;;  %v2616_v42 = vadd.f32 %v2615_v37, %v2613_v35  ;;  %v2628_v43 = vadd.f32 %v2627_v38, %v2625_v54  ;;  %vm2636_vm12 = vcmask 1040384   ;;  %v2643_v55 = vld [vmem:[%s4509_s25] sm:$0x3] }
 0x25a   : > { %3597 = dma.vmem_to_hbm [thread:$0]  (%p4675_p12), %s4559_s11, 256, %s4564_s28, %s2667_s8, %s4054_s9, %s4054_s9, %s4055_s6  }
 0x25b   : > { %v2617_v41 = vrot.slane %v2616_v42, 4  ;;  %v2629_v30 = vadd.f32 %v2628_v43, %v2626_v39  ;;  %s3013_s11 = sshll.u32 %s4036_s18, 5  ;;  %s2703_s28 = sshll.u32 %s4509_s25, 4  ;;  %s4598_s28 = int_to_ptr.vmem [resolvable:$true] %s2703_s28 }
 0x25c   : > { %s4596_s29 = scalar_lea.hbm %s4650_s4, %s3013_s11  ;;  %s2672_s24 = scalar_lea.sflag [#allocation10], %s4275_s13 }
 0x25d   : > { %v2618_v61 = vadd.f32 %v2617_v41, %v2616_v42  ;;  %v2630_v58 = vrot.slane %v2629_v30, 4  ;;  %s3954_s10 = scalar_lea.vmem %s4598_s28, 32  ;;  %s4056_s18 = smov [#allocation9]  }
 0x25e   : > { %p3955_p3 = scmp.ne.s32.totalorder %s4598_s28, %s3954_s10  ;;  %s3958_s23 = sshll.u32 %s4056_s18, 4  ;;  %s3959_s23 = int_to_ptr.vmem [resolvable:$false] %s3958_s23 }
 0x25f   : > { %v2619_v33 = vrot.slane %v2618_v61, 2  ;;  %v2631_v13 = vadd.f32 %v2630_v58, %v2629_v30  ;;  %s3960_s27 = scalar_lea.vmem %s3959_s23, 64  ;;  %p3961_p2 = scmp.lt.s32.totalorder %s4598_s28, %s3959_s23 }
 0x260   : > { %p3956_p5 = pnand %p3955_p3, %p4675_p12  ;;  %p3962_p0 = scmp.lt.s32.totalorder %s3960_s27, %s3954_s10 }
 0x261   : > { %v2620_v14 = vadd.f32 %v2619_v33, %v2618_v61  ;;  %v2632_v27 = vrot.slane %v2631_v13, 2 }
 0x262   : > { %p3957_p9 = pneg %p3956_p5  ;;  %p3963_p4 = por %p3962_p0, %p3961_p2 }
 0x263   : > { %v2621_v44 = vrot.slane %v2620_v14, 1  ;;  %v2633_v45 = vadd.f32 %v2632_v27, %v2631_v13 }
 0x264   : > { %p3964_p13 = pnand %p3963_p4, %p3957_p9 }
 0x265   : > { %v2634_v46 = vrot.slane %v2633_v45, 1  ;;  %v2622_v50 = vadd.f32 %v2621_v44, %v2620_v14 }
 0x267   : > { %v2635_v53 = vadd.f32 %v2634_v46, %v2633_v45 }
 0x269   : > { %v2637_v57 = vsel %vm2636_vm12, %v2622_v50, %v2635_v53 }
 0x26a   : > { %v2644_v59 = vadd.f32 %v2643_v55, %v2637_v57 }
 0x26c   : > { %2645 = vst [vmem:[%s4509_s25] sm:$0x3] %v2644_v59 }
 0x26d   : > { %3967 = shalt.err (!%p3964_p13)
}
 0x26e   : > { %s3968_s13 = scalar_lea.hbm %s4596_s29, 32  ;;  %s3972_s14 = scalar_lea.hbm %s4650_s4, 64 }
 0x26f   : > { %p3969_p6 = scmp.ne.s32.totalorder %s4596_s29, %s3968_s13  ;;  %p3973_p8 = scmp.lt.u32.totalorder %s4596_s29, %s4650_s4 }
 0x270   : > { %p3974_p1 = scmp.lt.u32.totalorder %s3972_s14, %s3968_s13  ;;  %p3976_p3 = scmp.lt.u32.totalorder %s3968_s13, %s4596_s29 }
 0x271   : > { %p3970_p7 = pnand %p3969_p6, %p4675_p12 }
 0x272   : > { %p3975_p10 = por %p3974_p1, %p3973_p8 }
 0x273   : > { %p3971_p11 = pneg %p3970_p7 }
 0x274   : > { %p3977_p5 = por %p3976_p3, %p3975_p10 }
 0x276   : > { %p3978_p9 = pnand %p3977_p5, %p3971_p11 }
 0x278   : > { %3981 = shalt.err (!%p3978_p9)
}
 0x279   : > { %3598 = dma.vmem_to_hbm [thread:$0]  (%p4675_p12), %s4598_s28, 32, %s4596_s29, %s2672_s24  }
 0x27a PF: > { %s2715_s6 = sand.u32 1, %s4024_s15   ;;  %p4676_p2 = scmp.ne.s32.totalorder %s4659_s26, 0 }
 0x27b   : > { %p4677_p0 = scmp.ge.s32.totalorder %s4044_s20, 2  ;;  %s2716_s11 = scalar_lea.sflag [#allocation4], %s2715_s6 }
 0x27d   : > { %p3613_p4 = pnand %p4677_p0, %p4676_p2 }
 0x27f   : > { %4015 = dma.done.wait (!%p3613_p4), %s2716_s11, 256  }
 0x280   : > { %4017 = vsyncadd (!%p3613_p4), %s2716_s11, 4294967040  ;;  %s2725_s8 = scalar_lea.sflag [#allocation10], %s2715_s6 }
 0x281   : > { %4019 = dma.done.wait (!%p3613_p4), %s2725_s8, 32  }
 0x282   : > { %4021 = vsyncadd (!%p3613_p4), %s2725_s8, 4294967264  ;;  %s25_s20 = sadd.s32 1, %s4044_s20   ;;  %s4678_s15 = smov %s4028_s16 }
 0x283   : > { %p22_p13 = scmp.ge.s32.totalorder %s25_s20, 4   ;;  %s4679_s16 = smov %s4032_s17 }
 0x284   : > { %s4680_s17 = smov %s4231_s12  ;;  %s4681_s18 = smov %s4040_s19 }
 0x285   : > { %s4682_s19 = smov %s4684_s7  ;;  %24 = sbr.rel (!%p22_p13) target bundleno = 9 (0x9), region = 121 }
 0x28c   :  { %2730 = vsyncpa [#allocation3], 1 }
 0x28d   :  { %2732 = vsyncpa [#allocation3 + $0x1], 1 }
 0x28e   :  { %2733 = vsyncpa [#allocation6], 1 }
 0x28f   :  { %2734 = vsyncpa [#allocation4], 1 }
 0x290   :  { %2736 = vsyncpa [#allocation4 + $0x1], 1 }
 0x291   :  { %2737 = vsyncpa [#allocation10], 1 }
 0x292   :  { %2739 = vsyncpa [#allocation10 + $0x1], 1 }

// kernel: _lambda_.15
= control target key start
LH: loop header
LB: loop body
LE: loop exit
PB: predicated region body
PF: predicated region fallthrough
CT: control target
= control target key end

     0   :  { %8 = vsyncpa [#allocation3], 0  ;;  %s4955_s0 = inlined_call_operand.hbm [shape: bf16[2,67,128], index: 0, kind: input, shape index: {}]   ;;  %s4956_s1 = inlined_call_operand.hbm [shape: bf16[16,128,128], index: 1, kind: input, shape index: {}]   ;;  %s4957_s2 = inlined_call_operand.hbm [shape: f32[1,128], index: 2, kind: input, shape index: {}]   ;;  %s4958_s3 = inlined_call_operand.hbm [shape: f32[2,40,128], index: 3, kind: output, shape index: {}]  }
   0x1   :  { %10 = vsyncpa [#allocation3 + $0x1], 0 }
   0x2   :  { %11 = vsyncpa [#allocation6], 0 }
   0x3   :  { %12 = vsyncpa [#allocation4], 0 }
   0x4   :  { %14 = vsyncpa [#allocation4 + $0x1], 0  ;;  %s4211_s12 = smov 0   ;;  %s4213_s13 = smov 0  }
   0x5   :  { %s4215_s14 = smov 0   ;;  %s4217_s15 = smov 0  }
   0x6   :  { %s4219_s16 = smov 0   ;;  %s4221_s17 = smov 0  }
   0x7 LB: > { %s2777_s18 = sadd.s32 4294967295, %s4179_s17   ;;  %s2778_s19 = sadd.s32 4294967294, %s4179_s17   ;;  %s4179_s17 = sphi %s4221_s17, %s20_s17   ;;  %s4175_s16 = sphi %s4219_s16, %s4980_s16   ;;  %s4171_s15 = sphi %s4217_s15, %s4979_s15   ;;  %s4167_s14 = sphi %s4215_s14, %s4978_s14   ;;  %s4163_s13 = sphi %s4213_s13, %s4977_s13   ;;  %s4159_s12 = sphi %s4211_s12, %s4976_s12  }
   0x8   : > { %p52_p0 = scmp.ne.s32.totalorder %s4163_s13, %s4159_s12  ;;  %p4245_p1 = scmp.eq.s32.totalorder %s2777_s18, 0 }
   0x9   : > { %p4249_p2 = scmp.eq.s32.totalorder %s2777_s18, 1  ;;  %p126_p3 = scmp.eq.s32.totalorder %s2778_s19, 1 }
   0xa   : > { %s4963_s20 = scalar_select %p4245_p1, 1, 0 }
   0xb   : > { %p4255_p4 = por %p4245_p1, %p52_p0  ;;  %p2779_p5 = scmp.ge.s32.totalorder %s4179_s17, 1 }
   0xc   : > { %p4260_p6 = por %p126_p3, %p52_p0  ;;  %p133_p7 = scmp.lt.s32.totalorder %s4179_s17, 3 }
   0xd   : > { %s4965_s22 = scalar_select %p4255_p4, 1, 0 }
   0xe   : > { %s4966_s23 = scalar_select %p4260_p6, 1, 0 }
   0xf   : > { %p4265_p8 = pnand %p2779_p5, %p133_p7  ;;  %s4181_s25 = smov [#allocation5]  }
  0x10   : > { %s145_s26 = sshll.u32 %s4181_s25, 4  ;;  %s4182_s28 = smov [#allocation7]   ;;  %s4269_s26 = int_to_ptr.vmem [resolvable:$true] %s145_s26 }
  0x11   : > { %p3770_p9 = pneg %p4265_p8  ;;  %s159_s29 = sshll.u32 %s4182_s28, 4  ;;  %s4280_s29 = int_to_ptr.vmem [resolvable:$true] %s159_s29 }
  0x12   : > { %s4007_s5 = scalar_lea.hbm %s4956_s1, 16384 }
  0x13   : > { %p4276_p11 = pnand %p3770_p9, %p4245_p1  ;;  %p4008_p12 = scmp.ne.s32.totalorder %s4956_s1, %s4007_s5 }
  0x14   : > { %p4014_p5 = scmp.lt.u32.totalorder %s4007_s5, %s4956_s1 }
  0x15   : > { %p4009_p13 = pneg %p4276_p11 }
  0x17   : > { %p4010_p0 = pnand %p4009_p13, %p4008_p12 }
  0x19   : > { %p4011_p3 = pneg %p4010_p0 }
  0x1b   : > { %p4016_p7 = pnand %p4014_p5, %p4011_p3 }
  0x1d   : > { %4019 = shalt.err (!%p4016_p7)
}
  0x1e   : > { %s4020_s10 = scalar_lea.vmem %s4269_s26, 16384  ;;  %p4028_p1 = scmp.lt.s32.totalorder %s4269_s26, %s4269_s26 }
  0x1f   : > { %p4021_p9 = scmp.ne.s32.totalorder %s4269_s26, %s4020_s10  ;;  %p4029_p12 = scmp.lt.s32.totalorder %s4020_s10, %s4020_s10 }
  0x21   : > { %p4023_p10 = pnand %p4021_p9, %p4009_p13  ;;  %p4030_p0 = por %p4029_p12, %p4028_p1 }
  0x23   : > { %p4024_p6 = pneg %p4023_p10 }
  0x25   : > { %p4031_p4 = pnand %p4030_p0, %p4024_p6 }
  0x27   : > { %4034 = shalt.err (!%p4031_p4)
}
  0x28   : > { %s4183_s11 = smov 64   ;;  %s4184_s18 = smov 4  }
  0x29   : > { %3773 = dma.hbm_to_vmem [thread:$0]  (!%p4276_p11), %s4956_s1, 16384, %s4269_s26, [#allocation6], %s4183_s11, %s4183_s11, %s4184_s18  }
  0x2a   : > { %s4035_s4 = scalar_lea.hbm %s4957_s2, 16 }
  0x2b   : > { %p4036_p1 = scmp.ne.s32.totalorder %s4957_s2, %s4035_s4  ;;  %p4042_p10 = scmp.lt.u32.totalorder %s4035_s4, %s4957_s2 }
  0x2d   : > { %p4038_p4 = pnand %p4036_p1, %p4009_p13 }
  0x2f   : > { %p4039_p6 = pneg %p4038_p4 }
  0x31   : > { %p4044_p3 = pnand %p4042_p10, %p4039_p6 }
  0x33   : > { %4047 = shalt.err (!%p4044_p3)
}
  0x34   : > { %s4048_s26 = scalar_lea.vmem %s4280_s29, 16  ;;  %s4055_s9 = scalar_lea.vmem %s4280_s29, 32 }
  0x35   : > { %p4049_p5 = scmp.ne.s32.totalorder %s4280_s29, %s4048_s26  ;;  %p4056_p12 = scmp.lt.s32.totalorder %s4280_s29, %s4280_s29 }
  0x36   : > { %p4057_p0 = scmp.lt.s32.totalorder %s4055_s9, %s4048_s26 }
  0x37   : > { %p4051_p7 = pnand %p4049_p5, %p4009_p13 }
  0x38   : > { %p4058_p1 = por %p4057_p0, %p4056_p12 }
  0x39   : > { %p4052_p9 = pneg %p4051_p7 }
  0x3b   : > { %p4059_p4 = pnand %p4058_p1, %p4052_p9 }
  0x3d   : > { %4062 = shalt.err (!%p4059_p4)
}
  0x3e   : > { %3776 = dma.hbm_to_vmem [thread:$0]  (!%p4276_p11), %s4957_s2, 16, %s4280_s29, [#allocation6]  }
  0x3f   : > { %s32_s25 = sadd.s32 1, %s4175_s16  ;;  %s39_s28 = sadd.s32 1, %s4167_s14 }
  0x40   : > { %p34_p13 = scmp.ge.s32.totalorder %s32_s25, 2  ;;  %p46_p6 = scmp.ne.s32.totalorder %s4167_s14, %s4163_s13 }
  0x41   : > { %p47_p10 = scmp.eq.s32.totalorder %s4179_s17, 0  ;;  %p3787_p3 = scmp.lt.s32.totalorder %s4179_s17, 2 }
  0x42   : > { %s4982_s25 = smov (%p34_p13, %s32_s25), 0  ;;  %p4348_p7 = por %p4249_p2, %p46_p6 }
  0x43   : > { %p48_p5 = por %p47_p10, %p46_p6  ;;  %s36_s30 = ssub.s32 %s4175_s16, %s4982_s25 }
  0x44   : > { %s4969_s27 = scalar_select %p4348_p7, 1, 0 }
  0x45   : > { %s170_s4 = sand.u32 1, %s4167_s14   ;;  %p37_p9 = scmp.eq.s32.totalorder %s36_s30, 0 }
  0x46   : > { %s3753_s29 = smul.u32 36, %s170_s4  ;;  %p4355_p11 = pnand %p3787_p3, %p48_p5 }
  0x47   : > { %s4360_s6 = scalar_select %p37_p9, %s4167_s14, %s39_s28  }
  0x48   : > { %s3754_s7 = smul.u32 576, %s4175_s16  ;;  %s174_s8 = scalar_lea.vmem [#allocation2], %s3753_s29 }
  0x49   : > { %s181_s26 = sshll.u32 %s174_s8, 4  ;;  %s4370_s19 = scalar_lea.sflag [#allocation3], %s170_s4  ;;  %s4368_s26 = int_to_ptr.vmem [resolvable:$true] %s181_s26 }
  0x4a   : > { %s4366_s10 = scalar_lea.hbm %s4955_s0, %s3754_s7  ;;  %p4065_p12 = pneg %p4355_p11 }
  0x4b   : > { %s4063_s30 = scalar_lea.hbm %s4366_s10, 576  ;;  %s4068_s7 = scalar_lea.hbm %s4955_s0, 1152 }
  0x4c   : > { %p4064_p2 = scmp.ne.s32.totalorder %s4366_s10, %s4063_s30  ;;  %p4069_p4 = scmp.lt.u32.totalorder %s4366_s10, %s4955_s0 }
  0x4d   : > { %p4070_p13 = scmp.lt.u32.totalorder %s4068_s7, %s4063_s30  ;;  %p4072_p10 = scmp.lt.u32.totalorder %s4063_s30, %s4366_s10 }
  0x4e   : > { %p4066_p0 = pnand %p4065_p12, %p4064_p2 }
  0x4f   : > { %p4071_p6 = por %p4070_p13, %p4069_p4 }
  0x50   : > { %p4067_p1 = pneg %p4066_p0 }
  0x51   : > { %p4073_p3 = por %p4072_p10, %p4071_p6 }
  0x53   : > { %p4074_p5 = pnand %p4073_p3, %p4067_p1 }
  0x55   : > { %4077 = shalt.err (!%p4074_p5)
}
  0x56   : > { %s4078_s4 = scalar_lea.vmem %s4368_s26, 576  ;;  %s4185_s9 = smov [#allocation2]  }
  0x57   : > { %p4079_p9 = scmp.ne.s32.totalorder %s4368_s26, %s4078_s4  ;;  %s4083_s28 = sshll.u32 %s4185_s9, 4  ;;  %s4084_s28 = int_to_ptr.vmem [resolvable:$false] %s4083_s28 }
  0x58   : > { %s4085_s29 = scalar_lea.vmem %s4084_s28, 1152  ;;  %p4086_p7 = scmp.lt.s32.totalorder %s4368_s26, %s4084_s28 }
  0x59   : > { %p4081_p2 = pnand %p4079_p9, %p4065_p12  ;;  %p4087_p4 = scmp.lt.s32.totalorder %s4085_s29, %s4078_s4 }
  0x5b   : > { %p4082_p0 = pneg %p4081_p2  ;;  %p4088_p13 = por %p4087_p4, %p4086_p7 }
  0x5d   : > { %p4089_p6 = pnand %p4088_p13, %p4082_p0 }
  0x5f   : > { %4092 = shalt.err (!%p4089_p6)
}
  0x60   : > { %3780 = dma.hbm_to_vmem [thread:$0]  (!%p4355_p11), %s4366_s10, 576, %s4368_s26, %s4370_s19, %s4183_s11, %s4183_s11, %s4184_s18  }
  0x61   : > { %193 = sbr.rel (%p4265_p8) target bundleno = 613 (0x265), region = 32  ;;  %s4404_s30 = sand.u32 (!%p4265_p8), 1, %s4163_s13  }
  0x62   : > { %s3755_s7 = smul.u32 (!%p4265_p8), 36, %s4404_s30  ;;  %s196_s8 = scalar_lea.sflag (!%p4265_p8), [#allocation3], %s4404_s30 }
  0x63   : > { %p4971_p7 = scmp.ne.s32.totalorder (!%p4265_p8), %s4965_s22, 0 }
  0x64   : > { %s4408_s21 = scalar_lea.vmem (!%p4265_p8), [#allocation2], %s3755_s7 }
  0x68   : > { %4146 = dma.done.wait (%p4971_p7), %s196_s8, 576  }
  0x69   : > { %4148 = vsyncadd (%p4971_p7), %s196_s8, 4294966720  ;;  %p4972_p11 = scmp.ne.s32.totalorder %s4963_s20, 0 }
  0x6b   : > { %4150 = dma.done.wait (%p4972_p11), [#allocation6], 16400  }
  0x6c   : > { %4152 = vsyncadd (%p4972_p11), [#allocation6], 4294950896  ;;  %v4186_v0 = vmov 0.0   ;;  %vm4187_vm0 = vmmov 0   ;;  %v3847_v1 = vld [vmem:[#allocation5] sm:$0xff]   ;;  %v3849_v3 = vld [vmem:[#allocation5 + $0x8] sm:$0xff]  }
  0x6d   : > { %3127 = vmatprep.subr.bf16.mxu1 %v4186_v0  ;;  %3351 = vmatprep.subr.bf16.mxu0 %v4186_v0  ;;  %v3848_v2 = vld [vmem:[#allocation5 + $0x200] sm:$0xff]   ;;  %v3850_v4 = vld [vmem:[#allocation5 + $0x208] sm:$0xff]   ;;  %v3851_v5 = vld [vmem:[#allocation5 + $0x10] sm:$0xff]   ;;  %vm423_vm1 = vsmask.f32 7424  ;;  %vm580_vm2 = vcmask 1046528  }
  0x6e   : > { %3143 = vmatprep.mubr.msk.bf16.mxu1 %vm4187_vm0, %v4186_v0  ;;  %3367 = vmatprep.mubr.msk.bf16.mxu0 %vm4187_vm0, %v4186_v0  ;;  %v3852_v6 = vld [vmem:[#allocation5 + $0x210] sm:$0xff]   ;;  %v3853_v7 = vld [vmem:[#allocation5 + $0x18] sm:$0xff]   ;;  %v3855_v9 = vld [vmem:[#allocation5 + $0x20] sm:$0xff]   ;;  %vm719_vm3 = vsmask.f32 6400  ;;  %s3756_s20 = smul.u32 40, %s4404_s30 }
  0x6f   : > { %3128 = vmatpush3.bf16.msra.mxu1 %v3847_v1  ;;  %3352 = vmatpush3.bf16.msra.mxu0 %v3848_v2  ;;  %v3854_v8 = vld [vmem:[#allocation5 + $0x218] sm:$0xff]   ;;  %v3856_v10 = vld [vmem:[#allocation5 + $0x220] sm:$0xff]   ;;  %v3857_v11 = vld [vmem:[#allocation5 + $0x28] sm:$0xff]   ;;  %s3757_s11 = smul.u32 640, %s4171_s15  ;;  %s2659_s15 = scalar_lea.sflag [#allocation4], %s4404_s30 }
  0x70   : > { %3129 = vmatprep.subr.bf16.mxu1 %v4186_v0  ;;  %3353 = vmatprep.subr.bf16.mxu0 %v4186_v0  ;;  %v3858_v12 = vld [vmem:[#allocation5 + $0x228] sm:$0xff]   ;;  %v3859_v13 = vld [vmem:[#allocation5 + $0x30] sm:$0xff]   ;;  %v3861_v15 = vld [vmem:[#allocation5 + $0x38] sm:$0xff]   ;;  %s4892_s22 = scalar_lea.vmem [#allocation8], %s3756_s20  ;;  %p4973_p12 = scmp.ne.s32.totalorder %s4969_s27, 0 }
  0x71   : > { %v3860_v14 = vld [vmem:[#allocation5 + $0x230] sm:$0xff]   ;;  %v3862_v16 = vld [vmem:[#allocation5 + $0x238] sm:$0xff]   ;;  %v4437_v17 = vld [vmem:[%s4408_s21 + $0x8] sm:$0xf]  ;;  %s2674_s24 = sshll.u32 %s4892_s22, 4  ;;  %s4905_s26 = scalar_lea.hbm %s4958_s3, %s3757_s11  ;;  %s4900_s24 = int_to_ptr.vmem [resolvable:$true] %s2674_s24 }
  0x72   : > { %v990_v18 = vld [vmem:[%s4408_s21 + $0xc] sm:$0xf]  ;;  %v991_v19 = vld [vmem:[%s4408_s21 + $0x10] sm:$0xf]  ;;  %v3863_v20 = vld [vmem:[%s4408_s21] sm:$0xff]   ;;  %s4093_s10 = scalar_lea.vmem %s4900_s24, 640 }
  0x73   : > { %3130 = vmatpush3.bf16.msra.mxu1 %v3849_v3  ;;  %3354 = vmatpush3.bf16.msra.mxu0 %v3850_v4  ;;  %v4444_v21 = vcombine.low %v990_v18, %v991_v19  ;;  %v3864_v22 = vld [vmem:[#allocation5 + $0x40] sm:$0xff]   ;;  %v2868_v23 = vcombine.low %v4437_v17, %v990_v18  ;;  %v3869_v25 = vld [vmem:[#allocation5 + $0x48] sm:$0xff]   ;;  %v3871_v29 = vld [vmem:[#allocation5 + $0x50] sm:$0xff]   ;;  %p4094_p8 = scmp.ne.s32.totalorder %s4900_s24, %s4093_s10  ;;  %s4188_s19 = smov [#allocation8]  }
  0x74   : > { %3131 = vmatprep.subr.bf16.mxu1 %v4186_v0  ;;  %3355 = vmatprep.subr.bf16.mxu0 %v4186_v0  ;;  %v3868_v24 = vld [vmem:[#allocation5 + $0x240] sm:$0xff]   ;;  %v3870_v26 = vld [vmem:[#allocation5 + $0x248] sm:$0xff]   ;;  %v3872_v33 = vld [vmem:[#allocation5 + $0x250] sm:$0xff]   ;;  %s4097_s4 = sshll.u32 %s4188_s19, 4  ;;  %s4098_s4 = int_to_ptr.vmem [resolvable:$false] %s4097_s4 }
  0x75   : > { %v4451_v27 = vld [vmem:[%s4408_s21 + $0x14] sm:$0xf]  ;;  %v3875_v28 = vld [vmem:[%s4408_s21 + $0x8] sm:$0xff]   ;;  %v4461_v31 = vld [vmem:[%s4408_s21 + $0x4] sm:$0xf]  ;;  %p4095_p1 = pnand %p4094_p8, %p4973_p12  ;;  %s4099_s9 = scalar_lea.vmem %s4098_s4, 1280 }
  0x76   : > { %v2869_v30 = vcombine.low %v991_v19, %v4451_v27  ;;  %v4464_v32 = vld [vmem:[%s4408_s21 + $0x8] sm:$0xf]  ;;  %v3873_v35 = vld [vmem:[#allocation5 + $0x58] sm:$0xff]   ;;  %v4471_v36 = vld [vmem:[%s4408_s21 + $0xc] sm:$0xf]  ;;  %p4100_p3 = scmp.lt.s32.totalorder %s4900_s24, %s4098_s4  ;;  %p4101_p5 = scmp.lt.s32.totalorder %s4099_s9, %s4093_s10 }
  0x77   : > { %3132 = vmatpush3.bf16.msra.mxu1 %v3851_v5  ;;  %3356 = vmatpush3.bf16.msra.mxu0 %v3852_v6  ;;  %v2828_v34 = vcombine.low %v4461_v31, %v4464_v32  ;;  %v4474_v37 = vld [vmem:[%s4408_s21 + $0x10] sm:$0xf]  ;;  %v385_v38 = vld [vmem:[%s4408_s21] sm:$0xf]  ;;  %v1588_v41 = vld [vmem:[%s4408_s21 + $0x8] sm:$0xf]  ;;  %p4096_p10 = pneg %p4095_p1 }
  0x78   : > { %3133 = vmatprep.subr.bf16.mxu1 %v4186_v0  ;;  %3357 = vmatprep.subr.bf16.mxu0 %v4186_v0  ;;  %v2908_v39 = vcombine.low %v4471_v36, %v4474_v37  ;;  %v3874_v40 = vld [vmem:[#allocation5 + $0x258] sm:$0xff]   ;;  %v3876_v42 = vld [vmem:[#allocation5 + $0x60] sm:$0xff]   ;;  %v3884_v43 = vld [vmem:[%s4408_s21 + $0x10] ss:$0 sps:$4 sm:$0xff]   ;;  %v2799_v46 = vcombine.low %v385_v38, %v4461_v31  ;;  %v2879_v48 = vcombine.low %v1588_v41, %v4471_v36  ;;  %p4102_p9 = por %p4101_p5, %p4100_p3 }
  0x79   : > { %v3881_v44 = vld [vmem:[#allocation5 + $0x260] sm:$0xff]   ;;  %v3886_v47 = vld [vmem:[%s4408_s21 + $0x18] ss:$0 sps:$4 sm:$0xff]   ;;  %v4495_v49 = vld [vmem:[%s4408_s21 + $0x14] sm:$0xf] }
  0x7a   : > { %v4488_v45 = vld [vmem:[%s4408_s21 + $0xc] sm:$0xf]  ;;  %v427_v51 = vshll.u32 %v2799_v46, 16  ;;  %v4503_v52 = vld [vmem:[%s4408_s21 + $0x10] sm:$0xf]  ;;  %v4507_v54 = vcombine.low %v4474_v37, %v4495_v49  ;;  %v1629_v55 = vshll.u32 %v2879_v48, 16  ;;  %p4103_p2 = pnand %p4102_p9, %p4096_p10 }
  0x7b   : > { %3134 = vmatpush3.bf16.msra.mxu1 %v3853_v7  ;;  %3358 = vmatpush3.bf16.msra.mxu0 %v3854_v8  ;;  %v4500_v50 = vcombine.low %v4464_v32, %v4488_v45  ;;  %v3882_v53 = vld [vmem:[#allocation5 + $0x68] sm:$0xff]   ;;  %v2829_v56 = vcombine.low %v4488_v45, %v4503_v52  ;;  %v4513_v58 = vld [vmem:[%s4408_s21 + $0x18] sm:$0xf]  ;;  %v988_v59 = vld [vmem:[%s4408_s21 + $0x4] sm:$0xf]  ;;  %v425_v61 = vshrl.u32 %v2799_v46, 16 }
  0x7c   : > { %3135 = vmatprep.subr.bf16.mxu1 %v4186_v0  ;;  %3359 = vmatprep.subr.bf16.mxu0 %v4186_v0  ;;  %v3883_v57 = vld [vmem:[#allocation5 + $0x268] sm:$0xff]   ;;  %v3885_v60 = vld [vmem:[#allocation5 + $0x70] sm:$0xff]   ;;  %v2909_v63 = vcombine.low %v4495_v49, %v4513_v58  ;;  %v429_v2 = vrot.slane %v427_v51, 1  ;;  %v1627_v3 = vshrl.u32 %v2879_v48, 16  ;;  %v1631_v4 = vrot.slane %v1629_v55, 1  ;;  %v3892_v18 = vld [vmem:[#allocation5 + $0x80] sm:$0xff]  }
  0x7d   : > { %v432_v62 = vshll.u32 %v4500_v50, 16  ;;  %v3887_v1 = vld [vmem:[#allocation5 + $0x270] sm:$0xff]   ;;  %v1634_v5 = vshll.u32 %v4507_v54, 16  ;;  %v2839_v8 = vcombine.low %v988_v59, %v4437_v17  ;;  %v3900_v59 = vld [vmem:[#allocation5 + $0x98] sm:$0xff]   ;;  %v2188_v37 = vld [vmem:[%s4408_s21 + $0xc] sm:$0xf] }
  0x7e   : > { %v390_v6 = vld [vmem:[%s4408_s21 + $0x14] sm:$0x1]  ;;  %v1593_v7 = vld [vmem:[%s4408_s21 + $0x1c] sm:$0x1]  ;;  %v3959_v49 = vld [vmem:[#allocation5 + $0x160] sm:$0xff]  }
  0x7f   : > { %3136 = vmatpush3.bf16.msra.mxu1 %v3855_v9  ;;  %3360 = vmatpush3.bf16.msra.mxu0 %v3856_v10  ;;  %v3888_v9 = vld [vmem:[#allocation5 + $0x78] sm:$0xff]   ;;  %v430_v10 = vor.u32 %v429_v2, %v425_v61  ;;  %v1029_v19 = vshll.u32 %v2839_v8, 16  ;;  %v3955_v32 = vld [vmem:[#allocation5 + $0x350] sm:$0xff]  }
  0x80   : > { %3137 = vmatprep.subr.bf16.mxu1 %v4186_v0  ;;  %3361 = vmatprep.subr.bf16.mxu0 %v4186_v0  ;;  %v3964_v45 = vld [vmem:[%s4408_s21 + $0x14] ss:$0 sps:$4 sm:$0xff]  }
  0x83   : > { %3138 = vmatpush3.bf16.msra.mxu1 %v3857_v11  ;;  %3362 = vmatpush3.bf16.msra.mxu0 %v3858_v12  ;;  %v434_v11 = vrot.slane %v432_v62, 1  ;;  %v4533_v12 = vcombine.low %v4503_v52, %v390_v6 }
  0x84   : > { %3139 = vmatprep.subr.bf16.mxu1 %v4186_v0  ;;  %3363 = vmatprep.subr.bf16.mxu0 %v4186_v0 }
  0x85   : > { %v444_v55 = vshrl.u32 %v4533_v12, 16 }
  0x87   : > { %3140 = vmatpush3.bf16.msra.mxu1 %v3859_v13  ;;  %3364 = vmatpush3.bf16.msra.mxu0 %v3860_v14  ;;  %v3889_v13 = vld [vmem:[#allocation5 + $0x278] sm:$0xff]   ;;  %v1632_v14 = vor.u32 %v1631_v4, %v1627_v3  ;;  %v3903_v4 = vld [vmem:[#allocation5 + $0xa0] sm:$0xff]  }
  0x88   : > { %3141 = vmatprep.subr.bf16.mxu1 %v4186_v0  ;;  %3365 = vmatprep.subr.bf16.mxu0 %v4186_v0 }
  0x8b   : > { %3142 = vmatpush3.bf16.msra.mxu1 %v3861_v15  ;;  %3366 = vmatpush3.bf16.msra.mxu0 %v3862_v16  ;;  %v1636_v15 = vrot.slane %v1634_v5, 1  ;;  %v4539_v16 = vcombine.low %v4513_v58, %v1593_v7  ;;  %v1038_v7 = vshrl.u32 %v4444_v21, 16 }
  0x8c   : > { %3155 = vmatprep.subr.bf16.mxu1 %v4186_v0  ;;  %3379 = vmatprep.subr.bf16.mxu0 %v4186_v0 }
  0x8e   : > { %3144 = vmatmul.mubr.bf16.vlgmr.msra.gmra.mrb[0].mxu1 %v3863_v20  ;;  %3368 = vmatmul.mubr.bf16.vlgmr.msra.gmra.mrb[0].mxu0 %v2868_v23  ;;  %v3895_v20 = vld [vmem:[#allocation5 + $0x280] sm:$0xff]   ;;  %v436_v23 = vshrl.u32 %v4500_v50, 16 }
  0x8f   : > { %3156 = vmatpush3.bf16.msra.mxu1 %v3864_v22  ;;  %3380 = vmatpush3.bf16.msra.mxu0 %v3868_v24  ;;  %v435_v22 = vsel %vm423_vm1, %v430_v10, %v434_v11  ;;  %v440_v24 = vshll.u32 %v4533_v12, 16  ;;  %v3906_v10 = vld [vmem:[#allocation5 + $0xa8] sm:$0xff]  }
  0x90   : > { %3157 = vmatprep.subr.bf16.mxu1 %v4186_v0  ;;  %3381 = vmatprep.subr.bf16.mxu0 %v4186_v0 }
  0x91   : > { %3147 = vmatprep.mubr.msk.bf16.mxu1 %vm4187_vm0, %v4186_v0  ;;  %3371 = vmatprep.mubr.msk.bf16.mxu0 %vm4187_vm0, %v4186_v0  ;;  %v442_v38 = vrot.slane %v440_v24, 1 }
  0x93   : > { %3158 = vmatpush3.bf16.msra.mxu1 %v3869_v25  ;;  %3382 = vmatpush3.bf16.msra.mxu0 %v3870_v26  ;;  %v1637_v25 = vsel %vm423_vm1, %v1632_v14, %v1636_v15  ;;  %v1638_v26 = vshrl.u32 %v4507_v54, 16  ;;  %v446_v3 = vor.u32 %v444_v55, %v442_v38  ;;  %v3917_v55 = vld [vmem:[#allocation5 + $0x2c8] sm:$0xff]  }
  0x94   : > { %3159 = vmatprep.subr.bf16.mxu1 %v4186_v0  ;;  %3383 = vmatprep.subr.bf16.mxu0 %v4186_v0 }
  0x95   : > { %v1640_v41 = vor.u32 %v1638_v26, %v1636_v15  ;;  %v559_v15 = vld [vmem:[%s4408_s21] sm:$0xe] }
  0x96   : > { %3148 = vmatmul.mubr.bf16.gmra.mrb[4].mxu1 %v3875_v28  ;;  %3372 = vmatmul.mubr.bf16.gmra.mrb[4].mxu0 %v2869_v30  ;;  %v1642_v28 = vshll.u32 %v4539_v16, 16  ;;  %v1031_v30 = vrot.slane %v1029_v19, 1 }
  0x97   : > { %3160 = vmatpush3.bf16.msra.mxu1 %v3871_v29  ;;  %3384 = vmatpush3.bf16.msra.mxu0 %v3872_v33  ;;  %v1027_v29 = vshrl.u32 %v2839_v8, 16  ;;  %v3896_v33 = vld [vmem:[#allocation5 + $0x88] sm:$0xff]   ;;  %v3905_v8 = vld [vmem:[#allocation5 + $0x2a0] sm:$0xff]  }
  0x98   : > { %3161 = vmatprep.subr.bf16.mxu1 %v4186_v0  ;;  %3385 = vmatprep.subr.bf16.mxu0 %v4186_v0 }
  0x99   : > { %3151 = vmatprep.mubr.msk.bf16.mxu1 %vm4187_vm0, %v4186_v0  ;;  %3375 = vmatprep.mubr.msk.bf16.mxu0 %vm4187_vm0, %v4186_v0  ;;  %v1032_v51 = vor.u32 %v1031_v30, %v1027_v29  ;;  %v3910_v29 = vld [vmem:[#allocation5 + $0xb8] sm:$0xff]   ;;  %v582_v30 = vrot.slane %v4500_v50, 1  ;;  %v3927_v50 = vld [vmem:[#allocation5 + $0x2f0] sm:$0xff]  }
  0x9b   : > { %3162 = vmatpush3.bf16.msra.mxu1 %v3873_v35  ;;  %3386 = vmatpush3.bf16.msra.mxu0 %v3874_v40  ;;  %v438_v35 = vor.u32 %v436_v23, %v434_v11  ;;  %v3897_v40 = vld [vmem:[#allocation5 + $0x288] sm:$0xff]  }
  0x9c   : > { %3163 = vmatprep.subr.bf16.mxu1 %v4186_v0  ;;  %3387 = vmatprep.subr.bf16.mxu0 %v4186_v0 }
  0x9d   : > { %v443_v46 = vsel %vm423_vm1, %v438_v35, %v442_v38 }
  0x9e   : > { %3152 = vmatmul.mubr.bf16.gmra.mrb[8].mxu1 %v3884_v43  ;;  %3376 = vmatmul.mubr.bf16.gmra.mrb[8].mxu0 %v3886_v47  ;;  %v1034_v43 = vshll.u32 %v4444_v21, 16  ;;  %v3899_v47 = vld [vmem:[#allocation5 + $0x290] sm:$0xff]  }
  0x9f   : > { %3164 = vmatpush3.bf16.msra.mxu1 %v3876_v42  ;;  %3388 = vmatpush3.bf16.msra.mxu0 %v3881_v44  ;;  %v1644_v42 = vrot.slane %v1642_v28, 1  ;;  %v3898_v44 = vld [vmem:[#allocation5 + $0x90] sm:$0xff]   ;;  %v1161_v28 = vld [vmem:[%s4408_s21 + $0x4] sm:$0xe] }
  0xa0   : > { %3165 = vmatprep.subr.bf16.mxu1 %v4186_v0  ;;  %3389 = vmatprep.subr.bf16.mxu0 %v4186_v0 }
  0xa1   : > { %3171 = vmatprep.mubr.msk.bf16.mxu1 %vm4187_vm0, %v4186_v0  ;;  %3395 = vmatprep.mubr.msk.bf16.mxu0 %vm4187_vm0, %v4186_v0  ;;  %v1645_v48 = vsel %vm423_vm1, %v1640_v41, %v1644_v42  ;;  %v4617_v41 = vcombine.low %v1161_v28, %v4437_v17  ;;  %v1183_v17 = vrot.slane %v4444_v21, 1  ;;  %v698_v28 = vld [vmem:[%s4408_s21 + $0x14] sm:$0x3] }
  0xa3   : > { %3166 = vmatpush3.bf16.msra.mxu1 %v3882_v53  ;;  %3390 = vmatpush3.bf16.msra.mxu0 %v3883_v57  ;;  %v993_v53 = vld [vmem:[%s4408_s21 + $0x18] sm:$0x1]  ;;  %v1036_v57 = vrot.slane %v1034_v43, 1 }
  0xa4   : > { %3167 = vmatprep.subr.bf16.mxu1 %v4186_v0  ;;  %3391 = vmatprep.subr.bf16.mxu0 %v4186_v0  ;;  %v4571_v61 = vcombine.low %v4451_v27, %v993_v53  ;;  %v584_v53 = vrot.slane %v4533_v12, 1 }
  0xa5   : > { %v4575_v2 = vsel %vm423_vm1, %v1032_v51, %v1036_v57  ;;  %v1040_v11 = vor.u32 %v1038_v7, %v1036_v57  ;;  %v3916_v51 = vld [vmem:[#allocation5 + $0xc8] sm:$0xff]   ;;  %v1785_v57 = vrot.slane %v4539_v16, 1 }
  0xa6   : > { %v585_v12 = vsel %vm580_vm2, %v582_v30, %v584_v53 }
  0xa7   : > { %3168 = vmatpush3.bf16.msra.mxu1 %v3885_v60  ;;  %3392 = vmatpush3.bf16.msra.mxu0 %v3887_v1  ;;  %v1646_v60 = vshrl.u32 %v4539_v16, 16  ;;  %v3901_v1 = vld [vmem:[#allocation5 + $0x298] sm:$0xff]  }
  0xa8   : > { %3169 = vmatprep.subr.bf16.mxu1 %v4186_v0  ;;  %3393 = vmatprep.subr.bf16.mxu0 %v4186_v0 }
  0xa9   : > { %v1648_v6 = vor.u32 %v1646_v60, %v1644_v42  ;;  %v3918_v60 = vld [vmem:[#allocation5 + $0xd0] sm:$0xff]  }
  0xab   : > { %3170 = vmatpush3.bf16.msra.mxu1 %v3888_v9  ;;  %3394 = vmatpush3.bf16.msra.mxu0 %v3889_v13  ;;  %v1042_v9 = vshll.u32 %v4571_v61, 16  ;;  %v3907_v13 = vld [vmem:[#allocation5 + $0x2a8] sm:$0xff]  }
  0xac   : > { %3183 = vmatprep.subr.bf16.mxu1 %v4186_v0  ;;  %3407 = vmatprep.subr.bf16.mxu0 %v4186_v0 }
  0xad   : > { %v4588_v14 = vrot.slane %v1042_v9, 1  ;;  %v3923_v9 = vld [vmem:[#allocation5 + $0x2e0] sm:$0xff]  }
  0xae   : > { %3172 = vmatmul.mubr.bf16.vlgmr.msra.gmra.mrb[0].mxu1 %v435_v22  ;;  %3396 = vmatmul.mubr.bf16.vlgmr.msra.gmra.mrb[0].mxu0 %v1637_v25  ;;  %v4603_v22 = vcombine.low %v559_v15, %v4461_v31  ;;  %v3909_v25 = vld [vmem:[#allocation5 + $0x2b0] sm:$0xff]  }
  0xaf   : > { %3184 = vmatpush3.bf16.msra.mxu1 %v3892_v18  ;;  %3408 = vmatpush3.bf16.msra.mxu0 %v3895_v20  ;;  %v1761_v18 = vld [vmem:[%s4408_s21 + $0x8] sm:$0xe]  ;;  %v4595_v19 = vsel %vm423_vm1, %v1040_v11, %v4588_v14  ;;  %v3908_v20 = vld [vmem:[#allocation5 + $0xb0] sm:$0xff]   ;;  %v728_v11 = vrot.slane %v436_v23, 1  ;;  %v1928_v23 = vrot.slane %v1638_v26, 1  ;;  %v2819_v26 = vcombine.low %v4503_v52, %v698_v28  ;;  %v3933_v28 = vld [vmem:[#allocation5 + $0x308] sm:$0xff]  }
  0xb0   : > { %3185 = vmatprep.subr.bf16.mxu1 %v4186_v0  ;;  %3409 = vmatprep.subr.bf16.mxu0 %v4186_v0  ;;  %v4606_v24 = vcombine.low %v1761_v18, %v4471_v36  ;;  %v581_v35 = vrot.slane %v4603_v22, 1  ;;  %v3924_v18 = vld [vmem:[#allocation5 + $0xe8] sm:$0xff]   ;;  %v3954_v31 = vld [vmem:[#allocation5 + $0x150] sm:$0xff]   ;;  %v3957_v36 = vld [vmem:[#allocation5 + $0x358] sm:$0xff]  }
  0xb1   : > { %3175 = vmatprep.mubr.msk.bf16.mxu1 %vm4187_vm0, %v4186_v0  ;;  %3399 = vmatprep.mubr.msk.bf16.mxu0 %vm4187_vm0, %v4186_v0  ;;  %v3966_v52 = vld [vmem:[%s4408_s21 + $0x1c] ss:$0 sps:$4 sm:$0xff]  }
  0xb2   : > { %v1782_v38 = vrot.slane %v4606_v24, 1  ;;  %v583_v42 = vsel %vm580_vm2, %v581_v35, %v582_v30  ;;  %v1921_v15 = vshrl.u32 %v4606_v24, 16  ;;  %v729_v30 = vrot.slane %v432_v62, 2 }
  0xb3   : > { %3186 = vmatpush3.bf16.msra.mxu1 %v3896_v33  ;;  %3410 = vmatpush3.bf16.msra.mxu0 %v3897_v40  ;;  %v3911_v33 = vld [vmem:[#allocation5 + $0x2b8] sm:$0xff]   ;;  %v1783_v40 = vrot.slane %v4507_v54, 1  ;;  %v1929_v62 = vrot.slane %v1634_v5, 2  ;;  %v3930_v5 = vld [vmem:[#allocation5 + $0x100] sm:$0xff]  }
  0xb4   : > { %3187 = vmatprep.subr.bf16.mxu1 %v4186_v0  ;;  %3411 = vmatprep.subr.bf16.mxu0 %v4186_v0  ;;  %v1923_v35 = vrot.slane %v1921_v15, 1  ;;  %v1299_v15 = vld [vmem:[%s4408_s21 + $0x18] sm:$0x3] }
  0xb5   : > { %v1786_v16 = vsel %vm580_vm2, %v1783_v40, %v1785_v57 }
  0xb6   : > { %3176 = vmatmul.mubr.bf16.gmra.mrb[4].mxu1 %v443_v46  ;;  %3400 = vmatmul.mubr.bf16.gmra.mrb[4].mxu0 %v1645_v48  ;;  %v1784_v46 = vsel %vm580_vm2, %v1782_v38, %v1783_v40  ;;  %v1182_v48 = vrot.slane %v4617_v41, 1  ;;  %v3926_v38 = vld [vmem:[#allocation5 + $0xf0] sm:$0xff]  }
  0xb7   : > { %3188 = vmatpush3.bf16.msra.mxu1 %v3898_v44  ;;  %3412 = vmatpush3.bf16.msra.mxu0 %v3899_v47  ;;  %v3913_v44 = vld [vmem:[#allocation5 + $0xc0] sm:$0xff]  }
  0xb8   : > { %3189 = vmatprep.subr.bf16.mxu1 %v4186_v0  ;;  %3413 = vmatprep.subr.bf16.mxu0 %v4186_v0  ;;  %v3915_v47 = vld [vmem:[#allocation5 + $0x2c0] sm:$0xff]  }
  0xb9   : > { %3179 = vmatprep.mubr.msk.bf16.mxu1 %vm4187_vm0, %v4186_v0  ;;  %3403 = vmatprep.mubr.msk.bf16.mxu0 %vm4187_vm0, %v4186_v0 }
  0xbb   : > { %3190 = vmatpush3.bf16.msra.mxu1 %v3900_v59  ;;  %3414 = vmatpush3.bf16.msra.mxu0 %v3901_v1  ;;  %v4630_v59 = vsel %vm580_vm2, %v1182_v48, %v1183_v17  ;;  %v3919_v1 = vld [vmem:[#allocation5 + $0x2d0] sm:$0xff]  }
  0xbc   : > { %3191 = vmatprep.subr.bf16.mxu1 %v4186_v0  ;;  %3415 = vmatprep.subr.bf16.mxu0 %v4186_v0 }
  0xbe   : > { %3180 = vmatmul.mubr.bf16.gmra.mrb[8].mxu1 %v446_v3  ;;  %3404 = vmatmul.mubr.bf16.gmra.mrb[8].mxu0 %v1648_v6  ;;  %v3920_v3 = vld [vmem:[#allocation5 + $0xd8] sm:$0xff]   ;;  %v3922_v6 = vld [vmem:[#allocation5 + $0xe0] sm:$0xff]  }
  0xbf   : > { %3192 = vmatpush3.bf16.msra.mxu1 %v3903_v4  ;;  %3416 = vmatpush3.bf16.msra.mxu0 %v3905_v8  ;;  %v3921_v4 = vld [vmem:[#allocation5 + $0x2d8] sm:$0xff]   ;;  %v721_v8 = vshrl.u32 %v4603_v22, 16 }
  0xc0   : > { %3193 = vmatprep.subr.bf16.mxu1 %v4186_v0  ;;  %3417 = vmatprep.subr.bf16.mxu0 %v4186_v0 }
  0xc1   : > { %3199 = vmatprep.mubr.msk.bf16.mxu1 %vm4187_vm0, %v4186_v0  ;;  %3423 = vmatprep.mubr.msk.bf16.mxu0 %vm4187_vm0, %v4186_v0 }
  0xc3   : > { %3194 = vmatpush3.bf16.msra.mxu1 %v3906_v10  ;;  %3418 = vmatpush3.bf16.msra.mxu0 %v3907_v13  ;;  %v1185_v10 = vrot.slane %v4571_v61, 1  ;;  %v724_v13 = vshll.u32 %v4603_v22, 16  ;;  %v3925_v22 = vld [vmem:[#allocation5 + $0x2e8] sm:$0xff]  }
  0xc4   : > { %3195 = vmatprep.subr.bf16.mxu1 %v4186_v0  ;;  %3419 = vmatprep.subr.bf16.mxu0 %v4186_v0 }
  0xc7   : > { %3196 = vmatpush3.bf16.msra.mxu1 %v3908_v20  ;;  %3420 = vmatpush3.bf16.msra.mxu0 %v3909_v25  ;;  %v1924_v20 = vshll.u32 %v4606_v24, 16  ;;  %v4659_v25 = vsel %vm580_vm2, %v1183_v17, %v1185_v10  ;;  %v1899_v24 = vld [vmem:[%s4408_s21 + $0x1c] sm:$0x3]  ;;  %v730_v17 = vor.u32 %v729_v30, %v728_v11  ;;  %v3932_v11 = vld [vmem:[#allocation5 + $0x108] sm:$0xff]  }
  0xc8   : > { %3197 = vmatprep.subr.bf16.mxu1 %v4186_v0  ;;  %3421 = vmatprep.subr.bf16.mxu0 %v4186_v0 }
  0xc9   : > { %v1926_v40 = vrot.slane %v1924_v20, 2  ;;  %v1328_v20 = vrot.slane %v1038_v7, 1  ;;  %v3934_v7 = vld [vmem:[#allocation5 + $0x110] sm:$0xff]  }
  0xcb   : > { %3198 = vmatpush3.bf16.msra.mxu1 %v3910_v29  ;;  %3422 = vmatpush3.bf16.msra.mxu0 %v3911_v33  ;;  %v723_v29 = vrot.slane %v721_v8, 1  ;;  %v726_v33 = vrot.slane %v724_v13, 2 }
  0xcc   : > { %3211 = vmatprep.subr.bf16.mxu1 %v4186_v0  ;;  %3435 = vmatprep.subr.bf16.mxu0 %v4186_v0 }
  0xcd   : > { %v727_v48 = vor.u32 %v726_v33, %v723_v29  ;;  %v1329_v29 = vrot.slane %v1034_v43, 2  ;;  %v2859_v33 = vcombine.low %v4451_v27, %v1299_v15  ;;  %v3936_v43 = vld [vmem:[#allocation5 + $0x118] sm:$0xff]  }
  0xce   : > { %3200 = vmatmul.mubr.bf16.vlgmr.msra.gmra.mrb[0].mxu1 %v583_v42  ;;  %3424 = vmatmul.mubr.bf16.vlgmr.msra.gmra.mrb[0].mxu0 %v1784_v46  ;;  %v2899_v42 = vcombine.low %v4513_v58, %v1899_v24  ;;  %v3928_v46 = vld [vmem:[#allocation5 + $0xf8] sm:$0xff]  }
  0xcf   : > { %3212 = vmatpush3.bf16.msra.mxu1 %v3913_v44  ;;  %3436 = vmatpush3.bf16.msra.mxu0 %v3915_v47  ;;  %v733_v44 = vshrl.u32 %v2819_v26, 16  ;;  %v3929_v47 = vld [vmem:[#allocation5 + $0x2f8] sm:$0xff]   ;;  %v1330_v24 = vor.u32 %v1329_v29, %v1328_v20  ;;  %v1333_v27 = vshrl.u32 %v2859_v33, 16 }
  0xd0   : > { %3213 = vmatprep.subr.bf16.mxu1 %v4186_v0  ;;  %3437 = vmatprep.subr.bf16.mxu0 %v4186_v0  ;;  %v1936_v54 = vshll.u32 %v2899_v42, 16  ;;  %v2193_v15 = vld [vmem:[%s4408_s21 + $0x20] sm:$0x1] }
  0xd1   : > { %3203 = vmatprep.mubr.msk.bf16.mxu1 %vm4187_vm0, %v4186_v0  ;;  %3427 = vmatprep.mubr.msk.bf16.mxu0 %vm4187_vm0, %v4186_v0  ;;  %v3969_v20 = vld [vmem:[#allocation5 + $0x378] sm:$0xff]  }
  0xd3   : > { %3214 = vmatpush3.bf16.msra.mxu1 %v3916_v51  ;;  %3438 = vmatpush3.bf16.msra.mxu0 %v3917_v55  ;;  %v736_v51 = vshll.u32 %v2819_v26, 16  ;;  %v1930_v55 = vor.u32 %v1929_v62, %v1928_v23  ;;  %v3939_v62 = vld [vmem:[#allocation5 + $0x120] sm:$0xff]  }
  0xd4   : > { %3215 = vmatprep.subr.bf16.mxu1 %v4186_v0  ;;  %3439 = vmatprep.subr.bf16.mxu0 %v4186_v0 }
  0xd6   : > { %3204 = vmatmul.mubr.bf16.gmra.mrb[4].mxu1 %v585_v12  ;;  %3428 = vmatmul.mubr.bf16.gmra.mrb[4].mxu0 %v1786_v16  ;;  %v735_v12 = vrot.slane %v733_v44, 1  ;;  %v731_v16 = vsel %vm719_vm3, %v727_v48, %v730_v17  ;;  %v3941_v44 = vld [vmem:[#allocation5 + $0x320] sm:$0xff]  }
  0xd7   : > { %3216 = vmatpush3.bf16.msra.mxu1 %v3918_v60  ;;  %3440 = vmatpush3.bf16.msra.mxu0 %v3919_v1  ;;  %v3931_v60 = vld [vmem:[#allocation5 + $0x300] sm:$0xff]   ;;  %v1321_v1 = vshrl.u32 %v4617_v41, 16 }
  0xd8   : > { %3217 = vmatprep.subr.bf16.mxu1 %v4186_v0  ;;  %3441 = vmatprep.subr.bf16.mxu0 %v4186_v0 }
  0xd9   : > { %3207 = vmatprep.mubr.msk.bf16.mxu1 %vm4187_vm0, %v4186_v0  ;;  %3431 = vmatprep.mubr.msk.bf16.mxu0 %vm4187_vm0, %v4186_v0  ;;  %v1323_v13 = vrot.slane %v1321_v1, 1  ;;  %v3963_v1 = vld [vmem:[#allocation5 + $0x368] sm:$0xff]  }
  0xdb   : > { %3218 = vmatpush3.bf16.msra.mxu1 %v3920_v3  ;;  %3442 = vmatpush3.bf16.msra.mxu0 %v3921_v4  ;;  %v738_v3 = vrot.slane %v736_v51, 2  ;;  %v1324_v4 = vshll.u32 %v4617_v41, 16  ;;  %v3944_v51 = vld [vmem:[#allocation5 + $0x130] sm:$0xff]  }
  0xdc   : > { %3219 = vmatprep.subr.bf16.mxu1 %v4186_v0  ;;  %3443 = vmatprep.subr.bf16.mxu0 %v4186_v0 }
  0xdd   : > { %v1326_v41 = vrot.slane %v1324_v4, 2  ;;  %v3965_v4 = vld [vmem:[#allocation5 + $0x170] sm:$0xff]  }
  0xde   : > { %3208 = vmatmul.mubr.bf16.gmra.mrb[8].mxu1 %v584_v53  ;;  %3432 = vmatmul.mubr.bf16.gmra.mrb[8].mxu0 %v1785_v57  ;;  %v1927_v53 = vor.u32 %v1926_v40, %v1923_v35  ;;  %v1933_v57 = vshrl.u32 %v2899_v42, 16  ;;  %v3935_v35 = vld [vmem:[#allocation5 + $0x310] sm:$0xff]   ;;  %v1336_v40 = vshll.u32 %v2859_v33, 16  ;;  %v3974_v33 = vld [vmem:[#allocation5 + $0x188] sm:$0xff]  }
  0xdf   : > { %3220 = vmatpush3.bf16.msra.mxu1 %v3922_v6  ;;  %3444 = vmatpush3.bf16.msra.mxu0 %v3923_v9  ;;  %v1938_v9 = vrot.slane %v1936_v54, 2  ;;  %v3949_v54 = vld [vmem:[#allocation5 + $0x140] sm:$0xff]  }
  0xe0   : > { %3221 = vmatprep.subr.bf16.mxu1 %v4186_v0  ;;  %3445 = vmatprep.subr.bf16.mxu0 %v4186_v0  ;;  %v1931_v6 = vsel %vm719_vm3, %v1927_v53, %v1930_v55  ;;  %v1935_v8 = vrot.slane %v1933_v57, 1  ;;  %v1338_v42 = vrot.slane %v1336_v40, 2  ;;  %v3945_v53 = vld [vmem:[#allocation5 + $0x330] sm:$0xff]   ;;  %v3947_v57 = vld [vmem:[#allocation5 + $0x338] sm:$0xff]   ;;  %v1046_v40 = vshrl.u32 %v4571_v61, 16 }
  0xe1   : > { %3227 = vmatprep.mubr.msk.bf16.mxu1 %vm4187_vm0, %v4186_v0  ;;  %3451 = vmatprep.mubr.msk.bf16.mxu0 %vm4187_vm0, %v4186_v0 }
  0xe2   : > { %v1939_v23 = vor.u32 %v1938_v9, %v1935_v8 }
  0xe3   : > { %3222 = vmatpush3.bf16.msra.mxu1 %v3924_v18  ;;  %3446 = vmatpush3.bf16.msra.mxu0 %v3925_v22  ;;  %v739_v18 = vor.u32 %v738_v3, %v735_v12  ;;  %v1327_v22 = vor.u32 %v1326_v41, %v1323_v13  ;;  %v3953_v12 = vld [vmem:[#allocation5 + $0x348] sm:$0xff]   ;;  %v4780_v13 = vld [vmem:[%s4408_s21 + $0x1c] sm:$0xf] }
  0xe4   : > { %3223 = vmatprep.subr.bf16.mxu1 %v4186_v0  ;;  %3447 = vmatprep.subr.bf16.mxu0 %v4186_v0  ;;  %v1940_v26 = vsel %vm719_vm3, %v1930_v55, %v1939_v23  ;;  %v3946_v55 = vld [vmem:[#allocation5 + $0x138] sm:$0xff]  }
  0xe5   : > { %v740_v30 = vsel %vm719_vm3, %v730_v17, %v739_v18  ;;  %v4704_v21 = vsel %vm719_vm3, %v1327_v22, %v1330_v24  ;;  %v3943_v17 = vld [vmem:[#allocation5 + $0x328] sm:$0xff]   ;;  %v3970_v22 = vld [vmem:[#allocation5 + $0x180] sm:$0xff]  }
  0xe7   : > { %3224 = vmatpush3.bf16.msra.mxu1 %v3926_v38  ;;  %3448 = vmatpush3.bf16.msra.mxu0 %v3927_v50  ;;  %v3937_v38 = vld [vmem:[#allocation5 + $0x318] sm:$0xff]   ;;  %v1335_v50 = vrot.slane %v1333_v27, 1 }
  0xe8   : > { %3225 = vmatprep.subr.bf16.mxu1 %v4186_v0  ;;  %3449 = vmatprep.subr.bf16.mxu0 %v4186_v0 }
  0xeb   : > { %3226 = vmatpush3.bf16.msra.mxu1 %v3928_v46  ;;  %3450 = vmatpush3.bf16.msra.mxu0 %v3929_v47  ;;  %v4714_v46 = vor.u32 %v1338_v42, %v1335_v50  ;;  %v3942_v47 = vld [vmem:[#allocation5 + $0x128] sm:$0xff]   ;;  %v3978_v50 = vld [vmem:[#allocation5 + $0x198] sm:$0xff]  }
  0xec   : > { %3239 = vmatprep.subr.bf16.mxu1 %v4186_v0  ;;  %3463 = vmatprep.subr.bf16.mxu0 %v4186_v0  ;;  %v3979_v42 = vld [vmem:[#allocation5 + $0x398] sm:$0xff]  }
  0xed   : > { %v4718_v48 = vsel %vm719_vm3, %v1330_v24, %v4714_v46 }
  0xee   : > { %3228 = vmatmul.mubr.bf16.vlgmr.msra.gmra.mrb[0].mxu1 %v731_v16  ;;  %3452 = vmatmul.mubr.bf16.vlgmr.msra.gmra.mrb[0].mxu0 %v1931_v6  ;;  %v4769_v16 = vld [vmem:[%s4408_s21 + $0x14] sm:$0xff]  }
  0xef   : > { %3240 = vmatpush3.bf16.msra.mxu1 %v3930_v5  ;;  %3464 = vmatpush3.bf16.msra.mxu0 %v3931_v60  ;;  %v3951_v5 = vld [vmem:[#allocation5 + $0x340] sm:$0xff]   ;;  %v3952_v60 = vld [vmem:[#allocation5 + $0x148] sm:$0xff]   ;;  %v3967_v6 = vld [vmem:[#allocation5 + $0x370] sm:$0xff]  }
  0xf0   : > { %3241 = vmatprep.subr.bf16.mxu1 %v4186_v0  ;;  %3465 = vmatprep.subr.bf16.mxu0 %v4186_v0 }
  0xf1   : > { %3231 = vmatprep.mubr.msk.bf16.mxu1 %vm4187_vm0, %v4186_v0  ;;  %3455 = vmatprep.mubr.msk.bf16.mxu0 %vm4187_vm0, %v4186_v0 }
  0xf3   : > { %3242 = vmatpush3.bf16.msra.mxu1 %v3932_v11  ;;  %3466 = vmatpush3.bf16.msra.mxu0 %v3933_v28  ;;  %v2234_v11 = vshll.u32 %v4769_v16, 16 }
  0xf4   : > { %3243 = vmatprep.subr.bf16.mxu1 %v4186_v0  ;;  %3467 = vmatprep.subr.bf16.mxu0 %v4186_v0 }
  0xf5   : > { %v2236_v28 = vrot.slane %v2234_v11, 1 }
  0xf6   : > { %3232 = vmatmul.mubr.bf16.gmra.mrb[4].mxu1 %v740_v30  ;;  %3456 = vmatmul.mubr.bf16.gmra.mrb[4].mxu0 %v1940_v26  ;;  %v2238_v30 = vshrl.u32 %v4769_v16, 16 }
  0xf7   : > { %3244 = vmatpush3.bf16.msra.mxu1 %v3934_v7  ;;  %3468 = vmatpush3.bf16.msra.mxu0 %v3935_v35  ;;  %v3973_v7 = vld [vmem:[#allocation5 + $0x380] sm:$0xff]   ;;  %v3975_v35 = vld [vmem:[#allocation5 + $0x388] sm:$0xff]  }
  0xf8   : > { %3245 = vmatprep.subr.bf16.mxu1 %v4186_v0  ;;  %3469 = vmatprep.subr.bf16.mxu0 %v4186_v0  ;;  %v2240_v26 = vor.u32 %v2238_v30, %v2236_v28  ;;  %v2528_v61 = vrot.slane %v2238_v30, 1 }
  0xf9   : > { %3235 = vmatprep.mubr.msk.bf16.mxu1 %vm4187_vm0, %v4186_v0  ;;  %3459 = vmatprep.mubr.msk.bf16.mxu0 %vm4187_vm0, %v4186_v0 }
  0xfb   : > { %3246 = vmatpush3.bf16.msra.mxu1 %v3936_v43  ;;  %3470 = vmatpush3.bf16.msra.mxu0 %v3937_v38  ;;  %v3977_v38 = vld [vmem:[#allocation5 + $0x390] sm:$0xff]  }
  0xfc   : > { %3247 = vmatprep.subr.bf16.mxu1 %v4186_v0  ;;  %3471 = vmatprep.subr.bf16.mxu0 %v4186_v0 }
  0xfe   : > { %3236 = vmatmul.mubr.bf16.gmra.mrb[8].mxu1 %v739_v18  ;;  %3460 = vmatmul.mubr.bf16.gmra.mrb[8].mxu0 %v1939_v23  ;;  %v3968_v18 = vld [vmem:[#allocation5 + $0x178] sm:$0xff]   ;;  %v4787_v23 = vcombine.low %v4780_v13, %v2193_v15 }
  0xff   : > { %3248 = vmatpush3.bf16.msra.mxu1 %v3939_v62  ;;  %3472 = vmatpush3.bf16.msra.mxu0 %v3941_v44  ;;  %v3980_v44 = vld [vmem:[#allocation5 + $0x1a0] sm:$0xff]  }
 0x100   : > { %3249 = vmatprep.subr.bf16.mxu1 %v4186_v0  ;;  %3473 = vmatprep.subr.bf16.mxu0 %v4186_v0  ;;  %v2242_v24 = vshll.u32 %v4787_v23, 16  ;;  %v2246_v62 = vshrl.u32 %v4787_v23, 16 }
 0x101   : > { %3255 = vmatprep.mubr.msk.bf16.mxu1 %vm4187_vm0, %v4186_v0  ;;  %3479 = vmatprep.mubr.msk.bf16.mxu0 %vm4187_vm0, %v4186_v0 }
 0x102   : > { %v2244_v43 = vrot.slane %v2242_v24, 1 }
 0x103   : > { %3250 = vmatpush3.bf16.msra.mxu1 %v3942_v47  ;;  %3474 = vmatpush3.bf16.msra.mxu0 %v3943_v17  ;;  %v3982_v17 = vld [vmem:[#allocation5 + $0x3a0] sm:$0xff]  }
 0x104   : > { %3251 = vmatprep.subr.bf16.mxu1 %v4186_v0  ;;  %3475 = vmatprep.subr.bf16.mxu0 %v4186_v0  ;;  %v2245_v27 = vsel %vm423_vm1, %v2240_v26, %v2244_v43  ;;  %v2248_v47 = vor.u32 %v2246_v62, %v2244_v43 }
 0x107   : > { %3252 = vmatpush3.bf16.msra.mxu1 %v3944_v51  ;;  %3476 = vmatpush3.bf16.msra.mxu0 %v3945_v53  ;;  %v3983_v51 = vld [vmem:[#allocation5 + $0x1a8] sm:$0xff]  }
 0x108   : > { %3253 = vmatprep.subr.bf16.mxu1 %v4186_v0  ;;  %3477 = vmatprep.subr.bf16.mxu0 %v4186_v0  ;;  %v3984_v53 = vld [vmem:[#allocation5 + $0x3a8] sm:$0xff]  }
 0x10b   : > { %3254 = vmatpush3.bf16.msra.mxu1 %v3946_v55  ;;  %3478 = vmatpush3.bf16.msra.mxu0 %v3947_v57  ;;  %v3985_v55 = vld [vmem:[#allocation5 + $0x1b0] sm:$0xff]  }
 0x10c   : > { %3267 = vmatprep.subr.bf16.mxu1 %v4186_v0  ;;  %3491 = vmatprep.subr.bf16.mxu0 %v4186_v0  ;;  %v3986_v57 = vld [vmem:[#allocation5 + $0x3b0] sm:$0xff]  }
 0x10e   : > { %3256 = vmatmul.mubr.bf16.vlgmr.msra.gmra.mrb[0].mxu1 %v2828_v34  ;;  %3480 = vmatmul.mubr.bf16.vlgmr.msra.gmra.mrb[0].mxu0 %v2908_v39  ;;  %v3956_v34 = vld [vmem:[#allocation5 + $0x158] sm:$0xff]   ;;  %v4758_v39 = vld [vmem:[%s4408_s21 + $0x10] sm:$0xf] }
 0x10f   : > { %3268 = vmatpush3.bf16.msra.mxu1 %v3949_v54  ;;  %3492 = vmatpush3.bf16.msra.mxu0 %v3951_v5  ;;  %v2919_v58 = vcombine.low %v2188_v37, %v4758_v39  ;;  %v3987_v5 = vld [vmem:[#allocation5 + $0x1b8] sm:$0xff]   ;;  %v3992_v37 = vld [vmem:[#allocation5 + $0x1c8] sm:$0xff]  }
 0x110   : > { %3269 = vmatprep.subr.bf16.mxu1 %v4186_v0  ;;  %3493 = vmatprep.subr.bf16.mxu0 %v4186_v0 }
 0x111   : > { %3259 = vmatprep.mubr.msk.bf16.mxu1 %vm4187_vm0, %v4186_v0  ;;  %3483 = vmatprep.mubr.msk.bf16.mxu0 %vm4187_vm0, %v4186_v0  ;;  %v2229_v3 = vshll.u32 %v2919_v58, 16  ;;  %v2227_v8 = vshrl.u32 %v2919_v58, 16  ;;  %v3997_v58 = vld [vmem:[#allocation5 + $0x3d8] sm:$0xff]  }
 0x113   : > { %3270 = vmatpush3.bf16.msra.mxu1 %v3952_v60  ;;  %3494 = vmatpush3.bf16.msra.mxu0 %v3953_v12  ;;  %v2231_v9 = vrot.slane %v2229_v3, 1  ;;  %v3988_v60 = vld [vmem:[#allocation5 + $0x3b8] sm:$0xff]   ;;  %v4001_v3 = vld [vmem:[#allocation5 + $0x3e8] sm:$0xff]  }
 0x114   : > { %3271 = vmatprep.subr.bf16.mxu1 %v4186_v0  ;;  %3495 = vmatprep.subr.bf16.mxu0 %v4186_v0 }
 0x115   : > { %v2232_v41 = vor.u32 %v2231_v9, %v2227_v8  ;;  %v2499_v8 = vld [vmem:[%s4408_s21 + $0x20] sm:$0x3]  ;;  %v4003_v9 = vld [vmem:[#allocation5 + $0x3f0] sm:$0xff]  }
 0x116   : > { %3260 = vmatmul.mubr.bf16.gmra.mrb[4].mxu1 %v2829_v56  ;;  %3484 = vmatmul.mubr.bf16.gmra.mrb[4].mxu0 %v2909_v63  ;;  %v3961_v56 = vld [vmem:[#allocation5 + $0x360] sm:$0xff]   ;;  %v3962_v63 = vld [vmem:[#allocation5 + $0x168] sm:$0xff]  }
 0x117   : > { %3272 = vmatpush3.bf16.msra.mxu1 %v3954_v31  ;;  %3496 = vmatpush3.bf16.msra.mxu0 %v3955_v32  ;;  %v2237_v29 = vsel %vm423_vm1, %v2232_v41, %v2236_v28  ;;  %v2383_v31 = vrot.slane %v4769_v16, 1  ;;  %v3989_v32 = vld [vmem:[#allocation5 + $0x1c0] sm:$0xff]   ;;  %v2939_v41 = vcombine.low %v4780_v13, %v2499_v8  ;;  %v4004_v28 = vld [vmem:[#allocation5 + $0x1f8] sm:$0xff]  }
 0x118   : > { %3273 = vmatprep.subr.bf16.mxu1 %v4186_v0  ;;  %3497 = vmatprep.subr.bf16.mxu0 %v4186_v0 }
 0x119   : > { %3263 = vmatprep.mubr.msk.bf16.mxu1 %vm4187_vm0, %v4186_v0  ;;  %3487 = vmatprep.mubr.msk.bf16.mxu0 %vm4187_vm0, %v4186_v0  ;;  %v2536_v30 = vshll.u32 %v2939_v41, 16 }
 0x11b   : > { %3274 = vmatpush3.bf16.msra.mxu1 %v3956_v34  ;;  %3498 = vmatpush3.bf16.msra.mxu0 %v3957_v36  ;;  %v3991_v36 = vld [vmem:[#allocation5 + $0x3c0] sm:$0xff]   ;;  %v2538_v13 = vrot.slane %v2536_v30, 2 }
 0x11c   : > { %3275 = vmatprep.subr.bf16.mxu1 %v4186_v0  ;;  %3499 = vmatprep.subr.bf16.mxu0 %v4186_v0 }
 0x11e   : > { %3264 = vmatmul.mubr.bf16.gmra.mrb[8].mxu1 %v3964_v45  ;;  %3488 = vmatmul.mubr.bf16.gmra.mrb[8].mxu0 %v3966_v52  ;;  %v2385_v45 = vrot.slane %v4787_v23, 1  ;;  %v4005_v23 = vld [vmem:[#allocation5 + $0x3f8] sm:$0xff]  }
 0x11f   : > { %3276 = vmatpush3.bf16.msra.mxu1 %v3959_v49  ;;  %3500 = vmatpush3.bf16.msra.mxu0 %v3961_v56  ;;  %v3994_v49 = vld [vmem:[#allocation5 + $0x1d0] sm:$0xff]   ;;  %v3996_v56 = vld [vmem:[#allocation5 + $0x1d8] sm:$0xff]  }
 0x120   : > { %3277 = vmatprep.subr.bf16.mxu1 %v4186_v0  ;;  %3501 = vmatprep.subr.bf16.mxu0 %v4186_v0  ;;  %v2386_v52 = vsel %vm580_vm2, %v2383_v31, %v2385_v45 }
 0x121   : > { %3283 = vmatprep.mubr.msk.bf16.mxu1 %vm4187_vm0, %v4186_v0  ;;  %3507 = vmatprep.mubr.msk.bf16.mxu0 %vm4187_vm0, %v4186_v0 }
 0x123   : > { %3278 = vmatpush3.bf16.msra.mxu1 %v3962_v63  ;;  %3502 = vmatpush3.bf16.msra.mxu0 %v3963_v1  ;;  %v3998_v63 = vld [vmem:[#allocation5 + $0x1e0] sm:$0xff]   ;;  %v4000_v1 = vld [vmem:[#allocation5 + $0x1e8] sm:$0xff]  }
 0x124   : > { %3279 = vmatprep.subr.bf16.mxu1 %v4186_v0  ;;  %3503 = vmatprep.subr.bf16.mxu0 %v4186_v0 }
 0x127   : > { %3280 = vmatpush3.bf16.msra.mxu1 %v3965_v4  ;;  %3504 = vmatpush3.bf16.msra.mxu0 %v3967_v6 }
 0x128   : > { %3281 = vmatprep.subr.bf16.mxu1 %v4186_v0  ;;  %3505 = vmatprep.subr.bf16.mxu0 %v4186_v0 }
 0x12b   : > { %3282 = vmatpush3.bf16.msra.mxu1 %v3968_v18  ;;  %3506 = vmatpush3.bf16.msra.mxu0 %v3969_v20  ;;  %v2529_v20 = vrot.slane %v2234_v11, 2 }
 0x12c   : > { %3295 = vmatprep.subr.bf16.mxu1 %v4186_v0  ;;  %3519 = vmatprep.subr.bf16.mxu0 %v4186_v0 }
 0x12e   : > { %3284 = vmatmul.mubr.bf16.vlgmr.msra.gmra.mrb[0].mxu1 %v4575_v2  ;;  %3508 = vmatmul.mubr.bf16.vlgmr.msra.gmra.mrb[0].mxu0 %v2237_v29  ;;  %v3976_v2 = vld [vmem:[#allocation5 + $0x190] sm:$0xff]   ;;  %v2530_v29 = vor.u32 %v2529_v20, %v2528_v61 }
 0x12f   : > { %3296 = vmatpush3.bf16.msra.mxu1 %v3970_v22  ;;  %3520 = vmatpush3.bf16.msra.mxu0 %v3973_v7  ;;  %v2533_v7 = vshrl.u32 %v2939_v41, 16 }
 0x130   : > { %3297 = vmatprep.subr.bf16.mxu1 %v4186_v0  ;;  %3521 = vmatprep.subr.bf16.mxu0 %v4186_v0 }
 0x131   : > { %3287 = vmatprep.mubr.msk.bf16.mxu1 %vm4187_vm0, %v4186_v0  ;;  %3511 = vmatprep.mubr.msk.bf16.mxu0 %vm4187_vm0, %v4186_v0  ;;  %v2535_v11 = vrot.slane %v2533_v7, 1 }
 0x133   : > { %3298 = vmatpush3.bf16.msra.mxu1 %v3974_v33  ;;  %3522 = vmatpush3.bf16.msra.mxu0 %v3975_v35  ;;  %v2539_v24 = vor.u32 %v2538_v13, %v2535_v11 }
 0x134   : > { %3299 = vmatprep.subr.bf16.mxu1 %v4186_v0  ;;  %3523 = vmatprep.subr.bf16.mxu0 %v4186_v0 }
 0x135   : > { %v2540_v33 = vsel %vm719_vm3, %v2530_v29, %v2539_v24 }
 0x136   : > { %3288 = vmatmul.mubr.bf16.gmra.mrb[4].mxu1 %v4595_v19  ;;  %3512 = vmatmul.mubr.bf16.gmra.mrb[4].mxu0 %v2245_v27  ;;  %v1048_v19 = vor.u32 %v1046_v40, %v4588_v14  ;;  %v2361_v14 = vld [vmem:[%s4408_s21 + $0xc] sm:$0xe] }
 0x137   : > { %3300 = vmatpush3.bf16.msra.mxu1 %v3976_v2  ;;  %3524 = vmatpush3.bf16.msra.mxu0 %v3977_v38  ;;  %v4828_v54 = vcombine.low %v2361_v14, %v4758_v39  ;;  %v3993_v39 = vld [vmem:[#allocation5 + $0x3c8] sm:$0xff]  }
 0x138   : > { %3301 = vmatprep.subr.bf16.mxu1 %v4186_v0  ;;  %3525 = vmatprep.subr.bf16.mxu0 %v4186_v0 }
 0x139   : > { %3291 = vmatprep.mubr.msk.bf16.mxu1 %vm4187_vm0, %v4186_v0  ;;  %3515 = vmatprep.mubr.msk.bf16.mxu0 %vm4187_vm0, %v4186_v0  ;;  %v2382_v12 = vrot.slane %v4828_v54, 1  ;;  %v2521_v4 = vshrl.u32 %v4828_v54, 16  ;;  %v2524_v6 = vshll.u32 %v4828_v54, 16 }
 0x13b   : > { %3302 = vmatpush3.bf16.msra.mxu1 %v3978_v50  ;;  %3526 = vmatpush3.bf16.msra.mxu0 %v3979_v42  ;;  %v2384_v34 = vsel %vm580_vm2, %v2382_v12, %v2383_v31  ;;  %v2523_v15 = vrot.slane %v2521_v4, 1  ;;  %v2526_v18 = vrot.slane %v2524_v6, 2 }
 0x13c   : > { %3303 = vmatprep.subr.bf16.mxu1 %v4186_v0  ;;  %3527 = vmatprep.subr.bf16.mxu0 %v4186_v0 }
 0x13d   : > { %v2527_v22 = vor.u32 %v2526_v18, %v2523_v15 }
 0x13e   : > { %3292 = vmatmul.mubr.bf16.gmra.mrb[8].mxu1 %v1048_v19  ;;  %3516 = vmatmul.mubr.bf16.gmra.mrb[8].mxu0 %v2248_v47 }
 0x13f   : > { %3304 = vmatpush3.bf16.msra.mxu1 %v3980_v44  ;;  %3528 = vmatpush3.bf16.msra.mxu0 %v3982_v17  ;;  %v2531_v16 = vsel %vm719_vm3, %v2527_v22, %v2530_v29 }
 0x140   : > { %3305 = vmatprep.subr.bf16.mxu1 %v4186_v0  ;;  %3529 = vmatprep.subr.bf16.mxu0 %v4186_v0 }
 0x141   : > { %3311 = vmatprep.mubr.msk.bf16.mxu1 %vm4187_vm0, %v4186_v0  ;;  %3535 = vmatprep.mubr.msk.bf16.mxu0 %vm4187_vm0, %v4186_v0 }
 0x143   : > { %3306 = vmatpush3.bf16.msra.mxu1 %v3983_v51  ;;  %3530 = vmatpush3.bf16.msra.mxu0 %v3984_v53 }
 0x144   : > { %3307 = vmatprep.subr.bf16.mxu1 %v4186_v0  ;;  %3531 = vmatprep.subr.bf16.mxu0 %v4186_v0 }
 0x147   : > { %3308 = vmatpush3.bf16.msra.mxu1 %v3985_v55  ;;  %3532 = vmatpush3.bf16.msra.mxu0 %v3986_v57 }
 0x148   : > { %3309 = vmatprep.subr.bf16.mxu1 %v4186_v0  ;;  %3533 = vmatprep.subr.bf16.mxu0 %v4186_v0 }
 0x14b   : > { %3310 = vmatpush3.bf16.msra.mxu1 %v3987_v5  ;;  %3534 = vmatpush3.bf16.msra.mxu0 %v3988_v60 }
 0x14c   : > { %3323 = vmatprep.subr.bf16.mxu1 %v4186_v0  ;;  %3547 = vmatprep.subr.bf16.mxu0 %v4186_v0 }
 0x14e   : > { %3312 = vmatmul.mubr.bf16.vlgmr.msra.gmra.mrb[0].mxu1 %v4630_v59  ;;  %3536 = vmatmul.mubr.bf16.vlgmr.msra.gmra.mrb[0].mxu0 %v2384_v34  ;;  %v3995_v59 = vld [vmem:[#allocation5 + $0x3d0] sm:$0xff]  }
 0x14f   : > { %3324 = vmatpush3.bf16.msra.mxu1 %v3989_v32  ;;  %3548 = vmatpush3.bf16.msra.mxu0 %v3991_v36 }
 0x150   : > { %3325 = vmatprep.subr.bf16.mxu1 %v4186_v0  ;;  %3549 = vmatprep.subr.bf16.mxu0 %v4186_v0 }
 0x151   : > { %3315 = vmatprep.mubr.msk.bf16.mxu1 %vm4187_vm0, %v4186_v0  ;;  %3539 = vmatprep.mubr.msk.bf16.mxu0 %vm4187_vm0, %v4186_v0 }
 0x153   : > { %3326 = vmatpush3.bf16.msra.mxu1 %v3992_v37  ;;  %3550 = vmatpush3.bf16.msra.mxu0 %v3993_v39 }
 0x154   : > { %3327 = vmatprep.subr.bf16.mxu1 %v4186_v0  ;;  %3551 = vmatprep.subr.bf16.mxu0 %v4186_v0 }
 0x156   : > { %3316 = vmatmul.mubr.bf16.gmra.mrb[4].mxu1 %v4659_v25  ;;  %3540 = vmatmul.mubr.bf16.gmra.mrb[4].mxu0 %v2386_v52  ;;  %v3999_v25 = vld [vmem:[#allocation5 + $0x3e0] sm:$0xff]  }
 0x157   : > { %3328 = vmatpush3.bf16.msra.mxu1 %v3994_v49  ;;  %3552 = vmatpush3.bf16.msra.mxu0 %v3995_v59 }
 0x158   : > { %3329 = vmatprep.subr.bf16.mxu1 %v4186_v0  ;;  %3553 = vmatprep.subr.bf16.mxu0 %v4186_v0 }
 0x159   : > { %3319 = vmatprep.mubr.msk.bf16.mxu1 %vm4187_vm0, %v4186_v0  ;;  %3543 = vmatprep.mubr.msk.bf16.mxu0 %vm4187_vm0, %v4186_v0 }
 0x15b   : > { %3330 = vmatpush3.bf16.msra.mxu1 %v3996_v56  ;;  %3554 = vmatpush3.bf16.msra.mxu0 %v3997_v58 }
 0x15c   : > { %3331 = vmatprep.subr.bf16.mxu1 %v4186_v0  ;;  %3555 = vmatprep.subr.bf16.mxu0 %v4186_v0 }
 0x15e   : > { %3320 = vmatmul.mubr.bf16.gmra.mrb[8].mxu1 %v1185_v10  ;;  %3544 = vmatmul.mubr.bf16.gmra.mrb[8].mxu0 %v2385_v45  ;;  %v4002_v10 = vld [vmem:[#allocation5 + $0x1f0] sm:$0xff]  }
 0x15f   : > { %3332 = vmatpush3.bf16.msra.mxu1 %v3998_v63  ;;  %3556 = vmatpush3.bf16.msra.mxu0 %v3999_v25 }
 0x160   : > { %3333 = vmatprep.subr.bf16.mxu1 %v4186_v0  ;;  %3557 = vmatprep.subr.bf16.mxu0 %v4186_v0 }
 0x161   : > { %3339 = vmatprep.mubr.msk.bf16.mxu1 %vm4187_vm0, %v4186_v0  ;;  %3563 = vmatprep.mubr.msk.bf16.mxu0 %vm4187_vm0, %v4186_v0 }
 0x163   : > { %3334 = vmatpush3.bf16.msra.mxu1 %v4000_v1  ;;  %3558 = vmatpush3.bf16.msra.mxu0 %v4001_v3 }
 0x164   : > { %3335 = vmatprep.subr.bf16.mxu1 %v4186_v0  ;;  %3559 = vmatprep.subr.bf16.mxu0 %v4186_v0 }
 0x167   : > { %3336 = vmatpush3.bf16.msra.mxu1 %v4002_v10  ;;  %3560 = vmatpush3.bf16.msra.mxu0 %v4003_v9 }
 0x168   : > { %3337 = vmatprep.subr.bf16.mxu1 %v4186_v0  ;;  %3561 = vmatprep.subr.bf16.mxu0 %v4186_v0 }
 0x16b   : > { %3338 = vmatpush3.bf16.msra.mxu1 %v4004_v28  ;;  %3562 = vmatpush3.bf16.msra.mxu0 %v4005_v23 }
 0x16e   : > { %3340 = vmatmul.mubr.bf16.vlgmr.msra.gmra.mrb[0].mxu1 %v4704_v21  ;;  %3564 = vmatmul.mubr.bf16.vlgmr.msra.gmra.mrb[0].mxu0 %v2531_v16  ;;  %v2787_v21 = vld [vmem:[#allocation7] ss:$0 sm:$0xff] }
 0x16f   : > { %3343 = vmatprep.mubr.msk.bf16.mxu1 %vm4187_vm0, %v4186_v0  ;;  %3567 = vmatprep.mubr.msk.bf16.mxu0 %vm4187_vm0, %v4186_v0 }
 0x176   : > { %3344 = vmatmul.mubr.bf16.gmra.mrb[4].mxu1 %v4718_v48  ;;  %3568 = vmatmul.mubr.bf16.gmra.mrb[4].mxu0 %v2540_v33 }
 0x177   : > { %3347 = vmatprep.mubr.msk.bf16.mxu1 %vm4187_vm0, %v4186_v0  ;;  %3571 = vmatprep.mubr.msk.bf16.mxu0 %vm4187_vm0, %v4186_v0 }
 0x17e   : > { %3348 = vmatmul.mubr.bf16.gmra.mrb[8].mxu1 %v4714_v46  ;;  %3572 = vmatmul.mubr.bf16.gmra.mrb[8].mxu0 %v2539_v24 }
 0x241   : > { %v1426_v35 = vpop.f32.mrb[0].mxu1  ;;  %v2626_v43 = vpop.f32.mrb[0].mxu0 }
 0x242   : > { %v3575_v26 = vadd.f32 %v2787_v21, %v1426_v35  ;;  %v3341_v2 = vpop.f32.mrb[1].mxu1  ;;  %v3565_v38 = vpop.f32.mrb[1].mxu0 }
 0x243   : > { %v1429_v27 = vpop.f32.mrb[2].mxu1  ;;  %v2629_v50 = vpop.f32.mrb[2].mxu0 }
 0x244   : > { %v3576_v40 = vadd.f32 %v3575_v26, %v2626_v43  ;;  %v3577_v48 = vadd.f32 %v2787_v21, %v1429_v27  ;;  %v3342_v62 = vpop.f32.mrb[3].mxu1  ;;  %v3566_v42 = vpop.f32.mrb[3].mxu0 }
 0x246   : > { %2653 = vst [vmem:[%s4892_s22] sm:$0xff] %v3576_v40  ;;  %v3578_v0 = vadd.f32 %v3577_v48, %v2629_v50 }
 0x248   : > { %2654 = vst [vmem:[%s4892_s22 + $0x8] sm:$0xff] %v3578_v0 }
 0x249   : > { %v1434_v46 = vpop.f32.mrb[4].mxu1  ;;  %v2634_v44 = vpop.f32.mrb[4].mxu0 }
 0x24a   : > { %v3579_v19 = vadd.f32 %v2787_v21, %v1434_v46  ;;  %v3345_v47 = vpop.f32.mrb[5].mxu1  ;;  %v3569_v17 = vpop.f32.mrb[5].mxu0 }
 0x24b   : > { %v1437_v51 = vpop.f32.mrb[6].mxu1  ;;  %v2637_v55 = vpop.f32.mrb[6].mxu0 }
 0x24c   : > { %v3580_v53 = vadd.f32 %v3579_v19, %v2634_v44  ;;  %v3581_v14 = vadd.f32 %v2787_v21, %v1437_v51  ;;  %v3346_v57 = vpop.f32.mrb[7].mxu1  ;;  %v3570_v54 = vpop.f32.mrb[7].mxu0 }
 0x24e   : > { %2655 = vst [vmem:[%s4892_s22 + $0x10] sm:$0xff] %v3580_v53  ;;  %v3582_v5 = vadd.f32 %v3581_v14, %v2637_v55 }
 0x250   : > { %2656 = vst [vmem:[%s4892_s22 + $0x18] sm:$0xff] %v3582_v5 }
 0x251   : > { %v1442_v60 = vpop.f32.mrb[8].mxu1  ;;  %v2642_v31 = vpop.f32.mrb[8].mxu0 }
 0x252   : > { %v3583_v12 = vadd.f32 %v2787_v21, %v1442_v60  ;;  %v3349_v32 = vpop.f32.mrb[9].mxu1  ;;  %v3573_v34 = vpop.f32.mrb[9].mxu0 }
 0x253   : > { %v1445_v36 = vpop.f32.mrb[10].mxu1  ;;  %v2645_v39 = vpop.f32.mrb[10].mxu0 }
 0x254   : > { %v3584_v37 = vadd.f32 %v3583_v12, %v2642_v31  ;;  %v3350_v45 = vpop.f32.mrb[11].mxu1  ;;  %v3574_v49 = vpop.f32.mrb[11].mxu0 }
 0x256   : > { %2657 = vst [vmem:[%s4892_s22 + $0x20] sm:$0xff] %v3584_v37 }
 0x257   : > { %4106 = shalt.err (!%p4103_p2)
}
 0x258   : > { %s4107_s28 = scalar_lea.hbm %s4905_s26, 640  ;;  %s4111_s8 = scalar_lea.hbm %s4958_s3, 1280 }
 0x259   : > { %p4108_p0 = scmp.ne.s32.totalorder %s4905_s26, %s4107_s28  ;;  %p4112_p6 = scmp.lt.u32.totalorder %s4905_s26, %s4958_s3 }
 0x25a   : > { %p4113_p7 = scmp.lt.u32.totalorder %s4111_s8, %s4107_s28  ;;  %p4115_p8 = scmp.lt.u32.totalorder %s4107_s28, %s4905_s26 }
 0x25b   : > { %p4109_p4 = pnand %p4108_p0, %p4973_p12 }
 0x25c   : > { %p4114_p11 = por %p4113_p7, %p4112_p6 }
 0x25d   : > { %p4110_p13 = pneg %p4109_p4 }
 0x25e   : > { %p4116_p1 = por %p4115_p8, %p4114_p11 }
 0x260   : > { %p4117_p10 = pnand %p4116_p1, %p4110_p13 }
 0x262   : > { %4120 = shalt.err (!%p4117_p10)
}
 0x263   : > { %s4189_s22 = smov 128   ;;  %s4190_s11 = smov 8  }
 0x264   : > { %3768 = dma.vmem_to_hbm [thread:$0]  (%p4973_p12), %s4900_s24, 640, %s4905_s26, %s2659_s15, %s4189_s22, %s4189_s22, %s4190_s11  }
 0x265 PF: > { %s2689_s18 = sand.u32 1, %s4159_s12   ;;  %p4974_p3 = scmp.ne.s32.totalorder %s4966_s23, 0 }
 0x266   : > { %p4975_p5 = scmp.ge.s32.totalorder %s4179_s17, 2  ;;  %s2690_s5 = scalar_lea.sflag [#allocation4], %s2689_s18 }
 0x268   : > { %p3782_p9 = pnand %p4975_p5, %p4974_p3 }
 0x26a   : > { %4154 = dma.done.wait (!%p3782_p9), %s2690_s5, 640  }
 0x26b   : > { %4156 = vsyncadd (!%p3782_p9), %s2690_s5, 4294966656  ;;  %s20_s17 = sadd.s32 1, %s4179_s17   ;;  %s4976_s12 = smov %s4163_s13 }
 0x26c   : > { %p17_p2 = scmp.ge.s32.totalorder %s20_s17, 4   ;;  %s4977_s13 = smov %s4167_s14 }
 0x26d   : > { %s4978_s14 = smov %s4360_s6  ;;  %s4979_s15 = smov %s4175_s16 }
 0x26e   : > { %s4980_s16 = smov %s4982_s25  ;;  %19 = sbr.rel (!%p17_p2) target bundleno = 7 (0x7), region = 100 }
 0x275   :  { %2695 = vsyncpa [#allocation3], 1 }
 0x276   :  { %2697 = vsyncpa [#allocation3 + $0x1], 1 }
 0x277   :  { %2698 = vsyncpa [#allocation6], 1 }
 0x278   :  { %2699 = vsyncpa [#allocation4], 1 }
 0x279   :  { %2701 = vsyncpa [#allocation4 + $0x1], 1 }

</bundles_post_ra>
